<compile_context>
chip_gen: v6e
topology: v6e:2x2x1
jax: 0.10.0
libtpu: 0.0.40
codegen_flags: <defaults>
</compile_context>

<pallas_src>
import jax
import jax.numpy as jnp
from jax.experimental import pallas as pl
from jax.experimental.pallas import tpu as pltpu


# ---------------------------------------------------------------------------
# Fused kernel: 2-layer BiLSTM + classifier, single invocation, all in VMEM.
# ---------------------------------------------------------------------------
def _bilstm_fused_kernel(
    x_ref,
    w1f_ih, w1f_hh, b1f, w1b_ih, w1b_hh, b1b,
    w2f_ihf, w2f_ihb, w2f_hh, b2f,
    w2b_ihf, w2b_ihb, w2b_hh, b2b,
    wc_f, wc_b, bc,
    out_ref,
    gbuf, seq_f, seq_b,
):
    """Shapes (all padded, f32):
      x_ref:   (T*Bp, Dp)    time-major input, rows t*Bp..t*Bp+Bp-1 = step t
      w*_ih:   (Dp|Hp, 4*Hp) input->gate weights, gate blocks lane-aligned
      w*_hh:   (Hp, 4*Hp)    hidden->gate weights
      b*:      (1, 4*Hp)     combined bias (b_ih + b_hh)
      wc_*:    (Hp, Lp), bc: (1, Lp)  classifier
      out_ref: (Bp, Lp)
      gbuf:    (T*Bp, 4*Hp)  scratch: precomputed x@W_ih + b per direction
      seq_f/b: (T*Bp, Hp)    scratch: layer-1 per-timestep hidden states
    """
    Hp = w1f_hh.shape[0]
    Bp = out_ref.shape[0]
    T = gbuf.shape[0] // Bp

    def run_recurrence(whh_ref, reverse, seq_ref):
        # Sequential LSTM recurrence over the precomputed gate inputs in gbuf.
        # T is small and static -> fully unrolled, all slices static.
        whh = whh_ref[...]
        h = jnp.zeros((Bp, Hp), jnp.float32)
        c = jnp.zeros((Bp, Hp), jnp.float32)
        order = range(T - 1, -1, -1) if reverse else range(T)
        for t in order:
            g = gbuf[pl.ds(t * Bp, Bp), :] + jnp.dot(
                h, whh, preferred_element_type=jnp.float32)
            i_g = jax.nn.sigmoid(g[:, 0 * Hp:1 * Hp])
            f_g = jax.nn.sigmoid(g[:, 1 * Hp:2 * Hp])
            g_g = jnp.tanh(g[:, 2 * Hp:3 * Hp])
            o_g = jax.nn.sigmoid(g[:, 3 * Hp:4 * Hp])
            c = f_g * c + i_g * g_g
            h = o_g * jnp.tanh(c)
            if seq_ref is not None:
                seq_ref[pl.ds(t * Bp, Bp), :] = h
        return h  # final hidden state of this direction

    x2d = x_ref[...]  # (T*Bp, Dp)

    # ---------------- Layer 1 (input -> H, both directions) ----------------
    gbuf[...] = jnp.dot(x2d, w1f_ih[...],
                        preferred_element_type=jnp.float32) + b1f[...]
    run_recurrence(w1f_hh, reverse=False, seq_ref=seq_f)

    gbuf[...] = jnp.dot(x2d, w1b_ih[...],
                        preferred_element_type=jnp.float32) + b1b[...]
    run_recurrence(w1b_hh, reverse=True, seq_ref=seq_b)

    # ---------------- Layer 2 (2H -> H, both directions) -------------------
    sf = seq_f[...]
    sb = seq_b[...]
    gbuf[...] = (jnp.dot(sf, w2f_ihf[...], preferred_element_type=jnp.float32)
                 + jnp.dot(sb, w2f_ihb[...], preferred_element_type=jnp.float32)
                 + b2f[...])
    h_fwd = run_recurrence(w2f_hh, reverse=False, seq_ref=None)

    gbuf[...] = (jnp.dot(sf, w2b_ihf[...], preferred_element_type=jnp.float32)
                 + jnp.dot(sb, w2b_ihb[...], preferred_element_type=jnp.float32)
                 + b2b[...])
    h_bwd = run_recurrence(w2b_hh, reverse=True, seq_ref=None)

    # ---------------- Classifier: sigmoid(ht @ W + b) ----------------------
    logits = (jnp.dot(h_fwd, wc_f[...], preferred_element_type=jnp.float32)
              + jnp.dot(h_bwd, wc_b[...], preferred_element_type=jnp.float32)
              + bc[...])
    out_ref[...] = jax.nn.sigmoid(logits)


# ---------------------------------------------------------------------------
# Padding helpers: lane/sublane-dense, gate-block-aligned weight layout.
# ---------------------------------------------------------------------------
def _round_up(n, m):
    return ((n + m - 1) // m) * m


def _pad_gate_cols(w, H, Hp):
    """(rows, 4*H) with PyTorch gate order [i|f|g|o] -> (rows, 4*Hp).
    Each gate block goes to lane-aligned offset g*Hp; padded columns are zero,
    which keeps padded hidden units identically zero through the LSTM."""
    rows = w.shape[0]
    out = jnp.zeros((rows, 4 * Hp), w.dtype)
    for g in range(4):
        out = out.at[:, g * Hp:g * Hp + H].set(w[:, g * H:(g + 1) * H])
    return out


def _pad_rows(w, rows_p):
    return jnp.pad(w, ((0, rows_p - w.shape[0]), (0, 0)))


def _prep_dir_l1(p, H, Dp, Hp):
    w_ih = _pad_rows(_pad_gate_cols(p["w_ih"].T, H, Hp), Dp)     # (Dp, 4Hp)
    w_hh = _pad_rows(_pad_gate_cols(p["w_hh"].T, H, Hp), Hp)     # (Hp, 4Hp)
    b = _pad_gate_cols((p["b_ih"] + p["b_hh"]).reshape(1, -1), H, Hp)
    return w_ih, w_hh, b


def _prep_dir_l2(p, H, Hp):
    w_ih = _pad_gate_cols(p["w_ih"].T, H, Hp)                    # (2H, 4Hp)
    w_ih_from_f = _pad_rows(w_ih[:H], Hp)                        # (Hp, 4Hp)
    w_ih_from_b = _pad_rows(w_ih[H:], Hp)                        # (Hp, 4Hp)
    w_hh = _pad_rows(_pad_gate_cols(p["w_hh"].T, H, Hp), Hp)     # (Hp, 4Hp)
    b = _pad_gate_cols((p["b_ih"] + p["b_hh"]).reshape(1, -1), H, Hp)
    return w_ih_from_f, w_ih_from_b, w_hh, b


def _prep_classifier(w, b, H, Hp, Lp):
    L = w.shape[0]
    w_t = w.T                                                    # (2H, L)
    wc_f = jnp.pad(w_t[:H], ((0, Hp - H), (0, Lp - L)))
    wc_b = jnp.pad(w_t[H:], ((0, Hp - H), (0, Lp - L)))
    bc = jnp.pad(b.reshape(1, -1), ((0, 0), (0, Lp - L)))
    return wc_f, wc_b, bc


# ---------------------------------------------------------------------------
# Full forward: BiLSTMNet.forward (eval mode)
# ---------------------------------------------------------------------------
@jax.jit
def bilstm_net_forward(x_btd, params):
    """x_btd: (B, T, input_size), batch_first like the PyTorch module."""
    B, T, Din = x_btd.shape
    H = params["lstm"][0][0]["w_hh"].shape[1]
    L = params["cls_b"].shape[0]
    assert len(params["lstm"]) == 2, "fused kernel is specialized to num_layers=2"

    Bp = _round_up(B, 8)       # sublane-dense batch
    Dp = _round_up(Din, 128)   # lane-dense input features
    Hp = _round_up(H, 128)     # lane-dense hidden size (per gate block)
    Lp = _round_up(L, 128)     # lane-dense classifier output

    # time-major, zero-padded, flattened to (T*Bp, Dp) so the hoisted input
    # projection is one big MXU matmul instead of T tiny ones.
    x = jnp.transpose(x_btd.astype(jnp.float32), (1, 0, 2))      # (T, B, Din)
    x = jnp.pad(x, ((0, 0), (0, Bp - B), (0, Dp - Din)))
    x2d = x.reshape(T * Bp, Dp)

    (l1f, l1b), (l2f, l2b) = params["lstm"]
    w1f_ih, w1f_hh, b1f = _prep_dir_l1(l1f, H, Dp, Hp)
    w1b_ih, w1b_hh, b1b = _prep_dir_l1(l1b, H, Dp, Hp)
    w2f_ihf, w2f_ihb, w2f_hh, b2f = _prep_dir_l2(l2f, H, Hp)
    w2b_ihf, w2b_ihb, w2b_hh, b2b = _prep_dir_l2(l2b, H, Hp)
    wc_f, wc_b, bc = _prep_classifier(params["cls_w"], params["cls_b"], H, Hp, Lp)

    out_p = pl.pallas_call(
        _bilstm_fused_kernel,
        out_shape=jax.ShapeDtypeStruct((Bp, Lp), jnp.float32),
        in_specs=[pl.BlockSpec(memory_space=pltpu.VMEM)] * 18,
        out_specs=pl.BlockSpec(memory_space=pltpu.VMEM),
        scratch_shapes=[
            pltpu.VMEM((T * Bp, 4 * Hp), jnp.float32),   # gbuf: x@W_ih + b
            pltpu.VMEM((T * Bp, Hp), jnp.float32),       # layer-1 fwd hiddens
            pltpu.VMEM((T * Bp, Hp), jnp.float32),       # layer-1 bwd hiddens
        ],
    )(x2d,
      w1f_ih, w1f_hh, b1f, w1b_ih, w1b_hh, b1b,
      w2f_ihf, w2f_ihb, w2f_hh, b2f,
      w2b_ihf, w2b_ihb, w2b_hh, b2b,
      wc_f, wc_b, bc)

    return out_p[:B, :L]


# ---------------------------------------------------------------------------
# Parameter init (PyTorch-style: every tensor uniform(-1/sqrt(H), 1/sqrt(H)),
# b_ih and b_hh sampled separately as in nn.LSTM)
# ---------------------------------------------------------------------------
def init_params(key, input_size, hidden_size, num_labels, num_layers=2):
    H = hidden_size
    k = 1.0 / float(hidden_size) ** 0.5
    params = {"lstm": []}
    keys = jax.random.split(key, num_layers * 2 * 4 + 2)
    ki = 0
    for layer in range(num_layers):
        din = input_size if layer == 0 else 2 * hidden_size
        layer_dirs = []
        for _direction in range(2):   # 0 = forward, 1 = backward
            w_ih = jax.random.uniform(keys[ki], (4 * H, din), jnp.float32, -k, k); ki += 1
            w_hh = jax.random.uniform(keys[ki], (4 * H, H), jnp.float32, -k, k); ki += 1
            b_ih = jax.random.uniform(keys[ki], (4 * H,), jnp.float32, -k, k); ki += 1
            b_hh = jax.random.uniform(keys[ki], (4 * H,), jnp.float32, -k, k); ki += 1
            layer_dirs.append({"w_ih": w_ih, "w_hh": w_hh, "b_ih": b_ih, "b_hh": b_hh})
        params["lstm"].append(layer_dirs)
    kc = 1.0 / float(2 * hidden_size) ** 0.5
    params["cls_w"] = jax.random.uniform(keys[ki], (num_labels, 2 * H), jnp.float32, -kc, kc); ki += 1
    params["cls_b"] = jax.random.uniform(keys[ki], (num_labels,), jnp.float32, -kc, kc)
    return params


# ---------------------------------------------------------------------------
# Pure-JAX reference (mirrors nn.LSTM math) for an in-script sanity check.
# ---------------------------------------------------------------------------
def _reference_forward(x_btd, params):
    def lstm_dir(x_tbd, p, reverse):
        T, B, _ = x_tbd.shape
        H = p["w_hh"].shape[1]
        h = jnp.zeros((B, H), jnp.float32)
        c = jnp.zeros((B, H), jnp.float32)
        outs = [None] * T
        order = range(T - 1, -1, -1) if reverse else range(T)
        for t in order:
            g = x_tbd[t] @ p["w_ih"].T + h @ p["w_hh"].T + p["b_ih"] + p["b_hh"]
            i_g = jax.nn.sigmoid(g[:, 0 * H:1 * H])
            f_g = jax.nn.sigmoid(g[:, 1 * H:2 * H])
            g_g = jnp.tanh(g[:, 2 * H:3 * H])
            o_g = jax.nn.sigmoid(g[:, 3 * H:4 * H])
            c = f_g * c + i_g * g_g
            h = o_g * jnp.tanh(c)
            outs[t] = h
        return jnp.stack(outs, axis=0), h

    x = jnp.transpose(x_btd.astype(jnp.float32), (1, 0, 2))
    (l1f, l1b), (l2f, l2b) = params["lstm"]
    of, _ = lstm_dir(x, l1f, False)
    ob, _ = lstm_dir(x, l1b, True)
    x2 = jnp.concatenate([of, ob], axis=-1)
    _, hf = lstm_dir(x2, l2f, False)
    _, hb = lstm_dir(x2, l2b, True)
    ht = jnp.concatenate([hf, hb], axis=1)
    return jax.nn.sigmoid(ht @ params["cls_w"].T + params["cls_b"])


if __name__ == "__main__":
    # Small shapes consistent with the module's forward.
    B, T = 2, 8
    INPUT_SIZE, HIDDEN_SIZE, NUM_LABELS, NUM_LAYERS = 32, 16, 3, 2

    key = jax.random.PRNGKey(0)
    kx, kp = jax.random.split(key)
    x = jax.random.normal(kx, (B, T, INPUT_SIZE), jnp.float32)
    params = init_params(kp, INPUT_SIZE, HIDDEN_SIZE, NUM_LABELS, NUM_LAYERS)

    out = bilstm_net_forward(x, params)
    out = jax.block_until_ready(out)
    assert out.shape == (B, NUM_LABELS), out.shape
    assert bool(jnp.all(jnp.isfinite(out)))

    ref = _reference_forward(x, params)
    assert bool(jnp.allclose(out, ref, atol=1e-3, rtol=1e-3)), (out, ref)

    print("KERNEL_OK")
</pallas_src>

<mosaic_0001>
module attributes {stable_mosaic.version = 11 : i64} {
  func.func @_bilstm_fused_kernel(%arg0: memref<64x128xf32, #tpu.memory_space<vmem>>, %arg1: memref<128x512xf32, #tpu.memory_space<vmem>>, %arg2: memref<128x512xf32, #tpu.memory_space<vmem>>, %arg3: memref<1x512xf32, #tpu.memory_space<vmem>>, %arg4: memref<128x512xf32, #tpu.memory_space<vmem>>, %arg5: memref<128x512xf32, #tpu.memory_space<vmem>>, %arg6: memref<1x512xf32, #tpu.memory_space<vmem>>, %arg7: memref<128x512xf32, #tpu.memory_space<vmem>>, %arg8: memref<128x512xf32, #tpu.memory_space<vmem>>, %arg9: memref<128x512xf32, #tpu.memory_space<vmem>>, %arg10: memref<1x512xf32, #tpu.memory_space<vmem>>, %arg11: memref<128x512xf32, #tpu.memory_space<vmem>>, %arg12: memref<128x512xf32, #tpu.memory_space<vmem>>, %arg13: memref<128x512xf32, #tpu.memory_space<vmem>>, %arg14: memref<1x512xf32, #tpu.memory_space<vmem>>, %arg15: memref<128x128xf32, #tpu.memory_space<vmem>>, %arg16: memref<128x128xf32, #tpu.memory_space<vmem>>, %arg17: memref<1x128xf32, #tpu.memory_space<vmem>>, %arg18: memref<8x128xf32, #tpu.memory_space<vmem>>, %arg19: memref<64x512xf32, #tpu.memory_space<vmem>>, %arg20: memref<64x128xf32, #tpu.memory_space<vmem>>, %arg21: memref<64x128xf32, #tpu.memory_space<vmem>>) attributes {dimension_semantics = [], scalar_prefetch = 0 : i64, scratch_operands = 3 : i64, tpu.core_type = #tpu.core_type<tc>} {
    %c0 = arith.constant 0 : index
    %c0_0 = arith.constant 0 : index
    %0 = vector.load %arg0[%c0, %c0_0] : memref<64x128xf32, #tpu.memory_space<vmem>>, vector<64x128xf32>
    %c0_1 = arith.constant 0 : index
    %c0_2 = arith.constant 0 : index
    %1 = vector.load %arg1[%c0_1, %c0_2] : memref<128x512xf32, #tpu.memory_space<vmem>>, vector<128x512xf32>
    %cst = arith.constant dense<0.000000e+00> : vector<64x512xf32>
    %2 = tpu.matmul %0, %1, %cst {dimension_numbers = #tpu.dot_dimension_numbers<[1], [0], [0], [1], [0, 0, 1, 1], [], []>} : vector<64x128xf32>, vector<128x512xf32>, vector<64x512xf32> -> vector<64x512xf32>
    %c0_3 = arith.constant 0 : index
    %c0_4 = arith.constant 0 : index
    %3 = vector.load %arg3[%c0_3, %c0_4] : memref<1x512xf32, #tpu.memory_space<vmem>>, vector<1x512xf32>
    %4 = vector.broadcast %3 : vector<1x512xf32> to vector<64x512xf32>
    %5 = arith.addf %2, %4 : vector<64x512xf32>
    %c0_5 = arith.constant 0 : index
    %c0_6 = arith.constant 0 : index
    %6 = vector.load %arg19[%c0_5, %c0_6] : memref<64x512xf32, #tpu.memory_space<vmem>>, vector<64x512xf32>
    tpu.vector_store %arg19[%c0_5, %c0_6], %5 {strides = array<i32>} : memref<64x512xf32, #tpu.memory_space<vmem>>, vector<64x512xf32>,
    %c0_7 = arith.constant 0 : index
    %c0_8 = arith.constant 0 : index
    %7 = vector.load %arg2[%c0_7, %c0_8] : memref<128x512xf32, #tpu.memory_space<vmem>>, vector<128x512xf32>
    %cst_9 = arith.constant 0.000000e+00 : f32
    %8 = vector.broadcast %cst_9 : f32 to vector<8x128xf32>
    %cst_10 = arith.constant 0.000000e+00 : f32
    %9 = vector.broadcast %cst_10 : f32 to vector<8x128xf32>
    %c0_11 = arith.constant 0 : index
    %c0_12 = arith.constant 0 : index
    %10 = vector.load %arg19[%c0_11, %c0_12] : memref<64x512xf32, #tpu.memory_space<vmem>>, vector<8x512xf32>
    %cst_13 = arith.constant dense<0.000000e+00> : vector<8x512xf32>
    %11 = tpu.matmul %8, %7, %cst_13 {dimension_numbers = #tpu.dot_dimension_numbers<[1], [0], [0], [1], [0, 0, 1, 1], [], []>} : vector<8x128xf32>, vector<128x512xf32>, vector<8x512xf32> -> vector<8x512xf32>
    %12 = arith.addf %10, %11 : vector<8x512xf32>
    %13 = vector.extract_strided_slice %12 {offsets = [0, 0], sizes = [8, 128], strides = [1, 1]} : vector<8x512xf32> to vector<8x128xf32>
    %14 = arith.negf %13 : vector<8x128xf32>
    %15 = math.exp %14 : vector<8x128xf32>
    %cst_14 = arith.constant 1.000000e+00 : f32
    %16 = vector.broadcast %cst_14 : f32 to vector<8x128xf32>
    %17 = arith.addf %16, %15 : vector<8x128xf32>
    %18 = arith.divf %16, %17 : vector<8x128xf32>
    %19 = vector.extract_strided_slice %12 {offsets = [0, 128], sizes = [8, 128], strides = [1, 1]} : vector<8x512xf32> to vector<8x128xf32>
    %20 = arith.negf %19 : vector<8x128xf32>
    %21 = math.exp %20 : vector<8x128xf32>
    %cst_15 = arith.constant 1.000000e+00 : f32
    %22 = vector.broadcast %cst_15 : f32 to vector<8x128xf32>
    %23 = arith.addf %22, %21 : vector<8x128xf32>
    %24 = arith.divf %22, %23 : vector<8x128xf32>
    %25 = vector.extract_strided_slice %12 {offsets = [0, 256], sizes = [8, 128], strides = [1, 1]} : vector<8x512xf32> to vector<8x128xf32>
    %26 = math.tanh %25 : vector<8x128xf32>
    %27 = vector.extract_strided_slice %12 {offsets = [0, 384], sizes = [8, 128], strides = [1, 1]} : vector<8x512xf32> to vector<8x128xf32>
    %28 = arith.negf %27 : vector<8x128xf32>
    %29 = math.exp %28 : vector<8x128xf32>
    %cst_16 = arith.constant 1.000000e+00 : f32
    %30 = vector.broadcast %cst_16 : f32 to vector<8x128xf32>
    %31 = arith.addf %30, %29 : vector<8x128xf32>
    %32 = arith.divf %30, %31 : vector<8x128xf32>
    %33 = arith.mulf %24, %9 : vector<8x128xf32>
    %34 = arith.mulf %18, %26 : vector<8x128xf32>
    %35 = arith.addf %33, %34 : vector<8x128xf32>
    %36 = math.tanh %35 : vector<8x128xf32>
    %37 = arith.mulf %32, %36 : vector<8x128xf32>
    %c0_17 = arith.constant 0 : index
    %c0_18 = arith.constant 0 : index
    %38 = vector.load %arg20[%c0_17, %c0_18] : memref<64x128xf32, #tpu.memory_space<vmem>>, vector<8x128xf32>
    tpu.vector_store %arg20[%c0_17, %c0_18], %37 {strides = array<i32>} : memref<64x128xf32, #tpu.memory_space<vmem>>, vector<8x128xf32>,
    %c8 = arith.constant 8 : index
    %c0_19 = arith.constant 0 : index
    %39 = vector.load %arg19[%c8, %c0_19] : memref<64x512xf32, #tpu.memory_space<vmem>>, vector<8x512xf32>
    %cst_20 = arith.constant dense<0.000000e+00> : vector<8x512xf32>
    %40 = tpu.matmul %37, %7, %cst_20 {dimension_numbers = #tpu.dot_dimension_numbers<[1], [0], [0], [1], [0, 0, 1, 1], [], []>} : vector<8x128xf32>, vector<128x512xf32>, vector<8x512xf32> -> vector<8x512xf32>
    %41 = arith.addf %39, %40 : vector<8x512xf32>
    %42 = vector.extract_strided_slice %41 {offsets = [0, 0], sizes = [8, 128], strides = [1, 1]} : vector<8x512xf32> to vector<8x128xf32>
    %43 = arith.negf %42 : vector<8x128xf32>
    %44 = math.exp %43 : vector<8x128xf32>
    %cst_21 = arith.constant 1.000000e+00 : f32
    %45 = vector.broadcast %cst_21 : f32 to vector<8x128xf32>
    %46 = arith.addf %45, %44 : vector<8x128xf32>
    %47 = arith.divf %45, %46 : vector<8x128xf32>
    %48 = vector.extract_strided_slice %41 {offsets = [0, 128], sizes = [8, 128], strides = [1, 1]} : vector<8x512xf32> to vector<8x128xf32>
    %49 = arith.negf %48 : vector<8x128xf32>
    %50 = math.exp %49 : vector<8x128xf32>
    %cst_22 = arith.constant 1.000000e+00 : f32
    %51 = vector.broadcast %cst_22 : f32 to vector<8x128xf32>
    %52 = arith.addf %51, %50 : vector<8x128xf32>
    %53 = arith.divf %51, %52 : vector<8x128xf32>
    %54 = vector.extract_strided_slice %41 {offsets = [0, 256], sizes = [8, 128], strides = [1, 1]} : vector<8x512xf32> to vector<8x128xf32>
    %55 = math.tanh %54 : vector<8x128xf32>
    %56 = vector.extract_strided_slice %41 {offsets = [0, 384], sizes = [8, 128], strides = [1, 1]} : vector<8x512xf32> to vector<8x128xf32>
    %57 = arith.negf %56 : vector<8x128xf32>
    %58 = math.exp %57 : vector<8x128xf32>
    %cst_23 = arith.constant 1.000000e+00 : f32
    %59 = vector.broadcast %cst_23 : f32 to vector<8x128xf32>
    %60 = arith.addf %59, %58 : vector<8x128xf32>
    %61 = arith.divf %59, %60 : vector<8x128xf32>
    %62 = arith.mulf %53, %35 : vector<8x128xf32>
    %63 = arith.mulf %47, %55 : vector<8x128xf32>
    %64 = arith.addf %62, %63 : vector<8x128xf32>
    %65 = math.tanh %64 : vector<8x128xf32>
    %66 = arith.mulf %61, %65 : vector<8x128xf32>
    %c8_24 = arith.constant 8 : index
    %c0_25 = arith.constant 0 : index
    %67 = vector.load %arg20[%c8_24, %c0_25] : memref<64x128xf32, #tpu.memory_space<vmem>>, vector<8x128xf32>
    tpu.vector_store %arg20[%c8_24, %c0_25], %66 {strides = array<i32>} : memref<64x128xf32, #tpu.memory_space<vmem>>, vector<8x128xf32>,
    %c16 = arith.constant 16 : index
    %c0_26 = arith.constant 0 : index
    %68 = vector.load %arg19[%c16, %c0_26] : memref<64x512xf32, #tpu.memory_space<vmem>>, vector<8x512xf32>
    %cst_27 = arith.constant dense<0.000000e+00> : vector<8x512xf32>
    %69 = tpu.matmul %66, %7, %cst_27 {dimension_numbers = #tpu.dot_dimension_numbers<[1], [0], [0], [1], [0, 0, 1, 1], [], []>} : vector<8x128xf32>, vector<128x512xf32>, vector<8x512xf32> -> vector<8x512xf32>
    %70 = arith.addf %68, %69 : vector<8x512xf32>
    %71 = vector.extract_strided_slice %70 {offsets = [0, 0], sizes = [8, 128], strides = [1, 1]} : vector<8x512xf32> to vector<8x128xf32>
    %72 = arith.negf %71 : vector<8x128xf32>
    %73 = math.exp %72 : vector<8x128xf32>
    %cst_28 = arith.constant 1.000000e+00 : f32
    %74 = vector.broadcast %cst_28 : f32 to vector<8x128xf32>
    %75 = arith.addf %74, %73 : vector<8x128xf32>
    %76 = arith.divf %74, %75 : vector<8x128xf32>
    %77 = vector.extract_strided_slice %70 {offsets = [0, 128], sizes = [8, 128], strides = [1, 1]} : vector<8x512xf32> to vector<8x128xf32>
    %78 = arith.negf %77 : vector<8x128xf32>
    %79 = math.exp %78 : vector<8x128xf32>
    %cst_29 = arith.constant 1.000000e+00 : f32
    %80 = vector.broadcast %cst_29 : f32 to vector<8x128xf32>
    %81 = arith.addf %80, %79 : vector<8x128xf32>
    %82 = arith.divf %80, %81 : vector<8x128xf32>
    %83 = vector.extract_strided_slice %70 {offsets = [0, 256], sizes = [8, 128], strides = [1, 1]} : vector<8x512xf32> to vector<8x128xf32>
    %84 = math.tanh %83 : vector<8x128xf32>
    %85 = vector.extract_strided_slice %70 {offsets = [0, 384], sizes = [8, 128], strides = [1, 1]} : vector<8x512xf32> to vector<8x128xf32>
    %86 = arith.negf %85 : vector<8x128xf32>
    %87 = math.exp %86 : vector<8x128xf32>
    %cst_30 = arith.constant 1.000000e+00 : f32
    %88 = vector.broadcast %cst_30 : f32 to vector<8x128xf32>
    %89 = arith.addf %88, %87 : vector<8x128xf32>
    %90 = arith.divf %88, %89 : vector<8x128xf32>
    %91 = arith.mulf %82, %64 : vector<8x128xf32>
    %92 = arith.mulf %76, %84 : vector<8x128xf32>
    %93 = arith.addf %91, %92 : vector<8x128xf32>
    %94 = math.tanh %93 : vector<8x128xf32>
    %95 = arith.mulf %90, %94 : vector<8x128xf32>
    %c16_31 = arith.constant 16 : index
    %c0_32 = arith.constant 0 : index
    %96 = vector.load %arg20[%c16_31, %c0_32] : memref<64x128xf32, #tpu.memory_space<vmem>>, vector<8x128xf32>
    tpu.vector_store %arg20[%c16_31, %c0_32], %95 {strides = array<i32>} : memref<64x128xf32, #tpu.memory_space<vmem>>, vector<8x128xf32>,
    %c24 = arith.constant 24 : index
    %c0_33 = arith.constant 0 : index
    %97 = vector.load %arg19[%c24, %c0_33] : memref<64x512xf32, #tpu.memory_space<vmem>>, vector<8x512xf32>
    %cst_34 = arith.constant dense<0.000000e+00> : vector<8x512xf32>
    %98 = tpu.matmul %95, %7, %cst_34 {dimension_numbers = #tpu.dot_dimension_numbers<[1], [0], [0], [1], [0, 0, 1, 1], [], []>} : vector<8x128xf32>, vector<128x512xf32>, vector<8x512xf32> -> vector<8x512xf32>
    %99 = arith.addf %97, %98 : vector<8x512xf32>
    %100 = vector.extract_strided_slice %99 {offsets = [0, 0], sizes = [8, 128], strides = [1, 1]} : vector<8x512xf32> to vector<8x128xf32>
    %101 = arith.negf %100 : vector<8x128xf32>
    %102 = math.exp %101 : vector<8x128xf32>
    %cst_35 = arith.constant 1.000000e+00 : f32
    %103 = vector.broadcast %cst_35 : f32 to vector<8x128xf32>
    %104 = arith.addf %103, %102 : vector<8x128xf32>
    %105 = arith.divf %103, %104 : vector<8x128xf32>
    %106 = vector.extract_strided_slice %99 {offsets = [0, 128], sizes = [8, 128], strides = [1, 1]} : vector<8x512xf32> to vector<8x128xf32>
    %107 = arith.negf %106 : vector<8x128xf32>
    %108 = math.exp %107 : vector<8x128xf32>
    %cst_36 = arith.constant 1.000000e+00 : f32
    %109 = vector.broadcast %cst_36 : f32 to vector<8x128xf32>
    %110 = arith.addf %109, %108 : vector<8x128xf32>
    %111 = arith.divf %109, %110 : vector<8x128xf32>
    %112 = vector.extract_strided_slice %99 {offsets = [0, 256], sizes = [8, 128], strides = [1, 1]} : vector<8x512xf32> to vector<8x128xf32>
    %113 = math.tanh %112 : vector<8x128xf32>
    %114 = vector.extract_strided_slice %99 {offsets = [0, 384], sizes = [8, 128], strides = [1, 1]} : vector<8x512xf32> to vector<8x128xf32>
    %115 = arith.negf %114 : vector<8x128xf32>
    %116 = math.exp %115 : vector<8x128xf32>
    %cst_37 = arith.constant 1.000000e+00 : f32
    %117 = vector.broadcast %cst_37 : f32 to vector<8x128xf32>
    %118 = arith.addf %117, %116 : vector<8x128xf32>
    %119 = arith.divf %117, %118 : vector<8x128xf32>
    %120 = arith.mulf %111, %93 : vector<8x128xf32>
    %121 = arith.mulf %105, %113 : vector<8x128xf32>
    %122 = arith.addf %120, %121 : vector<8x128xf32>
    %123 = math.tanh %122 : vector<8x128xf32>
    %124 = arith.mulf %119, %123 : vector<8x128xf32>
    %c24_38 = arith.constant 24 : index
    %c0_39 = arith.constant 0 : index
    %125 = vector.load %arg20[%c24_38, %c0_39] : memref<64x128xf32, #tpu.memory_space<vmem>>, vector<8x128xf32>
    tpu.vector_store %arg20[%c24_38, %c0_39], %124 {strides = array<i32>} : memref<64x128xf32, #tpu.memory_space<vmem>>, vector<8x128xf32>,
    %c32 = arith.constant 32 : index
    %c0_40 = arith.constant 0 : index
    %126 = vector.load %arg19[%c32, %c0_40] : memref<64x512xf32, #tpu.memory_space<vmem>>, vector<8x512xf32>
    %cst_41 = arith.constant dense<0.000000e+00> : vector<8x512xf32>
    %127 = tpu.matmul %124, %7, %cst_41 {dimension_numbers = #tpu.dot_dimension_numbers<[1], [0], [0], [1], [0, 0, 1, 1], [], []>} : vector<8x128xf32>, vector<128x512xf32>, vector<8x512xf32> -> vector<8x512xf32>
    %128 = arith.addf %126, %127 : vector<8x512xf32>
    %129 = vector.extract_strided_slice %128 {offsets = [0, 0], sizes = [8, 128], strides = [1, 1]} : vector<8x512xf32> to vector<8x128xf32>
    %130 = arith.negf %129 : vector<8x128xf32>
    %131 = math.exp %130 : vector<8x128xf32>
    %cst_42 = arith.constant 1.000000e+00 : f32
    %132 = vector.broadcast %cst_42 : f32 to vector<8x128xf32>
    %133 = arith.addf %132, %131 : vector<8x128xf32>
    %134 = arith.divf %132, %133 : vector<8x128xf32>
    %135 = vector.extract_strided_slice %128 {offsets = [0, 128], sizes = [8, 128], strides = [1, 1]} : vector<8x512xf32> to vector<8x128xf32>
    %136 = arith.negf %135 : vector<8x128xf32>
    %137 = math.exp %136 : vector<8x128xf32>
    %cst_43 = arith.constant 1.000000e+00 : f32
    %138 = vector.broadcast %cst_43 : f32 to vector<8x128xf32>
    %139 = arith.addf %138, %137 : vector<8x128xf32>
    %140 = arith.divf %138, %139 : vector<8x128xf32>
    %141 = vector.extract_strided_slice %128 {offsets = [0, 256], sizes = [8, 128], strides = [1, 1]} : vector<8x512xf32> to vector<8x128xf32>
    %142 = math.tanh %141 : vector<8x128xf32>
    %143 = vector.extract_strided_slice %128 {offsets = [0, 384], sizes = [8, 128], strides = [1, 1]} : vector<8x512xf32> to vector<8x128xf32>
    %144 = arith.negf %143 : vector<8x128xf32>
    %145 = math.exp %144 : vector<8x128xf32>
    %cst_44 = arith.constant 1.000000e+00 : f32
    %146 = vector.broadcast %cst_44 : f32 to vector<8x128xf32>
    %147 = arith.addf %146, %145 : vector<8x128xf32>
    %148 = arith.divf %146, %147 : vector<8x128xf32>
    %149 = arith.mulf %140, %122 : vector<8x128xf32>
    %150 = arith.mulf %134, %142 : vector<8x128xf32>
    %151 = arith.addf %149, %150 : vector<8x128xf32>
    %152 = math.tanh %151 : vector<8x128xf32>
    %153 = arith.mulf %148, %152 : vector<8x128xf32>
    %c32_45 = arith.constant 32 : index
    %c0_46 = arith.constant 0 : index
    %154 = vector.load %arg20[%c32_45, %c0_46] : memref<64x128xf32, #tpu.memory_space<vmem>>, vector<8x128xf32>
    tpu.vector_store %arg20[%c32_45, %c0_46], %153 {strides = array<i32>} : memref<64x128xf32, #tpu.memory_space<vmem>>, vector<8x128xf32>,
    %c40 = arith.constant 40 : index
    %c0_47 = arith.constant 0 : index
    %155 = vector.load %arg19[%c40, %c0_47] : memref<64x512xf32, #tpu.memory_space<vmem>>, vector<8x512xf32>
    %cst_48 = arith.constant dense<0.000000e+00> : vector<8x512xf32>
    %156 = tpu.matmul %153, %7, %cst_48 {dimension_numbers = #tpu.dot_dimension_numbers<[1], [0], [0], [1], [0, 0, 1, 1], [], []>} : vector<8x128xf32>, vector<128x512xf32>, vector<8x512xf32> -> vector<8x512xf32>
    %157 = arith.addf %155, %156 : vector<8x512xf32>
    %158 = vector.extract_strided_slice %157 {offsets = [0, 0], sizes = [8, 128], strides = [1, 1]} : vector<8x512xf32> to vector<8x128xf32>
    %159 = arith.negf %158 : vector<8x128xf32>
    %160 = math.exp %159 : vector<8x128xf32>
    %cst_49 = arith.constant 1.000000e+00 : f32
    %161 = vector.broadcast %cst_49 : f32 to vector<8x128xf32>
    %162 = arith.addf %161, %160 : vector<8x128xf32>
    %163 = arith.divf %161, %162 : vector<8x128xf32>
    %164 = vector.extract_strided_slice %157 {offsets = [0, 128], sizes = [8, 128], strides = [1, 1]} : vector<8x512xf32> to vector<8x128xf32>
    %165 = arith.negf %164 : vector<8x128xf32>
    %166 = math.exp %165 : vector<8x128xf32>
    %cst_50 = arith.constant 1.000000e+00 : f32
    %167 = vector.broadcast %cst_50 : f32 to vector<8x128xf32>
    %168 = arith.addf %167, %166 : vector<8x128xf32>
    %169 = arith.divf %167, %168 : vector<8x128xf32>
    %170 = vector.extract_strided_slice %157 {offsets = [0, 256], sizes = [8, 128], strides = [1, 1]} : vector<8x512xf32> to vector<8x128xf32>
    %171 = math.tanh %170 : vector<8x128xf32>
    %172 = vector.extract_strided_slice %157 {offsets = [0, 384], sizes = [8, 128], strides = [1, 1]} : vector<8x512xf32> to vector<8x128xf32>
    %173 = arith.negf %172 : vector<8x128xf32>
    %174 = math.exp %173 : vector<8x128xf32>
    %cst_51 = arith.constant 1.000000e+00 : f32
    %175 = vector.broadcast %cst_51 : f32 to vector<8x128xf32>
    %176 = arith.addf %175, %174 : vector<8x128xf32>
    %177 = arith.divf %175, %176 : vector<8x128xf32>
    %178 = arith.mulf %169, %151 : vector<8x128xf32>
    %179 = arith.mulf %163, %171 : vector<8x128xf32>
    %180 = arith.addf %178, %179 : vector<8x128xf32>
    %181 = math.tanh %180 : vector<8x128xf32>
    %182 = arith.mulf %177, %181 : vector<8x128xf32>
    %c40_52 = arith.constant 40 : index
    %c0_53 = arith.constant 0 : index
    %183 = vector.load %arg20[%c40_52, %c0_53] : memref<64x128xf32, #tpu.memory_space<vmem>>, vector<8x128xf32>
    tpu.vector_store %arg20[%c40_52, %c0_53], %182 {strides = array<i32>} : memref<64x128xf32, #tpu.memory_space<vmem>>, vector<8x128xf32>,
    %c48 = arith.constant 48 : index
    %c0_54 = arith.constant 0 : index
    %184 = vector.load %arg19[%c48, %c0_54] : memref<64x512xf32, #tpu.memory_space<vmem>>, vector<8x512xf32>
    %cst_55 = arith.constant dense<0.000000e+00> : vector<8x512xf32>
    %185 = tpu.matmul %182, %7, %cst_55 {dimension_numbers = #tpu.dot_dimension_numbers<[1], [0], [0], [1], [0, 0, 1, 1], [], []>} : vector<8x128xf32>, vector<128x512xf32>, vector<8x512xf32> -> vector<8x512xf32>
    %186 = arith.addf %184, %185 : vector<8x512xf32>
    %187 = vector.extract_strided_slice %186 {offsets = [0, 0], sizes = [8, 128], strides = [1, 1]} : vector<8x512xf32> to vector<8x128xf32>
    %188 = arith.negf %187 : vector<8x128xf32>
    %189 = math.exp %188 : vector<8x128xf32>
    %cst_56 = arith.constant 1.000000e+00 : f32
    %190 = vector.broadcast %cst_56 : f32 to vector<8x128xf32>
    %191 = arith.addf %190, %189 : vector<8x128xf32>
    %192 = arith.divf %190, %191 : vector<8x128xf32>
    %193 = vector.extract_strided_slice %186 {offsets = [0, 128], sizes = [8, 128], strides = [1, 1]} : vector<8x512xf32> to vector<8x128xf32>
    %194 = arith.negf %193 : vector<8x128xf32>
    %195 = math.exp %194 : vector<8x128xf32>
    %cst_57 = arith.constant 1.000000e+00 : f32
    %196 = vector.broadcast %cst_57 : f32 to vector<8x128xf32>
    %197 = arith.addf %196, %195 : vector<8x128xf32>
    %198 = arith.divf %196, %197 : vector<8x128xf32>
    %199 = vector.extract_strided_slice %186 {offsets = [0, 256], sizes = [8, 128], strides = [1, 1]} : vector<8x512xf32> to vector<8x128xf32>
    %200 = math.tanh %199 : vector<8x128xf32>
    %201 = vector.extract_strided_slice %186 {offsets = [0, 384], sizes = [8, 128], strides = [1, 1]} : vector<8x512xf32> to vector<8x128xf32>
    %202 = arith.negf %201 : vector<8x128xf32>
    %203 = math.exp %202 : vector<8x128xf32>
    %cst_58 = arith.constant 1.000000e+00 : f32
    %204 = vector.broadcast %cst_58 : f32 to vector<8x128xf32>
    %205 = arith.addf %204, %203 : vector<8x128xf32>
    %206 = arith.divf %204, %205 : vector<8x128xf32>
    %207 = arith.mulf %198, %180 : vector<8x128xf32>
    %208 = arith.mulf %192, %200 : vector<8x128xf32>
    %209 = arith.addf %207, %208 : vector<8x128xf32>
    %210 = math.tanh %209 : vector<8x128xf32>
    %211 = arith.mulf %206, %210 : vector<8x128xf32>
    %c48_59 = arith.constant 48 : index
    %c0_60 = arith.constant 0 : index
    %212 = vector.load %arg20[%c48_59, %c0_60] : memref<64x128xf32, #tpu.memory_space<vmem>>, vector<8x128xf32>
    tpu.vector_store %arg20[%c48_59, %c0_60], %211 {strides = array<i32>} : memref<64x128xf32, #tpu.memory_space<vmem>>, vector<8x128xf32>,
    %c56 = arith.constant 56 : index
    %c0_61 = arith.constant 0 : index
    %213 = vector.load %arg19[%c56, %c0_61] : memref<64x512xf32, #tpu.memory_space<vmem>>, vector<8x512xf32>
    %cst_62 = arith.constant dense<0.000000e+00> : vector<8x512xf32>
    %214 = tpu.matmul %211, %7, %cst_62 {dimension_numbers = #tpu.dot_dimension_numbers<[1], [0], [0], [1], [0, 0, 1, 1], [], []>} : vector<8x128xf32>, vector<128x512xf32>, vector<8x512xf32> -> vector<8x512xf32>
    %215 = arith.addf %213, %214 : vector<8x512xf32>
    %216 = vector.extract_strided_slice %215 {offsets = [0, 0], sizes = [8, 128], strides = [1, 1]} : vector<8x512xf32> to vector<8x128xf32>
    %217 = arith.negf %216 : vector<8x128xf32>
    %218 = math.exp %217 : vector<8x128xf32>
    %cst_63 = arith.constant 1.000000e+00 : f32
    %219 = vector.broadcast %cst_63 : f32 to vector<8x128xf32>
    %220 = arith.addf %219, %218 : vector<8x128xf32>
    %221 = arith.divf %219, %220 : vector<8x128xf32>
    %222 = vector.extract_strided_slice %215 {offsets = [0, 128], sizes = [8, 128], strides = [1, 1]} : vector<8x512xf32> to vector<8x128xf32>
    %223 = arith.negf %222 : vector<8x128xf32>
    %224 = math.exp %223 : vector<8x128xf32>
    %cst_64 = arith.constant 1.000000e+00 : f32
    %225 = vector.broadcast %cst_64 : f32 to vector<8x128xf32>
    %226 = arith.addf %225, %224 : vector<8x128xf32>
    %227 = arith.divf %225, %226 : vector<8x128xf32>
    %228 = vector.extract_strided_slice %215 {offsets = [0, 256], sizes = [8, 128], strides = [1, 1]} : vector<8x512xf32> to vector<8x128xf32>
    %229 = math.tanh %228 : vector<8x128xf32>
    %230 = vector.extract_strided_slice %215 {offsets = [0, 384], sizes = [8, 128], strides = [1, 1]} : vector<8x512xf32> to vector<8x128xf32>
    %231 = arith.negf %230 : vector<8x128xf32>
    %232 = math.exp %231 : vector<8x128xf32>
    %cst_65 = arith.constant 1.000000e+00 : f32
    %233 = vector.broadcast %cst_65 : f32 to vector<8x128xf32>
    %234 = arith.addf %233, %232 : vector<8x128xf32>
    %235 = arith.divf %233, %234 : vector<8x128xf32>
    %236 = arith.mulf %227, %209 : vector<8x128xf32>
    %237 = arith.mulf %221, %229 : vector<8x128xf32>
    %238 = arith.addf %236, %237 : vector<8x128xf32>
    %239 = math.tanh %238 : vector<8x128xf32>
    %240 = arith.mulf %235, %239 : vector<8x128xf32>
    %c56_66 = arith.constant 56 : index
    %c0_67 = arith.constant 0 : index
    %241 = vector.load %arg20[%c56_66, %c0_67] : memref<64x128xf32, #tpu.memory_space<vmem>>, vector<8x128xf32>
    tpu.vector_store %arg20[%c56_66, %c0_67], %240 {strides = array<i32>} : memref<64x128xf32, #tpu.memory_space<vmem>>, vector<8x128xf32>,
    %c0_68 = arith.constant 0 : index
    %c0_69 = arith.constant 0 : index
    %242 = vector.load %arg4[%c0_68, %c0_69] : memref<128x512xf32, #tpu.memory_space<vmem>>, vector<128x512xf32>
    %cst_70 = arith.constant dense<0.000000e+00> : vector<64x512xf32>
    %243 = tpu.matmul %0, %242, %cst_70 {dimension_numbers = #tpu.dot_dimension_numbers<[1], [0], [0], [1], [0, 0, 1, 1], [], []>} : vector<64x128xf32>, vector<128x512xf32>, vector<64x512xf32> -> vector<64x512xf32>
    %c0_71 = arith.constant 0 : index
    %c0_72 = arith.constant 0 : index
    %244 = vector.load %arg6[%c0_71, %c0_72] : memref<1x512xf32, #tpu.memory_space<vmem>>, vector<1x512xf32>
    %245 = vector.broadcast %244 : vector<1x512xf32> to vector<64x512xf32>
    %246 = arith.addf %243, %245 : vector<64x512xf32>
    %c0_73 = arith.constant 0 : index
    %c0_74 = arith.constant 0 : index
    %247 = vector.load %arg19[%c0_73, %c0_74] : memref<64x512xf32, #tpu.memory_space<vmem>>, vector<64x512xf32>
    tpu.vector_store %arg19[%c0_73, %c0_74], %246 {strides = array<i32>} : memref<64x512xf32, #tpu.memory_space<vmem>>, vector<64x512xf32>,
    %c0_75 = arith.constant 0 : index
    %c0_76 = arith.constant 0 : index
    %248 = vector.load %arg5[%c0_75, %c0_76] : memref<128x512xf32, #tpu.memory_space<vmem>>, vector<128x512xf32>
    %cst_77 = arith.constant 0.000000e+00 : f32
    %249 = vector.broadcast %cst_77 : f32 to vector<8x128xf32>
    %cst_78 = arith.constant 0.000000e+00 : f32
    %250 = vector.broadcast %cst_78 : f32 to vector<8x128xf32>
    %c56_79 = arith.constant 56 : index
    %c0_80 = arith.constant 0 : index
    %251 = vector.load %arg19[%c56_79, %c0_80] : memref<64x512xf32, #tpu.memory_space<vmem>>, vector<8x512xf32>
    %cst_81 = arith.constant dense<0.000000e+00> : vector<8x512xf32>
    %252 = tpu.matmul %249, %248, %cst_81 {dimension_numbers = #tpu.dot_dimension_numbers<[1], [0], [0], [1], [0, 0, 1, 1], [], []>} : vector<8x128xf32>, vector<128x512xf32>, vector<8x512xf32> -> vector<8x512xf32>
    %253 = arith.addf %251, %252 : vector<8x512xf32>
    %254 = vector.extract_strided_slice %253 {offsets = [0, 0], sizes = [8, 128], strides = [1, 1]} : vector<8x512xf32> to vector<8x128xf32>
    %255 = arith.negf %254 : vector<8x128xf32>
    %256 = math.exp %255 : vector<8x128xf32>
    %cst_82 = arith.constant 1.000000e+00 : f32
    %257 = vector.broadcast %cst_82 : f32 to vector<8x128xf32>
    %258 = arith.addf %257, %256 : vector<8x128xf32>
    %259 = arith.divf %257, %258 : vector<8x128xf32>
    %260 = vector.extract_strided_slice %253 {offsets = [0, 128], sizes = [8, 128], strides = [1, 1]} : vector<8x512xf32> to vector<8x128xf32>
    %261 = arith.negf %260 : vector<8x128xf32>
    %262 = math.exp %261 : vector<8x128xf32>
    %cst_83 = arith.constant 1.000000e+00 : f32
    %263 = vector.broadcast %cst_83 : f32 to vector<8x128xf32>
    %264 = arith.addf %263, %262 : vector<8x128xf32>
    %265 = arith.divf %263, %264 : vector<8x128xf32>
    %266 = vector.extract_strided_slice %253 {offsets = [0, 256], sizes = [8, 128], strides = [1, 1]} : vector<8x512xf32> to vector<8x128xf32>
    %267 = math.tanh %266 : vector<8x128xf32>
    %268 = vector.extract_strided_slice %253 {offsets = [0, 384], sizes = [8, 128], strides = [1, 1]} : vector<8x512xf32> to vector<8x128xf32>
    %269 = arith.negf %268 : vector<8x128xf32>
    %270 = math.exp %269 : vector<8x128xf32>
    %cst_84 = arith.constant 1.000000e+00 : f32
    %271 = vector.broadcast %cst_84 : f32 to vector<8x128xf32>
    %272 = arith.addf %271, %270 : vector<8x128xf32>
    %273 = arith.divf %271, %272 : vector<8x128xf32>
    %274 = arith.mulf %265, %250 : vector<8x128xf32>
    %275 = arith.mulf %259, %267 : vector<8x128xf32>
    %276 = arith.addf %274, %275 : vector<8x128xf32>
    %277 = math.tanh %276 : vector<8x128xf32>
    %278 = arith.mulf %273, %277 : vector<8x128xf32>
    %c56_85 = arith.constant 56 : index
    %c0_86 = arith.constant 0 : index
    %279 = vector.load %arg21[%c56_85, %c0_86] : memref<64x128xf32, #tpu.memory_space<vmem>>, vector<8x128xf32>
    tpu.vector_store %arg21[%c56_85, %c0_86], %278 {strides = array<i32>} : memref<64x128xf32, #tpu.memory_space<vmem>>, vector<8x128xf32>,
    %c48_87 = arith.constant 48 : index
    %c0_88 = arith.constant 0 : index
    %280 = vector.load %arg19[%c48_87, %c0_88] : memref<64x512xf32, #tpu.memory_space<vmem>>, vector<8x512xf32>
    %cst_89 = arith.constant dense<0.000000e+00> : vector<8x512xf32>
    %281 = tpu.matmul %278, %248, %cst_89 {dimension_numbers = #tpu.dot_dimension_numbers<[1], [0], [0], [1], [0, 0, 1, 1], [], []>} : vector<8x128xf32>, vector<128x512xf32>, vector<8x512xf32> -> vector<8x512xf32>
    %282 = arith.addf %280, %281 : vector<8x512xf32>
    %283 = vector.extract_strided_slice %282 {offsets = [0, 0], sizes = [8, 128], strides = [1, 1]} : vector<8x512xf32> to vector<8x128xf32>
    %284 = arith.negf %283 : vector<8x128xf32>
    %285 = math.exp %284 : vector<8x128xf32>
    %cst_90 = arith.constant 1.000000e+00 : f32
    %286 = vector.broadcast %cst_90 : f32 to vector<8x128xf32>
    %287 = arith.addf %286, %285 : vector<8x128xf32>
    %288 = arith.divf %286, %287 : vector<8x128xf32>
    %289 = vector.extract_strided_slice %282 {offsets = [0, 128], sizes = [8, 128], strides = [1, 1]} : vector<8x512xf32> to vector<8x128xf32>
    %290 = arith.negf %289 : vector<8x128xf32>
    %291 = math.exp %290 : vector<8x128xf32>
    %cst_91 = arith.constant 1.000000e+00 : f32
    %292 = vector.broadcast %cst_91 : f32 to vector<8x128xf32>
    %293 = arith.addf %292, %291 : vector<8x128xf32>
    %294 = arith.divf %292, %293 : vector<8x128xf32>
    %295 = vector.extract_strided_slice %282 {offsets = [0, 256], sizes = [8, 128], strides = [1, 1]} : vector<8x512xf32> to vector<8x128xf32>
    %296 = math.tanh %295 : vector<8x128xf32>
    %297 = vector.extract_strided_slice %282 {offsets = [0, 384], sizes = [8, 128], strides = [1, 1]} : vector<8x512xf32> to vector<8x128xf32>
    %298 = arith.negf %297 : vector<8x128xf32>
    %299 = math.exp %298 : vector<8x128xf32>
    %cst_92 = arith.constant 1.000000e+00 : f32
    %300 = vector.broadcast %cst_92 : f32 to vector<8x128xf32>
    %301 = arith.addf %300, %299 : vector<8x128xf32>
    %302 = arith.divf %300, %301 : vector<8x128xf32>
    %303 = arith.mulf %294, %276 : vector<8x128xf32>
    %304 = arith.mulf %288, %296 : vector<8x128xf32>
    %305 = arith.addf %303, %304 : vector<8x128xf32>
    %306 = math.tanh %305 : vector<8x128xf32>
    %307 = arith.mulf %302, %306 : vector<8x128xf32>
    %c48_93 = arith.constant 48 : index
    %c0_94 = arith.constant 0 : index
    %308 = vector.load %arg21[%c48_93, %c0_94] : memref<64x128xf32, #tpu.memory_space<vmem>>, vector<8x128xf32>
    tpu.vector_store %arg21[%c48_93, %c0_94], %307 {strides = array<i32>} : memref<64x128xf32, #tpu.memory_space<vmem>>, vector<8x128xf32>,
    %c40_95 = arith.constant 40 : index
    %c0_96 = arith.constant 0 : index
    %309 = vector.load %arg19[%c40_95, %c0_96] : memref<64x512xf32, #tpu.memory_space<vmem>>, vector<8x512xf32>
    %cst_97 = arith.constant dense<0.000000e+00> : vector<8x512xf32>
    %310 = tpu.matmul %307, %248, %cst_97 {dimension_numbers = #tpu.dot_dimension_numbers<[1], [0], [0], [1], [0, 0, 1, 1], [], []>} : vector<8x128xf32>, vector<128x512xf32>, vector<8x512xf32> -> vector<8x512xf32>
    %311 = arith.addf %309, %310 : vector<8x512xf32>
    %312 = vector.extract_strided_slice %311 {offsets = [0, 0], sizes = [8, 128], strides = [1, 1]} : vector<8x512xf32> to vector<8x128xf32>
    %313 = arith.negf %312 : vector<8x128xf32>
    %314 = math.exp %313 : vector<8x128xf32>
    %cst_98 = arith.constant 1.000000e+00 : f32
    %315 = vector.broadcast %cst_98 : f32 to vector<8x128xf32>
    %316 = arith.addf %315, %314 : vector<8x128xf32>
    %317 = arith.divf %315, %316 : vector<8x128xf32>
    %318 = vector.extract_strided_slice %311 {offsets = [0, 128], sizes = [8, 128], strides = [1, 1]} : vector<8x512xf32> to vector<8x128xf32>
    %319 = arith.negf %318 : vector<8x128xf32>
    %320 = math.exp %319 : vector<8x128xf32>
    %cst_99 = arith.constant 1.000000e+00 : f32
    %321 = vector.broadcast %cst_99 : f32 to vector<8x128xf32>
    %322 = arith.addf %321, %320 : vector<8x128xf32>
    %323 = arith.divf %321, %322 : vector<8x128xf32>
    %324 = vector.extract_strided_slice %311 {offsets = [0, 256], sizes = [8, 128], strides = [1, 1]} : vector<8x512xf32> to vector<8x128xf32>
    %325 = math.tanh %324 : vector<8x128xf32>
    %326 = vector.extract_strided_slice %311 {offsets = [0, 384], sizes = [8, 128], strides = [1, 1]} : vector<8x512xf32> to vector<8x128xf32>
    %327 = arith.negf %326 : vector<8x128xf32>
    %328 = math.exp %327 : vector<8x128xf32>
    %cst_100 = arith.constant 1.000000e+00 : f32
    %329 = vector.broadcast %cst_100 : f32 to vector<8x128xf32>
    %330 = arith.addf %329, %328 : vector<8x128xf32>
    %331 = arith.divf %329, %330 : vector<8x128xf32>
    %332 = arith.mulf %323, %305 : vector<8x128xf32>
    %333 = arith.mulf %317, %325 : vector<8x128xf32>
    %334 = arith.addf %332, %333 : vector<8x128xf32>
    %335 = math.tanh %334 : vector<8x128xf32>
    %336 = arith.mulf %331, %335 : vector<8x128xf32>
    %c40_101 = arith.constant 40 : index
    %c0_102 = arith.constant 0 : index
    %337 = vector.load %arg21[%c40_101, %c0_102] : memref<64x128xf32, #tpu.memory_space<vmem>>, vector<8x128xf32>
    tpu.vector_store %arg21[%c40_101, %c0_102], %336 {strides = array<i32>} : memref<64x128xf32, #tpu.memory_space<vmem>>, vector<8x128xf32>,
    %c32_103 = arith.constant 32 : index
    %c0_104 = arith.constant 0 : index
    %338 = vector.load %arg19[%c32_103, %c0_104] : memref<64x512xf32, #tpu.memory_space<vmem>>, vector<8x512xf32>
    %cst_105 = arith.constant dense<0.000000e+00> : vector<8x512xf32>
    %339 = tpu.matmul %336, %248, %cst_105 {dimension_numbers = #tpu.dot_dimension_numbers<[1], [0], [0], [1], [0, 0, 1, 1], [], []>} : vector<8x128xf32>, vector<128x512xf32>, vector<8x512xf32> -> vector<8x512xf32>
    %340 = arith.addf %338, %339 : vector<8x512xf32>
    %341 = vector.extract_strided_slice %340 {offsets = [0, 0], sizes = [8, 128], strides = [1, 1]} : vector<8x512xf32> to vector<8x128xf32>
    %342 = arith.negf %341 : vector<8x128xf32>
    %343 = math.exp %342 : vector<8x128xf32>
    %cst_106 = arith.constant 1.000000e+00 : f32
    %344 = vector.broadcast %cst_106 : f32 to vector<8x128xf32>
    %345 = arith.addf %344, %343 : vector<8x128xf32>
    %346 = arith.divf %344, %345 : vector<8x128xf32>
    %347 = vector.extract_strided_slice %340 {offsets = [0, 128], sizes = [8, 128], strides = [1, 1]} : vector<8x512xf32> to vector<8x128xf32>
    %348 = arith.negf %347 : vector<8x128xf32>
    %349 = math.exp %348 : vector<8x128xf32>
    %cst_107 = arith.constant 1.000000e+00 : f32
    %350 = vector.broadcast %cst_107 : f32 to vector<8x128xf32>
    %351 = arith.addf %350, %349 : vector<8x128xf32>
    %352 = arith.divf %350, %351 : vector<8x128xf32>
    %353 = vector.extract_strided_slice %340 {offsets = [0, 256], sizes = [8, 128], strides = [1, 1]} : vector<8x512xf32> to vector<8x128xf32>
    %354 = math.tanh %353 : vector<8x128xf32>
    %355 = vector.extract_strided_slice %340 {offsets = [0, 384], sizes = [8, 128], strides = [1, 1]} : vector<8x512xf32> to vector<8x128xf32>
    %356 = arith.negf %355 : vector<8x128xf32>
    %357 = math.exp %356 : vector<8x128xf32>
    %cst_108 = arith.constant 1.000000e+00 : f32
    %358 = vector.broadcast %cst_108 : f32 to vector<8x128xf32>
    %359 = arith.addf %358, %357 : vector<8x128xf32>
    %360 = arith.divf %358, %359 : vector<8x128xf32>
    %361 = arith.mulf %352, %334 : vector<8x128xf32>
    %362 = arith.mulf %346, %354 : vector<8x128xf32>
    %363 = arith.addf %361, %362 : vector<8x128xf32>
    %364 = math.tanh %363 : vector<8x128xf32>
    %365 = arith.mulf %360, %364 : vector<8x128xf32>
    %c32_109 = arith.constant 32 : index
    %c0_110 = arith.constant 0 : index
    %366 = vector.load %arg21[%c32_109, %c0_110] : memref<64x128xf32, #tpu.memory_space<vmem>>, vector<8x128xf32>
    tpu.vector_store %arg21[%c32_109, %c0_110], %365 {strides = array<i32>} : memref<64x128xf32, #tpu.memory_space<vmem>>, vector<8x128xf32>,
    %c24_111 = arith.constant 24 : index
    %c0_112 = arith.constant 0 : index
    %367 = vector.load %arg19[%c24_111, %c0_112] : memref<64x512xf32, #tpu.memory_space<vmem>>, vector<8x512xf32>
    %cst_113 = arith.constant dense<0.000000e+00> : vector<8x512xf32>
    %368 = tpu.matmul %365, %248, %cst_113 {dimension_numbers = #tpu.dot_dimension_numbers<[1], [0], [0], [1], [0, 0, 1, 1], [], []>} : vector<8x128xf32>, vector<128x512xf32>, vector<8x512xf32> -> vector<8x512xf32>
    %369 = arith.addf %367, %368 : vector<8x512xf32>
    %370 = vector.extract_strided_slice %369 {offsets = [0, 0], sizes = [8, 128], strides = [1, 1]} : vector<8x512xf32> to vector<8x128xf32>
    %371 = arith.negf %370 : vector<8x128xf32>
    %372 = math.exp %371 : vector<8x128xf32>
    %cst_114 = arith.constant 1.000000e+00 : f32
    %373 = vector.broadcast %cst_114 : f32 to vector<8x128xf32>
    %374 = arith.addf %373, %372 : vector<8x128xf32>
    %375 = arith.divf %373, %374 : vector<8x128xf32>
    %376 = vector.extract_strided_slice %369 {offsets = [0, 128], sizes = [8, 128], strides = [1, 1]} : vector<8x512xf32> to vector<8x128xf32>
    %377 = arith.negf %376 : vector<8x128xf32>
    %378 = math.exp %377 : vector<8x128xf32>
    %cst_115 = arith.constant 1.000000e+00 : f32
    %379 = vector.broadcast %cst_115 : f32 to vector<8x128xf32>
    %380 = arith.addf %379, %378 : vector<8x128xf32>
    %381 = arith.divf %379, %380 : vector<8x128xf32>
    %382 = vector.extract_strided_slice %369 {offsets = [0, 256], sizes = [8, 128], strides = [1, 1]} : vector<8x512xf32> to vector<8x128xf32>
    %383 = math.tanh %382 : vector<8x128xf32>
    %384 = vector.extract_strided_slice %369 {offsets = [0, 384], sizes = [8, 128], strides = [1, 1]} : vector<8x512xf32> to vector<8x128xf32>
    %385 = arith.negf %384 : vector<8x128xf32>
    %386 = math.exp %385 : vector<8x128xf32>
    %cst_116 = arith.constant 1.000000e+00 : f32
    %387 = vector.broadcast %cst_116 : f32 to vector<8x128xf32>
    %388 = arith.addf %387, %386 : vector<8x128xf32>
    %389 = arith.divf %387, %388 : vector<8x128xf32>
    %390 = arith.mulf %381, %363 : vector<8x128xf32>
    %391 = arith.mulf %375, %383 : vector<8x128xf32>
    %392 = arith.addf %390, %391 : vector<8x128xf32>
    %393 = math.tanh %392 : vector<8x128xf32>
    %394 = arith.mulf %389, %393 : vector<8x128xf32>
    %c24_117 = arith.constant 24 : index
    %c0_118 = arith.constant 0 : index
    %395 = vector.load %arg21[%c24_117, %c0_118] : memref<64x128xf32, #tpu.memory_space<vmem>>, vector<8x128xf32>
    tpu.vector_store %arg21[%c24_117, %c0_118], %394 {strides = array<i32>} : memref<64x128xf32, #tpu.memory_space<vmem>>, vector<8x128xf32>,
    %c16_119 = arith.constant 16 : index
    %c0_120 = arith.constant 0 : index
    %396 = vector.load %arg19[%c16_119, %c0_120] : memref<64x512xf32, #tpu.memory_space<vmem>>, vector<8x512xf32>
    %cst_121 = arith.constant dense<0.000000e+00> : vector<8x512xf32>
    %397 = tpu.matmul %394, %248, %cst_121 {dimension_numbers = #tpu.dot_dimension_numbers<[1], [0], [0], [1], [0, 0, 1, 1], [], []>} : vector<8x128xf32>, vector<128x512xf32>, vector<8x512xf32> -> vector<8x512xf32>
    %398 = arith.addf %396, %397 : vector<8x512xf32>
    %399 = vector.extract_strided_slice %398 {offsets = [0, 0], sizes = [8, 128], strides = [1, 1]} : vector<8x512xf32> to vector<8x128xf32>
    %400 = arith.negf %399 : vector<8x128xf32>
    %401 = math.exp %400 : vector<8x128xf32>
    %cst_122 = arith.constant 1.000000e+00 : f32
    %402 = vector.broadcast %cst_122 : f32 to vector<8x128xf32>
    %403 = arith.addf %402, %401 : vector<8x128xf32>
    %404 = arith.divf %402, %403 : vector<8x128xf32>
    %405 = vector.extract_strided_slice %398 {offsets = [0, 128], sizes = [8, 128], strides = [1, 1]} : vector<8x512xf32> to vector<8x128xf32>
    %406 = arith.negf %405 : vector<8x128xf32>
    %407 = math.exp %406 : vector<8x128xf32>
    %cst_123 = arith.constant 1.000000e+00 : f32
    %408 = vector.broadcast %cst_123 : f32 to vector<8x128xf32>
    %409 = arith.addf %408, %407 : vector<8x128xf32>
    %410 = arith.divf %408, %409 : vector<8x128xf32>
    %411 = vector.extract_strided_slice %398 {offsets = [0, 256], sizes = [8, 128], strides = [1, 1]} : vector<8x512xf32> to vector<8x128xf32>
    %412 = math.tanh %411 : vector<8x128xf32>
    %413 = vector.extract_strided_slice %398 {offsets = [0, 384], sizes = [8, 128], strides = [1, 1]} : vector<8x512xf32> to vector<8x128xf32>
    %414 = arith.negf %413 : vector<8x128xf32>
    %415 = math.exp %414 : vector<8x128xf32>
    %cst_124 = arith.constant 1.000000e+00 : f32
    %416 = vector.broadcast %cst_124 : f32 to vector<8x128xf32>
    %417 = arith.addf %416, %415 : vector<8x128xf32>
    %418 = arith.divf %416, %417 : vector<8x128xf32>
    %419 = arith.mulf %410, %392 : vector<8x128xf32>
    %420 = arith.mulf %404, %412 : vector<8x128xf32>
    %421 = arith.addf %419, %420 : vector<8x128xf32>
    %422 = math.tanh %421 : vector<8x128xf32>
    %423 = arith.mulf %418, %422 : vector<8x128xf32>
    %c16_125 = arith.constant 16 : index
    %c0_126 = arith.constant 0 : index
    %424 = vector.load %arg21[%c16_125, %c0_126] : memref<64x128xf32, #tpu.memory_space<vmem>>, vector<8x128xf32>
    tpu.vector_store %arg21[%c16_125, %c0_126], %423 {strides = array<i32>} : memref<64x128xf32, #tpu.memory_space<vmem>>, vector<8x128xf32>,
    %c8_127 = arith.constant 8 : index
    %c0_128 = arith.constant 0 : index
    %425 = vector.load %arg19[%c8_127, %c0_128] : memref<64x512xf32, #tpu.memory_space<vmem>>, vector<8x512xf32>
    %cst_129 = arith.constant dense<0.000000e+00> : vector<8x512xf32>
    %426 = tpu.matmul %423, %248, %cst_129 {dimension_numbers = #tpu.dot_dimension_numbers<[1], [0], [0], [1], [0, 0, 1, 1], [], []>} : vector<8x128xf32>, vector<128x512xf32>, vector<8x512xf32> -> vector<8x512xf32>
    %427 = arith.addf %425, %426 : vector<8x512xf32>
    %428 = vector.extract_strided_slice %427 {offsets = [0, 0], sizes = [8, 128], strides = [1, 1]} : vector<8x512xf32> to vector<8x128xf32>
    %429 = arith.negf %428 : vector<8x128xf32>
    %430 = math.exp %429 : vector<8x128xf32>
    %cst_130 = arith.constant 1.000000e+00 : f32
    %431 = vector.broadcast %cst_130 : f32 to vector<8x128xf32>
    %432 = arith.addf %431, %430 : vector<8x128xf32>
    %433 = arith.divf %431, %432 : vector<8x128xf32>
    %434 = vector.extract_strided_slice %427 {offsets = [0, 128], sizes = [8, 128], strides = [1, 1]} : vector<8x512xf32> to vector<8x128xf32>
    %435 = arith.negf %434 : vector<8x128xf32>
    %436 = math.exp %435 : vector<8x128xf32>
    %cst_131 = arith.constant 1.000000e+00 : f32
    %437 = vector.broadcast %cst_131 : f32 to vector<8x128xf32>
    %438 = arith.addf %437, %436 : vector<8x128xf32>
    %439 = arith.divf %437, %438 : vector<8x128xf32>
    %440 = vector.extract_strided_slice %427 {offsets = [0, 256], sizes = [8, 128], strides = [1, 1]} : vector<8x512xf32> to vector<8x128xf32>
    %441 = math.tanh %440 : vector<8x128xf32>
    %442 = vector.extract_strided_slice %427 {offsets = [0, 384], sizes = [8, 128], strides = [1, 1]} : vector<8x512xf32> to vector<8x128xf32>
    %443 = arith.negf %442 : vector<8x128xf32>
    %444 = math.exp %443 : vector<8x128xf32>
    %cst_132 = arith.constant 1.000000e+00 : f32
    %445 = vector.broadcast %cst_132 : f32 to vector<8x128xf32>
    %446 = arith.addf %445, %444 : vector<8x128xf32>
    %447 = arith.divf %445, %446 : vector<8x128xf32>
    %448 = arith.mulf %439, %421 : vector<8x128xf32>
    %449 = arith.mulf %433, %441 : vector<8x128xf32>
    %450 = arith.addf %448, %449 : vector<8x128xf32>
    %451 = math.tanh %450 : vector<8x128xf32>
    %452 = arith.mulf %447, %451 : vector<8x128xf32>
    %c8_133 = arith.constant 8 : index
    %c0_134 = arith.constant 0 : index
    %453 = vector.load %arg21[%c8_133, %c0_134] : memref<64x128xf32, #tpu.memory_space<vmem>>, vector<8x128xf32>
    tpu.vector_store %arg21[%c8_133, %c0_134], %452 {strides = array<i32>} : memref<64x128xf32, #tpu.memory_space<vmem>>, vector<8x128xf32>,
    %c0_135 = arith.constant 0 : index
    %c0_136 = arith.constant 0 : index
    %454 = vector.load %arg19[%c0_135, %c0_136] : memref<64x512xf32, #tpu.memory_space<vmem>>, vector<8x512xf32>
    %cst_137 = arith.constant dense<0.000000e+00> : vector<8x512xf32>
    %455 = tpu.matmul %452, %248, %cst_137 {dimension_numbers = #tpu.dot_dimension_numbers<[1], [0], [0], [1], [0, 0, 1, 1], [], []>} : vector<8x128xf32>, vector<128x512xf32>, vector<8x512xf32> -> vector<8x512xf32>
    %456 = arith.addf %454, %455 : vector<8x512xf32>
    %457 = vector.extract_strided_slice %456 {offsets = [0, 0], sizes = [8, 128], strides = [1, 1]} : vector<8x512xf32> to vector<8x128xf32>
    %458 = arith.negf %457 : vector<8x128xf32>
    %459 = math.exp %458 : vector<8x128xf32>
    %cst_138 = arith.constant 1.000000e+00 : f32
    %460 = vector.broadcast %cst_138 : f32 to vector<8x128xf32>
    %461 = arith.addf %460, %459 : vector<8x128xf32>
    %462 = arith.divf %460, %461 : vector<8x128xf32>
    %463 = vector.extract_strided_slice %456 {offsets = [0, 128], sizes = [8, 128], strides = [1, 1]} : vector<8x512xf32> to vector<8x128xf32>
    %464 = arith.negf %463 : vector<8x128xf32>
    %465 = math.exp %464 : vector<8x128xf32>
    %cst_139 = arith.constant 1.000000e+00 : f32
    %466 = vector.broadcast %cst_139 : f32 to vector<8x128xf32>
    %467 = arith.addf %466, %465 : vector<8x128xf32>
    %468 = arith.divf %466, %467 : vector<8x128xf32>
    %469 = vector.extract_strided_slice %456 {offsets = [0, 256], sizes = [8, 128], strides = [1, 1]} : vector<8x512xf32> to vector<8x128xf32>
    %470 = math.tanh %469 : vector<8x128xf32>
    %471 = vector.extract_strided_slice %456 {offsets = [0, 384], sizes = [8, 128], strides = [1, 1]} : vector<8x512xf32> to vector<8x128xf32>
    %472 = arith.negf %471 : vector<8x128xf32>
    %473 = math.exp %472 : vector<8x128xf32>
    %cst_140 = arith.constant 1.000000e+00 : f32
    %474 = vector.broadcast %cst_140 : f32 to vector<8x128xf32>
    %475 = arith.addf %474, %473 : vector<8x128xf32>
    %476 = arith.divf %474, %475 : vector<8x128xf32>
    %477 = arith.mulf %468, %450 : vector<8x128xf32>
    %478 = arith.mulf %462, %470 : vector<8x128xf32>
    %479 = arith.addf %477, %478 : vector<8x128xf32>
    %480 = math.tanh %479 : vector<8x128xf32>
    %481 = arith.mulf %476, %480 : vector<8x128xf32>
    %c0_141 = arith.constant 0 : index
    %c0_142 = arith.constant 0 : index
    %482 = vector.load %arg21[%c0_141, %c0_142] : memref<64x128xf32, #tpu.memory_space<vmem>>, vector<8x128xf32>
    tpu.vector_store %arg21[%c0_141, %c0_142], %481 {strides = array<i32>} : memref<64x128xf32, #tpu.memory_space<vmem>>, vector<8x128xf32>,
    %c0_143 = arith.constant 0 : index
    %c0_144 = arith.constant 0 : index
    %483 = vector.load %arg20[%c0_143, %c0_144] : memref<64x128xf32, #tpu.memory_space<vmem>>, vector<64x128xf32>
    %c0_145 = arith.constant 0 : index
    %c0_146 = arith.constant 0 : index
    %484 = vector.load %arg21[%c0_145, %c0_146] : memref<64x128xf32, #tpu.memory_space<vmem>>, vector<64x128xf32>
    %c0_147 = arith.constant 0 : index
    %c0_148 = arith.constant 0 : index
    %485 = vector.load %arg7[%c0_147, %c0_148] : memref<128x512xf32, #tpu.memory_space<vmem>>, vector<128x512xf32>
    %cst_149 = arith.constant dense<0.000000e+00> : vector<64x512xf32>
    %486 = tpu.matmul %483, %485, %cst_149 {dimension_numbers = #tpu.dot_dimension_numbers<[1], [0], [0], [1], [0, 0, 1, 1], [], []>} : vector<64x128xf32>, vector<128x512xf32>, vector<64x512xf32> -> vector<64x512xf32>
    %c0_150 = arith.constant 0 : index
    %c0_151 = arith.constant 0 : index
    %487 = vector.load %arg8[%c0_150, %c0_151] : memref<128x512xf32, #tpu.memory_space<vmem>>, vector<128x512xf32>
    %cst_152 = arith.constant dense<0.000000e+00> : vector<64x512xf32>
    %488 = tpu.matmul %484, %487, %cst_152 {dimension_numbers = #tpu.dot_dimension_numbers<[1], [0], [0], [1], [0, 0, 1, 1], [], []>} : vector<64x128xf32>, vector<128x512xf32>, vector<64x512xf32> -> vector<64x512xf32>
    %489 = arith.addf %486, %488 : vector<64x512xf32>
    %c0_153 = arith.constant 0 : index
    %c0_154 = arith.constant 0 : index
    %490 = vector.load %arg10[%c0_153, %c0_154] : memref<1x512xf32, #tpu.memory_space<vmem>>, vector<1x512xf32>
    %491 = vector.broadcast %490 : vector<1x512xf32> to vector<64x512xf32>
    %492 = arith.addf %489, %491 : vector<64x512xf32>
    %c0_155 = arith.constant 0 : index
    %c0_156 = arith.constant 0 : index
    %493 = vector.load %arg19[%c0_155, %c0_156] : memref<64x512xf32, #tpu.memory_space<vmem>>, vector<64x512xf32>
    tpu.vector_store %arg19[%c0_155, %c0_156], %492 {strides = array<i32>} : memref<64x512xf32, #tpu.memory_space<vmem>>, vector<64x512xf32>,
    %c0_157 = arith.constant 0 : index
    %c0_158 = arith.constant 0 : index
    %494 = vector.load %arg9[%c0_157, %c0_158] : memref<128x512xf32, #tpu.memory_space<vmem>>, vector<128x512xf32>
    %cst_159 = arith.constant 0.000000e+00 : f32
    %495 = vector.broadcast %cst_159 : f32 to vector<8x128xf32>
    %cst_160 = arith.constant 0.000000e+00 : f32
    %496 = vector.broadcast %cst_160 : f32 to vector<8x128xf32>
    %c0_161 = arith.constant 0 : index
    %c0_162 = arith.constant 0 : index
    %497 = vector.load %arg19[%c0_161, %c0_162] : memref<64x512xf32, #tpu.memory_space<vmem>>, vector<8x512xf32>
    %cst_163 = arith.constant dense<0.000000e+00> : vector<8x512xf32>
    %498 = tpu.matmul %495, %494, %cst_163 {dimension_numbers = #tpu.dot_dimension_numbers<[1], [0], [0], [1], [0, 0, 1, 1], [], []>} : vector<8x128xf32>, vector<128x512xf32>, vector<8x512xf32> -> vector<8x512xf32>
    %499 = arith.addf %497, %498 : vector<8x512xf32>
    %500 = vector.extract_strided_slice %499 {offsets = [0, 0], sizes = [8, 128], strides = [1, 1]} : vector<8x512xf32> to vector<8x128xf32>
    %501 = arith.negf %500 : vector<8x128xf32>
    %502 = math.exp %501 : vector<8x128xf32>
    %cst_164 = arith.constant 1.000000e+00 : f32
    %503 = vector.broadcast %cst_164 : f32 to vector<8x128xf32>
    %504 = arith.addf %503, %502 : vector<8x128xf32>
    %505 = arith.divf %503, %504 : vector<8x128xf32>
    %506 = vector.extract_strided_slice %499 {offsets = [0, 128], sizes = [8, 128], strides = [1, 1]} : vector<8x512xf32> to vector<8x128xf32>
    %507 = arith.negf %506 : vector<8x128xf32>
    %508 = math.exp %507 : vector<8x128xf32>
    %cst_165 = arith.constant 1.000000e+00 : f32
    %509 = vector.broadcast %cst_165 : f32 to vector<8x128xf32>
    %510 = arith.addf %509, %508 : vector<8x128xf32>
    %511 = arith.divf %509, %510 : vector<8x128xf32>
    %512 = vector.extract_strided_slice %499 {offsets = [0, 256], sizes = [8, 128], strides = [1, 1]} : vector<8x512xf32> to vector<8x128xf32>
    %513 = math.tanh %512 : vector<8x128xf32>
    %514 = vector.extract_strided_slice %499 {offsets = [0, 384], sizes = [8, 128], strides = [1, 1]} : vector<8x512xf32> to vector<8x128xf32>
    %515 = arith.negf %514 : vector<8x128xf32>
    %516 = math.exp %515 : vector<8x128xf32>
    %cst_166 = arith.constant 1.000000e+00 : f32
    %517 = vector.broadcast %cst_166 : f32 to vector<8x128xf32>
    %518 = arith.addf %517, %516 : vector<8x128xf32>
    %519 = arith.divf %517, %518 : vector<8x128xf32>
    %520 = arith.mulf %511, %496 : vector<8x128xf32>
    %521 = arith.mulf %505, %513 : vector<8x128xf32>
    %522 = arith.addf %520, %521 : vector<8x128xf32>
    %523 = math.tanh %522 : vector<8x128xf32>
    %524 = arith.mulf %519, %523 : vector<8x128xf32>
    %c8_167 = arith.constant 8 : index
    %c0_168 = arith.constant 0 : index
    %525 = vector.load %arg19[%c8_167, %c0_168] : memref<64x512xf32, #tpu.memory_space<vmem>>, vector<8x512xf32>
    %cst_169 = arith.constant dense<0.000000e+00> : vector<8x512xf32>
    %526 = tpu.matmul %524, %494, %cst_169 {dimension_numbers = #tpu.dot_dimension_numbers<[1], [0], [0], [1], [0, 0, 1, 1], [], []>} : vector<8x128xf32>, vector<128x512xf32>, vector<8x512xf32> -> vector<8x512xf32>
    %527 = arith.addf %525, %526 : vector<8x512xf32>
    %528 = vector.extract_strided_slice %527 {offsets = [0, 0], sizes = [8, 128], strides = [1, 1]} : vector<8x512xf32> to vector<8x128xf32>
    %529 = arith.negf %528 : vector<8x128xf32>
    %530 = math.exp %529 : vector<8x128xf32>
    %cst_170 = arith.constant 1.000000e+00 : f32
    %531 = vector.broadcast %cst_170 : f32 to vector<8x128xf32>
    %532 = arith.addf %531, %530 : vector<8x128xf32>
    %533 = arith.divf %531, %532 : vector<8x128xf32>
    %534 = vector.extract_strided_slice %527 {offsets = [0, 128], sizes = [8, 128], strides = [1, 1]} : vector<8x512xf32> to vector<8x128xf32>
    %535 = arith.negf %534 : vector<8x128xf32>
    %536 = math.exp %535 : vector<8x128xf32>
    %cst_171 = arith.constant 1.000000e+00 : f32
    %537 = vector.broadcast %cst_171 : f32 to vector<8x128xf32>
    %538 = arith.addf %537, %536 : vector<8x128xf32>
    %539 = arith.divf %537, %538 : vector<8x128xf32>
    %540 = vector.extract_strided_slice %527 {offsets = [0, 256], sizes = [8, 128], strides = [1, 1]} : vector<8x512xf32> to vector<8x128xf32>
    %541 = math.tanh %540 : vector<8x128xf32>
    %542 = vector.extract_strided_slice %527 {offsets = [0, 384], sizes = [8, 128], strides = [1, 1]} : vector<8x512xf32> to vector<8x128xf32>
    %543 = arith.negf %542 : vector<8x128xf32>
    %544 = math.exp %543 : vector<8x128xf32>
    %cst_172 = arith.constant 1.000000e+00 : f32
    %545 = vector.broadcast %cst_172 : f32 to vector<8x128xf32>
    %546 = arith.addf %545, %544 : vector<8x128xf32>
    %547 = arith.divf %545, %546 : vector<8x128xf32>
    %548 = arith.mulf %539, %522 : vector<8x128xf32>
    %549 = arith.mulf %533, %541 : vector<8x128xf32>
    %550 = arith.addf %548, %549 : vector<8x128xf32>
    %551 = math.tanh %550 : vector<8x128xf32>
    %552 = arith.mulf %547, %551 : vector<8x128xf32>
    %c16_173 = arith.constant 16 : index
    %c0_174 = arith.constant 0 : index
    %553 = vector.load %arg19[%c16_173, %c0_174] : memref<64x512xf32, #tpu.memory_space<vmem>>, vector<8x512xf32>
    %cst_175 = arith.constant dense<0.000000e+00> : vector<8x512xf32>
    %554 = tpu.matmul %552, %494, %cst_175 {dimension_numbers = #tpu.dot_dimension_numbers<[1], [0], [0], [1], [0, 0, 1, 1], [], []>} : vector<8x128xf32>, vector<128x512xf32>, vector<8x512xf32> -> vector<8x512xf32>
    %555 = arith.addf %553, %554 : vector<8x512xf32>
    %556 = vector.extract_strided_slice %555 {offsets = [0, 0], sizes = [8, 128], strides = [1, 1]} : vector<8x512xf32> to vector<8x128xf32>
    %557 = arith.negf %556 : vector<8x128xf32>
    %558 = math.exp %557 : vector<8x128xf32>
    %cst_176 = arith.constant 1.000000e+00 : f32
    %559 = vector.broadcast %cst_176 : f32 to vector<8x128xf32>
    %560 = arith.addf %559, %558 : vector<8x128xf32>
    %561 = arith.divf %559, %560 : vector<8x128xf32>
    %562 = vector.extract_strided_slice %555 {offsets = [0, 128], sizes = [8, 128], strides = [1, 1]} : vector<8x512xf32> to vector<8x128xf32>
    %563 = arith.negf %562 : vector<8x128xf32>
    %564 = math.exp %563 : vector<8x128xf32>
    %cst_177 = arith.constant 1.000000e+00 : f32
    %565 = vector.broadcast %cst_177 : f32 to vector<8x128xf32>
    %566 = arith.addf %565, %564 : vector<8x128xf32>
    %567 = arith.divf %565, %566 : vector<8x128xf32>
    %568 = vector.extract_strided_slice %555 {offsets = [0, 256], sizes = [8, 128], strides = [1, 1]} : vector<8x512xf32> to vector<8x128xf32>
    %569 = math.tanh %568 : vector<8x128xf32>
    %570 = vector.extract_strided_slice %555 {offsets = [0, 384], sizes = [8, 128], strides = [1, 1]} : vector<8x512xf32> to vector<8x128xf32>
    %571 = arith.negf %570 : vector<8x128xf32>
    %572 = math.exp %571 : vector<8x128xf32>
    %cst_178 = arith.constant 1.000000e+00 : f32
    %573 = vector.broadcast %cst_178 : f32 to vector<8x128xf32>
    %574 = arith.addf %573, %572 : vector<8x128xf32>
    %575 = arith.divf %573, %574 : vector<8x128xf32>
    %576 = arith.mulf %567, %550 : vector<8x128xf32>
    %577 = arith.mulf %561, %569 : vector<8x128xf32>
    %578 = arith.addf %576, %577 : vector<8x128xf32>
    %579 = math.tanh %578 : vector<8x128xf32>
    %580 = arith.mulf %575, %579 : vector<8x128xf32>
    %c24_179 = arith.constant 24 : index
    %c0_180 = arith.constant 0 : index
    %581 = vector.load %arg19[%c24_179, %c0_180] : memref<64x512xf32, #tpu.memory_space<vmem>>, vector<8x512xf32>
    %cst_181 = arith.constant dense<0.000000e+00> : vector<8x512xf32>
    %582 = tpu.matmul %580, %494, %cst_181 {dimension_numbers = #tpu.dot_dimension_numbers<[1], [0], [0], [1], [0, 0, 1, 1], [], []>} : vector<8x128xf32>, vector<128x512xf32>, vector<8x512xf32> -> vector<8x512xf32>
    %583 = arith.addf %581, %582 : vector<8x512xf32>
    %584 = vector.extract_strided_slice %583 {offsets = [0, 0], sizes = [8, 128], strides = [1, 1]} : vector<8x512xf32> to vector<8x128xf32>
    %585 = arith.negf %584 : vector<8x128xf32>
    %586 = math.exp %585 : vector<8x128xf32>
    %cst_182 = arith.constant 1.000000e+00 : f32
    %587 = vector.broadcast %cst_182 : f32 to vector<8x128xf32>
    %588 = arith.addf %587, %586 : vector<8x128xf32>
    %589 = arith.divf %587, %588 : vector<8x128xf32>
    %590 = vector.extract_strided_slice %583 {offsets = [0, 128], sizes = [8, 128], strides = [1, 1]} : vector<8x512xf32> to vector<8x128xf32>
    %591 = arith.negf %590 : vector<8x128xf32>
    %592 = math.exp %591 : vector<8x128xf32>
    %cst_183 = arith.constant 1.000000e+00 : f32
    %593 = vector.broadcast %cst_183 : f32 to vector<8x128xf32>
    %594 = arith.addf %593, %592 : vector<8x128xf32>
    %595 = arith.divf %593, %594 : vector<8x128xf32>
    %596 = vector.extract_strided_slice %583 {offsets = [0, 256], sizes = [8, 128], strides = [1, 1]} : vector<8x512xf32> to vector<8x128xf32>
    %597 = math.tanh %596 : vector<8x128xf32>
    %598 = vector.extract_strided_slice %583 {offsets = [0, 384], sizes = [8, 128], strides = [1, 1]} : vector<8x512xf32> to vector<8x128xf32>
    %599 = arith.negf %598 : vector<8x128xf32>
    %600 = math.exp %599 : vector<8x128xf32>
    %cst_184 = arith.constant 1.000000e+00 : f32
    %601 = vector.broadcast %cst_184 : f32 to vector<8x128xf32>
    %602 = arith.addf %601, %600 : vector<8x128xf32>
    %603 = arith.divf %601, %602 : vector<8x128xf32>
    %604 = arith.mulf %595, %578 : vector<8x128xf32>
    %605 = arith.mulf %589, %597 : vector<8x128xf32>
    %606 = arith.addf %604, %605 : vector<8x128xf32>
    %607 = math.tanh %606 : vector<8x128xf32>
    %608 = arith.mulf %603, %607 : vector<8x128xf32>
    %c32_185 = arith.constant 32 : index
    %c0_186 = arith.constant 0 : index
    %609 = vector.load %arg19[%c32_185, %c0_186] : memref<64x512xf32, #tpu.memory_space<vmem>>, vector<8x512xf32>
    %cst_187 = arith.constant dense<0.000000e+00> : vector<8x512xf32>
    %610 = tpu.matmul %608, %494, %cst_187 {dimension_numbers = #tpu.dot_dimension_numbers<[1], [0], [0], [1], [0, 0, 1, 1], [], []>} : vector<8x128xf32>, vector<128x512xf32>, vector<8x512xf32> -> vector<8x512xf32>
    %611 = arith.addf %609, %610 : vector<8x512xf32>
    %612 = vector.extract_strided_slice %611 {offsets = [0, 0], sizes = [8, 128], strides = [1, 1]} : vector<8x512xf32> to vector<8x128xf32>
    %613 = arith.negf %612 : vector<8x128xf32>
    %614 = math.exp %613 : vector<8x128xf32>
    %cst_188 = arith.constant 1.000000e+00 : f32
    %615 = vector.broadcast %cst_188 : f32 to vector<8x128xf32>
    %616 = arith.addf %615, %614 : vector<8x128xf32>
    %617 = arith.divf %615, %616 : vector<8x128xf32>
    %618 = vector.extract_strided_slice %611 {offsets = [0, 128], sizes = [8, 128], strides = [1, 1]} : vector<8x512xf32> to vector<8x128xf32>
    %619 = arith.negf %618 : vector<8x128xf32>
    %620 = math.exp %619 : vector<8x128xf32>
    %cst_189 = arith.constant 1.000000e+00 : f32
    %621 = vector.broadcast %cst_189 : f32 to vector<8x128xf32>
    %622 = arith.addf %621, %620 : vector<8x128xf32>
    %623 = arith.divf %621, %622 : vector<8x128xf32>
    %624 = vector.extract_strided_slice %611 {offsets = [0, 256], sizes = [8, 128], strides = [1, 1]} : vector<8x512xf32> to vector<8x128xf32>
    %625 = math.tanh %624 : vector<8x128xf32>
    %626 = vector.extract_strided_slice %611 {offsets = [0, 384], sizes = [8, 128], strides = [1, 1]} : vector<8x512xf32> to vector<8x128xf32>
    %627 = arith.negf %626 : vector<8x128xf32>
    %628 = math.exp %627 : vector<8x128xf32>
    %cst_190 = arith.constant 1.000000e+00 : f32
    %629 = vector.broadcast %cst_190 : f32 to vector<8x128xf32>
    %630 = arith.addf %629, %628 : vector<8x128xf32>
    %631 = arith.divf %629, %630 : vector<8x128xf32>
    %632 = arith.mulf %623, %606 : vector<8x128xf32>
    %633 = arith.mulf %617, %625 : vector<8x128xf32>
    %634 = arith.addf %632, %633 : vector<8x128xf32>
    %635 = math.tanh %634 : vector<8x128xf32>
    %636 = arith.mulf %631, %635 : vector<8x128xf32>
    %c40_191 = arith.constant 40 : index
    %c0_192 = arith.constant 0 : index
    %637 = vector.load %arg19[%c40_191, %c0_192] : memref<64x512xf32, #tpu.memory_space<vmem>>, vector<8x512xf32>
    %cst_193 = arith.constant dense<0.000000e+00> : vector<8x512xf32>
    %638 = tpu.matmul %636, %494, %cst_193 {dimension_numbers = #tpu.dot_dimension_numbers<[1], [0], [0], [1], [0, 0, 1, 1], [], []>} : vector<8x128xf32>, vector<128x512xf32>, vector<8x512xf32> -> vector<8x512xf32>
    %639 = arith.addf %637, %638 : vector<8x512xf32>
    %640 = vector.extract_strided_slice %639 {offsets = [0, 0], sizes = [8, 128], strides = [1, 1]} : vector<8x512xf32> to vector<8x128xf32>
    %641 = arith.negf %640 : vector<8x128xf32>
    %642 = math.exp %641 : vector<8x128xf32>
    %cst_194 = arith.constant 1.000000e+00 : f32
    %643 = vector.broadcast %cst_194 : f32 to vector<8x128xf32>
    %644 = arith.addf %643, %642 : vector<8x128xf32>
    %645 = arith.divf %643, %644 : vector<8x128xf32>
    %646 = vector.extract_strided_slice %639 {offsets = [0, 128], sizes = [8, 128], strides = [1, 1]} : vector<8x512xf32> to vector<8x128xf32>
    %647 = arith.negf %646 : vector<8x128xf32>
    %648 = math.exp %647 : vector<8x128xf32>
    %cst_195 = arith.constant 1.000000e+00 : f32
    %649 = vector.broadcast %cst_195 : f32 to vector<8x128xf32>
    %650 = arith.addf %649, %648 : vector<8x128xf32>
    %651 = arith.divf %649, %650 : vector<8x128xf32>
    %652 = vector.extract_strided_slice %639 {offsets = [0, 256], sizes = [8, 128], strides = [1, 1]} : vector<8x512xf32> to vector<8x128xf32>
    %653 = math.tanh %652 : vector<8x128xf32>
    %654 = vector.extract_strided_slice %639 {offsets = [0, 384], sizes = [8, 128], strides = [1, 1]} : vector<8x512xf32> to vector<8x128xf32>
    %655 = arith.negf %654 : vector<8x128xf32>
    %656 = math.exp %655 : vector<8x128xf32>
    %cst_196 = arith.constant 1.000000e+00 : f32
    %657 = vector.broadcast %cst_196 : f32 to vector<8x128xf32>
    %658 = arith.addf %657, %656 : vector<8x128xf32>
    %659 = arith.divf %657, %658 : vector<8x128xf32>
    %660 = arith.mulf %651, %634 : vector<8x128xf32>
    %661 = arith.mulf %645, %653 : vector<8x128xf32>
    %662 = arith.addf %660, %661 : vector<8x128xf32>
    %663 = math.tanh %662 : vector<8x128xf32>
    %664 = arith.mulf %659, %663 : vector<8x128xf32>
    %c48_197 = arith.constant 48 : index
    %c0_198 = arith.constant 0 : index
    %665 = vector.load %arg19[%c48_197, %c0_198] : memref<64x512xf32, #tpu.memory_space<vmem>>, vector<8x512xf32>
    %cst_199 = arith.constant dense<0.000000e+00> : vector<8x512xf32>
    %666 = tpu.matmul %664, %494, %cst_199 {dimension_numbers = #tpu.dot_dimension_numbers<[1], [0], [0], [1], [0, 0, 1, 1], [], []>} : vector<8x128xf32>, vector<128x512xf32>, vector<8x512xf32> -> vector<8x512xf32>
    %667 = arith.addf %665, %666 : vector<8x512xf32>
    %668 = vector.extract_strided_slice %667 {offsets = [0, 0], sizes = [8, 128], strides = [1, 1]} : vector<8x512xf32> to vector<8x128xf32>
    %669 = arith.negf %668 : vector<8x128xf32>
    %670 = math.exp %669 : vector<8x128xf32>
    %cst_200 = arith.constant 1.000000e+00 : f32
    %671 = vector.broadcast %cst_200 : f32 to vector<8x128xf32>
    %672 = arith.addf %671, %670 : vector<8x128xf32>
    %673 = arith.divf %671, %672 : vector<8x128xf32>
    %674 = vector.extract_strided_slice %667 {offsets = [0, 128], sizes = [8, 128], strides = [1, 1]} : vector<8x512xf32> to vector<8x128xf32>
    %675 = arith.negf %674 : vector<8x128xf32>
    %676 = math.exp %675 : vector<8x128xf32>
    %cst_201 = arith.constant 1.000000e+00 : f32
    %677 = vector.broadcast %cst_201 : f32 to vector<8x128xf32>
    %678 = arith.addf %677, %676 : vector<8x128xf32>
    %679 = arith.divf %677, %678 : vector<8x128xf32>
    %680 = vector.extract_strided_slice %667 {offsets = [0, 256], sizes = [8, 128], strides = [1, 1]} : vector<8x512xf32> to vector<8x128xf32>
    %681 = math.tanh %680 : vector<8x128xf32>
    %682 = vector.extract_strided_slice %667 {offsets = [0, 384], sizes = [8, 128], strides = [1, 1]} : vector<8x512xf32> to vector<8x128xf32>
    %683 = arith.negf %682 : vector<8x128xf32>
    %684 = math.exp %683 : vector<8x128xf32>
    %cst_202 = arith.constant 1.000000e+00 : f32
    %685 = vector.broadcast %cst_202 : f32 to vector<8x128xf32>
    %686 = arith.addf %685, %684 : vector<8x128xf32>
    %687 = arith.divf %685, %686 : vector<8x128xf32>
    %688 = arith.mulf %679, %662 : vector<8x128xf32>
    %689 = arith.mulf %673, %681 : vector<8x128xf32>
    %690 = arith.addf %688, %689 : vector<8x128xf32>
    %691 = math.tanh %690 : vector<8x128xf32>
    %692 = arith.mulf %687, %691 : vector<8x128xf32>
    %c56_203 = arith.constant 56 : index
    %c0_204 = arith.constant 0 : index
    %693 = vector.load %arg19[%c56_203, %c0_204] : memref<64x512xf32, #tpu.memory_space<vmem>>, vector<8x512xf32>
    %cst_205 = arith.constant dense<0.000000e+00> : vector<8x512xf32>
    %694 = tpu.matmul %692, %494, %cst_205 {dimension_numbers = #tpu.dot_dimension_numbers<[1], [0], [0], [1], [0, 0, 1, 1], [], []>} : vector<8x128xf32>, vector<128x512xf32>, vector<8x512xf32> -> vector<8x512xf32>
    %695 = arith.addf %693, %694 : vector<8x512xf32>
    %696 = vector.extract_strided_slice %695 {offsets = [0, 0], sizes = [8, 128], strides = [1, 1]} : vector<8x512xf32> to vector<8x128xf32>
    %697 = arith.negf %696 : vector<8x128xf32>
    %698 = math.exp %697 : vector<8x128xf32>
    %cst_206 = arith.constant 1.000000e+00 : f32
    %699 = vector.broadcast %cst_206 : f32 to vector<8x128xf32>
    %700 = arith.addf %699, %698 : vector<8x128xf32>
    %701 = arith.divf %699, %700 : vector<8x128xf32>
    %702 = vector.extract_strided_slice %695 {offsets = [0, 128], sizes = [8, 128], strides = [1, 1]} : vector<8x512xf32> to vector<8x128xf32>
    %703 = arith.negf %702 : vector<8x128xf32>
    %704 = math.exp %703 : vector<8x128xf32>
    %cst_207 = arith.constant 1.000000e+00 : f32
    %705 = vector.broadcast %cst_207 : f32 to vector<8x128xf32>
    %706 = arith.addf %705, %704 : vector<8x128xf32>
    %707 = arith.divf %705, %706 : vector<8x128xf32>
    %708 = vector.extract_strided_slice %695 {offsets = [0, 256], sizes = [8, 128], strides = [1, 1]} : vector<8x512xf32> to vector<8x128xf32>
    %709 = math.tanh %708 : vector<8x128xf32>
    %710 = vector.extract_strided_slice %695 {offsets = [0, 384], sizes = [8, 128], strides = [1, 1]} : vector<8x512xf32> to vector<8x128xf32>
    %711 = arith.negf %710 : vector<8x128xf32>
    %712 = math.exp %711 : vector<8x128xf32>
    %cst_208 = arith.constant 1.000000e+00 : f32
    %713 = vector.broadcast %cst_208 : f32 to vector<8x128xf32>
    %714 = arith.addf %713, %712 : vector<8x128xf32>
    %715 = arith.divf %713, %714 : vector<8x128xf32>
    %716 = arith.mulf %707, %690 : vector<8x128xf32>
    %717 = arith.mulf %701, %709 : vector<8x128xf32>
    %718 = arith.addf %716, %717 : vector<8x128xf32>
    %719 = math.tanh %718 : vector<8x128xf32>
    %720 = arith.mulf %715, %719 : vector<8x128xf32>
    %c0_209 = arith.constant 0 : index
    %c0_210 = arith.constant 0 : index
    %721 = vector.load %arg11[%c0_209, %c0_210] : memref<128x512xf32, #tpu.memory_space<vmem>>, vector<128x512xf32>
    %cst_211 = arith.constant dense<0.000000e+00> : vector<64x512xf32>
    %722 = tpu.matmul %483, %721, %cst_211 {dimension_numbers = #tpu.dot_dimension_numbers<[1], [0], [0], [1], [0, 0, 1, 1], [], []>} : vector<64x128xf32>, vector<128x512xf32>, vector<64x512xf32> -> vector<64x512xf32>
    %c0_212 = arith.constant 0 : index
    %c0_213 = arith.constant 0 : index
    %723 = vector.load %arg12[%c0_212, %c0_213] : memref<128x512xf32, #tpu.memory_space<vmem>>, vector<128x512xf32>
    %cst_214 = arith.constant dense<0.000000e+00> : vector<64x512xf32>
    %724 = tpu.matmul %484, %723, %cst_214 {dimension_numbers = #tpu.dot_dimension_numbers<[1], [0], [0], [1], [0, 0, 1, 1], [], []>} : vector<64x128xf32>, vector<128x512xf32>, vector<64x512xf32> -> vector<64x512xf32>
    %725 = arith.addf %722, %724 : vector<64x512xf32>
    %c0_215 = arith.constant 0 : index
    %c0_216 = arith.constant 0 : index
    %726 = vector.load %arg14[%c0_215, %c0_216] : memref<1x512xf32, #tpu.memory_space<vmem>>, vector<1x512xf32>
    %727 = vector.broadcast %726 : vector<1x512xf32> to vector<64x512xf32>
    %728 = arith.addf %725, %727 : vector<64x512xf32>
    %c0_217 = arith.constant 0 : index
    %c0_218 = arith.constant 0 : index
    %729 = vector.load %arg19[%c0_217, %c0_218] : memref<64x512xf32, #tpu.memory_space<vmem>>, vector<64x512xf32>
    tpu.vector_store %arg19[%c0_217, %c0_218], %728 {strides = array<i32>} : memref<64x512xf32, #tpu.memory_space<vmem>>, vector<64x512xf32>,
    %c0_219 = arith.constant 0 : index
    %c0_220 = arith.constant 0 : index
    %730 = vector.load %arg13[%c0_219, %c0_220] : memref<128x512xf32, #tpu.memory_space<vmem>>, vector<128x512xf32>
    %cst_221 = arith.constant 0.000000e+00 : f32
    %731 = vector.broadcast %cst_221 : f32 to vector<8x128xf32>
    %cst_222 = arith.constant 0.000000e+00 : f32
    %732 = vector.broadcast %cst_222 : f32 to vector<8x128xf32>
    %c56_223 = arith.constant 56 : index
    %c0_224 = arith.constant 0 : index
    %733 = vector.load %arg19[%c56_223, %c0_224] : memref<64x512xf32, #tpu.memory_space<vmem>>, vector<8x512xf32>
    %cst_225 = arith.constant dense<0.000000e+00> : vector<8x512xf32>
    %734 = tpu.matmul %731, %730, %cst_225 {dimension_numbers = #tpu.dot_dimension_numbers<[1], [0], [0], [1], [0, 0, 1, 1], [], []>} : vector<8x128xf32>, vector<128x512xf32>, vector<8x512xf32> -> vector<8x512xf32>
    %735 = arith.addf %733, %734 : vector<8x512xf32>
    %736 = vector.extract_strided_slice %735 {offsets = [0, 0], sizes = [8, 128], strides = [1, 1]} : vector<8x512xf32> to vector<8x128xf32>
    %737 = arith.negf %736 : vector<8x128xf32>
    %738 = math.exp %737 : vector<8x128xf32>
    %cst_226 = arith.constant 1.000000e+00 : f32
    %739 = vector.broadcast %cst_226 : f32 to vector<8x128xf32>
    %740 = arith.addf %739, %738 : vector<8x128xf32>
    %741 = arith.divf %739, %740 : vector<8x128xf32>
    %742 = vector.extract_strided_slice %735 {offsets = [0, 128], sizes = [8, 128], strides = [1, 1]} : vector<8x512xf32> to vector<8x128xf32>
    %743 = arith.negf %742 : vector<8x128xf32>
    %744 = math.exp %743 : vector<8x128xf32>
    %cst_227 = arith.constant 1.000000e+00 : f32
    %745 = vector.broadcast %cst_227 : f32 to vector<8x128xf32>
    %746 = arith.addf %745, %744 : vector<8x128xf32>
    %747 = arith.divf %745, %746 : vector<8x128xf32>
    %748 = vector.extract_strided_slice %735 {offsets = [0, 256], sizes = [8, 128], strides = [1, 1]} : vector<8x512xf32> to vector<8x128xf32>
    %749 = math.tanh %748 : vector<8x128xf32>
    %750 = vector.extract_strided_slice %735 {offsets = [0, 384], sizes = [8, 128], strides = [1, 1]} : vector<8x512xf32> to vector<8x128xf32>
    %751 = arith.negf %750 : vector<8x128xf32>
    %752 = math.exp %751 : vector<8x128xf32>
    %cst_228 = arith.constant 1.000000e+00 : f32
    %753 = vector.broadcast %cst_228 : f32 to vector<8x128xf32>
    %754 = arith.addf %753, %752 : vector<8x128xf32>
    %755 = arith.divf %753, %754 : vector<8x128xf32>
    %756 = arith.mulf %747, %732 : vector<8x128xf32>
    %757 = arith.mulf %741, %749 : vector<8x128xf32>
    %758 = arith.addf %756, %757 : vector<8x128xf32>
    %759 = math.tanh %758 : vector<8x128xf32>
    %760 = arith.mulf %755, %759 : vector<8x128xf32>
    %c48_229 = arith.constant 48 : index
    %c0_230 = arith.constant 0 : index
    %761 = vector.load %arg19[%c48_229, %c0_230] : memref<64x512xf32, #tpu.memory_space<vmem>>, vector<8x512xf32>
    %cst_231 = arith.constant dense<0.000000e+00> : vector<8x512xf32>
    %762 = tpu.matmul %760, %730, %cst_231 {dimension_numbers = #tpu.dot_dimension_numbers<[1], [0], [0], [1], [0, 0, 1, 1], [], []>} : vector<8x128xf32>, vector<128x512xf32>, vector<8x512xf32> -> vector<8x512xf32>
    %763 = arith.addf %761, %762 : vector<8x512xf32>
    %764 = vector.extract_strided_slice %763 {offsets = [0, 0], sizes = [8, 128], strides = [1, 1]} : vector<8x512xf32> to vector<8x128xf32>
    %765 = arith.negf %764 : vector<8x128xf32>
    %766 = math.exp %765 : vector<8x128xf32>
    %cst_232 = arith.constant 1.000000e+00 : f32
    %767 = vector.broadcast %cst_232 : f32 to vector<8x128xf32>
    %768 = arith.addf %767, %766 : vector<8x128xf32>
    %769 = arith.divf %767, %768 : vector<8x128xf32>
    %770 = vector.extract_strided_slice %763 {offsets = [0, 128], sizes = [8, 128], strides = [1, 1]} : vector<8x512xf32> to vector<8x128xf32>
    %771 = arith.negf %770 : vector<8x128xf32>
    %772 = math.exp %771 : vector<8x128xf32>
    %cst_233 = arith.constant 1.000000e+00 : f32
    %773 = vector.broadcast %cst_233 : f32 to vector<8x128xf32>
    %774 = arith.addf %773, %772 : vector<8x128xf32>
    %775 = arith.divf %773, %774 : vector<8x128xf32>
    %776 = vector.extract_strided_slice %763 {offsets = [0, 256], sizes = [8, 128], strides = [1, 1]} : vector<8x512xf32> to vector<8x128xf32>
    %777 = math.tanh %776 : vector<8x128xf32>
    %778 = vector.extract_strided_slice %763 {offsets = [0, 384], sizes = [8, 128], strides = [1, 1]} : vector<8x512xf32> to vector<8x128xf32>
    %779 = arith.negf %778 : vector<8x128xf32>
    %780 = math.exp %779 : vector<8x128xf32>
    %cst_234 = arith.constant 1.000000e+00 : f32
    %781 = vector.broadcast %cst_234 : f32 to vector<8x128xf32>
    %782 = arith.addf %781, %780 : vector<8x128xf32>
    %783 = arith.divf %781, %782 : vector<8x128xf32>
    %784 = arith.mulf %775, %758 : vector<8x128xf32>
    %785 = arith.mulf %769, %777 : vector<8x128xf32>
    %786 = arith.addf %784, %785 : vector<8x128xf32>
    %787 = math.tanh %786 : vector<8x128xf32>
    %788 = arith.mulf %783, %787 : vector<8x128xf32>
    %c40_235 = arith.constant 40 : index
    %c0_236 = arith.constant 0 : index
    %789 = vector.load %arg19[%c40_235, %c0_236] : memref<64x512xf32, #tpu.memory_space<vmem>>, vector<8x512xf32>
    %cst_237 = arith.constant dense<0.000000e+00> : vector<8x512xf32>
    %790 = tpu.matmul %788, %730, %cst_237 {dimension_numbers = #tpu.dot_dimension_numbers<[1], [0], [0], [1], [0, 0, 1, 1], [], []>} : vector<8x128xf32>, vector<128x512xf32>, vector<8x512xf32> -> vector<8x512xf32>
    %791 = arith.addf %789, %790 : vector<8x512xf32>
    %792 = vector.extract_strided_slice %791 {offsets = [0, 0], sizes = [8, 128], strides = [1, 1]} : vector<8x512xf32> to vector<8x128xf32>
    %793 = arith.negf %792 : vector<8x128xf32>
    %794 = math.exp %793 : vector<8x128xf32>
    %cst_238 = arith.constant 1.000000e+00 : f32
    %795 = vector.broadcast %cst_238 : f32 to vector<8x128xf32>
    %796 = arith.addf %795, %794 : vector<8x128xf32>
    %797 = arith.divf %795, %796 : vector<8x128xf32>
    %798 = vector.extract_strided_slice %791 {offsets = [0, 128], sizes = [8, 128], strides = [1, 1]} : vector<8x512xf32> to vector<8x128xf32>
    %799 = arith.negf %798 : vector<8x128xf32>
    %800 = math.exp %799 : vector<8x128xf32>
    %cst_239 = arith.constant 1.000000e+00 : f32
    %801 = vector.broadcast %cst_239 : f32 to vector<8x128xf32>
    %802 = arith.addf %801, %800 : vector<8x128xf32>
    %803 = arith.divf %801, %802 : vector<8x128xf32>
    %804 = vector.extract_strided_slice %791 {offsets = [0, 256], sizes = [8, 128], strides = [1, 1]} : vector<8x512xf32> to vector<8x128xf32>
    %805 = math.tanh %804 : vector<8x128xf32>
    %806 = vector.extract_strided_slice %791 {offsets = [0, 384], sizes = [8, 128], strides = [1, 1]} : vector<8x512xf32> to vector<8x128xf32>
    %807 = arith.negf %806 : vector<8x128xf32>
    %808 = math.exp %807 : vector<8x128xf32>
    %cst_240 = arith.constant 1.000000e+00 : f32
    %809 = vector.broadcast %cst_240 : f32 to vector<8x128xf32>
    %810 = arith.addf %809, %808 : vector<8x128xf32>
    %811 = arith.divf %809, %810 : vector<8x128xf32>
    %812 = arith.mulf %803, %786 : vector<8x128xf32>
    %813 = arith.mulf %797, %805 : vector<8x128xf32>
    %814 = arith.addf %812, %813 : vector<8x128xf32>
    %815 = math.tanh %814 : vector<8x128xf32>
    %816 = arith.mulf %811, %815 : vector<8x128xf32>
    %c32_241 = arith.constant 32 : index
    %c0_242 = arith.constant 0 : index
    %817 = vector.load %arg19[%c32_241, %c0_242] : memref<64x512xf32, #tpu.memory_space<vmem>>, vector<8x512xf32>
    %cst_243 = arith.constant dense<0.000000e+00> : vector<8x512xf32>
    %818 = tpu.matmul %816, %730, %cst_243 {dimension_numbers = #tpu.dot_dimension_numbers<[1], [0], [0], [1], [0, 0, 1, 1], [], []>} : vector<8x128xf32>, vector<128x512xf32>, vector<8x512xf32> -> vector<8x512xf32>
    %819 = arith.addf %817, %818 : vector<8x512xf32>
    %820 = vector.extract_strided_slice %819 {offsets = [0, 0], sizes = [8, 128], strides = [1, 1]} : vector<8x512xf32> to vector<8x128xf32>
    %821 = arith.negf %820 : vector<8x128xf32>
    %822 = math.exp %821 : vector<8x128xf32>
    %cst_244 = arith.constant 1.000000e+00 : f32
    %823 = vector.broadcast %cst_244 : f32 to vector<8x128xf32>
    %824 = arith.addf %823, %822 : vector<8x128xf32>
    %825 = arith.divf %823, %824 : vector<8x128xf32>
    %826 = vector.extract_strided_slice %819 {offsets = [0, 128], sizes = [8, 128], strides = [1, 1]} : vector<8x512xf32> to vector<8x128xf32>
    %827 = arith.negf %826 : vector<8x128xf32>
    %828 = math.exp %827 : vector<8x128xf32>
    %cst_245 = arith.constant 1.000000e+00 : f32
    %829 = vector.broadcast %cst_245 : f32 to vector<8x128xf32>
    %830 = arith.addf %829, %828 : vector<8x128xf32>
    %831 = arith.divf %829, %830 : vector<8x128xf32>
    %832 = vector.extract_strided_slice %819 {offsets = [0, 256], sizes = [8, 128], strides = [1, 1]} : vector<8x512xf32> to vector<8x128xf32>
    %833 = math.tanh %832 : vector<8x128xf32>
    %834 = vector.extract_strided_slice %819 {offsets = [0, 384], sizes = [8, 128], strides = [1, 1]} : vector<8x512xf32> to vector<8x128xf32>
    %835 = arith.negf %834 : vector<8x128xf32>
    %836 = math.exp %835 : vector<8x128xf32>
    %cst_246 = arith.constant 1.000000e+00 : f32
    %837 = vector.broadcast %cst_246 : f32 to vector<8x128xf32>
    %838 = arith.addf %837, %836 : vector<8x128xf32>
    %839 = arith.divf %837, %838 : vector<8x128xf32>
    %840 = arith.mulf %831, %814 : vector<8x128xf32>
    %841 = arith.mulf %825, %833 : vector<8x128xf32>
    %842 = arith.addf %840, %841 : vector<8x128xf32>
    %843 = math.tanh %842 : vector<8x128xf32>
    %844 = arith.mulf %839, %843 : vector<8x128xf32>
    %c24_247 = arith.constant 24 : index
    %c0_248 = arith.constant 0 : index
    %845 = vector.load %arg19[%c24_247, %c0_248] : memref<64x512xf32, #tpu.memory_space<vmem>>, vector<8x512xf32>
    %cst_249 = arith.constant dense<0.000000e+00> : vector<8x512xf32>
    %846 = tpu.matmul %844, %730, %cst_249 {dimension_numbers = #tpu.dot_dimension_numbers<[1], [0], [0], [1], [0, 0, 1, 1], [], []>} : vector<8x128xf32>, vector<128x512xf32>, vector<8x512xf32> -> vector<8x512xf32>
    %847 = arith.addf %845, %846 : vector<8x512xf32>
    %848 = vector.extract_strided_slice %847 {offsets = [0, 0], sizes = [8, 128], strides = [1, 1]} : vector<8x512xf32> to vector<8x128xf32>
    %849 = arith.negf %848 : vector<8x128xf32>
    %850 = math.exp %849 : vector<8x128xf32>
    %cst_250 = arith.constant 1.000000e+00 : f32
    %851 = vector.broadcast %cst_250 : f32 to vector<8x128xf32>
    %852 = arith.addf %851, %850 : vector<8x128xf32>
    %853 = arith.divf %851, %852 : vector<8x128xf32>
    %854 = vector.extract_strided_slice %847 {offsets = [0, 128], sizes = [8, 128], strides = [1, 1]} : vector<8x512xf32> to vector<8x128xf32>
    %855 = arith.negf %854 : vector<8x128xf32>
    %856 = math.exp %855 : vector<8x128xf32>
    %cst_251 = arith.constant 1.000000e+00 : f32
    %857 = vector.broadcast %cst_251 : f32 to vector<8x128xf32>
    %858 = arith.addf %857, %856 : vector<8x128xf32>
    %859 = arith.divf %857, %858 : vector<8x128xf32>
    %860 = vector.extract_strided_slice %847 {offsets = [0, 256], sizes = [8, 128], strides = [1, 1]} : vector<8x512xf32> to vector<8x128xf32>
    %861 = math.tanh %860 : vector<8x128xf32>
    %862 = vector.extract_strided_slice %847 {offsets = [0, 384], sizes = [8, 128], strides = [1, 1]} : vector<8x512xf32> to vector<8x128xf32>
    %863 = arith.negf %862 : vector<8x128xf32>
    %864 = math.exp %863 : vector<8x128xf32>
    %cst_252 = arith.constant 1.000000e+00 : f32
    %865 = vector.broadcast %cst_252 : f32 to vector<8x128xf32>
    %866 = arith.addf %865, %864 : vector<8x128xf32>
    %867 = arith.divf %865, %866 : vector<8x128xf32>
    %868 = arith.mulf %859, %842 : vector<8x128xf32>
    %869 = arith.mulf %853, %861 : vector<8x128xf32>
    %870 = arith.addf %868, %869 : vector<8x128xf32>
    %871 = math.tanh %870 : vector<8x128xf32>
    %872 = arith.mulf %867, %871 : vector<8x128xf32>
    %c16_253 = arith.constant 16 : index
    %c0_254 = arith.constant 0 : index
    %873 = vector.load %arg19[%c16_253, %c0_254] : memref<64x512xf32, #tpu.memory_space<vmem>>, vector<8x512xf32>
    %cst_255 = arith.constant dense<0.000000e+00> : vector<8x512xf32>
    %874 = tpu.matmul %872, %730, %cst_255 {dimension_numbers = #tpu.dot_dimension_numbers<[1], [0], [0], [1], [0, 0, 1, 1], [], []>} : vector<8x128xf32>, vector<128x512xf32>, vector<8x512xf32> -> vector<8x512xf32>
    %875 = arith.addf %873, %874 : vector<8x512xf32>
    %876 = vector.extract_strided_slice %875 {offsets = [0, 0], sizes = [8, 128], strides = [1, 1]} : vector<8x512xf32> to vector<8x128xf32>
    %877 = arith.negf %876 : vector<8x128xf32>
    %878 = math.exp %877 : vector<8x128xf32>
    %cst_256 = arith.constant 1.000000e+00 : f32
    %879 = vector.broadcast %cst_256 : f32 to vector<8x128xf32>
    %880 = arith.addf %879, %878 : vector<8x128xf32>
    %881 = arith.divf %879, %880 : vector<8x128xf32>
    %882 = vector.extract_strided_slice %875 {offsets = [0, 128], sizes = [8, 128], strides = [1, 1]} : vector<8x512xf32> to vector<8x128xf32>
    %883 = arith.negf %882 : vector<8x128xf32>
    %884 = math.exp %883 : vector<8x128xf32>
    %cst_257 = arith.constant 1.000000e+00 : f32
    %885 = vector.broadcast %cst_257 : f32 to vector<8x128xf32>
    %886 = arith.addf %885, %884 : vector<8x128xf32>
    %887 = arith.divf %885, %886 : vector<8x128xf32>
    %888 = vector.extract_strided_slice %875 {offsets = [0, 256], sizes = [8, 128], strides = [1, 1]} : vector<8x512xf32> to vector<8x128xf32>
    %889 = math.tanh %888 : vector<8x128xf32>
    %890 = vector.extract_strided_slice %875 {offsets = [0, 384], sizes = [8, 128], strides = [1, 1]} : vector<8x512xf32> to vector<8x128xf32>
    %891 = arith.negf %890 : vector<8x128xf32>
    %892 = math.exp %891 : vector<8x128xf32>
    %cst_258 = arith.constant 1.000000e+00 : f32
    %893 = vector.broadcast %cst_258 : f32 to vector<8x128xf32>
    %894 = arith.addf %893, %892 : vector<8x128xf32>
    %895 = arith.divf %893, %894 : vector<8x128xf32>
    %896 = arith.mulf %887, %870 : vector<8x128xf32>
    %897 = arith.mulf %881, %889 : vector<8x128xf32>
    %898 = arith.addf %896, %897 : vector<8x128xf32>
    %899 = math.tanh %898 : vector<8x128xf32>
    %900 = arith.mulf %895, %899 : vector<8x128xf32>
    %c8_259 = arith.constant 8 : index
    %c0_260 = arith.constant 0 : index
    %901 = vector.load %arg19[%c8_259, %c0_260] : memref<64x512xf32, #tpu.memory_space<vmem>>, vector<8x512xf32>
    %cst_261 = arith.constant dense<0.000000e+00> : vector<8x512xf32>
    %902 = tpu.matmul %900, %730, %cst_261 {dimension_numbers = #tpu.dot_dimension_numbers<[1], [0], [0], [1], [0, 0, 1, 1], [], []>} : vector<8x128xf32>, vector<128x512xf32>, vector<8x512xf32> -> vector<8x512xf32>
    %903 = arith.addf %901, %902 : vector<8x512xf32>
    %904 = vector.extract_strided_slice %903 {offsets = [0, 0], sizes = [8, 128], strides = [1, 1]} : vector<8x512xf32> to vector<8x128xf32>
    %905 = arith.negf %904 : vector<8x128xf32>
    %906 = math.exp %905 : vector<8x128xf32>
    %cst_262 = arith.constant 1.000000e+00 : f32
    %907 = vector.broadcast %cst_262 : f32 to vector<8x128xf32>
    %908 = arith.addf %907, %906 : vector<8x128xf32>
    %909 = arith.divf %907, %908 : vector<8x128xf32>
    %910 = vector.extract_strided_slice %903 {offsets = [0, 128], sizes = [8, 128], strides = [1, 1]} : vector<8x512xf32> to vector<8x128xf32>
    %911 = arith.negf %910 : vector<8x128xf32>
    %912 = math.exp %911 : vector<8x128xf32>
    %cst_263 = arith.constant 1.000000e+00 : f32
    %913 = vector.broadcast %cst_263 : f32 to vector<8x128xf32>
    %914 = arith.addf %913, %912 : vector<8x128xf32>
    %915 = arith.divf %913, %914 : vector<8x128xf32>
    %916 = vector.extract_strided_slice %903 {offsets = [0, 256], sizes = [8, 128], strides = [1, 1]} : vector<8x512xf32> to vector<8x128xf32>
    %917 = math.tanh %916 : vector<8x128xf32>
    %918 = vector.extract_strided_slice %903 {offsets = [0, 384], sizes = [8, 128], strides = [1, 1]} : vector<8x512xf32> to vector<8x128xf32>
    %919 = arith.negf %918 : vector<8x128xf32>
    %920 = math.exp %919 : vector<8x128xf32>
    %cst_264 = arith.constant 1.000000e+00 : f32
    %921 = vector.broadcast %cst_264 : f32 to vector<8x128xf32>
    %922 = arith.addf %921, %920 : vector<8x128xf32>
    %923 = arith.divf %921, %922 : vector<8x128xf32>
    %924 = arith.mulf %915, %898 : vector<8x128xf32>
    %925 = arith.mulf %909, %917 : vector<8x128xf32>
    %926 = arith.addf %924, %925 : vector<8x128xf32>
    %927 = math.tanh %926 : vector<8x128xf32>
    %928 = arith.mulf %923, %927 : vector<8x128xf32>
    %c0_265 = arith.constant 0 : index
    %c0_266 = arith.constant 0 : index
    %929 = vector.load %arg19[%c0_265, %c0_266] : memref<64x512xf32, #tpu.memory_space<vmem>>, vector<8x512xf32>
    %cst_267 = arith.constant dense<0.000000e+00> : vector<8x512xf32>
    %930 = tpu.matmul %928, %730, %cst_267 {dimension_numbers = #tpu.dot_dimension_numbers<[1], [0], [0], [1], [0, 0, 1, 1], [], []>} : vector<8x128xf32>, vector<128x512xf32>, vector<8x512xf32> -> vector<8x512xf32>
    %931 = arith.addf %929, %930 : vector<8x512xf32>
    %932 = vector.extract_strided_slice %931 {offsets = [0, 0], sizes = [8, 128], strides = [1, 1]} : vector<8x512xf32> to vector<8x128xf32>
    %933 = arith.negf %932 : vector<8x128xf32>
    %934 = math.exp %933 : vector<8x128xf32>
    %cst_268 = arith.constant 1.000000e+00 : f32
    %935 = vector.broadcast %cst_268 : f32 to vector<8x128xf32>
    %936 = arith.addf %935, %934 : vector<8x128xf32>
    %937 = arith.divf %935, %936 : vector<8x128xf32>
    %938 = vector.extract_strided_slice %931 {offsets = [0, 128], sizes = [8, 128], strides = [1, 1]} : vector<8x512xf32> to vector<8x128xf32>
    %939 = arith.negf %938 : vector<8x128xf32>
    %940 = math.exp %939 : vector<8x128xf32>
    %cst_269 = arith.constant 1.000000e+00 : f32
    %941 = vector.broadcast %cst_269 : f32 to vector<8x128xf32>
    %942 = arith.addf %941, %940 : vector<8x128xf32>
    %943 = arith.divf %941, %942 : vector<8x128xf32>
    %944 = vector.extract_strided_slice %931 {offsets = [0, 256], sizes = [8, 128], strides = [1, 1]} : vector<8x512xf32> to vector<8x128xf32>
    %945 = math.tanh %944 : vector<8x128xf32>
    %946 = vector.extract_strided_slice %931 {offsets = [0, 384], sizes = [8, 128], strides = [1, 1]} : vector<8x512xf32> to vector<8x128xf32>
    %947 = arith.negf %946 : vector<8x128xf32>
    %948 = math.exp %947 : vector<8x128xf32>
    %cst_270 = arith.constant 1.000000e+00 : f32
    %949 = vector.broadcast %cst_270 : f32 to vector<8x128xf32>
    %950 = arith.addf %949, %948 : vector<8x128xf32>
    %951 = arith.divf %949, %950 : vector<8x128xf32>
    %952 = arith.mulf %943, %926 : vector<8x128xf32>
    %953 = arith.mulf %937, %945 : vector<8x128xf32>
    %954 = arith.addf %952, %953 : vector<8x128xf32>
    %955 = math.tanh %954 : vector<8x128xf32>
    %956 = arith.mulf %951, %955 : vector<8x128xf32>
    %c0_271 = arith.constant 0 : index
    %c0_272 = arith.constant 0 : index
    %957 = vector.load %arg15[%c0_271, %c0_272] : memref<128x128xf32, #tpu.memory_space<vmem>>, vector<128x128xf32>
    %cst_273 = arith.constant dense<0.000000e+00> : vector<8x128xf32>
    %958 = tpu.matmul %720, %957, %cst_273 {dimension_numbers = #tpu.dot_dimension_numbers<[1], [0], [0], [1], [0, 0, 1, 1], [], []>} : vector<8x128xf32>, vector<128x128xf32>, vector<8x128xf32> -> vector<8x128xf32>
    %c0_274 = arith.constant 0 : index
    %c0_275 = arith.constant 0 : index
    %959 = vector.load %arg16[%c0_274, %c0_275] : memref<128x128xf32, #tpu.memory_space<vmem>>, vector<128x128xf32>
    %cst_276 = arith.constant dense<0.000000e+00> : vector<8x128xf32>
    %960 = tpu.matmul %956, %959, %cst_276 {dimension_numbers = #tpu.dot_dimension_numbers<[1], [0], [0], [1], [0, 0, 1, 1], [], []>} : vector<8x128xf32>, vector<128x128xf32>, vector<8x128xf32> -> vector<8x128xf32>
    %961 = arith.addf %958, %960 : vector<8x128xf32>
    %c0_277 = arith.constant 0 : index
    %c0_278 = arith.constant 0 : index
    %962 = vector.load %arg17[%c0_277, %c0_278] : memref<1x128xf32, #tpu.memory_space<vmem>>, vector<1x128xf32>
    %963 = vector.broadcast %962 : vector<1x128xf32> to vector<8x128xf32>
    %964 = arith.addf %961, %963 : vector<8x128xf32>
    %965 = arith.negf %964 : vector<8x128xf32>
    %966 = math.exp %965 : vector<8x128xf32>
    %cst_279 = arith.constant 1.000000e+00 : f32
    %967 = vector.broadcast %cst_279 : f32 to vector<8x128xf32>
    %968 = arith.addf %967, %966 : vector<8x128xf32>
    %969 = arith.divf %967, %968 : vector<8x128xf32>
    %c0_280 = arith.constant 0 : index
    %c0_281 = arith.constant 0 : index
    %970 = vector.load %arg18[%c0_280, %c0_281] : memref<8x128xf32, #tpu.memory_space<vmem>>, vector<8x128xf32>
    tpu.vector_store %arg18[%c0_280, %c0_281], %969 {strides = array<i32>} : memref<8x128xf32, #tpu.memory_space<vmem>>, vector<8x128xf32>,
    return
  }
}

</mosaic_0001>

<bundles_post_ra>
// kernel: bilstm_net_forward.1
= control target key start
LH: loop header
LB: loop body
LE: loop exit
PB: predicated region body
PF: predicated region fallthrough
CT: control target
= control target key end

     0   :  { %v16243_v3 = vmov 0.0   ;;  %vm9119_vm0 = vmmov 0   ;;  %s16221_s1 = inlined_call_operand.vmem [shape: f32[128,512], index: 1, kind: input, shape index: {}]   ;;  %s16222_s0 = inlined_call_operand.vmem [shape: f32[64,128], index: 0, kind: input, shape index: {}]   ;;  %s16223_s2 = inlined_call_operand.vmem [shape: f32[128,512], index: 2, kind: input, shape index: {}]   ;;  %s16224_s3 = inlined_call_operand.vmem [shape: f32[1,512], index: 3, kind: input, shape index: {}]   ;;  %s16225_s4 = inlined_call_operand.vmem [shape: f32[128,512], index: 4, kind: input, shape index: {}]   ;;  %s16226_s5 = inlined_call_operand.vmem [shape: f32[128,512], index: 5, kind: input, shape index: {}]   ;;  %s16227_s6 = inlined_call_operand.vmem [shape: f32[1,512], index: 6, kind: input, shape index: {}]   ;;  %s16228_s8 = inlined_call_operand.vmem [shape: f32[128,512], index: 8, kind: input, shape index: {}]   ;;  %s16229_s7 = inlined_call_operand.vmem [shape: f32[128,512], index: 7, kind: input, shape index: {}]   ;;  %s16230_s9 = inlined_call_operand.vmem [shape: f32[128,512], index: 9, kind: input, shape index: {}]   ;;  %s16231_s10 = inlined_call_operand.vmem [shape: f32[1,512], index: 10, kind: input, shape index: {}]   ;;  %s16232_s12 = inlined_call_operand.vmem [shape: f32[128,512], index: 12, kind: input, shape index: {}]   ;;  %s16233_s11 = inlined_call_operand.vmem [shape: f32[128,512], index: 11, kind: input, shape index: {}]   ;;  %s16234_s13 = inlined_call_operand.vmem [shape: f32[128,512], index: 13, kind: input, shape index: {}]   ;;  %s16235_s14 = inlined_call_operand.vmem [shape: f32[1,512], index: 14, kind: input, shape index: {}]   ;;  %s16236_s15 = inlined_call_operand.vmem [shape: f32[128,128], index: 15, kind: input, shape index: {}]   ;;  %s16237_s16 = inlined_call_operand.vmem [shape: f32[128,128], index: 16, kind: input, shape index: {}]   ;;  %s16238_s17 = inlined_call_operand.vmem [shape: f32[1,128], index: 17, kind: input, shape index: {}]   ;;  %s16239_s18 = inlined_call_operand.vmem [shape: f32[8,128], index: 18, kind: output, shape index: {}]  }
   0x1   :  { %16777 = sst [smem:[#allocation103_spill]] %s16221_s1  ;;  %217 = vmatprep.mubr.f32.mxu0 %v16243_v3  ;;  %330 = vmatprep.mubr.f32.mxu1 %v16243_v3 }
   0x2   :  { %16778 = sst [smem:[#allocation104_spill]] %s16222_s0 }
   0x3   :  { %16779 = sst [smem:[#allocation105_spill]] %s16223_s2 }
   0x4   :  { %s16780_s29 = sld [smem:[#allocation103_spill]] }
   0x5   :  { %s16781_s19 = sld [smem:[#allocation104_spill]] }
   0x6   :  { %s16782_s21 = sld [smem:[#allocation105_spill]] }
   0xa   :  { %v128_v0 = vld [vmem:[%s16780_s29 + $0x1e8] sm:$0xff]  ;;  %v130_v1 = vld [vmem:[%s16780_s29 + $0x1f8] sm:$0xff]  ;;  %v127_v2 = vld [vmem:[%s16780_s29 + $0x1e0] sm:$0xff] }
   0xb   :  { %153 = vmatprep.subr.mxu0 %v128_v0  ;;  %266 = vmatprep.subr.mxu1 %v130_v1  ;;  %v129_v4 = vld [vmem:[%s16780_s29 + $0x1f0] sm:$0xff]  ;;  %v124_v5 = vld [vmem:[%s16780_s29 + $0x1c8] sm:$0xff]  ;;  %v126_v6 = vld [vmem:[%s16780_s29 + $0x1d8] sm:$0xff] }
   0xc   :  { %154 = vmatpush1.msra.mxu0 %v127_v2  ;;  %267 = vmatpush1.msra.mxu1 %v129_v4  ;;  %v123_v7 = vld [vmem:[%s16780_s29 + $0x1c0] sm:$0xff]  ;;  %v125_v8 = vld [vmem:[%s16780_s29 + $0x1d0] sm:$0xff]  ;;  %v120_v9 = vld [vmem:[%s16780_s29 + $0x1a8] sm:$0xff] }
   0xd   :  { %155 = vmatprep.subr.mxu0 %v124_v5  ;;  %268 = vmatprep.subr.mxu1 %v126_v6  ;;  %v122_v10 = vld [vmem:[%s16780_s29 + $0x1b8] sm:$0xff]  ;;  %v119_v11 = vld [vmem:[%s16780_s29 + $0x1a0] sm:$0xff]  ;;  %v121_v12 = vld [vmem:[%s16780_s29 + $0x1b0] sm:$0xff] }
   0xe   :  { %156 = vmatpush1.msra.mxu0 %v123_v7  ;;  %269 = vmatpush1.msra.mxu1 %v125_v8  ;;  %v116_v13 = vld [vmem:[%s16780_s29 + $0x188] sm:$0xff]  ;;  %v118_v14 = vld [vmem:[%s16780_s29 + $0x198] sm:$0xff]  ;;  %v115_v15 = vld [vmem:[%s16780_s29 + $0x180] sm:$0xff] }
   0xf   :  { %157 = vmatprep.subr.mxu0 %v120_v9  ;;  %270 = vmatprep.subr.mxu1 %v122_v10  ;;  %v117_v16 = vld [vmem:[%s16780_s29 + $0x190] sm:$0xff]  ;;  %v112_v17 = vld [vmem:[%s16780_s29 + $0x168] sm:$0xff]  ;;  %v114_v18 = vld [vmem:[%s16780_s29 + $0x178] sm:$0xff] }
  0x10   :  { %158 = vmatpush1.msra.mxu0 %v119_v11  ;;  %271 = vmatpush1.msra.mxu1 %v121_v12  ;;  %v111_v19 = vld [vmem:[%s16780_s29 + $0x160] sm:$0xff]  ;;  %v113_v20 = vld [vmem:[%s16780_s29 + $0x170] sm:$0xff]  ;;  %v108_v21 = vld [vmem:[%s16780_s29 + $0x148] sm:$0xff] }
  0x11   :  { %159 = vmatprep.subr.mxu0 %v116_v13  ;;  %272 = vmatprep.subr.mxu1 %v118_v14  ;;  %v110_v22 = vld [vmem:[%s16780_s29 + $0x158] sm:$0xff]  ;;  %v107_v23 = vld [vmem:[%s16780_s29 + $0x140] sm:$0xff]  ;;  %v109_v24 = vld [vmem:[%s16780_s29 + $0x150] sm:$0xff] }
  0x12   :  { %160 = vmatpush1.msra.mxu0 %v115_v15  ;;  %273 = vmatpush1.msra.mxu1 %v117_v16  ;;  %v104_v25 = vld [vmem:[%s16780_s29 + $0x128] sm:$0xff]  ;;  %v106_v26 = vld [vmem:[%s16780_s29 + $0x138] sm:$0xff]  ;;  %v103_v27 = vld [vmem:[%s16780_s29 + $0x120] sm:$0xff] }
  0x13   :  { %161 = vmatprep.subr.mxu0 %v112_v17  ;;  %274 = vmatprep.subr.mxu1 %v114_v18  ;;  %v105_v28 = vld [vmem:[%s16780_s29 + $0x130] sm:$0xff]  ;;  %v100_v29 = vld [vmem:[%s16780_s29 + $0x108] sm:$0xff]  ;;  %v102_v30 = vld [vmem:[%s16780_s29 + $0x118] sm:$0xff] }
  0x14   :  { %162 = vmatpush1.msra.mxu0 %v111_v19  ;;  %275 = vmatpush1.msra.mxu1 %v113_v20  ;;  %v99_v31 = vld [vmem:[%s16780_s29 + $0x100] sm:$0xff]  ;;  %v101_v32 = vld [vmem:[%s16780_s29 + $0x110] sm:$0xff]  ;;  %v96_v33 = vld [vmem:[%s16780_s29 + $0xe8] sm:$0xff] }
  0x15   :  { %163 = vmatprep.subr.mxu0 %v108_v21  ;;  %276 = vmatprep.subr.mxu1 %v110_v22  ;;  %v98_v34 = vld [vmem:[%s16780_s29 + $0xf8] sm:$0xff]  ;;  %v95_v35 = vld [vmem:[%s16780_s29 + $0xe0] sm:$0xff]  ;;  %v97_v36 = vld [vmem:[%s16780_s29 + $0xf0] sm:$0xff] }
  0x16   :  { %164 = vmatpush1.msra.mxu0 %v107_v23  ;;  %277 = vmatpush1.msra.mxu1 %v109_v24  ;;  %v92_v37 = vld [vmem:[%s16780_s29 + $0xc8] sm:$0xff]  ;;  %v94_v38 = vld [vmem:[%s16780_s29 + $0xd8] sm:$0xff]  ;;  %v91_v39 = vld [vmem:[%s16780_s29 + $0xc0] sm:$0xff] }
  0x17   :  { %165 = vmatprep.subr.mxu0 %v104_v25  ;;  %278 = vmatprep.subr.mxu1 %v106_v26  ;;  %v93_v40 = vld [vmem:[%s16780_s29 + $0xd0] sm:$0xff]  ;;  %v88_v41 = vld [vmem:[%s16780_s29 + $0xa8] sm:$0xff]  ;;  %v90_v42 = vld [vmem:[%s16780_s29 + $0xb8] sm:$0xff] }
  0x18   :  { %166 = vmatpush1.msra.mxu0 %v103_v27  ;;  %279 = vmatpush1.msra.mxu1 %v105_v28  ;;  %v87_v43 = vld [vmem:[%s16780_s29 + $0xa0] sm:$0xff]  ;;  %v89_v44 = vld [vmem:[%s16780_s29 + $0xb0] sm:$0xff]  ;;  %v84_v45 = vld [vmem:[%s16780_s29 + $0x88] sm:$0xff] }
  0x19   :  { %167 = vmatprep.subr.mxu0 %v100_v29  ;;  %280 = vmatprep.subr.mxu1 %v102_v30  ;;  %v86_v46 = vld [vmem:[%s16780_s29 + $0x98] sm:$0xff]  ;;  %v83_v47 = vld [vmem:[%s16780_s29 + $0x80] sm:$0xff]  ;;  %v85_v48 = vld [vmem:[%s16780_s29 + $0x90] sm:$0xff] }
  0x1a   :  { %168 = vmatpush1.msra.mxu0 %v99_v31  ;;  %281 = vmatpush1.msra.mxu1 %v101_v32  ;;  %v80_v49 = vld [vmem:[%s16780_s29 + $0x68] sm:$0xff]  ;;  %v82_v50 = vld [vmem:[%s16780_s29 + $0x78] sm:$0xff]  ;;  %v79_v51 = vld [vmem:[%s16780_s29 + $0x60] sm:$0xff] }
  0x1b   :  { %169 = vmatprep.subr.mxu0 %v96_v33  ;;  %282 = vmatprep.subr.mxu1 %v98_v34  ;;  %v81_v52 = vld [vmem:[%s16780_s29 + $0x70] sm:$0xff]  ;;  %v76_v53 = vld [vmem:[%s16780_s29 + $0x48] sm:$0xff]  ;;  %v78_v54 = vld [vmem:[%s16780_s29 + $0x58] sm:$0xff] }
  0x1c   :  { %170 = vmatpush1.msra.mxu0 %v95_v35  ;;  %283 = vmatpush1.msra.mxu1 %v97_v36  ;;  %v75_v55 = vld [vmem:[%s16780_s29 + $0x40] sm:$0xff]  ;;  %v77_v56 = vld [vmem:[%s16780_s29 + $0x50] sm:$0xff]  ;;  %v72_v57 = vld [vmem:[%s16780_s29 + $0x28] sm:$0xff] }
  0x1d   :  { %171 = vmatprep.subr.mxu0 %v92_v37  ;;  %284 = vmatprep.subr.mxu1 %v94_v38  ;;  %v74_v58 = vld [vmem:[%s16780_s29 + $0x38] sm:$0xff]  ;;  %v71_v59 = vld [vmem:[%s16780_s29 + $0x20] sm:$0xff]  ;;  %v73_v60 = vld [vmem:[%s16780_s29 + $0x30] sm:$0xff] }
  0x1e   :  { %172 = vmatpush1.msra.mxu0 %v91_v39  ;;  %285 = vmatpush1.msra.mxu1 %v93_v40  ;;  %v68_v61 = vld [vmem:[%s16780_s29 + $0x8] sm:$0xff]  ;;  %v70_v62 = vld [vmem:[%s16780_s29 + $0x18] sm:$0xff]  ;;  %v67_v63 = vld [vmem:[%s16780_s29] sm:$0xff] }
  0x1f   :  { %173 = vmatprep.subr.mxu0 %v88_v41  ;;  %286 = vmatprep.subr.mxu1 %v90_v42  ;;  %v69_v0 = vld [vmem:[%s16780_s29 + $0x10] sm:$0xff]  ;;  %v59_v1 = vld [vmem:[%s16781_s19] sm:$0xff]  ;;  %v9415_v2 = vld [vmem:[%s16782_s21 + $0x1e8] sm:$0xff] }
  0x20   :  { %174 = vmatpush1.msra.mxu0 %v87_v43  ;;  %287 = vmatpush1.msra.mxu1 %v89_v44  ;;  %16783 = vst [vmem:[#allocation5_spill] sm:$0xff] %v9415_v2  ;;  %v9420_v4 = vld [vmem:[%s16782_s21 + $0x1f8] sm:$0xff]  ;;  %v9425_v5 = vld [vmem:[%s16782_s21 + $0x1e0] sm:$0xff]  ;;  %v9430_v6 = vld [vmem:[%s16782_s21 + $0x1f0] sm:$0xff] }
  0x21   :  { %175 = vmatprep.subr.mxu0 %v84_v45  ;;  %288 = vmatprep.subr.mxu1 %v86_v46  ;;  %16784 = vst [vmem:[#allocation6_spill] sm:$0xff] %v9420_v4  ;;  %v9435_v7 = vld [vmem:[%s16782_s21 + $0x1c8] sm:$0xff]  ;;  %v9440_v8 = vld [vmem:[%s16782_s21 + $0x1d8] sm:$0xff]  ;;  %v9449_v9 = vld [vmem:[%s16782_s21 + $0x1c0] sm:$0xff] }
  0x22   :  { %176 = vmatpush1.msra.mxu0 %v83_v47  ;;  %289 = vmatpush1.msra.mxu1 %v85_v48  ;;  %v9454_v10 = vld [vmem:[%s16782_s21 + $0x1d0] sm:$0xff]  ;;  %v60_v11 = vld [vmem:[%s16781_s19 + $0x8] sm:$0xff]  ;;  %v9471_v13 = vld [vmem:[%s16782_s21 + $0x1b8] sm:$0xff] }
  0x23   :  { %177 = vmatprep.subr.mxu0 %v80_v49  ;;  %290 = vmatprep.subr.mxu1 %v82_v50  ;;  %v9466_v12 = vld [vmem:[%s16782_s21 + $0x1a8] sm:$0xff]  ;;  %v9478_v14 = vld [vmem:[%s16782_s21 + $0x1a0] sm:$0xff]  ;;  %v9483_v15 = vld [vmem:[%s16782_s21 + $0x1b0] sm:$0xff] }
  0x24   :  { %178 = vmatpush1.msra.mxu0 %v79_v51  ;;  %291 = vmatpush1.msra.mxu1 %v81_v52  ;;  %v9488_v16 = vld [vmem:[%s16782_s21 + $0x188] sm:$0xff]  ;;  %v9493_v17 = vld [vmem:[%s16782_s21 + $0x198] sm:$0xff]  ;;  %v9502_v18 = vld [vmem:[%s16782_s21 + $0x180] sm:$0xff] }
  0x25   :  { %179 = vmatprep.subr.mxu0 %v76_v53  ;;  %292 = vmatprep.subr.mxu1 %v78_v54  ;;  %v9507_v19 = vld [vmem:[%s16782_s21 + $0x190] sm:$0xff]  ;;  %v9519_v21 = vld [vmem:[%s16782_s21 + $0x168] sm:$0xff]  ;;  %v9524_v22 = vld [vmem:[%s16782_s21 + $0x178] sm:$0xff] }
  0x26   :  { %180 = vmatpush1.msra.mxu0 %v75_v55  ;;  %293 = vmatpush1.msra.mxu1 %v77_v56  ;;  %v61_v20 = vld [vmem:[%s16781_s19 + $0x10] sm:$0xff]  ;;  %v9531_v23 = vld [vmem:[%s16782_s21 + $0x160] sm:$0xff]  ;;  %v9541_v25 = vld [vmem:[%s16782_s21 + $0x148] sm:$0xff] }
  0x27   :  { %181 = vmatprep.subr.mxu0 %v72_v57  ;;  %294 = vmatprep.subr.mxu1 %v74_v58  ;;  %v9536_v24 = vld [vmem:[%s16782_s21 + $0x170] sm:$0xff]  ;;  %v9546_v26 = vld [vmem:[%s16782_s21 + $0x158] sm:$0xff]  ;;  %v9555_v27 = vld [vmem:[%s16782_s21 + $0x140] sm:$0xff] }
  0x28   :  { %182 = vmatpush1.msra.mxu0 %v71_v59  ;;  %295 = vmatpush1.msra.mxu1 %v73_v60  ;;  %v9560_v28 = vld [vmem:[%s16782_s21 + $0x150] sm:$0xff]  ;;  %v62_v29 = vld [vmem:[%s16781_s19 + $0x18] sm:$0xff]  ;;  %v9572_v30 = vld [vmem:[%s16782_s21 + $0x128] sm:$0xff] }
  0x29   :  { %183 = vmatprep.subr.mxu0 %v68_v61  ;;  %296 = vmatprep.subr.mxu1 %v70_v62  ;;  %v9577_v31 = vld [vmem:[%s16782_s21 + $0x138] sm:$0xff]  ;;  %v9584_v32 = vld [vmem:[%s16782_s21 + $0x120] sm:$0xff]  ;;  %v9589_v33 = vld [vmem:[%s16782_s21 + $0x130] sm:$0xff] }
  0x2a   :  { %184 = vmatpush1.msra.mxu0 %v67_v63  ;;  %297 = vmatpush1.msra.mxu1 %v69_v0  ;;  %v9594_v34 = vld [vmem:[%s16782_s21 + $0x108] sm:$0xff]  ;;  %v9599_v35 = vld [vmem:[%s16782_s21 + $0x118] sm:$0xff]  ;;  %v9608_v36 = vld [vmem:[%s16782_s21 + $0x100] sm:$0xff] }
  0x2b   :  { %218 = vmatmul.mubr.f32.vlgmr.msra.gmra.mxu0 %v59_v1  ;;  %331 = vmatmul.mubr.f32.vlgmr.msra.gmra.mxu1 %v59_v1  ;;  %v9613_v37 = vld [vmem:[%s16782_s21 + $0x110] sm:$0xff]  ;;  %v63_v38 = vld [vmem:[%s16781_s19 + $0x20] sm:$0xff]  ;;  %v9625_v39 = vld [vmem:[%s16782_s21 + $0xe8] sm:$0xff] }
  0x2c   :  { %479 = vmatprep.subr.mxu0 %v9415_v2  ;;  %550 = vmatprep.subr.mxu1 %v9420_v4  ;;  %v9630_v40 = vld [vmem:[%s16782_s21 + $0xf8] sm:$0xff]  ;;  %v9637_v41 = vld [vmem:[%s16782_s21 + $0xe0] sm:$0xff]  ;;  %v9642_v42 = vld [vmem:[%s16782_s21 + $0xf0] sm:$0xff] }
  0x2d   :  { %480 = vmatpush1.msra.mxu0 %v9425_v5  ;;  %551 = vmatpush1.msra.mxu1 %v9430_v6  ;;  %v9647_v43 = vld [vmem:[%s16782_s21 + $0xc8] sm:$0xff]  ;;  %v9652_v44 = vld [vmem:[%s16782_s21 + $0xd8] sm:$0xff]  ;;  %v9661_v45 = vld [vmem:[%s16782_s21 + $0xc0] sm:$0xff] }
  0x2e   :  { %481 = vmatprep.subr.mxu0 %v9435_v7  ;;  %552 = vmatprep.subr.mxu1 %v9440_v8  ;;  %v9666_v46 = vld [vmem:[%s16782_s21 + $0xd0] sm:$0xff]  ;;  %v64_v47 = vld [vmem:[%s16781_s19 + $0x28] sm:$0xff]  ;;  %v9683_v49 = vld [vmem:[%s16782_s21 + $0xb8] sm:$0xff] }
  0x2f   :  { %223 = vmatprep.mubr.f32.mxu0 %v16243_v3  ;;  %336 = vmatprep.mubr.f32.mxu1 %v16243_v3  ;;  %v9678_v48 = vld [vmem:[%s16782_s21 + $0xa8] sm:$0xff]  ;;  %v9690_v50 = vld [vmem:[%s16782_s21 + $0xa0] sm:$0xff]  ;;  %v9695_v51 = vld [vmem:[%s16782_s21 + $0xb0] sm:$0xff] }
  0x30   :  { %482 = vmatpush1.msra.mxu0 %v9449_v9  ;;  %553 = vmatpush1.msra.mxu1 %v9454_v10  ;;  %16785 = vst [vmem:[#allocation7_spill] sm:$0xff] %v9695_v51  ;;  %v9700_v52 = vld [vmem:[%s16782_s21 + $0x88] sm:$0xff]  ;;  %v9705_v53 = vld [vmem:[%s16782_s21 + $0x98] sm:$0xff]  ;;  %v9714_v54 = vld [vmem:[%s16782_s21 + $0x80] sm:$0xff] }
  0x31   :  { %224 = vmatmul.mubr.f32.gmra.mxu0 %v60_v11  ;;  %337 = vmatmul.mubr.f32.gmra.mxu1 %v60_v11  ;;  %16786 = vst [vmem:[#allocation8_spill] sm:$0xff] %v9700_v52  ;;  %16787 = vst [vmem:[#allocation9_spill] sm:$0xff] %v9705_v53  ;;  %v9719_v55 = vld [vmem:[%s16782_s21 + $0x90] sm:$0xff]  ;;  %v9731_v57 = vld [vmem:[%s16782_s21 + $0x68] sm:$0xff] }
  0x32   :  { %483 = vmatprep.subr.mxu0 %v9466_v12  ;;  %554 = vmatprep.subr.mxu1 %v9471_v13  ;;  %16788 = vst [vmem:[#allocation10_spill] sm:$0xff] %v9714_v54  ;;  %16789 = vst [vmem:[#allocation11_spill] sm:$0xff] %v9719_v55  ;;  %v65_v56 = vld [vmem:[%s16781_s19 + $0x30] sm:$0xff]  ;;  %v9736_v58 = vld [vmem:[%s16782_s21 + $0x78] sm:$0xff] }
  0x33   :  { %484 = vmatpush1.msra.mxu0 %v9478_v14  ;;  %555 = vmatpush1.msra.mxu1 %v9483_v15  ;;  %16790 = vst [vmem:[#allocation12_spill] sm:$0xff] %v9731_v57  ;;  %16791 = vst [vmem:[#allocation13_spill] sm:$0xff] %v9736_v58  ;;  %v9743_v59 = vld [vmem:[%s16782_s21 + $0x60] sm:$0xff]  ;;  %v9748_v60 = vld [vmem:[%s16782_s21 + $0x70] sm:$0xff] }
  0x34   :  { %485 = vmatprep.subr.mxu0 %v9488_v16  ;;  %556 = vmatprep.subr.mxu1 %v9493_v17  ;;  %16792 = vst [vmem:[#allocation14_spill] sm:$0xff] %v9743_v59  ;;  %16793 = vst [vmem:[#allocation15_spill] sm:$0xff] %v9748_v60  ;;  %v9753_v61 = vld [vmem:[%s16782_s21 + $0x48] sm:$0xff]  ;;  %v9758_v62 = vld [vmem:[%s16782_s21 + $0x58] sm:$0xff] }
  0x35   :  { %229 = vmatprep.mubr.f32.mxu0 %v16243_v3  ;;  %342 = vmatprep.mubr.f32.mxu1 %v16243_v3  ;;  %16794 = vst [vmem:[#allocation16_spill] sm:$0xff] %v9753_v61  ;;  %16795 = vst [vmem:[#allocation17_spill] sm:$0xff] %v9758_v62  ;;  %v9767_v63 = vld [vmem:[%s16782_s21 + $0x40] sm:$0xff]  ;;  %v9772_v0 = vld [vmem:[%s16782_s21 + $0x50] sm:$0xff] }
  0x36   :  { %486 = vmatpush1.msra.mxu0 %v9502_v18  ;;  %557 = vmatpush1.msra.mxu1 %v9507_v19  ;;  %16796 = vst [vmem:[#allocation18_spill] sm:$0xff] %v9767_v63  ;;  %16797 = vst [vmem:[#allocation19_spill] sm:$0xff] %v9772_v0  ;;  %v66_v1 = vld [vmem:[%s16781_s19 + $0x38] sm:$0xff]  ;;  %v9784_v11 = vld [vmem:[%s16782_s21 + $0x28] sm:$0xff] }
  0x37   :  { %230 = vmatmul.mubr.f32.gmra.mxu0 %v61_v20  ;;  %343 = vmatmul.mubr.f32.gmra.mxu1 %v61_v20  ;;  %16798 = vst [vmem:[#allocation20_spill] sm:$0xff] %v9784_v11  ;;  %v9789_v20 = vld [vmem:[%s16782_s21 + $0x38] sm:$0xff] }
  0x38   :  { %487 = vmatprep.subr.mxu0 %v9519_v21  ;;  %558 = vmatprep.subr.mxu1 %v9524_v22  ;;  %16799 = vst [vmem:[#allocation21_spill] sm:$0xff] %v9789_v20 }
  0x39   :  { %488 = vmatpush1.msra.mxu0 %v9531_v23  ;;  %559 = vmatpush1.msra.mxu1 %v9536_v24 }
  0x3a   :  { %489 = vmatprep.subr.mxu0 %v9541_v25  ;;  %560 = vmatprep.subr.mxu1 %v9546_v26 }
  0x3b   :  { %235 = vmatprep.mubr.f32.mxu0 %v16243_v3  ;;  %348 = vmatprep.mubr.f32.mxu1 %v16243_v3 }
  0x3c   :  { %490 = vmatpush1.msra.mxu0 %v9555_v27  ;;  %561 = vmatpush1.msra.mxu1 %v9560_v28 }
  0x3d   :  { %236 = vmatmul.mubr.f32.gmra.mxu0 %v62_v29  ;;  %349 = vmatmul.mubr.f32.gmra.mxu1 %v62_v29  ;;  %v9796_v29 = vld [vmem:[%s16782_s21 + $0x20] sm:$0xff] }
  0x3e   :  { %491 = vmatprep.subr.mxu0 %v9572_v30  ;;  %562 = vmatprep.subr.mxu1 %v9577_v31  ;;  %16800 = vst [vmem:[#allocation22_spill] sm:$0xff] %v9796_v29 }
  0x3f   :  { %492 = vmatpush1.msra.mxu0 %v9584_v32  ;;  %563 = vmatpush1.msra.mxu1 %v9589_v33 }
  0x40   :  { %493 = vmatprep.subr.mxu0 %v9594_v34  ;;  %564 = vmatprep.subr.mxu1 %v9599_v35 }
  0x41   :  { %241 = vmatprep.mubr.f32.mxu0 %v16243_v3  ;;  %354 = vmatprep.mubr.f32.mxu1 %v16243_v3 }
  0x42   :  { %494 = vmatpush1.msra.mxu0 %v9608_v36  ;;  %565 = vmatpush1.msra.mxu1 %v9613_v37 }
  0x43   :  { %242 = vmatmul.mubr.f32.gmra.mxu0 %v63_v38  ;;  %355 = vmatmul.mubr.f32.gmra.mxu1 %v63_v38  ;;  %v9801_v38 = vld [vmem:[%s16782_s21 + $0x30] sm:$0xff] }
  0x44   :  { %495 = vmatprep.subr.mxu0 %v9625_v39  ;;  %566 = vmatprep.subr.mxu1 %v9630_v40  ;;  %16801 = vst [vmem:[#allocation23_spill] sm:$0xff] %v9801_v38 }
  0x45   :  { %496 = vmatpush1.msra.mxu0 %v9637_v41  ;;  %567 = vmatpush1.msra.mxu1 %v9642_v42 }
  0x46   :  { %497 = vmatprep.subr.mxu0 %v9647_v43  ;;  %568 = vmatprep.subr.mxu1 %v9652_v44 }
  0x47   :  { %247 = vmatprep.mubr.f32.mxu0 %v16243_v3  ;;  %360 = vmatprep.mubr.f32.mxu1 %v16243_v3 }
  0x48   :  { %498 = vmatpush1.msra.mxu0 %v9661_v45  ;;  %569 = vmatpush1.msra.mxu1 %v9666_v46 }
  0x49   :  { %248 = vmatmul.mubr.f32.gmra.mxu0 %v64_v47  ;;  %361 = vmatmul.mubr.f32.gmra.mxu1 %v64_v47  ;;  %v9806_v47 = vld [vmem:[%s16782_s21 + $0x8] sm:$0xff] }
  0x4a   :  { %499 = vmatprep.subr.mxu0 %v9678_v48  ;;  %570 = vmatprep.subr.mxu1 %v9683_v49  ;;  %16802 = vst [vmem:[#allocation24_spill] sm:$0xff] %v9806_v47 }
  0x4b   :  { %500 = vmatpush1.msra.mxu0 %v9690_v50  ;;  %571 = vmatpush1.msra.mxu1 %v9695_v51 }
  0x4c   :  { %501 = vmatprep.subr.mxu0 %v9700_v52  ;;  %572 = vmatprep.subr.mxu1 %v9705_v53 }
  0x4d   :  { %253 = vmatprep.mubr.f32.mxu0 %v16243_v3  ;;  %366 = vmatprep.mubr.f32.mxu1 %v16243_v3 }
  0x4e   :  { %502 = vmatpush1.msra.mxu0 %v9714_v54  ;;  %573 = vmatpush1.msra.mxu1 %v9719_v55 }
  0x4f   :  { %254 = vmatmul.mubr.f32.gmra.mxu0 %v65_v56  ;;  %367 = vmatmul.mubr.f32.gmra.mxu1 %v65_v56  ;;  %v9811_v56 = vld [vmem:[%s16782_s21 + $0x18] sm:$0xff] }
  0x50   :  { %503 = vmatprep.subr.mxu0 %v9731_v57  ;;  %574 = vmatprep.subr.mxu1 %v9736_v58  ;;  %16803 = vst [vmem:[#allocation25_spill] sm:$0xff] %v9811_v56 }
  0x51   :  { %504 = vmatpush1.msra.mxu0 %v9743_v59  ;;  %575 = vmatpush1.msra.mxu1 %v9748_v60 }
  0x52   :  { %505 = vmatprep.subr.mxu0 %v9753_v61  ;;  %576 = vmatprep.subr.mxu1 %v9758_v62 }
  0x53   :  { %259 = vmatprep.mubr.f32.mxu0 %v16243_v3  ;;  %372 = vmatprep.mubr.f32.mxu1 %v16243_v3  ;;  %v9818_v3 = vld [vmem:[%s16782_s21] sm:$0xff] }
  0x54   :  { %506 = vmatpush1.msra.mxu0 %v9767_v63  ;;  %577 = vmatpush1.msra.mxu1 %v9772_v0  ;;  %16804 = vst [vmem:[#allocation26_spill] sm:$0xff] %v9818_v3 }
  0x55   :  { %260 = vmatmul.mubr.f32.gmra.mxu0 %v66_v1  ;;  %373 = vmatmul.mubr.f32.gmra.mxu1 %v66_v1  ;;  %v9825_v1 = vld [vmem:[%s16782_s21 + $0x10] sm:$0xff] }
  0x56   :  { %507 = vmatprep.subr.mxu0 %v9784_v11  ;;  %578 = vmatprep.subr.mxu1 %v9789_v20  ;;  %16805 = vst [vmem:[#allocation27_spill] sm:$0xff] %v9825_v1  ;;  %v16806_v20 = vmov 0.0  }
  0x57   :  { %508 = vmatpush1.msra.mxu0 %v9796_v29  ;;  %579 = vmatpush1.msra.mxu1 %v9801_v38 }
  0x58   :  { %509 = vmatprep.subr.mxu0 %v9806_v47  ;;  %580 = vmatprep.subr.mxu1 %v9811_v56 }
  0x59   :  { %510 = vmatpush1.msra.mxu0 %v9818_v3  ;;  %543 = vmatprep.mubr.f32.mxu0 %v16806_v20 }
  0x5a   :  { %581 = vmatpush1.msra.mxu1 %v9825_v1  ;;  %614 = vmatprep.mubr.f32.mxu1 %v16806_v20 }
  0x5b   :  { %544 = vmatmul.mubr.f32.vlgmr.msra.gmra.mxu0 %v16806_v20  ;;  %615 = vmatmul.mubr.f32.vlgmr.msra.gmra.mxu1 %v16806_v20 }
  0x5c   :  { %654 = vmatprep.subr.mxu0 %v9415_v2  ;;  %725 = vmatprep.subr.mxu1 %v9420_v4 }
  0x5d   :  { %655 = vmatpush1.msra.mxu0 %v9425_v5  ;;  %726 = vmatpush1.msra.mxu1 %v9430_v6 }
  0x5e   :  { %656 = vmatprep.subr.mxu0 %v9435_v7  ;;  %727 = vmatprep.subr.mxu1 %v9440_v8 }
  0x5f   :  { %657 = vmatpush1.msra.mxu0 %v9449_v9  ;;  %728 = vmatpush1.msra.mxu1 %v9454_v10 }
  0x60   :  { %658 = vmatprep.subr.mxu0 %v9466_v12  ;;  %729 = vmatprep.subr.mxu1 %v9471_v13 }
  0x61   :  { %659 = vmatpush1.msra.mxu0 %v9478_v14  ;;  %730 = vmatpush1.msra.mxu1 %v9483_v15 }
  0x62   :  { %660 = vmatprep.subr.mxu0 %v9488_v16  ;;  %731 = vmatprep.subr.mxu1 %v9493_v17 }
  0x63   :  { %661 = vmatpush1.msra.mxu0 %v9502_v18  ;;  %732 = vmatpush1.msra.mxu1 %v9507_v19 }
  0x64   :  { %662 = vmatprep.subr.mxu0 %v9519_v21  ;;  %733 = vmatprep.subr.mxu1 %v9524_v22 }
  0x65   :  { %663 = vmatpush1.msra.mxu0 %v9531_v23  ;;  %734 = vmatpush1.msra.mxu1 %v9536_v24 }
  0x66   :  { %664 = vmatprep.subr.mxu0 %v9541_v25  ;;  %735 = vmatprep.subr.mxu1 %v9546_v26 }
  0x67   :  { %665 = vmatpush1.msra.mxu0 %v9555_v27  ;;  %736 = vmatpush1.msra.mxu1 %v9560_v28 }
  0x68   :  { %666 = vmatprep.subr.mxu0 %v9572_v30  ;;  %737 = vmatprep.subr.mxu1 %v9577_v31 }
  0x69   :  { %667 = vmatpush1.msra.mxu0 %v9584_v32  ;;  %738 = vmatpush1.msra.mxu1 %v9589_v33 }
  0x6a   :  { %668 = vmatprep.subr.mxu0 %v9594_v34  ;;  %739 = vmatprep.subr.mxu1 %v9599_v35 }
  0x6b   :  { %669 = vmatpush1.msra.mxu0 %v9608_v36  ;;  %740 = vmatpush1.msra.mxu1 %v9613_v37 }
  0x6c   :  { %670 = vmatprep.subr.mxu0 %v9625_v39  ;;  %741 = vmatprep.subr.mxu1 %v9630_v40 }
  0x6d   :  { %671 = vmatpush1.msra.mxu0 %v9637_v41  ;;  %742 = vmatpush1.msra.mxu1 %v9642_v42 }
  0x6e   :  { %672 = vmatprep.subr.mxu0 %v9647_v43  ;;  %743 = vmatprep.subr.mxu1 %v9652_v44 }
  0x6f   :  { %673 = vmatpush1.msra.mxu0 %v9661_v45  ;;  %744 = vmatpush1.msra.mxu1 %v9666_v46 }
  0x70   :  { %674 = vmatprep.subr.mxu0 %v9678_v48  ;;  %745 = vmatprep.subr.mxu1 %v9683_v49 }
  0x71   :  { %675 = vmatpush1.msra.mxu0 %v9690_v50  ;;  %746 = vmatpush1.msra.mxu1 %v9695_v51 }
  0x72   :  { %676 = vmatprep.subr.mxu0 %v9700_v52  ;;  %747 = vmatprep.subr.mxu1 %v9705_v53 }
  0x73   :  { %677 = vmatpush1.msra.mxu0 %v9714_v54  ;;  %748 = vmatpush1.msra.mxu1 %v9719_v55  ;;  %v16807_v54 = vld [vmem:[#allocation21_spill] sm:$0xff] }
  0x74   :  { %678 = vmatprep.subr.mxu0 %v9731_v57  ;;  %749 = vmatprep.subr.mxu1 %v9736_v58 }
  0x75   :  { %679 = vmatpush1.msra.mxu0 %v9743_v59  ;;  %750 = vmatpush1.msra.mxu1 %v9748_v60 }
  0x76   :  { %680 = vmatprep.subr.mxu0 %v9753_v61  ;;  %751 = vmatprep.subr.mxu1 %v9758_v62 }
  0x77   :  { %681 = vmatpush1.msra.mxu0 %v9767_v63  ;;  %752 = vmatpush1.msra.mxu1 %v9772_v0 }
  0x78   :  { %682 = vmatprep.subr.mxu0 %v9784_v11  ;;  %753 = vmatprep.subr.mxu1 %v16807_v54  ;;  %v133_v54 = vlaneseq }
  0x79   :  { %683 = vmatpush1.msra.mxu0 %v9796_v29  ;;  %754 = vmatpush1.msra.mxu1 %v9801_v38 }
  0x7a   :  { %684 = vmatprep.subr.mxu0 %v9806_v47  ;;  %755 = vmatprep.subr.mxu1 %v9811_v56  ;;  %v134_v29 = vshrl.u32 %v133_v54, 7 }
  0x7b   :  { %685 = vmatpush1.msra.mxu0 %v9818_v3  ;;  %718 = vmatprep.mubr.f32.mxu0 %v16806_v20  ;;  %v131_v3 = vld [vmem:[%s16224_s3] sm:$0xf] }
  0x7c   :  { %756 = vmatpush1.msra.mxu1 %v9825_v1  ;;  %789 = vmatprep.mubr.f32.mxu1 %v16806_v20  ;;  %v9905_v47 = vsub.s32 0, %v134_v29  ;;  %v9907_v56 = vsub.s32 2, %v134_v29 }
  0x7d   :  { %829 = vmatprep.subr.mxu0 %v9415_v2  ;;  %900 = vmatprep.subr.mxu1 %v9420_v4 }
  0x7e   :  { %16808 = vst [vmem:[#allocation28_spill] sm:$0xff] %v9905_v47  ;;  %16809 = vst [vmem:[#allocation29_spill] sm:$0xff] %v9907_v56  ;;  %v136_v20 = vrot.slane %v131_v3, %v9905_v47  ;;  %v144_v2 = vrot.slane %v131_v3, %v9907_v56 }
  0xeb   :  { %v219_v11 = vpop.f32.mrf.mxu0  ;;  %v9903_v38 = vpop.f32.mrf.mxu1 }
  0xed   :  { %v221_v1 = vpop.f32.mrf.mxu0  ;;  %v334_v0 = vpop.f32.mrf.mxu1 }
  0xf1   :  { %v225_v4 = vpop.f32.mrf.mxu0  ;;  %v338_v63 = vpop.f32.mrf.mxu1 }
  0xf2   :  { %v9914_v54 = vadd.f32 %v225_v4, %v136_v20  ;;  %v9916_v62 = vadd.f32 %v338_v63, %v144_v2 }
  0xf3   :  { %v9918_v61 = vpop.f32.mrf.mxu0  ;;  %v9920_v60 = vpop.f32.mrf.mxu1 }
  0xf4   :  { %16810 = vst [vmem:[#allocation30_spill] sm:$0xff] %v9914_v54  ;;  %16811 = vst [vmem:[#allocation31_spill] sm:$0xff] %v9916_v62 }
  0xf5   :  { %16812 = vst [vmem:[#allocation32_spill] sm:$0xff] %v9918_v61  ;;  %16813 = vst [vmem:[#allocation33_spill] sm:$0xff] %v9920_v60 }
  0xf7   :  { %v231_v59 = vpop.f32.mrf.mxu0  ;;  %v344_v58 = vpop.f32.mrf.mxu1 }
  0xf8   :  { %v9922_v57 = vadd.f32 %v231_v59, %v136_v20  ;;  %v9924_v55 = vadd.f32 %v344_v58, %v144_v2 }
  0xf9   :  { %v9926_v53 = vpop.f32.mrf.mxu0  ;;  %v9928_v47 = vpop.f32.mrf.mxu1 }
  0xfa   :  { %16814 = vst [vmem:[#allocation34_spill] sm:$0xff] %v9922_v57  ;;  %16815 = vst [vmem:[#allocation35_spill] sm:$0xff] %v9924_v55 }
  0xfb   :  { %16816 = vst [vmem:[#allocation36_spill] sm:$0xff] %v9926_v53  ;;  %16817 = vst [vmem:[#allocation37_spill] sm:$0xff] %v9928_v47 }
  0xfd   :  { %v237_v56 = vpop.f32.mrf.mxu0  ;;  %v350_v52 = vpop.f32.mrf.mxu1 }
  0xfe   :  { %v9930_v4 = vadd.f32 %v237_v56, %v136_v20  ;;  %v9932_v63 = vadd.f32 %v350_v52, %v144_v2 }
  0xff   :  { %v9934_v62 = vpop.f32.mrf.mxu0  ;;  %v9936_v54 = vpop.f32.mrf.mxu1 }
 0x100   :  { %16818 = vst [vmem:[#allocation38_spill] sm:$0xff] %v9930_v4  ;;  %16819 = vst [vmem:[#allocation39_spill] sm:$0xff] %v9932_v63 }
 0x101   :  { %16820 = vst [vmem:[#allocation40_spill] sm:$0xff] %v9934_v62  ;;  %16821 = vst [vmem:[#allocation41_spill] sm:$0xff] %v9936_v54 }
 0x103   :  { %v243_v60 = vpop.f32.mrf.mxu0  ;;  %v356_v61 = vpop.f32.mrf.mxu1 }
 0x104   :  { %v9938_v59 = vadd.f32 %v243_v60, %v136_v20  ;;  %v9940_v58 = vadd.f32 %v356_v61, %v144_v2 }
 0x105   :  { %v9942_v55 = vpop.f32.mrf.mxu0  ;;  %v9944_v57 = vpop.f32.mrf.mxu1 }
 0x106   :  { %16822 = vst [vmem:[#allocation42_spill] sm:$0xff] %v9938_v59  ;;  %16823 = vst [vmem:[#allocation43_spill] sm:$0xff] %v9940_v58 }
 0x107   :  { %16824 = vst [vmem:[#allocation44_spill] sm:$0xff] %v9942_v55  ;;  %16825 = vst [vmem:[#allocation45_spill] sm:$0xff] %v9944_v57  ;;  %v9962_v57 = vsub.s32 1, %v134_v29 }
 0x109   :  { %v249_v47 = vpop.f32.mrf.mxu0  ;;  %v362_v53 = vpop.f32.mrf.mxu1  ;;  %16834 = vst [vmem:[#allocation54_spill] sm:$0xff] %v9962_v57 }
 0x10a   :  { %v9946_v56 = vadd.f32 %v249_v47, %v136_v20  ;;  %v9948_v52 = vadd.f32 %v362_v53, %v144_v2 }
 0x10b   :  { %v9950_v63 = vpop.f32.mrf.mxu0  ;;  %v9952_v4 = vpop.f32.mrf.mxu1 }
 0x10c   :  { %16826 = vst [vmem:[#allocation46_spill] sm:$0xff] %v9946_v56  ;;  %16827 = vst [vmem:[#allocation47_spill] sm:$0xff] %v9948_v52 }
 0x10d   :  { %16828 = vst [vmem:[#allocation48_spill] sm:$0xff] %v9950_v63  ;;  %16829 = vst [vmem:[#allocation49_spill] sm:$0xff] %v9952_v4  ;;  %v9971_v4 = vrot.slane %v131_v3, %v9962_v57 }
 0x10f   :  { %v255_v54 = vpop.f32.mrf.mxu0  ;;  %v368_v62 = vpop.f32.mrf.mxu1  ;;  %16838 = vst [vmem:[#allocation58_spill] sm:$0xff] %v9971_v4 }
 0x110   :  { %v9954_v60 = vadd.f32 %v255_v54, %v136_v20  ;;  %v9956_v61 = vadd.f32 %v368_v62, %v144_v2  ;;  %v220_v54 = vadd.f32 %v219_v11, %v136_v20 }
 0x111   :  { %v9958_v58 = vpop.f32.mrf.mxu0  ;;  %v9960_v59 = vpop.f32.mrf.mxu1 }
 0x112   :  { %16830 = vst [vmem:[#allocation50_spill] sm:$0xff] %v9954_v60  ;;  %16831 = vst [vmem:[#allocation51_spill] sm:$0xff] %v9956_v61  ;;  %v222_v61 = vadd.f32 %v221_v1, %v9971_v4  ;;  %v333_v1 = vadd.f32 %v9903_v38, %v144_v2 }
 0x113   :  { %16832 = vst [vmem:[#allocation52_spill] sm:$0xff] %v9958_v58  ;;  %16833 = vst [vmem:[#allocation53_spill] sm:$0xff] %v9960_v59  ;;  %v9976_v58 = vsub.s32 3, %v134_v29 }
 0x115   :  { %v261_v47 = vpop.f32.mrf.mxu0  ;;  %v374_v56 = vpop.f32.mrf.mxu1  ;;  %16840 = vst [vmem:[#allocation60_spill] sm:$0xff] %v9976_v58 }
 0x116   :  { %v9964_v53 = vadd.f32 %v261_v47, %v136_v20  ;;  %v9966_v52 = vadd.f32 %v374_v56, %v144_v2 }
 0x117   :  { %v9968_v63 = vpop.f32.mrf.mxu0  ;;  %v9974_v60 = vpop.f32.mrf.mxu1 }
 0x118   :  { %16835 = vst [vmem:[#allocation55_spill] sm:$0xff] %v9964_v53  ;;  %16836 = vst [vmem:[#allocation56_spill] sm:$0xff] %v9966_v52  ;;  %v9979_v53 = vrot.slane %v131_v3, %v9976_v58  ;;  %v16862_v58 = vld [vmem:[#allocation26_spill] sm:$0xff] }
 0x119   :  { %16837 = vst [vmem:[#allocation57_spill] sm:$0xff] %v9968_v63  ;;  %16839 = vst [vmem:[#allocation59_spill] sm:$0xff] %v9974_v60 }
 0x11a   :  { %16841 = vst [vmem:[#allocation61_spill] sm:$0xff] %v9979_v53  ;;  %v335_v11 = vadd.f32 %v334_v0, %v9979_v53 }
 0x11b   :  { %v545_v62 = vpop.f32.mrf.mxu0  ;;  %v616_v56 = vpop.f32.mrf.mxu1 }
 0x11c   :  { %v621_v59 = vadd.f32 %v545_v62, %v220_v54  ;;  %v623_v29 = vadd.f32 %v616_v56, %v333_v1  ;;  %v16847_v1 = vld [vmem:[#allocation11_spill] sm:$0xff] }
 0x11d   :  { %v547_v55 = vpop.f32.mrf.mxu0  ;;  %v618_v57 = vpop.f32.mrf.mxu1 }
 0x11e   :  { %v8134_v51 = vmul.f32 -1.442695, %v621_v59  ;;  %v622_v47 = vadd.f32 %v547_v55, %v222_v61  ;;  %v624_v20 = vadd.f32 %v618_v57, %v335_v11  ;;  %v16845_v11 = vld [vmem:[#allocation9_spill] sm:$0xff] }
 0x120   :  { %8338 = vpow2.f32 %v8134_v51  ;;  %v8135_v52 = vmul.f32 -1.442695, %v622_v47  ;;  %v8136_v60 = vmul.f32 -1.442695, %v624_v20  ;;  %v16846_v20 = vld [vmem:[#allocation10_spill] sm:$0xff] }
 0x122   :  { %8340 = vpow2.f32 %v8135_v52 }
 0x123   :  { %8342 = vpow2.f32 %v8136_v60  ;;  %v16844_v60 = vld [vmem:[#allocation8_spill] sm:$0xff] }
 0x12d   :  { %v8339_v54 = vpop.eup %8338 }
 0x12e   :  { %v628_v62 = vadd.f32 1.0, %v8339_v54  ;;  %v16848_v54 = vld [vmem:[#allocation12_spill] sm:$0xff] }
 0x12f   :  { %v8341_v63 = vpop.eup %8340 }
 0x130   :  { %8344 = vrcp.f32 %v628_v62  ;;  %v634_v51 = vadd.f32 1.0, %v8341_v63  ;;  %v8343_v55 = vpop.eup %8342  ;;  %v16843_v63 = vld [vmem:[#allocation7_spill] sm:$0xff]  ;;  %v16850_v62 = vld [vmem:[#allocation14_spill] sm:$0xff] }
 0x131   :  { %8346 = vtanh.f32 %v623_v29  ;;  %v641_v61 = vadd.f32 1.0, %v8343_v55  ;;  %v16849_v29 = vld [vmem:[#allocation13_spill] sm:$0xff]  ;;  %v16852_v55 = vld [vmem:[#allocation16_spill] sm:$0xff] }
 0x132   :  { %8348 = vrcp.f32 %v634_v51  ;;  %v16851_v51 = vld [vmem:[#allocation15_spill] sm:$0xff] }
 0x133   :  { %8350 = vrcp.f32 %v641_v61  ;;  %v16856_v61 = vld [vmem:[#allocation20_spill] sm:$0xff] }
 0x13d   :  { %v8345_v3 = vpop.eup %8344 }
 0x13e   :  { %v8347_v59 = vpop.eup %8346 }
 0x13f   :  { %v8349_v52 = vpop.eup %8348  ;;  %v645_v0 = vmul.f32 %v8347_v59, %v8345_v3  ;;  %v16853_v3 = vld [vmem:[#allocation17_spill] sm:$0xff]  ;;  %v16854_v59 = vld [vmem:[#allocation18_spill] sm:$0xff] }
 0x140   :  { %v644_v47 = vmul.f32 0.0, %v8349_v52  ;;  %v8351_v2 = vpop.eup %8350  ;;  %v16855_v52 = vld [vmem:[#allocation19_spill] sm:$0xff] }
 0x142   :  { %v9983_v57 = vadd.f32 %v645_v0, %v644_v47  ;;  %v16857_v47 = vld [vmem:[#allocation21_spill] sm:$0xff]  ;;  %v16858_v0 = vld [vmem:[#allocation22_spill] sm:$0xff] }
 0x144   :  { %8352 = vtanh.f32 %v9983_v57 }
 0x151   :  { %v8353_v38 = vpop.eup %8352 }
 0x152   :  { %v9986_v56 = vmul.f32 %v8353_v38, %v8351_v2  ;;  %v16859_v2 = vld [vmem:[#allocation23_spill] sm:$0xff]  ;;  %v16860_v38 = vld [vmem:[#allocation24_spill] sm:$0xff] }
 0x154   :  { %16842 = vst [vmem:[#allocation62_spill] sm:$0xff] %v9986_v56  ;;  %719 = vmatmul.mubr.f32.vlgmr.msra.gmra.mxu0 %v9986_v56  ;;  %790 = vmatmul.mubr.f32.vlgmr.msra.gmra.mxu1 %v9986_v56  ;;  %v16861_v56 = vld [vmem:[#allocation25_spill] sm:$0xff] }
 0x155   :  { %830 = vmatpush1.msra.mxu0 %v9425_v5  ;;  %901 = vmatpush1.msra.mxu1 %v9430_v6 }
 0x156   :  { %831 = vmatprep.subr.mxu0 %v9435_v7  ;;  %902 = vmatprep.subr.mxu1 %v9440_v8 }
 0x157   :  { %832 = vmatpush1.msra.mxu0 %v9449_v9  ;;  %903 = vmatpush1.msra.mxu1 %v9454_v10 }
 0x158   :  { %833 = vmatprep.subr.mxu0 %v9466_v12  ;;  %904 = vmatprep.subr.mxu1 %v9471_v13 }
 0x159   :  { %834 = vmatpush1.msra.mxu0 %v9478_v14  ;;  %905 = vmatpush1.msra.mxu1 %v9483_v15 }
 0x15a   :  { %835 = vmatprep.subr.mxu0 %v9488_v16  ;;  %906 = vmatprep.subr.mxu1 %v9493_v17 }
 0x15b   :  { %836 = vmatpush1.msra.mxu0 %v9502_v18  ;;  %907 = vmatpush1.msra.mxu1 %v9507_v19 }
 0x15c   :  { %837 = vmatprep.subr.mxu0 %v9519_v21  ;;  %908 = vmatprep.subr.mxu1 %v9524_v22 }
 0x15d   :  { %838 = vmatpush1.msra.mxu0 %v9531_v23  ;;  %909 = vmatpush1.msra.mxu1 %v9536_v24 }
 0x15e   :  { %839 = vmatprep.subr.mxu0 %v9541_v25  ;;  %910 = vmatprep.subr.mxu1 %v9546_v26 }
 0x15f   :  { %840 = vmatpush1.msra.mxu0 %v9555_v27  ;;  %911 = vmatpush1.msra.mxu1 %v9560_v28 }
 0x160   :  { %841 = vmatprep.subr.mxu0 %v9572_v30  ;;  %912 = vmatprep.subr.mxu1 %v9577_v31 }
 0x161   :  { %842 = vmatpush1.msra.mxu0 %v9584_v32  ;;  %913 = vmatpush1.msra.mxu1 %v9589_v33 }
 0x162   :  { %843 = vmatprep.subr.mxu0 %v9594_v34  ;;  %914 = vmatprep.subr.mxu1 %v9599_v35 }
 0x163   :  { %844 = vmatpush1.msra.mxu0 %v9608_v36  ;;  %915 = vmatpush1.msra.mxu1 %v9613_v37 }
 0x164   :  { %845 = vmatprep.subr.mxu0 %v9625_v39  ;;  %916 = vmatprep.subr.mxu1 %v9630_v40 }
 0x165   :  { %846 = vmatpush1.msra.mxu0 %v9637_v41  ;;  %917 = vmatpush1.msra.mxu1 %v9642_v42 }
 0x166   :  { %847 = vmatprep.subr.mxu0 %v9647_v43  ;;  %918 = vmatprep.subr.mxu1 %v9652_v44 }
 0x167   :  { %848 = vmatpush1.msra.mxu0 %v9661_v45  ;;  %919 = vmatpush1.msra.mxu1 %v9666_v46 }
 0x168   :  { %849 = vmatprep.subr.mxu0 %v9678_v48  ;;  %920 = vmatprep.subr.mxu1 %v9683_v49 }
 0x169   :  { %850 = vmatpush1.msra.mxu0 %v9690_v50  ;;  %921 = vmatpush1.msra.mxu1 %v16843_v63 }
 0x16a   :  { %851 = vmatprep.subr.mxu0 %v16844_v60  ;;  %922 = vmatprep.subr.mxu1 %v16845_v11 }
 0x16b   :  { %852 = vmatpush1.msra.mxu0 %v16846_v20  ;;  %923 = vmatpush1.msra.mxu1 %v16847_v1  ;;  %v16870_v1 = vld [vmem:[#allocation31_spill] sm:$0xff] }
 0x16c   :  { %853 = vmatprep.subr.mxu0 %v16848_v54  ;;  %924 = vmatprep.subr.mxu1 %v16849_v29 }
 0x16d   :  { %854 = vmatpush1.msra.mxu0 %v16850_v62  ;;  %925 = vmatpush1.msra.mxu1 %v16851_v51 }
 0x16e   :  { %855 = vmatprep.subr.mxu0 %v16852_v55  ;;  %926 = vmatprep.subr.mxu1 %v16853_v3  ;;  %v16863_v55 = vmov 0.0   ;;  %v16864_v3 = vld [vmem:[#allocation27_spill] sm:$0xff] }
 0x16f   :  { %856 = vmatpush1.msra.mxu0 %v16854_v59  ;;  %927 = vmatpush1.msra.mxu1 %v16855_v52  ;;  %v16865_v52 = vld [vmem:[#allocation5_spill] sm:$0xff]  ;;  %v16868_v59 = vld [vmem:[#allocation30_spill] sm:$0xff] }
 0x170   :  { %857 = vmatprep.subr.mxu0 %v16856_v61  ;;  %928 = vmatprep.subr.mxu1 %v16857_v47  ;;  %v16866_v61 = vld [vmem:[#allocation6_spill] sm:$0xff] }
 0x171   :  { %858 = vmatpush1.msra.mxu0 %v16858_v0  ;;  %929 = vmatpush1.msra.mxu1 %v16859_v2  ;;  %v16867_v0 = vld [vmem:[#allocation32_spill] sm:$0xff] }
 0x172   :  { %859 = vmatprep.subr.mxu0 %v16860_v38  ;;  %930 = vmatprep.subr.mxu1 %v16861_v56  ;;  %v228_v2 = vadd.f32 %v16867_v0, %v9971_v4 }
 0x173   :  { %860 = vmatpush1.msra.mxu0 %v16862_v58  ;;  %893 = vmatprep.mubr.f32.mxu0 %v16863_v55 }
 0x174   :  { %931 = vmatpush1.msra.mxu1 %v16864_v3  ;;  %964 = vmatprep.mubr.f32.mxu1 %v16863_v55  ;;  %v16869_v55 = vld [vmem:[#allocation33_spill] sm:$0xff] }
 0x175   :  { %1004 = vmatprep.subr.mxu0 %v16865_v52  ;;  %1075 = vmatprep.subr.mxu1 %v16866_v61  ;;  %v341_v54 = vadd.f32 %v16869_v55, %v9979_v53 }
 0x214   :  { %v720_v47 = vpop.f32.mrf.mxu0  ;;  %v791_v58 = vpop.f32.mrf.mxu1 }
 0x215   :  { %v796_v38 = vadd.f32 %v720_v47, %v16868_v59  ;;  %v798_v61 = vadd.f32 %v791_v58, %v16870_v1 }
 0x216   :  { %v722_v51 = vpop.f32.mrf.mxu0  ;;  %v793_v3 = vpop.f32.mrf.mxu1 }
 0x217   :  { %v8137_v56 = vmul.f32 -1.442695, %v796_v38  ;;  %v797_v62 = vadd.f32 %v722_v51, %v228_v2  ;;  %v799_v52 = vadd.f32 %v793_v3, %v341_v54  ;;  %v16896_v38 = vld [vmem:[#allocation34_spill] sm:$0xff] }
 0x219   :  { %8354 = vpow2.f32 %v8137_v56  ;;  %v8138_v29 = vmul.f32 -1.442695, %v797_v62  ;;  %v8139_v20 = vmul.f32 -1.442695, %v799_v52  ;;  %v16895_v52 = vld [vmem:[#allocation36_spill] sm:$0xff] }
 0x21b   :  { %8356 = vpow2.f32 %v8138_v29 }
 0x21c   :  { %8358 = vtanh.f32 %v798_v61  ;;  %v234_v61 = vadd.f32 %v16895_v52, %v9971_v4 }
 0x21d   :  { %8360 = vpow2.f32 %v8139_v20  ;;  %v16894_v20 = vld [vmem:[#allocation6_spill] sm:$0xff] }
 0x226   :  { %v8355_v11 = vpop.eup %8354 }
 0x227   :  { %v803_v60 = vadd.f32 1.0, %v8355_v11 }
 0x228   :  { %v8357_v0 = vpop.eup %8356 }
 0x229   :  { %8362 = vrcp.f32 %v803_v60  ;;  %v809_v59 = vadd.f32 1.0, %v8357_v0  ;;  %v8359_v56 = vpop.eup %8358  ;;  %v16893_v60 = vld [vmem:[#allocation5_spill] sm:$0xff] }
 0x22a   :  { %v8361_v51 = vpop.eup %8360 }
 0x22b   :  { %8364 = vrcp.f32 %v809_v59  ;;  %v816_v2 = vadd.f32 1.0, %v8361_v51 }
 0x22d   :  { %8366 = vrcp.f32 %v816_v2  ;;  %v16897_v2 = vld [vmem:[#allocation37_spill] sm:$0xff] }
 0x236   :  { %v8363_v62 = vpop.eup %8362 }
 0x237   :  { %v820_v29 = vmul.f32 %v8363_v62, %v8359_v56 }
 0x238   :  { %v8365_v47 = vpop.eup %8364 }
 0x239   :  { %v819_v55 = vmul.f32 %v8365_v47, %v9983_v57  ;;  %v16892_v57 = vld [vmem:[#allocation27_spill] sm:$0xff] }
 0x23a   :  { %v8367_v58 = vpop.eup %8366 }
 0x23b   :  { %v10063_v54 = vadd.f32 %v820_v29, %v819_v55  ;;  %v347_v55 = vadd.f32 %v16897_v2, %v9979_v53 }
 0x23d   :  { %8368 = vtanh.f32 %v10063_v54 }
 0x24a   :  { %v8369_v11 = vpop.eup %8368 }
 0x24b   :  { %v10066_v1 = vmul.f32 %v8369_v11, %v8367_v58  ;;  %v16898_v11 = vld [vmem:[#allocation35_spill] sm:$0xff] }
 0x24d   :  { %16871 = vst [vmem:[#allocation7_spill] sm:$0xff] %v10066_v1  ;;  %894 = vmatmul.mubr.f32.vlgmr.msra.gmra.mxu0 %v10066_v1  ;;  %965 = vmatmul.mubr.f32.vlgmr.msra.gmra.mxu1 %v10066_v1 }
 0x24e   :  { %1005 = vmatpush1.msra.mxu0 %v9425_v5  ;;  %1076 = vmatpush1.msra.mxu1 %v9430_v6  ;;  %v16872_v5 = vld [vmem:[#allocation8_spill] sm:$0xff]  ;;  %v16873_v6 = vld [vmem:[#allocation9_spill] sm:$0xff] }
 0x24f   :  { %1006 = vmatprep.subr.mxu0 %v9435_v7  ;;  %1077 = vmatprep.subr.mxu1 %v9440_v8  ;;  %v16874_v7 = vld [vmem:[#allocation10_spill] sm:$0xff]  ;;  %v16875_v8 = vld [vmem:[#allocation11_spill] sm:$0xff] }
 0x250   :  { %1007 = vmatpush1.msra.mxu0 %v9449_v9  ;;  %1078 = vmatpush1.msra.mxu1 %v9454_v10  ;;  %v16876_v9 = vld [vmem:[#allocation12_spill] sm:$0xff]  ;;  %v16877_v10 = vld [vmem:[#allocation13_spill] sm:$0xff] }
 0x251   :  { %1008 = vmatprep.subr.mxu0 %v9466_v12  ;;  %1079 = vmatprep.subr.mxu1 %v9471_v13  ;;  %v16878_v12 = vld [vmem:[#allocation14_spill] sm:$0xff]  ;;  %v16879_v13 = vld [vmem:[#allocation15_spill] sm:$0xff] }
 0x252   :  { %1009 = vmatpush1.msra.mxu0 %v9478_v14  ;;  %1080 = vmatpush1.msra.mxu1 %v9483_v15  ;;  %v16880_v14 = vld [vmem:[#allocation16_spill] sm:$0xff]  ;;  %v16881_v15 = vld [vmem:[#allocation17_spill] sm:$0xff] }
 0x253   :  { %1010 = vmatprep.subr.mxu0 %v9488_v16  ;;  %1081 = vmatprep.subr.mxu1 %v9493_v17  ;;  %v16882_v16 = vld [vmem:[#allocation18_spill] sm:$0xff]  ;;  %v16883_v17 = vld [vmem:[#allocation19_spill] sm:$0xff] }
 0x254   :  { %1011 = vmatpush1.msra.mxu0 %v9502_v18  ;;  %1082 = vmatpush1.msra.mxu1 %v9507_v19  ;;  %v16884_v18 = vld [vmem:[#allocation20_spill] sm:$0xff]  ;;  %v16885_v19 = vld [vmem:[#allocation21_spill] sm:$0xff] }
 0x255   :  { %1012 = vmatprep.subr.mxu0 %v9519_v21  ;;  %1083 = vmatprep.subr.mxu1 %v9524_v22  ;;  %v16886_v21 = vld [vmem:[#allocation22_spill] sm:$0xff]  ;;  %v16887_v22 = vld [vmem:[#allocation23_spill] sm:$0xff] }
 0x256   :  { %1013 = vmatpush1.msra.mxu0 %v9531_v23  ;;  %1084 = vmatpush1.msra.mxu1 %v9536_v24  ;;  %v16888_v23 = vld [vmem:[#allocation24_spill] sm:$0xff]  ;;  %v16889_v24 = vld [vmem:[#allocation25_spill] sm:$0xff] }
 0x257   :  { %1014 = vmatprep.subr.mxu0 %v9541_v25  ;;  %1085 = vmatprep.subr.mxu1 %v9546_v26  ;;  %v16890_v25 = vld [vmem:[#allocation26_spill] sm:$0xff]  ;;  %v16891_v26 = vmov 0.0  }
 0x258   :  { %1015 = vmatpush1.msra.mxu0 %v9555_v27  ;;  %1086 = vmatpush1.msra.mxu1 %v9560_v28 }
 0x259   :  { %1016 = vmatprep.subr.mxu0 %v9572_v30  ;;  %1087 = vmatprep.subr.mxu1 %v9577_v31 }
 0x25a   :  { %1017 = vmatpush1.msra.mxu0 %v9584_v32  ;;  %1088 = vmatpush1.msra.mxu1 %v9589_v33 }
 0x25b   :  { %1018 = vmatprep.subr.mxu0 %v9594_v34  ;;  %1089 = vmatprep.subr.mxu1 %v9599_v35 }
 0x25c   :  { %1019 = vmatpush1.msra.mxu0 %v9608_v36  ;;  %1090 = vmatpush1.msra.mxu1 %v9613_v37 }
 0x25d   :  { %1020 = vmatprep.subr.mxu0 %v9625_v39  ;;  %1091 = vmatprep.subr.mxu1 %v9630_v40 }
 0x25e   :  { %1021 = vmatpush1.msra.mxu0 %v9637_v41  ;;  %1092 = vmatpush1.msra.mxu1 %v9642_v42 }
 0x25f   :  { %1022 = vmatprep.subr.mxu0 %v9647_v43  ;;  %1093 = vmatprep.subr.mxu1 %v9652_v44 }
 0x260   :  { %1023 = vmatpush1.msra.mxu0 %v9661_v45  ;;  %1094 = vmatpush1.msra.mxu1 %v9666_v46 }
 0x261   :  { %1024 = vmatprep.subr.mxu0 %v9678_v48  ;;  %1095 = vmatprep.subr.mxu1 %v9683_v49 }
 0x262   :  { %1025 = vmatpush1.msra.mxu0 %v9690_v50  ;;  %1096 = vmatpush1.msra.mxu1 %v16843_v63 }
 0x263   :  { %1026 = vmatprep.subr.mxu0 %v16872_v5  ;;  %1097 = vmatprep.subr.mxu1 %v16873_v6 }
 0x264   :  { %1027 = vmatpush1.msra.mxu0 %v16874_v7  ;;  %1098 = vmatpush1.msra.mxu1 %v16875_v8 }
 0x265   :  { %1028 = vmatprep.subr.mxu0 %v16876_v9  ;;  %1099 = vmatprep.subr.mxu1 %v16877_v10 }
 0x266   :  { %1029 = vmatpush1.msra.mxu0 %v16878_v12  ;;  %1100 = vmatpush1.msra.mxu1 %v16879_v13 }
 0x267   :  { %1030 = vmatprep.subr.mxu0 %v16880_v14  ;;  %1101 = vmatprep.subr.mxu1 %v16881_v15 }
 0x268   :  { %1031 = vmatpush1.msra.mxu0 %v16882_v16  ;;  %1102 = vmatpush1.msra.mxu1 %v16883_v17 }
 0x269   :  { %1032 = vmatprep.subr.mxu0 %v16884_v18  ;;  %1103 = vmatprep.subr.mxu1 %v16885_v19 }
 0x26a   :  { %1033 = vmatpush1.msra.mxu0 %v16886_v21  ;;  %1104 = vmatpush1.msra.mxu1 %v16887_v22 }
 0x26b   :  { %1034 = vmatprep.subr.mxu0 %v16888_v23  ;;  %1105 = vmatprep.subr.mxu1 %v16889_v24 }
 0x26c   :  { %1035 = vmatpush1.msra.mxu0 %v16890_v25  ;;  %1068 = vmatprep.mubr.f32.mxu0 %v16891_v26 }
 0x26d   :  { %1106 = vmatpush1.msra.mxu1 %v16892_v57  ;;  %1139 = vmatprep.mubr.f32.mxu1 %v16891_v26 }
 0x26e   :  { %1179 = vmatprep.subr.mxu0 %v16893_v60  ;;  %1250 = vmatprep.subr.mxu1 %v16894_v20 }
 0x30d   :  { %v895_v3 = vpop.f32.mrf.mxu0  ;;  %v966_v62 = vpop.f32.mrf.mxu1 }
 0x30e   :  { %v971_v0 = vadd.f32 %v895_v3, %v16896_v38  ;;  %v973_v60 = vadd.f32 %v966_v62, %v16898_v11  ;;  %v10177_v11 = vld [vmem:[%s16782_s21 + $0x1c0] sm:$0xff] }
 0x30f   :  { %v897_v59 = vpop.f32.mrf.mxu0  ;;  %v968_v47 = vpop.f32.mrf.mxu1 }
 0x310   :  { %v8140_v56 = vmul.f32 -1.442695, %v971_v0  ;;  %v972_v51 = vadd.f32 %v897_v59, %v234_v61  ;;  %v974_v58 = vadd.f32 %v968_v47, %v347_v55  ;;  %v10165_v55 = vld [vmem:[%s16782_s21 + $0x1c8] sm:$0xff] }
 0x312   :  { %8370 = vpow2.f32 %v8140_v56  ;;  %v8141_v29 = vmul.f32 -1.442695, %v972_v51  ;;  %v8142_v20 = vmul.f32 -1.442695, %v974_v58  ;;  %v10171_v58 = vld [vmem:[%s16782_s21 + $0x1d8] sm:$0xff] }
 0x314   :  { %8372 = vpow2.f32 %v8141_v29 }
 0x315   :  { %8374 = vtanh.f32 %v973_v60  ;;  %v10183_v60 = vld [vmem:[%s16782_s21 + $0x1d0] sm:$0xff] }
 0x316   :  { %8376 = vpow2.f32 %v8142_v20  ;;  %v10189_v20 = vld [vmem:[%s16782_s21 + $0x1a8] sm:$0xff] }
 0x31f   :  { %v8371_v1 = vpop.eup %8370 }
 0x320   :  { %v978_v57 = vadd.f32 1.0, %v8371_v1 }
 0x321   :  { %v8373_v52 = vpop.eup %8372 }
 0x322   :  { %8378 = vrcp.f32 %v978_v57  ;;  %v984_v3 = vadd.f32 1.0, %v8373_v52  ;;  %v8375_v61 = vpop.eup %8374  ;;  %v10153_v57 = vld [vmem:[%s16782_s21 + $0x1e0] sm:$0xff]  ;;  %v10195_v52 = vld [vmem:[%s16782_s21 + $0x1b8] sm:$0xff] }
 0x323   :  { %v8377_v38 = vpop.eup %8376 }
 0x324   :  { %8380 = vrcp.f32 %v984_v3  ;;  %v991_v51 = vadd.f32 1.0, %v8377_v38  ;;  %v10201_v3 = vld [vmem:[%s16782_s21 + $0x1a0] sm:$0xff]  ;;  %v10213_v38 = vld [vmem:[%s16782_s21 + $0x188] sm:$0xff] }
 0x326   :  { %8382 = vrcp.f32 %v991_v51  ;;  %v10237_v51 = vld [vmem:[%s16782_s21 + $0x168] sm:$0xff] }
 0x32f   :  { %v8379_v0 = vpop.eup %8378 }
 0x330   :  { %v995_v59 = vmul.f32 %v8379_v0, %v8375_v61  ;;  %v10207_v61 = vld [vmem:[%s16782_s21 + $0x1b0] sm:$0xff]  ;;  %v10219_v0 = vld [vmem:[%s16782_s21 + $0x198] sm:$0xff] }
 0x331   :  { %v8381_v56 = vpop.eup %8380 }
 0x332   :  { %v994_v29 = vmul.f32 %v8381_v56, %v10063_v54  ;;  %v10159_v54 = vld [vmem:[%s16782_s21 + $0x1f0] sm:$0xff] }
 0x333   :  { %v8383_v1 = vpop.eup %8382  ;;  %v10231_v56 = vld [vmem:[%s16782_s21 + $0x190] sm:$0xff] }
 0x334   :  { %v10143_v47 = vadd.f32 %v995_v59, %v994_v29  ;;  %v10225_v59 = vld [vmem:[%s16782_s21 + $0x180] sm:$0xff]  ;;  %v10243_v29 = vld [vmem:[%s16782_s21 + $0x178] sm:$0xff] }
 0x335   :  { %16900 = vst [vmem:[#allocation30_spill] sm:$0xff] %v10243_v29 }
 0x336   :  { %8384 = vtanh.f32 %v10143_v47 }
 0x343   :  { %v8385_v62 = vpop.eup %8384 }
 0x344   :  { %v10146_v2 = vmul.f32 %v8385_v62, %v8383_v1  ;;  %v10249_v1 = vld [vmem:[%s16782_s21 + $0x160] sm:$0xff]  ;;  %v10255_v62 = vld [vmem:[%s16782_s21 + $0x170] sm:$0xff] }
 0x346   :  { %16899 = vst [vmem:[#allocation32_spill] sm:$0xff] %v10146_v2  ;;  %1069 = vmatmul.mubr.f32.vlgmr.msra.gmra.mxu0 %v10146_v2  ;;  %1140 = vmatmul.mubr.f32.vlgmr.msra.gmra.mxu1 %v10146_v2  ;;  %v10261_v2 = vld [vmem:[%s16782_s21 + $0x148] sm:$0xff] }
 0x347   :  { %1180 = vmatpush1.msra.mxu0 %v10153_v57  ;;  %1251 = vmatpush1.msra.mxu1 %v10159_v54 }
 0x348   :  { %1181 = vmatprep.subr.mxu0 %v10165_v55  ;;  %1252 = vmatprep.subr.mxu1 %v10171_v58 }
 0x349   :  { %1182 = vmatpush1.msra.mxu0 %v10177_v11  ;;  %1253 = vmatpush1.msra.mxu1 %v10183_v60 }
 0x34a   :  { %1183 = vmatprep.subr.mxu0 %v10189_v20  ;;  %1254 = vmatprep.subr.mxu1 %v10195_v52 }
 0x34b   :  { %1184 = vmatpush1.msra.mxu0 %v10201_v3  ;;  %1255 = vmatpush1.msra.mxu1 %v10207_v61 }
 0x34c   :  { %1185 = vmatprep.subr.mxu0 %v10213_v38  ;;  %1256 = vmatprep.subr.mxu1 %v10219_v0 }
 0x34d   :  { %1186 = vmatpush1.msra.mxu0 %v10225_v59  ;;  %1257 = vmatpush1.msra.mxu1 %v10231_v56 }
 0x34e   :  { %1187 = vmatprep.subr.mxu0 %v10237_v51  ;;  %1258 = vmatprep.subr.mxu1 %v10243_v29  ;;  %v10267_v29 = vld [vmem:[%s16782_s21 + $0x158] sm:$0xff] }
 0x34f   :  { %1188 = vmatpush1.msra.mxu0 %v10249_v1  ;;  %1259 = vmatpush1.msra.mxu1 %v10255_v62 }
 0x350   :  { %1189 = vmatprep.subr.mxu0 %v10261_v2  ;;  %1260 = vmatprep.subr.mxu1 %v10267_v29 }
 0x351   :  { %1190 = vmatpush1.msra.mxu0 %v9555_v27  ;;  %1261 = vmatpush1.msra.mxu1 %v9560_v28  ;;  %v16901_v27 = vld [vmem:[#allocation27_spill] sm:$0xff]  ;;  %v10317_v28 = vld [vmem:[%s16782_s21 + $0x1e8] sm:$0xff] }
 0x352   :  { %1191 = vmatprep.subr.mxu0 %v9572_v30  ;;  %1262 = vmatprep.subr.mxu1 %v9577_v31  ;;  %16902 = vst [vmem:[#allocation33_spill] sm:$0xff] %v10317_v28  ;;  %v10323_v30 = vld [vmem:[%s16782_s21 + $0x1f8] sm:$0xff] }
 0x353   :  { %1192 = vmatpush1.msra.mxu0 %v9584_v32  ;;  %1263 = vmatpush1.msra.mxu1 %v9589_v33  ;;  %16903 = vst [vmem:[#allocation31_spill] sm:$0xff] %v10323_v30  ;;  %v16904_v32 = vld [vmem:[#allocation40_spill] sm:$0xff] }
 0x354   :  { %1193 = vmatprep.subr.mxu0 %v9594_v34  ;;  %1264 = vmatprep.subr.mxu1 %v9599_v35  ;;  %v240_v33 = vadd.f32 %v16904_v32, %v9971_v4  ;;  %v16905_v34 = vld [vmem:[#allocation38_spill] sm:$0xff]  ;;  %v10411_v32 = vld [vmem:[%s16782_s21 + $0x100] sm:$0xff] }
 0x355   :  { %1194 = vmatpush1.msra.mxu0 %v9608_v36  ;;  %1265 = vmatpush1.msra.mxu1 %v9613_v37 }
 0x356   :  { %1195 = vmatprep.subr.mxu0 %v9625_v39  ;;  %1266 = vmatprep.subr.mxu1 %v9630_v40 }
 0x357   :  { %1196 = vmatpush1.msra.mxu0 %v9637_v41  ;;  %1267 = vmatpush1.msra.mxu1 %v9642_v42 }
 0x358   :  { %1197 = vmatprep.subr.mxu0 %v9647_v43  ;;  %1268 = vmatprep.subr.mxu1 %v9652_v44  ;;  %v16906_v43 = vld [vmem:[#allocation41_spill] sm:$0xff] }
 0x359   :  { %1198 = vmatpush1.msra.mxu0 %v9661_v45  ;;  %1269 = vmatpush1.msra.mxu1 %v9666_v46  ;;  %v353_v44 = vadd.f32 %v16906_v43, %v9979_v53  ;;  %v16907_v46 = vld [vmem:[#allocation39_spill] sm:$0xff]  ;;  %v10471_v43 = vld [vmem:[%s16782_s21 + $0xa8] sm:$0xff] }
 0x35a   :  { %1199 = vmatprep.subr.mxu0 %v9678_v48  ;;  %1270 = vmatprep.subr.mxu1 %v9683_v49 }
 0x35b   :  { %1200 = vmatpush1.msra.mxu0 %v9690_v50  ;;  %1271 = vmatpush1.msra.mxu1 %v16843_v63 }
 0x35c   :  { %1201 = vmatprep.subr.mxu0 %v16872_v5  ;;  %1272 = vmatprep.subr.mxu1 %v16873_v6 }
 0x35d   :  { %1202 = vmatpush1.msra.mxu0 %v16874_v7  ;;  %1273 = vmatpush1.msra.mxu1 %v16875_v8 }
 0x35e   :  { %1203 = vmatprep.subr.mxu0 %v16876_v9  ;;  %1274 = vmatprep.subr.mxu1 %v16877_v10 }
 0x35f   :  { %1204 = vmatpush1.msra.mxu0 %v16878_v12  ;;  %1275 = vmatpush1.msra.mxu1 %v16879_v13 }
 0x360   :  { %1205 = vmatprep.subr.mxu0 %v16880_v14  ;;  %1276 = vmatprep.subr.mxu1 %v16881_v15 }
 0x361   :  { %1206 = vmatpush1.msra.mxu0 %v16882_v16  ;;  %1277 = vmatpush1.msra.mxu1 %v16883_v17 }
 0x362   :  { %1207 = vmatprep.subr.mxu0 %v16884_v18  ;;  %1278 = vmatprep.subr.mxu1 %v16885_v19  ;;  %v16909_v19 = vld [vmem:[#allocation30_spill] sm:$0xff] }
 0x363   :  { %1208 = vmatpush1.msra.mxu0 %v16886_v21  ;;  %1279 = vmatpush1.msra.mxu1 %v16887_v22  ;;  %v10363_v21 = vld [vmem:[%s16782_s21 + $0x140] sm:$0xff]  ;;  %v10369_v22 = vld [vmem:[%s16782_s21 + $0x150] sm:$0xff] }
 0x364   :  { %1209 = vmatprep.subr.mxu0 %v16888_v23  ;;  %1280 = vmatprep.subr.mxu1 %v16889_v24  ;;  %v10375_v23 = vld [vmem:[%s16782_s21 + $0x128] sm:$0xff]  ;;  %v10381_v24 = vld [vmem:[%s16782_s21 + $0x138] sm:$0xff] }
 0x365   :  { %1210 = vmatpush1.msra.mxu0 %v16890_v25  ;;  %1243 = vmatprep.mubr.f32.mxu0 %v16891_v26  ;;  %v10387_v25 = vld [vmem:[%s16782_s21 + $0x120] sm:$0xff] }
 0x366   :  { %1281 = vmatpush1.msra.mxu1 %v16901_v27  ;;  %1314 = vmatprep.mubr.f32.mxu1 %v16891_v26  ;;  %v10399_v27 = vld [vmem:[%s16782_s21 + $0x108] sm:$0xff] }
 0x367   :  { %1354 = vmatprep.subr.mxu0 %v10317_v28  ;;  %1425 = vmatprep.subr.mxu1 %v10323_v30 }
 0x406   :  { %v1070_v31 = vpop.f32.mrf.mxu0  ;;  %v1141_v40 = vpop.f32.mrf.mxu1 }
 0x407   :  { %v1146_v35 = vadd.f32 %v1070_v31, %v16905_v34  ;;  %v1148_v48 = vadd.f32 %v1141_v40, %v16907_v46  ;;  %v10405_v31 = vld [vmem:[%s16782_s21 + $0x118] sm:$0xff]  ;;  %v10423_v34 = vld [vmem:[%s16782_s21 + $0xe8] sm:$0xff]  ;;  %v10489_v46 = vld [vmem:[%s16782_s21 + $0xb0] sm:$0xff] }
 0x408   :  { %v1072_v36 = vpop.f32.mrf.mxu0  ;;  %v1143_v42 = vpop.f32.mrf.mxu1  ;;  %v10453_v40 = vld [vmem:[%s16782_s21 + $0xd8] sm:$0xff] }
 0x409   :  { %v8143_v37 = vmul.f32 -1.442695, %v1146_v35  ;;  %v1147_v39 = vadd.f32 %v1072_v36, %v240_v33  ;;  %v1149_v45 = vadd.f32 %v1143_v42, %v353_v44  ;;  %v10417_v33 = vld [vmem:[%s16782_s21 + $0x110] sm:$0xff]  ;;  %v10429_v35 = vld [vmem:[%s16782_s21 + $0xf8] sm:$0xff]  ;;  %v10435_v36 = vld [vmem:[%s16782_s21 + $0xe0] sm:$0xff] }
 0x40a   :  { %v10465_v42 = vld [vmem:[%s16782_s21 + $0xd0] sm:$0xff]  ;;  %v10477_v44 = vld [vmem:[%s16782_s21 + $0xb8] sm:$0xff] }
 0x40b   :  { %8386 = vpow2.f32 %v8143_v37  ;;  %v8144_v41 = vmul.f32 -1.442695, %v1147_v39  ;;  %v8145_v49 = vmul.f32 -1.442695, %v1149_v45  ;;  %v10441_v37 = vld [vmem:[%s16782_s21 + $0xf0] sm:$0xff]  ;;  %v10447_v39 = vld [vmem:[%s16782_s21 + $0xc8] sm:$0xff] }
 0x40c   :  { %v10483_v45 = vld [vmem:[%s16782_s21 + $0xa0] sm:$0xff] }
 0x40d   :  { %8388 = vpow2.f32 %v8144_v41  ;;  %v10459_v41 = vld [vmem:[%s16782_s21 + $0xc0] sm:$0xff] }
 0x40e   :  { %8390 = vtanh.f32 %v1148_v48  ;;  %v10495_v48 = vld [vmem:[%s16782_s21 + $0x88] sm:$0xff] }
 0x40f   :  { %8392 = vpow2.f32 %v8145_v49  ;;  %16910 = vst [vmem:[#allocation9_spill] sm:$0xff] %v10495_v48  ;;  %v10501_v49 = vld [vmem:[%s16782_s21 + $0x98] sm:$0xff] }
 0x410   :  { %16911 = vst [vmem:[#allocation10_spill] sm:$0xff] %v10501_v49 }
 0x418   :  { %v8387_v50 = vpop.eup %8386 }
 0x419   :  { %v1153_v63 = vadd.f32 1.0, %v8387_v50  ;;  %v10507_v50 = vld [vmem:[%s16782_s21 + $0x80] sm:$0xff] }
 0x41a   :  { %v8389_v5 = vpop.eup %8388  ;;  %16912 = vst [vmem:[#allocation11_spill] sm:$0xff] %v10507_v50 }
 0x41b   :  { %8394 = vrcp.f32 %v1153_v63  ;;  %v1159_v6 = vadd.f32 1.0, %v8389_v5  ;;  %v8391_v7 = vpop.eup %8390  ;;  %v10513_v63 = vld [vmem:[%s16782_s21 + $0x90] sm:$0xff]  ;;  %v10519_v5 = vld [vmem:[%s16782_s21 + $0x68] sm:$0xff] }
 0x41c   :  { %v8393_v8 = vpop.eup %8392  ;;  %16913 = vst [vmem:[#allocation12_spill] sm:$0xff] %v10513_v63  ;;  %16914 = vst [vmem:[#allocation13_spill] sm:$0xff] %v10519_v5 }
 0x41d   :  { %8396 = vrcp.f32 %v1159_v6  ;;  %v1166_v13 = vadd.f32 1.0, %v8393_v8  ;;  %v10525_v6 = vld [vmem:[%s16782_s21 + $0x78] sm:$0xff]  ;;  %v10537_v8 = vld [vmem:[%s16782_s21 + $0x70] sm:$0xff] }
 0x41e   :  { %16915 = vst [vmem:[#allocation14_spill] sm:$0xff] %v10525_v6  ;;  %16917 = vst [vmem:[#allocation16_spill] sm:$0xff] %v10537_v8 }
 0x41f   :  { %8398 = vrcp.f32 %v1166_v13  ;;  %v10561_v13 = vld [vmem:[%s16782_s21 + $0x50] sm:$0xff] }
 0x420   :  { %16921 = vst [vmem:[#allocation20_spill] sm:$0xff] %v10561_v13 }
 0x428   :  { %v8395_v9 = vpop.eup %8394 }
 0x429   :  { %v1170_v10 = vmul.f32 %v8395_v9, %v8391_v7  ;;  %v10531_v7 = vld [vmem:[%s16782_s21 + $0x60] sm:$0xff]  ;;  %v10543_v9 = vld [vmem:[%s16782_s21 + $0x48] sm:$0xff] }
 0x42a   :  { %v8397_v12 = vpop.eup %8396  ;;  %16916 = vst [vmem:[#allocation15_spill] sm:$0xff] %v10531_v7  ;;  %16918 = vst [vmem:[#allocation17_spill] sm:$0xff] %v10543_v9 }
 0x42b   :  { %v1169_v14 = vmul.f32 %v8397_v12, %v10143_v47  ;;  %v10393_v47 = vld [vmem:[%s16782_s21 + $0x130] sm:$0xff]  ;;  %v10555_v12 = vld [vmem:[%s16782_s21 + $0x40] sm:$0xff] }
 0x42c   :  { %v8399_v16 = vpop.eup %8398  ;;  %16920 = vst [vmem:[#allocation19_spill] sm:$0xff] %v10555_v12 }
 0x42d   :  { %v10333_v15 = vadd.f32 %v1170_v10, %v1169_v14  ;;  %v10549_v10 = vld [vmem:[%s16782_s21 + $0x58] sm:$0xff]  ;;  %v10567_v14 = vld [vmem:[%s16782_s21 + $0x28] sm:$0xff] }
 0x42e   :  { %16919 = vst [vmem:[#allocation18_spill] sm:$0xff] %v10549_v10  ;;  %16922 = vst [vmem:[#allocation21_spill] sm:$0xff] %v10567_v14 }
 0x42f   :  { %8400 = vtanh.f32 %v10333_v15 }
 0x43c   :  { %v8401_v17 = vpop.eup %8400 }
 0x43d   :  { %v10336_v18 = vmul.f32 %v8401_v17, %v8399_v16  ;;  %v10573_v16 = vld [vmem:[%s16782_s21 + $0x38] sm:$0xff]  ;;  %v10579_v17 = vld [vmem:[%s16782_s21 + $0x20] sm:$0xff] }
 0x43e   :  { %16923 = vst [vmem:[#allocation22_spill] sm:$0xff] %v10573_v16  ;;  %16924 = vst [vmem:[#allocation23_spill] sm:$0xff] %v10579_v17 }
 0x43f   :  { %16908 = vst [vmem:[#allocation8_spill] sm:$0xff] %v10336_v18  ;;  %1244 = vmatmul.mubr.f32.vlgmr.msra.gmra.mxu0 %v10336_v18  ;;  %1315 = vmatmul.mubr.f32.vlgmr.msra.gmra.mxu1 %v10336_v18  ;;  %v10585_v18 = vld [vmem:[%s16782_s21 + $0x30] sm:$0xff] }
 0x440   :  { %1355 = vmatpush1.msra.mxu0 %v10153_v57  ;;  %1426 = vmatpush1.msra.mxu1 %v10159_v54  ;;  %16925 = vst [vmem:[#allocation24_spill] sm:$0xff] %v10585_v18 }
 0x441   :  { %1356 = vmatprep.subr.mxu0 %v10165_v55  ;;  %1427 = vmatprep.subr.mxu1 %v10171_v58 }
 0x442   :  { %1357 = vmatpush1.msra.mxu0 %v10177_v11  ;;  %1428 = vmatpush1.msra.mxu1 %v10183_v60 }
 0x443   :  { %1358 = vmatprep.subr.mxu0 %v10189_v20  ;;  %1429 = vmatprep.subr.mxu1 %v10195_v52 }
 0x444   :  { %1359 = vmatpush1.msra.mxu0 %v10201_v3  ;;  %1430 = vmatpush1.msra.mxu1 %v10207_v61 }
 0x445   :  { %1360 = vmatprep.subr.mxu0 %v10213_v38  ;;  %1431 = vmatprep.subr.mxu1 %v10219_v0 }
 0x446   :  { %1361 = vmatpush1.msra.mxu0 %v10225_v59  ;;  %1432 = vmatpush1.msra.mxu1 %v10231_v56 }
 0x447   :  { %1362 = vmatprep.subr.mxu0 %v10237_v51  ;;  %1433 = vmatprep.subr.mxu1 %v16909_v19 }
 0x448   :  { %1363 = vmatpush1.msra.mxu0 %v10249_v1  ;;  %1434 = vmatpush1.msra.mxu1 %v10255_v62 }
 0x449   :  { %1364 = vmatprep.subr.mxu0 %v10261_v2  ;;  %1435 = vmatprep.subr.mxu1 %v10267_v29 }
 0x44a   :  { %1365 = vmatpush1.msra.mxu0 %v10363_v21  ;;  %1436 = vmatpush1.msra.mxu1 %v10369_v22 }
 0x44b   :  { %1366 = vmatprep.subr.mxu0 %v10375_v23  ;;  %1437 = vmatprep.subr.mxu1 %v10381_v24 }
 0x44c   :  { %1367 = vmatpush1.msra.mxu0 %v10387_v25  ;;  %1438 = vmatpush1.msra.mxu1 %v10393_v47 }
 0x44d   :  { %1368 = vmatprep.subr.mxu0 %v10399_v27  ;;  %1439 = vmatprep.subr.mxu1 %v10405_v31 }
 0x44e   :  { %1369 = vmatpush1.msra.mxu0 %v10411_v32  ;;  %1440 = vmatpush1.msra.mxu1 %v10417_v33 }
 0x44f   :  { %1370 = vmatprep.subr.mxu0 %v10423_v34  ;;  %1441 = vmatprep.subr.mxu1 %v10429_v35 }
 0x450   :  { %1371 = vmatpush1.msra.mxu0 %v10435_v36  ;;  %1442 = vmatpush1.msra.mxu1 %v10441_v37 }
 0x451   :  { %1372 = vmatprep.subr.mxu0 %v10447_v39  ;;  %1443 = vmatprep.subr.mxu1 %v10453_v40 }
 0x452   :  { %1373 = vmatpush1.msra.mxu0 %v10459_v41  ;;  %1444 = vmatpush1.msra.mxu1 %v10465_v42 }
 0x453   :  { %1374 = vmatprep.subr.mxu0 %v10471_v43  ;;  %1445 = vmatprep.subr.mxu1 %v10477_v44 }
 0x454   :  { %1375 = vmatpush1.msra.mxu0 %v10483_v45  ;;  %1446 = vmatpush1.msra.mxu1 %v10489_v46 }
 0x455   :  { %1376 = vmatprep.subr.mxu0 %v10495_v48  ;;  %1447 = vmatprep.subr.mxu1 %v10501_v49 }
 0x456   :  { %1377 = vmatpush1.msra.mxu0 %v10507_v50  ;;  %1448 = vmatpush1.msra.mxu1 %v10513_v63  ;;  %v16933_v63 = vld [vmem:[#allocation43_spill] sm:$0xff] }
 0x457   :  { %1378 = vmatprep.subr.mxu0 %v10519_v5  ;;  %1449 = vmatprep.subr.mxu1 %v10525_v6 }
 0x458   :  { %1379 = vmatpush1.msra.mxu0 %v10531_v7  ;;  %1450 = vmatpush1.msra.mxu1 %v10537_v8 }
 0x459   :  { %1380 = vmatprep.subr.mxu0 %v10543_v9  ;;  %1451 = vmatprep.subr.mxu1 %v10549_v10 }
 0x45a   :  { %1381 = vmatpush1.msra.mxu0 %v10555_v12  ;;  %1452 = vmatpush1.msra.mxu1 %v10561_v13 }
 0x45b   :  { %1382 = vmatprep.subr.mxu0 %v10567_v14  ;;  %1453 = vmatprep.subr.mxu1 %v10573_v16  ;;  %v10591_v14 = vld [vmem:[%s16782_s21 + $0x8] sm:$0xff]  ;;  %v10597_v16 = vld [vmem:[%s16782_s21 + $0x18] sm:$0xff] }
 0x45c   :  { %1383 = vmatpush1.msra.mxu0 %v10579_v17  ;;  %1454 = vmatpush1.msra.mxu1 %v10585_v18  ;;  %16926 = vst [vmem:[#allocation25_spill] sm:$0xff] %v10591_v14  ;;  %16927 = vst [vmem:[#allocation26_spill] sm:$0xff] %v10597_v16  ;;  %v10603_v17 = vld [vmem:[%s16782_s21] sm:$0xff]  ;;  %v16930_v18 = vld [vmem:[#allocation44_spill] sm:$0xff] }
 0x45d   :  { %1384 = vmatprep.subr.mxu0 %v10591_v14  ;;  %1455 = vmatprep.subr.mxu1 %v10597_v16  ;;  %16928 = vst [vmem:[#allocation5_spill] sm:$0xff] %v10603_v17  ;;  %v10610_v14 = vld [vmem:[%s16782_s21 + $0x10] sm:$0xff]  ;;  %v246_v13 = vadd.f32 %v16930_v18, %v9971_v4 }
 0x45e   :  { %1385 = vmatpush1.msra.mxu0 %v10603_v17  ;;  %1418 = vmatprep.mubr.f32.mxu0 %v16891_v26  ;;  %16929 = vst [vmem:[#allocation6_spill] sm:$0xff] %v10610_v14  ;;  %v16931_v17 = vld [vmem:[#allocation42_spill] sm:$0xff] }
 0x45f   :  { %1456 = vmatpush1.msra.mxu1 %v10610_v14  ;;  %1489 = vmatprep.mubr.f32.mxu1 %v16891_v26  ;;  %v16932_v26 = vld [vmem:[#allocation45_spill] sm:$0xff] }
 0x460   :  { %1529 = vmatprep.subr.mxu0 %v10317_v28  ;;  %1600 = vmatprep.subr.mxu1 %v10323_v30  ;;  %v359_v5 = vadd.f32 %v16932_v26, %v9979_v53 }
 0x4ff   :  { %v1245_v16 = vpop.f32.mrf.mxu0  ;;  %v1316_v7 = vpop.f32.mrf.mxu1 }
 0x500   :  { %v1321_v12 = vadd.f32 %v1245_v16, %v16931_v17  ;;  %v1323_v30 = vadd.f32 %v1316_v7, %v16933_v63  ;;  %v16938_v63 = vld [vmem:[#allocation12_spill] sm:$0xff]  ;;  %v16939_v7 = vld [vmem:[#allocation13_spill] sm:$0xff]  ;;  %v16941_v17 = vld [vmem:[#allocation15_spill] sm:$0xff] }
 0x501   :  { %v1247_v10 = vpop.f32.mrf.mxu0  ;;  %v1318_v14 = vpop.f32.mrf.mxu1 }
 0x502   :  { %v8146_v9 = vmul.f32 -1.442695, %v1321_v12  ;;  %v1322_v8 = vadd.f32 %v1247_v10, %v246_v13  ;;  %v1324_v28 = vadd.f32 %v1318_v14, %v359_v5  ;;  %v16940_v14 = vld [vmem:[#allocation14_spill] sm:$0xff] }
 0x504   :  { %8402 = vpow2.f32 %v8146_v9  ;;  %v8147_v6 = vmul.f32 -1.442695, %v1322_v8  ;;  %v8148_v50 = vmul.f32 -1.442695, %v1324_v28 }
 0x506   :  { %8404 = vpow2.f32 %v8147_v6 }
 0x507   :  { %8406 = vtanh.f32 %v1323_v30 }
 0x508   :  { %8408 = vpow2.f32 %v8148_v50  ;;  %v16937_v50 = vld [vmem:[#allocation11_spill] sm:$0xff] }
 0x511   :  { %v8403_v49 = vpop.eup %8402 }
 0x512   :  { %v1328_v48 = vadd.f32 1.0, %v8403_v49 }
 0x513   :  { %v8405_v18 = vpop.eup %8404 }
 0x514   :  { %8410 = vrcp.f32 %v1328_v48  ;;  %v1334_v12 = vadd.f32 1.0, %v8405_v18  ;;  %v8407_v9 = vpop.eup %8406  ;;  %v16936_v48 = vld [vmem:[#allocation10_spill] sm:$0xff]  ;;  %v16942_v18 = vld [vmem:[#allocation16_spill] sm:$0xff] }
 0x515   :  { %v8409_v10 = vpop.eup %8408 }
 0x516   :  { %8412 = vrcp.f32 %v1334_v12  ;;  %v1341_v16 = vadd.f32 1.0, %v8409_v10  ;;  %v16943_v12 = vld [vmem:[#allocation17_spill] sm:$0xff]  ;;  %v16945_v10 = vld [vmem:[#allocation19_spill] sm:$0xff] }
 0x518   :  { %8414 = vrcp.f32 %v1341_v16  ;;  %v16949_v16 = vld [vmem:[#allocation23_spill] sm:$0xff] }
 0x521   :  { %v8411_v8 = vpop.eup %8410 }
 0x522   :  { %v1345_v6 = vmul.f32 %v8411_v8, %v8407_v9  ;;  %v16944_v9 = vld [vmem:[#allocation18_spill] sm:$0xff]  ;;  %v16946_v8 = vld [vmem:[#allocation20_spill] sm:$0xff] }
 0x523   :  { %v8413_v13 = vpop.eup %8412 }
 0x524   :  { %v1344_v26 = vmul.f32 %v8413_v13, %v10333_v15  ;;  %v16935_v15 = vld [vmem:[#allocation9_spill] sm:$0xff]  ;;  %v16948_v13 = vld [vmem:[#allocation22_spill] sm:$0xff] }
 0x525   :  { %v8415_v28 = vpop.eup %8414 }
 0x526   :  { %v10623_v5 = vadd.f32 %v1345_v6, %v1344_v26  ;;  %v16947_v6 = vld [vmem:[#allocation21_spill] sm:$0xff]  ;;  %v16950_v26 = vld [vmem:[#allocation24_spill] sm:$0xff] }
 0x528   :  { %8416 = vtanh.f32 %v10623_v5 }
 0x535   :  { %v8417_v30 = vpop.eup %8416 }
 0x536   :  { %v10626_v49 = vmul.f32 %v8417_v30, %v8415_v28  ;;  %v16951_v28 = vld [vmem:[#allocation25_spill] sm:$0xff]  ;;  %v16952_v30 = vld [vmem:[#allocation26_spill] sm:$0xff] }
 0x538   :  { %16934 = vst [vmem:[#allocation36_spill] sm:$0xff] %v10626_v49  ;;  %1419 = vmatmul.mubr.f32.vlgmr.msra.gmra.mxu0 %v10626_v49  ;;  %1490 = vmatmul.mubr.f32.vlgmr.msra.gmra.mxu1 %v10626_v49  ;;  %v16953_v49 = vld [vmem:[#allocation5_spill] sm:$0xff] }
 0x539   :  { %1530 = vmatpush1.msra.mxu0 %v10153_v57  ;;  %1601 = vmatpush1.msra.mxu1 %v10159_v54 }
 0x53a   :  { %1531 = vmatprep.subr.mxu0 %v10165_v55  ;;  %1602 = vmatprep.subr.mxu1 %v10171_v58 }
 0x53b   :  { %1532 = vmatpush1.msra.mxu0 %v10177_v11  ;;  %1603 = vmatpush1.msra.mxu1 %v10183_v60 }
 0x53c   :  { %1533 = vmatprep.subr.mxu0 %v10189_v20  ;;  %1604 = vmatprep.subr.mxu1 %v10195_v52 }
 0x53d   :  { %1534 = vmatpush1.msra.mxu0 %v10201_v3  ;;  %1605 = vmatpush1.msra.mxu1 %v10207_v61 }
 0x53e   :  { %1535 = vmatprep.subr.mxu0 %v10213_v38  ;;  %1606 = vmatprep.subr.mxu1 %v10219_v0 }
 0x53f   :  { %1536 = vmatpush1.msra.mxu0 %v10225_v59  ;;  %1607 = vmatpush1.msra.mxu1 %v10231_v56 }
 0x540   :  { %1537 = vmatprep.subr.mxu0 %v10237_v51  ;;  %1608 = vmatprep.subr.mxu1 %v16909_v19 }
 0x541   :  { %1538 = vmatpush1.msra.mxu0 %v10249_v1  ;;  %1609 = vmatpush1.msra.mxu1 %v10255_v62 }
 0x542   :  { %1539 = vmatprep.subr.mxu0 %v10261_v2  ;;  %1610 = vmatprep.subr.mxu1 %v10267_v29 }
 0x543   :  { %1540 = vmatpush1.msra.mxu0 %v10363_v21  ;;  %1611 = vmatpush1.msra.mxu1 %v10369_v22 }
 0x544   :  { %1541 = vmatprep.subr.mxu0 %v10375_v23  ;;  %1612 = vmatprep.subr.mxu1 %v10381_v24 }
 0x545   :  { %1542 = vmatpush1.msra.mxu0 %v10387_v25  ;;  %1613 = vmatpush1.msra.mxu1 %v10393_v47 }
 0x546   :  { %1543 = vmatprep.subr.mxu0 %v10399_v27  ;;  %1614 = vmatprep.subr.mxu1 %v10405_v31 }
 0x547   :  { %1544 = vmatpush1.msra.mxu0 %v10411_v32  ;;  %1615 = vmatpush1.msra.mxu1 %v10417_v33 }
 0x548   :  { %1545 = vmatprep.subr.mxu0 %v10423_v34  ;;  %1616 = vmatprep.subr.mxu1 %v10429_v35 }
 0x549   :  { %1546 = vmatpush1.msra.mxu0 %v10435_v36  ;;  %1617 = vmatpush1.msra.mxu1 %v10441_v37 }
 0x54a   :  { %1547 = vmatprep.subr.mxu0 %v10447_v39  ;;  %1618 = vmatprep.subr.mxu1 %v10453_v40 }
 0x54b   :  { %1548 = vmatpush1.msra.mxu0 %v10459_v41  ;;  %1619 = vmatpush1.msra.mxu1 %v10465_v42 }
 0x54c   :  { %1549 = vmatprep.subr.mxu0 %v10471_v43  ;;  %1620 = vmatprep.subr.mxu1 %v10477_v44 }
 0x54d   :  { %1550 = vmatpush1.msra.mxu0 %v10483_v45  ;;  %1621 = vmatpush1.msra.mxu1 %v10489_v46 }
 0x54e   :  { %1551 = vmatprep.subr.mxu0 %v16935_v15  ;;  %1622 = vmatprep.subr.mxu1 %v16936_v48 }
 0x54f   :  { %1552 = vmatpush1.msra.mxu0 %v16937_v50  ;;  %1623 = vmatpush1.msra.mxu1 %v16938_v63  ;;  %v16961_v63 = vld [vmem:[#allocation47_spill] sm:$0xff] }
 0x550   :  { %1553 = vmatprep.subr.mxu0 %v16939_v7  ;;  %1624 = vmatprep.subr.mxu1 %v16940_v14 }
 0x551   :  { %1554 = vmatpush1.msra.mxu0 %v16941_v17  ;;  %1625 = vmatpush1.msra.mxu1 %v16942_v18 }
 0x552   :  { %1555 = vmatprep.subr.mxu0 %v16943_v12  ;;  %1626 = vmatprep.subr.mxu1 %v16944_v9  ;;  %v16954_v12 = vmov 0.0   ;;  %v16955_v9 = vld [vmem:[#allocation6_spill] sm:$0xff] }
 0x553   :  { %1556 = vmatpush1.msra.mxu0 %v16945_v10  ;;  %1627 = vmatpush1.msra.mxu1 %v16946_v8  ;;  %v16956_v8 = vld [vmem:[#allocation33_spill] sm:$0xff]  ;;  %v16959_v10 = vld [vmem:[#allocation46_spill] sm:$0xff] }
 0x554   :  { %1557 = vmatprep.subr.mxu0 %v16947_v6  ;;  %1628 = vmatprep.subr.mxu1 %v16948_v13  ;;  %v16957_v6 = vld [vmem:[#allocation31_spill] sm:$0xff] }
 0x555   :  { %1558 = vmatpush1.msra.mxu0 %v16949_v16  ;;  %1629 = vmatpush1.msra.mxu1 %v16950_v26  ;;  %v16958_v16 = vld [vmem:[#allocation48_spill] sm:$0xff] }
 0x556   :  { %1559 = vmatprep.subr.mxu0 %v16951_v28  ;;  %1630 = vmatprep.subr.mxu1 %v16952_v30  ;;  %v252_v26 = vadd.f32 %v16958_v16, %v9971_v4 }
 0x557   :  { %1560 = vmatpush1.msra.mxu0 %v16953_v49  ;;  %1593 = vmatprep.mubr.f32.mxu0 %v16954_v12 }
 0x558   :  { %1631 = vmatpush1.msra.mxu1 %v16955_v9  ;;  %1664 = vmatprep.mubr.f32.mxu1 %v16954_v12  ;;  %v16960_v12 = vld [vmem:[#allocation49_spill] sm:$0xff] }
 0x559   :  { %1704 = vmatprep.subr.mxu0 %v16956_v8  ;;  %1775 = vmatprep.subr.mxu1 %v16957_v6  ;;  %v365_v7 = vadd.f32 %v16960_v12, %v9979_v53 }
 0x5f8   :  { %v1420_v13 = vpop.f32.mrf.mxu0  ;;  %v1491_v49 = vpop.f32.mrf.mxu1 }
 0x5f9   :  { %v1496_v28 = vadd.f32 %v1420_v13, %v16959_v10  ;;  %v1498_v6 = vadd.f32 %v1491_v49, %v16961_v63 }
 0x5fa   :  { %v1422_v18 = vpop.f32.mrf.mxu0  ;;  %v1493_v9 = vpop.f32.mrf.mxu1 }
 0x5fb   :  { %v8149_v30 = vmul.f32 -1.442695, %v1496_v28  ;;  %v1497_v17 = vadd.f32 %v1422_v18, %v252_v26  ;;  %v1499_v8 = vadd.f32 %v1493_v9, %v365_v7 }
 0x5fd   :  { %8418 = vpow2.f32 %v8149_v30  ;;  %v8150_v14 = vmul.f32 -1.442695, %v1497_v17  ;;  %v8151_v50 = vmul.f32 -1.442695, %v1499_v8 }
 0x5ff   :  { %8420 = vpow2.f32 %v8150_v14 }
 0x600   :  { %8422 = vtanh.f32 %v1498_v6 }
 0x601   :  { %8424 = vpow2.f32 %v8151_v50 }
 0x60a   :  { %v8419_v48 = vpop.eup %8418 }
 0x60b   :  { %v1503_v15 = vadd.f32 1.0, %v8419_v48 }
 0x60c   :  { %v8421_v16 = vpop.eup %8420 }
 0x60d   :  { %8426 = vrcp.f32 %v1503_v15  ;;  %v1509_v10 = vadd.f32 1.0, %v8421_v16  ;;  %v8423_v18 = vpop.eup %8422 }
 0x60e   :  { %v8425_v13 = vpop.eup %8424 }
 0x60f   :  { %8428 = vrcp.f32 %v1509_v10  ;;  %v1516_v28 = vadd.f32 1.0, %v8425_v13 }
 0x611   :  { %8430 = vrcp.f32 %v1516_v28  ;;  %v1937_v28 = vld [vmem:[%s16225_s4 + $0x1f0] sm:$0xff] }
 0x61a   :  { %v8427_v17 = vpop.eup %8426 }
 0x61b   :  { %v1520_v14 = vmul.f32 %v8427_v17, %v8423_v18 }
 0x61c   :  { %v8429_v26 = vpop.eup %8428 }
 0x61d   :  { %v1519_v12 = vmul.f32 %v8429_v26, %v10623_v5  ;;  %v1935_v26 = vld [vmem:[%s16225_s4 + $0x1e0] sm:$0xff] }
 0x61e   :  { %v8431_v49 = vpop.eup %8430 }
 0x61f   :  { %v10703_v7 = vadd.f32 %v1520_v14, %v1519_v12  ;;  %v1932_v12 = vld [vmem:[%s16225_s4 + $0x1c8] sm:$0xff] }
 0x621   :  { %8432 = vtanh.f32 %v10703_v7 }
 0x62e   :  { %v8433_v48 = vpop.eup %8432 }
 0x62f   :  { %v10706_v63 = vmul.f32 %v8433_v48, %v8431_v49  ;;  %v1931_v49 = vld [vmem:[%s16225_s4 + $0x1c0] sm:$0xff]  ;;  %v1933_v48 = vld [vmem:[%s16225_s4 + $0x1d0] sm:$0xff] }
 0x631   :  { %16962 = vst [vmem:[#allocation34_spill] sm:$0xff] %v10706_v63  ;;  %1594 = vmatmul.mubr.f32.vlgmr.msra.gmra.mxu0 %v10706_v63  ;;  %1665 = vmatmul.mubr.f32.vlgmr.msra.gmra.mxu1 %v10706_v63  ;;  %v11371_v63 = vld [vmem:[%s16226_s5 + $0x78] sm:$0xff] }
 0x632   :  { %1705 = vmatpush1.msra.mxu0 %v10153_v57  ;;  %1776 = vmatpush1.msra.mxu1 %v10159_v54  ;;  %v16964_v57 = vld [vmem:[#allocation10_spill] sm:$0xff]  ;;  %v16965_v54 = vld [vmem:[#allocation11_spill] sm:$0xff] }
 0x633   :  { %1706 = vmatprep.subr.mxu0 %v10165_v55  ;;  %1777 = vmatprep.subr.mxu1 %v10171_v58  ;;  %v16966_v55 = vld [vmem:[#allocation12_spill] sm:$0xff]  ;;  %v16967_v58 = vld [vmem:[#allocation13_spill] sm:$0xff] }
 0x634   :  { %1707 = vmatpush1.msra.mxu0 %v10177_v11  ;;  %1778 = vmatpush1.msra.mxu1 %v10183_v60  ;;  %v16968_v11 = vld [vmem:[#allocation14_spill] sm:$0xff]  ;;  %v16969_v60 = vld [vmem:[#allocation15_spill] sm:$0xff] }
 0x635   :  { %1708 = vmatprep.subr.mxu0 %v10189_v20  ;;  %1779 = vmatprep.subr.mxu1 %v10195_v52  ;;  %v16970_v20 = vld [vmem:[#allocation16_spill] sm:$0xff]  ;;  %v16971_v52 = vld [vmem:[#allocation17_spill] sm:$0xff] }
 0x636   :  { %1709 = vmatpush1.msra.mxu0 %v10201_v3  ;;  %1780 = vmatpush1.msra.mxu1 %v10207_v61  ;;  %v16972_v3 = vld [vmem:[#allocation18_spill] sm:$0xff]  ;;  %v16973_v61 = vld [vmem:[#allocation19_spill] sm:$0xff] }
 0x637   :  { %1710 = vmatprep.subr.mxu0 %v10213_v38  ;;  %1781 = vmatprep.subr.mxu1 %v10219_v0  ;;  %v16974_v38 = vld [vmem:[#allocation20_spill] sm:$0xff]  ;;  %v16975_v0 = vld [vmem:[#allocation21_spill] sm:$0xff] }
 0x638   :  { %1711 = vmatpush1.msra.mxu0 %v10225_v59  ;;  %1782 = vmatpush1.msra.mxu1 %v10231_v56  ;;  %v16976_v59 = vld [vmem:[#allocation22_spill] sm:$0xff]  ;;  %v16977_v56 = vld [vmem:[#allocation23_spill] sm:$0xff] }
 0x639   :  { %1712 = vmatprep.subr.mxu0 %v10237_v51  ;;  %1783 = vmatprep.subr.mxu1 %v16909_v19  ;;  %v16978_v51 = vld [vmem:[#allocation24_spill] sm:$0xff]  ;;  %v16982_v19 = vmov 0.0  }
 0x63a   :  { %1713 = vmatpush1.msra.mxu0 %v10249_v1  ;;  %1784 = vmatpush1.msra.mxu1 %v10255_v62  ;;  %v16980_v1 = vld [vmem:[#allocation26_spill] sm:$0xff]  ;;  %v16981_v62 = vld [vmem:[#allocation5_spill] sm:$0xff] }
 0x63b   :  { %1714 = vmatprep.subr.mxu0 %v10261_v2  ;;  %1785 = vmatprep.subr.mxu1 %v10267_v29  ;;  %v16963_v2 = vld [vmem:[#allocation9_spill] sm:$0xff] }
 0x63c   :  { %1715 = vmatpush1.msra.mxu0 %v10363_v21  ;;  %1786 = vmatpush1.msra.mxu1 %v10369_v22  ;;  %v16979_v29 = vld [vmem:[#allocation25_spill] sm:$0xff]  ;;  %v16983_v21 = vld [vmem:[#allocation6_spill] sm:$0xff]  ;;  %17006 = vst [vmem:[#allocation9_spill] sm:$0xff] %v11371_v63 }
 0x63d   :  { %1716 = vmatprep.subr.mxu0 %v10375_v23  ;;  %1787 = vmatprep.subr.mxu1 %v10381_v24  ;;  %v1936_v22 = vld [vmem:[%s16225_s4 + $0x1e8] sm:$0xff]  ;;  %v1938_v23 = vld [vmem:[%s16225_s4 + $0x1f8] sm:$0xff] }
 0x63e   :  { %1717 = vmatpush1.msra.mxu0 %v10387_v25  ;;  %1788 = vmatpush1.msra.mxu1 %v10393_v47  ;;  %v16984_v25 = vld [vmem:[#allocation52_spill] sm:$0xff] }
 0x63f   :  { %1718 = vmatprep.subr.mxu0 %v10399_v27  ;;  %1789 = vmatprep.subr.mxu1 %v10405_v31  ;;  %v258_v47 = vadd.f32 %v16984_v25, %v9971_v4  ;;  %v16985_v27 = vld [vmem:[#allocation50_spill] sm:$0xff]  ;;  %v1909_v25 = vld [vmem:[%s16225_s4 + $0x110] sm:$0xff] }
 0x640   :  { %1719 = vmatpush1.msra.mxu0 %v10411_v32  ;;  %1790 = vmatpush1.msra.mxu1 %v10417_v33  ;;  %v11418_v4 = vld [vmem:[%s16226_s5 + $0x10] sm:$0xff] }
 0x641   :  { %1720 = vmatprep.subr.mxu0 %v10423_v34  ;;  %1791 = vmatprep.subr.mxu1 %v10429_v35  ;;  %17013 = vst [vmem:[#allocation16_spill] sm:$0xff] %v11418_v4 }
 0x642   :  { %1721 = vmatpush1.msra.mxu0 %v10435_v36  ;;  %1792 = vmatpush1.msra.mxu1 %v10441_v37 }
 0x643   :  { %1722 = vmatprep.subr.mxu0 %v10447_v39  ;;  %1793 = vmatprep.subr.mxu1 %v10453_v40  ;;  %v16986_v39 = vld [vmem:[#allocation53_spill] sm:$0xff] }
 0x644   :  { %1723 = vmatpush1.msra.mxu0 %v10459_v41  ;;  %1794 = vmatpush1.msra.mxu1 %v10465_v42  ;;  %v371_v40 = vadd.f32 %v16986_v39, %v9979_v53  ;;  %v16987_v42 = vld [vmem:[#allocation51_spill] sm:$0xff]  ;;  %v1895_v39 = vld [vmem:[%s16225_s4 + $0xa0] sm:$0xff] }
 0x645   :  { %1724 = vmatprep.subr.mxu0 %v10471_v43  ;;  %1795 = vmatprep.subr.mxu1 %v10477_v44  ;;  %v11391_v53 = vld [vmem:[%s16226_s5 + $0x50] sm:$0xff] }
 0x646   :  { %1725 = vmatpush1.msra.mxu0 %v10483_v45  ;;  %1796 = vmatpush1.msra.mxu1 %v10489_v46  ;;  %17009 = vst [vmem:[#allocation12_spill] sm:$0xff] %v11391_v53 }
 0x647   :  { %1726 = vmatprep.subr.mxu0 %v16963_v2  ;;  %1797 = vmatprep.subr.mxu1 %v16964_v57  ;;  %v1928_v2 = vld [vmem:[%s16225_s4 + $0x1a8] sm:$0xff]  ;;  %v1930_v57 = vld [vmem:[%s16225_s4 + $0x1b8] sm:$0xff] }
 0x648   :  { %1727 = vmatpush1.msra.mxu0 %v16965_v54  ;;  %1798 = vmatpush1.msra.mxu1 %v16966_v55  ;;  %v1927_v54 = vld [vmem:[%s16225_s4 + $0x1a0] sm:$0xff]  ;;  %v1929_v55 = vld [vmem:[%s16225_s4 + $0x1b0] sm:$0xff] }
 0x649   :  { %1728 = vmatprep.subr.mxu0 %v16967_v58  ;;  %1799 = vmatprep.subr.mxu1 %v16968_v11  ;;  %v1924_v58 = vld [vmem:[%s16225_s4 + $0x188] sm:$0xff]  ;;  %v1926_v11 = vld [vmem:[%s16225_s4 + $0x198] sm:$0xff] }
 0x64a   :  { %1729 = vmatpush1.msra.mxu0 %v16969_v60  ;;  %1800 = vmatpush1.msra.mxu1 %v16970_v20  ;;  %v1923_v60 = vld [vmem:[%s16225_s4 + $0x180] sm:$0xff]  ;;  %v1925_v20 = vld [vmem:[%s16225_s4 + $0x190] sm:$0xff] }
 0x64b   :  { %1730 = vmatprep.subr.mxu0 %v16971_v52  ;;  %1801 = vmatprep.subr.mxu1 %v16972_v3  ;;  %v1920_v52 = vld [vmem:[%s16225_s4 + $0x168] sm:$0xff]  ;;  %v1922_v3 = vld [vmem:[%s16225_s4 + $0x178] sm:$0xff] }
 0x64c   :  { %1731 = vmatpush1.msra.mxu0 %v16973_v61  ;;  %1802 = vmatpush1.msra.mxu1 %v16974_v38  ;;  %v1919_v61 = vld [vmem:[%s16225_s4 + $0x160] sm:$0xff]  ;;  %v1921_v38 = vld [vmem:[%s16225_s4 + $0x170] sm:$0xff] }
 0x64d   :  { %1732 = vmatprep.subr.mxu0 %v16975_v0  ;;  %1803 = vmatprep.subr.mxu1 %v16976_v59  ;;  %v1916_v0 = vld [vmem:[%s16225_s4 + $0x148] sm:$0xff]  ;;  %v1918_v59 = vld [vmem:[%s16225_s4 + $0x158] sm:$0xff] }
 0x64e   :  { %1733 = vmatpush1.msra.mxu0 %v16977_v56  ;;  %1804 = vmatpush1.msra.mxu1 %v16978_v51  ;;  %v1915_v56 = vld [vmem:[%s16225_s4 + $0x140] sm:$0xff]  ;;  %v1917_v51 = vld [vmem:[%s16225_s4 + $0x150] sm:$0xff] }
 0x64f   :  { %1734 = vmatprep.subr.mxu0 %v16979_v29  ;;  %1805 = vmatprep.subr.mxu1 %v16980_v1  ;;  %v1912_v29 = vld [vmem:[%s16225_s4 + $0x128] sm:$0xff]  ;;  %v1914_v1 = vld [vmem:[%s16225_s4 + $0x138] sm:$0xff] }
 0x650   :  { %1735 = vmatpush1.msra.mxu0 %v16981_v62  ;;  %1768 = vmatprep.mubr.f32.mxu0 %v16982_v19  ;;  %v1911_v62 = vld [vmem:[%s16225_s4 + $0x120] sm:$0xff] }
 0x651   :  { %1806 = vmatpush1.msra.mxu1 %v16983_v21  ;;  %1839 = vmatprep.mubr.f32.mxu1 %v16982_v19  ;;  %v1913_v21 = vld [vmem:[%s16225_s4 + $0x130] sm:$0xff] }
 0x652   :  { %1961 = vmatprep.subr.mxu0 %v1936_v22  ;;  %2074 = vmatprep.subr.mxu1 %v1938_v23  ;;  %v1908_v22 = vld [vmem:[%s16225_s4 + $0x108] sm:$0xff]  ;;  %v1910_v23 = vld [vmem:[%s16225_s4 + $0x118] sm:$0xff] }
 0x6f1   :  { %v1595_v24 = vpop.f32.mrf.mxu0  ;;  %v1666_v35 = vpop.f32.mrf.mxu1 }
 0x6f2   :  { %v1671_v31 = vadd.f32 %v1595_v24, %v16985_v27  ;;  %v1673_v43 = vadd.f32 %v1666_v35, %v16987_v42  ;;  %v1907_v24 = vld [vmem:[%s16225_s4 + $0x100] sm:$0xff]  ;;  %v1906_v27 = vld [vmem:[%s16225_s4 + $0xf8] sm:$0xff]  ;;  %v1897_v42 = vld [vmem:[%s16225_s4 + $0xb0] sm:$0xff] }
 0x6f3   :  { %v1597_v32 = vpop.f32.mrf.mxu0  ;;  %v1668_v37 = vpop.f32.mrf.mxu1  ;;  %v1902_v35 = vld [vmem:[%s16225_s4 + $0xd8] sm:$0xff] }
 0x6f4   :  { %v8152_v33 = vmul.f32 -1.442695, %v1671_v31  ;;  %v1672_v34 = vadd.f32 %v1597_v32, %v258_v47  ;;  %v1674_v41 = vadd.f32 %v1668_v37, %v371_v40  ;;  %v1904_v47 = vld [vmem:[%s16225_s4 + $0xe8] sm:$0xff]  ;;  %v1903_v31 = vld [vmem:[%s16225_s4 + $0xe0] sm:$0xff]  ;;  %v1901_v37 = vld [vmem:[%s16225_s4 + $0xd0] sm:$0xff] }
 0x6f5   :  { %v1900_v32 = vld [vmem:[%s16225_s4 + $0xc8] sm:$0xff]  ;;  %v1898_v40 = vld [vmem:[%s16225_s4 + $0xb8] sm:$0xff] }
 0x6f6   :  { %8434 = vpow2.f32 %v8152_v33  ;;  %v8153_v36 = vmul.f32 -1.442695, %v1672_v34  ;;  %v8154_v44 = vmul.f32 -1.442695, %v1674_v41  ;;  %v1905_v33 = vld [vmem:[%s16225_s4 + $0xf0] sm:$0xff]  ;;  %v1899_v34 = vld [vmem:[%s16225_s4 + $0xc0] sm:$0xff] }
 0x6f7   :  { %v1892_v41 = vld [vmem:[%s16225_s4 + $0x88] sm:$0xff] }
 0x6f8   :  { %8436 = vpow2.f32 %v8153_v36  ;;  %v1896_v36 = vld [vmem:[%s16225_s4 + $0xa8] sm:$0xff] }
 0x6f9   :  { %8438 = vtanh.f32 %v1673_v43  ;;  %v1891_v43 = vld [vmem:[%s16225_s4 + $0x80] sm:$0xff] }
 0x6fa   :  { %8440 = vpow2.f32 %v8154_v44  ;;  %v1894_v44 = vld [vmem:[%s16225_s4 + $0x98] sm:$0xff] }
 0x703   :  { %v8435_v45 = vpop.eup %8434 }
 0x704   :  { %v1678_v46 = vadd.f32 1.0, %v8435_v45  ;;  %v1888_v45 = vld [vmem:[%s16225_s4 + $0x68] sm:$0xff] }
 0x705   :  { %v8437_v5 = vpop.eup %8436 }
 0x706   :  { %8442 = vrcp.f32 %v1678_v46  ;;  %v1684_v15 = vadd.f32 1.0, %v8437_v5  ;;  %v8439_v50 = vpop.eup %8438  ;;  %v1893_v46 = vld [vmem:[%s16225_s4 + $0x90] sm:$0xff]  ;;  %v1887_v5 = vld [vmem:[%s16225_s4 + $0x60] sm:$0xff] }
 0x707   :  { %v8441_v9 = vpop.eup %8440 }
 0x708   :  { %8444 = vrcp.f32 %v1684_v15  ;;  %v1691_v16 = vadd.f32 1.0, %v8441_v9  ;;  %v1890_v15 = vld [vmem:[%s16225_s4 + $0x78] sm:$0xff]  ;;  %v1889_v9 = vld [vmem:[%s16225_s4 + $0x70] sm:$0xff] }
 0x70a   :  { %8446 = vrcp.f32 %v1691_v16  ;;  %v1885_v16 = vld [vmem:[%s16225_s4 + $0x50] sm:$0xff] }
 0x713   :  { %v8443_v30 = vpop.eup %8442 }
 0x714   :  { %v1695_v8 = vmul.f32 %v8443_v30, %v8439_v50  ;;  %v1884_v50 = vld [vmem:[%s16225_s4 + $0x48] sm:$0xff]  ;;  %v1883_v30 = vld [vmem:[%s16225_s4 + $0x40] sm:$0xff] }
 0x715   :  { %v8445_v6 = vpop.eup %8444 }
 0x716   :  { %v1694_v10 = vmul.f32 %v8445_v6, %v10703_v7  ;;  %v1934_v7 = vld [vmem:[%s16225_s4 + $0x1d8] sm:$0xff]  ;;  %v1880_v6 = vld [vmem:[%s16225_s4 + $0x28] sm:$0xff] }
 0x717   :  { %v8447_v13 = vpop.eup %8446 }
 0x718   :  { %v10787_v18 = vadd.f32 %v1695_v8, %v1694_v10  ;;  %v1886_v8 = vld [vmem:[%s16225_s4 + $0x58] sm:$0xff]  ;;  %v1879_v10 = vld [vmem:[%s16225_s4 + $0x20] sm:$0xff] }
 0x71a   :  { %16988 = vst [vmem:[#allocation37_spill] sm:$0xff] %v10787_v18  ;;  %8448 = vtanh.f32 %v10787_v18  ;;  %v11384_v18 = vld [vmem:[%s16226_s5 + $0x58] sm:$0xff] }
 0x71b   :  { %17008 = vst [vmem:[#allocation11_spill] sm:$0xff] %v11384_v18 }
 0x727   :  { %v8449_v17 = vpop.eup %8448 }
 0x728   :  { %v10790_v14 = vmul.f32 %v8449_v17, %v8447_v13  ;;  %v1882_v13 = vld [vmem:[%s16225_s4 + $0x38] sm:$0xff]  ;;  %v1876_v17 = vld [vmem:[%s16225_s4 + $0x8] sm:$0xff] }
 0x72a   :  { %16989 = vst [vmem:[#allocation35_spill] sm:$0xff] %v10790_v14  ;;  %1769 = vmatmul.mubr.f32.vlgmr.msra.gmra.mxu0 %v10790_v14  ;;  %1840 = vmatmul.mubr.f32.vlgmr.msra.gmra.mxu1 %v10790_v14  ;;  %v11364_v14 = vld [vmem:[%s16226_s5 + $0x90] sm:$0xff] }
 0x72b   :  { %1962 = vmatpush1.msra.mxu0 %v1935_v26  ;;  %2075 = vmatpush1.msra.mxu1 %v1937_v28  ;;  %v1881_v26 = vld [vmem:[%s16225_s4 + $0x30] sm:$0xff]  ;;  %v1875_v28 = vld [vmem:[%s16225_s4] sm:$0xff]  ;;  %17005 = vst [vmem:[#allocation47_spill] sm:$0xff] %v11364_v14 }
 0x72c   :  { %1963 = vmatprep.subr.mxu0 %v1932_v12  ;;  %2076 = vmatprep.subr.mxu1 %v1934_v7  ;;  %v1878_v12 = vld [vmem:[%s16225_s4 + $0x18] sm:$0xff]  ;;  %v10981_v7 = vld [vmem:[%s16226_s5 + $0x1e8] sm:$0xff] }
 0x72d   :  { %1964 = vmatpush1.msra.mxu0 %v1931_v49  ;;  %2077 = vmatpush1.msra.mxu1 %v1933_v48  ;;  %16990 = vst [vmem:[#allocation27_spill] sm:$0xff] %v10981_v7  ;;  %v10986_v49 = vld [vmem:[%s16226_s5 + $0x1e0] sm:$0xff]  ;;  %v10991_v48 = vld [vmem:[%s16226_s5 + $0x1c8] sm:$0xff] }
 0x72e   :  { %1965 = vmatprep.subr.mxu0 %v1928_v2  ;;  %2078 = vmatprep.subr.mxu1 %v1930_v57  ;;  %16991 = vst [vmem:[#allocation40_spill] sm:$0xff] %v10986_v49  ;;  %16992 = vst [vmem:[#allocation38_spill] sm:$0xff] %v10991_v48  ;;  %v1877_v2 = vld [vmem:[%s16225_s4 + $0x10] sm:$0xff]  ;;  %v8918_v57 = vld [vmem:[%s16781_s19] sm:$0xff] }
 0x72f   :  { %1966 = vmatpush1.msra.mxu0 %v1927_v54  ;;  %2079 = vmatpush1.msra.mxu1 %v1929_v55  ;;  %v11003_v54 = vld [vmem:[%s16226_s5 + $0x1c0] sm:$0xff]  ;;  %v11010_v55 = vld [vmem:[%s16226_s5 + $0x1a8] sm:$0xff] }
 0x730   :  { %1967 = vmatprep.subr.mxu0 %v1924_v58  ;;  %2080 = vmatprep.subr.mxu1 %v1926_v11  ;;  %v11016_v58 = vld [vmem:[%s16226_s5 + $0x1a0] sm:$0xff]  ;;  %v11022_v11 = vld [vmem:[%s16226_s5 + $0x188] sm:$0xff] }
 0x731   :  { %1968 = vmatpush1.msra.mxu0 %v1923_v60  ;;  %2081 = vmatpush1.msra.mxu1 %v1925_v20  ;;  %v8919_v60 = vld [vmem:[%s16781_s19 + $0x8] sm:$0xff]  ;;  %v11032_v20 = vld [vmem:[%s16226_s5 + $0x180] sm:$0xff] }
 0x732   :  { %1969 = vmatprep.subr.mxu0 %v1920_v52  ;;  %2082 = vmatprep.subr.mxu1 %v1922_v3  ;;  %v11037_v52 = vld [vmem:[%s16226_s5 + $0x1f8] sm:$0xff]  ;;  %v11044_v3 = vld [vmem:[%s16226_s5 + $0x168] sm:$0xff] }
 0x733   :  { %1970 = vmatpush1.msra.mxu0 %v1919_v61  ;;  %2083 = vmatpush1.msra.mxu1 %v1921_v38  ;;  %16993 = vst [vmem:[#allocation41_spill] sm:$0xff] %v11037_v52  ;;  %v11050_v61 = vld [vmem:[%s16226_s5 + $0x160] sm:$0xff]  ;;  %v11056_v38 = vld [vmem:[%s16226_s5 + $0x148] sm:$0xff] }
 0x734   :  { %1971 = vmatprep.subr.mxu0 %v1916_v0  ;;  %2084 = vmatprep.subr.mxu1 %v1918_v59  ;;  %v11062_v0 = vld [vmem:[%s16226_s5 + $0x1f0] sm:$0xff] }
 0x735   :  { %1972 = vmatpush1.msra.mxu0 %v1915_v56  ;;  %2085 = vmatpush1.msra.mxu1 %v1917_v51  ;;  %v8920_v59 = vld [vmem:[%s16781_s19 + $0x10] sm:$0xff]  ;;  %v11071_v56 = vld [vmem:[%s16226_s5 + $0x140] sm:$0xff]  ;;  %v11076_v51 = vld [vmem:[%s16226_s5 + $0x1d8] sm:$0xff] }
 0x736   :  { %1973 = vmatprep.subr.mxu0 %v1912_v29  ;;  %2086 = vmatprep.subr.mxu1 %v1914_v1  ;;  %v11083_v29 = vld [vmem:[%s16226_s5 + $0x128] sm:$0xff]  ;;  %v11089_v1 = vld [vmem:[%s16226_s5 + $0x120] sm:$0xff] }
 0x737   :  { %1974 = vmatpush1.msra.mxu0 %v1911_v62  ;;  %2087 = vmatpush1.msra.mxu1 %v1913_v21  ;;  %v11096_v62 = vld [vmem:[%s16226_s5 + $0x108] sm:$0xff]  ;;  %v11102_v21 = vld [vmem:[%s16781_s19 + $0x18] sm:$0xff] }
 0x738   :  { %1975 = vmatprep.subr.mxu0 %v1908_v22  ;;  %2088 = vmatprep.subr.mxu1 %v1910_v23  ;;  %v11109_v22 = vld [vmem:[%s16226_s5 + $0x100] sm:$0xff]  ;;  %v11114_v23 = vld [vmem:[%s16226_s5 + $0x1d0] sm:$0xff] }
 0x739   :  { %1976 = vmatpush1.msra.mxu0 %v1907_v24  ;;  %2089 = vmatpush1.msra.mxu1 %v1909_v25  ;;  %v11121_v24 = vld [vmem:[%s16226_s5 + $0xe8] sm:$0xff]  ;;  %v11128_v25 = vld [vmem:[%s16226_s5 + $0xe0] sm:$0xff] }
 0x73a   :  { %1977 = vmatprep.subr.mxu0 %v1904_v47  ;;  %2090 = vmatprep.subr.mxu1 %v1906_v27  ;;  %v11135_v47 = vld [vmem:[%s16226_s5 + $0xc8] sm:$0xff]  ;;  %v11140_v27 = vld [vmem:[%s16226_s5 + $0x1b8] sm:$0xff] }
 0x73b   :  { %1978 = vmatpush1.msra.mxu0 %v1903_v31  ;;  %2025 = vmatprep.mubr.f32.mxu0 %v16982_v19  ;;  %v11145_v31 = vld [vmem:[%s16781_s19 + $0x20] sm:$0xff] }
 0x73c   :  { %1979 = vmatprep.subr.mxu0 %v1900_v32  ;;  %2091 = vmatpush1.msra.mxu1 %v1905_v33  ;;  %v11152_v32 = vld [vmem:[%s16226_s5 + $0xc0] sm:$0xff]  ;;  %v11158_v33 = vld [vmem:[%s16226_s5 + $0x1b0] sm:$0xff] }
 0x73d   :  { %1980 = vmatpush1.msra.mxu0 %v1899_v34  ;;  %2092 = vmatprep.subr.mxu1 %v1902_v35  ;;  %v11165_v34 = vld [vmem:[%s16226_s5 + $0xa8] sm:$0xff]  ;;  %v11170_v35 = vld [vmem:[%s16226_s5 + $0x198] sm:$0xff] }
 0x73e   :  { %1981 = vmatprep.subr.mxu0 %v1896_v36  ;;  %2093 = vmatpush1.msra.mxu1 %v1901_v37  ;;  %v11177_v36 = vld [vmem:[%s16226_s5 + $0xa0] sm:$0xff]  ;;  %v11183_v37 = vld [vmem:[%s16781_s19 + $0x28] sm:$0xff] }
 0x73f   :  { %1982 = vmatpush1.msra.mxu0 %v1895_v39  ;;  %2094 = vmatprep.subr.mxu1 %v1898_v40  ;;  %v11189_v39 = vld [vmem:[%s16226_s5 + $0x190] sm:$0xff]  ;;  %v11194_v40 = vld [vmem:[%s16226_s5 + $0x88] sm:$0xff] }
 0x740   :  { %1983 = vmatprep.subr.mxu0 %v1892_v41  ;;  %2095 = vmatpush1.msra.mxu1 %v1897_v42  ;;  %16994 = vst [vmem:[#allocation39_spill] sm:$0xff] %v11194_v40  ;;  %v11201_v41 = vld [vmem:[%s16226_s5 + $0x178] sm:$0xff]  ;;  %v11208_v42 = vld [vmem:[%s16226_s5 + $0x80] sm:$0xff] }
 0x741   :  { %1984 = vmatpush1.msra.mxu0 %v1891_v43  ;;  %2096 = vmatprep.subr.mxu1 %v1894_v44  ;;  %16995 = vst [vmem:[#allocation30_spill] sm:$0xff] %v11208_v42  ;;  %v11215_v43 = vld [vmem:[%s16226_s5 + $0x170] sm:$0xff]  ;;  %v11221_v44 = vld [vmem:[%s16226_s5 + $0x68] sm:$0xff] }
 0x742   :  { %1985 = vmatprep.subr.mxu0 %v1888_v45  ;;  %2097 = vmatpush1.msra.mxu1 %v1893_v46  ;;  %16996 = vst [vmem:[#allocation44_spill] sm:$0xff] %v11221_v44  ;;  %v11226_v45 = vld [vmem:[%s16226_s5 + $0x158] sm:$0xff]  ;;  %v11233_v46 = vld [vmem:[%s16226_s5 + $0x60] sm:$0xff] }
 0x743   :  { %1986 = vmatpush1.msra.mxu0 %v1887_v5  ;;  %2098 = vmatprep.subr.mxu1 %v1890_v15  ;;  %16997 = vst [vmem:[#allocation42_spill] sm:$0xff] %v11233_v46  ;;  %v8924_v5 = vld [vmem:[%s16781_s19 + $0x30] sm:$0xff] }
 0x744   :  { %1987 = vmatprep.subr.mxu0 %v1884_v50  ;;  %2099 = vmatpush1.msra.mxu1 %v1889_v9  ;;  %v11242_v15 = vld [vmem:[%s16226_s5 + $0x150] sm:$0xff]  ;;  %v11247_v50 = vld [vmem:[%s16226_s5 + $0x48] sm:$0xff]  ;;  %v11254_v9 = vld [vmem:[%s16226_s5 + $0x138] sm:$0xff] }
 0x745   :  { %1988 = vmatpush1.msra.mxu0 %v1883_v30  ;;  %2100 = vmatprep.subr.mxu1 %v1886_v8  ;;  %16998 = vst [vmem:[#allocation45_spill] sm:$0xff] %v11247_v50  ;;  %v11261_v30 = vld [vmem:[%s16226_s5 + $0x40] sm:$0xff]  ;;  %v11268_v8 = vld [vmem:[%s16226_s5 + $0x130] sm:$0xff] }
 0x746   :  { %1989 = vmatprep.subr.mxu0 %v1880_v6  ;;  %2101 = vmatpush1.msra.mxu1 %v1885_v16  ;;  %16999 = vst [vmem:[#allocation43_spill] sm:$0xff] %v11261_v30  ;;  %v11275_v6 = vld [vmem:[%s16226_s5 + $0x28] sm:$0xff]  ;;  %v11280_v16 = vld [vmem:[%s16226_s5 + $0x118] sm:$0xff] }
 0x747   :  { %1990 = vmatpush1.msra.mxu0 %v1879_v10  ;;  %2102 = vmatprep.subr.mxu1 %v1882_v13  ;;  %17000 = vst [vmem:[#allocation33_spill] sm:$0xff] %v11275_v6  ;;  %v11287_v10 = vld [vmem:[%s16226_s5 + $0x20] sm:$0xff]  ;;  %v8925_v13 = vld [vmem:[%s16781_s19 + $0x38] sm:$0xff] }
 0x748   :  { %1991 = vmatprep.subr.mxu0 %v1876_v17  ;;  %2103 = vmatpush1.msra.mxu1 %v1881_v26  ;;  %17001 = vst [vmem:[#allocation31_spill] sm:$0xff] %v11287_v10  ;;  %v11296_v17 = vld [vmem:[%s16226_s5 + $0x110] sm:$0xff]  ;;  %v11301_v26 = vld [vmem:[%s16226_s5 + $0x8] sm:$0xff] }
 0x749   :  { %1992 = vmatpush1.msra.mxu0 %v1875_v28  ;;  %2104 = vmatprep.subr.mxu1 %v1878_v12  ;;  %17002 = vst [vmem:[#allocation48_spill] sm:$0xff] %v11301_v26  ;;  %v11308_v28 = vld [vmem:[%s16226_s5 + $0xf8] sm:$0xff]  ;;  %v11315_v12 = vld [vmem:[%s16226_s5] sm:$0xff] }
 0x74a   :  { %2026 = vmatmul.mubr.f32.vlgmr.msra.gmra.mxu0 %v8918_v57  ;;  %2287 = vmatprep.subr.mxu0 %v10981_v7  ;;  %17003 = vst [vmem:[#allocation46_spill] sm:$0xff] %v11315_v12 }
 0x74b   :  { %2288 = vmatpush1.msra.mxu0 %v10986_v49  ;;  %2031 = vmatprep.mubr.f32.mxu0 %v16982_v19 }
 0x74c   :  { %2289 = vmatprep.subr.mxu0 %v10991_v48  ;;  %2105 = vmatpush1.msra.mxu1 %v1877_v2  ;;  %v11322_v2 = vld [vmem:[%s16226_s5 + $0xf0] sm:$0xff] }
 0x74d   :  { %2290 = vmatpush1.msra.mxu0 %v11003_v54  ;;  %2138 = vmatprep.mubr.f32.mxu1 %v16982_v19 }
 0x74e   :  { %2032 = vmatmul.mubr.f32.gmra.mxu0 %v8919_v60  ;;  %2291 = vmatprep.subr.mxu0 %v11010_v55 }
 0x74f   :  { %2292 = vmatpush1.msra.mxu0 %v11016_v58  ;;  %2037 = vmatprep.mubr.f32.mxu0 %v16982_v19 }
 0x750   :  { %2293 = vmatprep.subr.mxu0 %v11022_v11  ;;  %2139 = vmatmul.mubr.f32.vlgmr.msra.gmra.mxu1 %v8918_v57  ;;  %v11329_v57 = vld [vmem:[%s16226_s5 + $0xd8] sm:$0xff] }
 0x751   :  { %2294 = vmatpush1.msra.mxu0 %v11032_v20  ;;  %2358 = vmatprep.subr.mxu1 %v11037_v52 }
 0x752   :  { %2038 = vmatmul.mubr.f32.gmra.mxu0 %v8920_v59  ;;  %2295 = vmatprep.subr.mxu0 %v11044_v3 }
 0x753   :  { %2296 = vmatpush1.msra.mxu0 %v11050_v61  ;;  %2043 = vmatprep.mubr.f32.mxu0 %v16982_v19 }
 0x754   :  { %2297 = vmatprep.subr.mxu0 %v11056_v38  ;;  %2359 = vmatpush1.msra.mxu1 %v11062_v0 }
 0x755   :  { %2298 = vmatpush1.msra.mxu0 %v11071_v56  ;;  %2360 = vmatprep.subr.mxu1 %v11076_v51 }
 0x756   :  { %2044 = vmatmul.mubr.f32.gmra.mxu0 %v11102_v21  ;;  %2299 = vmatprep.subr.mxu0 %v11083_v29 }
 0x757   :  { %2300 = vmatpush1.msra.mxu0 %v11089_v1  ;;  %2049 = vmatprep.mubr.f32.mxu0 %v16982_v19 }
 0x758   :  { %2301 = vmatprep.subr.mxu0 %v11096_v62  ;;  %2144 = vmatprep.mubr.f32.mxu1 %v16982_v19 }
 0x759   :  { %2302 = vmatpush1.msra.mxu0 %v11109_v22  ;;  %2361 = vmatpush1.msra.mxu1 %v11114_v23 }
 0x75a   :  { %2050 = vmatmul.mubr.f32.gmra.mxu0 %v11145_v31  ;;  %2303 = vmatprep.subr.mxu0 %v11121_v24 }
 0x75b   :  { %2304 = vmatpush1.msra.mxu0 %v11128_v25  ;;  %2145 = vmatmul.mubr.f32.gmra.mxu1 %v8919_v60  ;;  %v11336_v60 = vld [vmem:[%s16226_s5 + $0xd0] sm:$0xff] }
 0x75c   :  { %2305 = vmatprep.subr.mxu0 %v11135_v47  ;;  %2362 = vmatprep.subr.mxu1 %v11140_v27 }
 0x75d   :  { %2055 = vmatprep.mubr.f32.mxu0 %v16982_v19  ;;  %2306 = vmatpush1.msra.mxu0 %v11152_v32 }
 0x75e   :  { %2363 = vmatpush1.msra.mxu1 %v11158_v33  ;;  %2056 = vmatmul.mubr.f32.gmra.mxu0 %v11183_v37 }
 0x75f   :  { %2307 = vmatprep.subr.mxu0 %v11165_v34  ;;  %2364 = vmatprep.subr.mxu1 %v11170_v35 }
 0x760   :  { %2150 = vmatprep.mubr.f32.mxu1 %v16982_v19  ;;  %2308 = vmatpush1.msra.mxu0 %v11177_v36 }
 0x761   :  { %2365 = vmatpush1.msra.mxu1 %v11189_v39  ;;  %2309 = vmatprep.subr.mxu0 %v11194_v40 }
 0x762   :  { %2151 = vmatmul.mubr.f32.gmra.mxu1 %v8920_v59  ;;  %2366 = vmatprep.subr.mxu1 %v11201_v41  ;;  %v11343_v59 = vld [vmem:[%s16226_s5 + $0xb8] sm:$0xff] }
 0x763   :  { %2061 = vmatprep.mubr.f32.mxu0 %v16982_v19  ;;  %2310 = vmatpush1.msra.mxu0 %v11208_v42 }
 0x764   :  { %2367 = vmatpush1.msra.mxu1 %v11215_v43  ;;  %2062 = vmatmul.mubr.f32.gmra.mxu0 %v8924_v5 }
 0x765   :  { %2311 = vmatprep.subr.mxu0 %v11221_v44  ;;  %2368 = vmatprep.subr.mxu1 %v11226_v45 }
 0x766   :  { %2156 = vmatprep.mubr.f32.mxu1 %v16982_v19  ;;  %2312 = vmatpush1.msra.mxu0 %v11233_v46 }
 0x767   :  { %2369 = vmatpush1.msra.mxu1 %v11242_v15  ;;  %2313 = vmatprep.subr.mxu0 %v11247_v50 }
 0x768   :  { %2157 = vmatmul.mubr.f32.gmra.mxu1 %v11102_v21  ;;  %2370 = vmatprep.subr.mxu1 %v11254_v9  ;;  %v11350_v21 = vld [vmem:[%s16226_s5 + $0xb0] sm:$0xff] }
 0x769   :  { %2067 = vmatprep.mubr.f32.mxu0 %v16982_v19  ;;  %2314 = vmatpush1.msra.mxu0 %v11261_v30 }
 0x76a   :  { %2371 = vmatpush1.msra.mxu1 %v11268_v8  ;;  %2068 = vmatmul.mubr.f32.gmra.mxu0 %v8925_v13 }
 0x76b   :  { %2315 = vmatprep.subr.mxu0 %v11275_v6  ;;  %2372 = vmatprep.subr.mxu1 %v11280_v16 }
 0x76c   :  { %2162 = vmatprep.mubr.f32.mxu1 %v16982_v19  ;;  %2316 = vmatpush1.msra.mxu0 %v11287_v10 }
 0x76d   :  { %2373 = vmatpush1.msra.mxu1 %v11296_v17  ;;  %2317 = vmatprep.subr.mxu0 %v11301_v26 }
 0x76e   :  { %2163 = vmatmul.mubr.f32.gmra.mxu1 %v11145_v31  ;;  %2374 = vmatprep.subr.mxu1 %v11308_v28  ;;  %v11356_v31 = vld [vmem:[%s16226_s5 + $0x98] sm:$0xff] }
 0x76f   :  { %2318 = vmatpush1.msra.mxu0 %v11315_v12  ;;  %2351 = vmatprep.mubr.f32.mxu0 %v16982_v19  ;;  %17004 = vst [vmem:[#allocation49_spill] sm:$0xff] %v11356_v31 }
 0x770   :  { %2375 = vmatpush1.msra.mxu1 %v11322_v2  ;;  %2352 = vmatmul.mubr.f32.vlgmr.msra.gmra.mxu0 %v16982_v19 }
 0x771   :  { %2376 = vmatprep.subr.mxu1 %v11329_v57  ;;  %2168 = vmatprep.mubr.f32.mxu1 %v16982_v19 }
 0x772   :  { %2377 = vmatpush1.msra.mxu1 %v11336_v60  ;;  %2462 = vmatprep.subr.mxu0 %v10981_v7 }
 0x773   :  { %2169 = vmatmul.mubr.f32.gmra.mxu1 %v11183_v37  ;;  %2378 = vmatprep.subr.mxu1 %v11343_v59  ;;  %v11377_v37 = vld [vmem:[%s16226_s5 + $0x70] sm:$0xff] }
 0x774   :  { %2379 = vmatpush1.msra.mxu1 %v11350_v21  ;;  %2174 = vmatprep.mubr.f32.mxu1 %v16982_v19  ;;  %17007 = vst [vmem:[#allocation10_spill] sm:$0xff] %v11377_v37 }
 0x775   :  { %2380 = vmatprep.subr.mxu1 %v11356_v31  ;;  %2463 = vmatpush1.msra.mxu0 %v10986_v49  ;;  %v11398_v49 = vld [vmem:[%s16226_s5 + $0x38] sm:$0xff] }
 0x776   :  { %2381 = vmatpush1.msra.mxu1 %v11364_v14  ;;  %2464 = vmatprep.subr.mxu0 %v10991_v48  ;;  %17010 = vst [vmem:[#allocation13_spill] sm:$0xff] %v11398_v49  ;;  %v11411_v48 = vld [vmem:[%s16226_s5 + $0x18] sm:$0xff] }
 0x777   :  { %2175 = vmatmul.mubr.f32.gmra.mxu1 %v8924_v5  ;;  %2382 = vmatprep.subr.mxu1 %v11371_v63  ;;  %v11404_v5 = vld [vmem:[%s16226_s5 + $0x30] sm:$0xff]  ;;  %17012 = vst [vmem:[#allocation15_spill] sm:$0xff] %v11411_v48 }
 0x778   :  { %2383 = vmatpush1.msra.mxu1 %v11377_v37  ;;  %2180 = vmatprep.mubr.f32.mxu1 %v16982_v19  ;;  %17011 = vst [vmem:[#allocation14_spill] sm:$0xff] %v11404_v5 }
 0x779   :  { %2384 = vmatprep.subr.mxu1 %v11384_v18  ;;  %2465 = vmatpush1.msra.mxu0 %v11003_v54 }
 0x77a   :  { %2385 = vmatpush1.msra.mxu1 %v11391_v53  ;;  %2466 = vmatprep.subr.mxu0 %v11010_v55 }
 0x77b   :  { %2181 = vmatmul.mubr.f32.gmra.mxu1 %v8925_v13  ;;  %2386 = vmatprep.subr.mxu1 %v11398_v49 }
 0x77c   :  { %2387 = vmatpush1.msra.mxu1 %v11404_v5  ;;  %2422 = vmatprep.mubr.f32.mxu1 %v16982_v19 }
 0x77d   :  { %2388 = vmatprep.subr.mxu1 %v11411_v48  ;;  %2467 = vmatpush1.msra.mxu0 %v11016_v58 }
 0x77e   :  { %2389 = vmatpush1.msra.mxu1 %v11418_v4  ;;  %2468 = vmatprep.subr.mxu0 %v11022_v11 }
 0x77f   :  { %2423 = vmatmul.mubr.f32.vlgmr.msra.gmra.mxu1 %v16982_v19  ;;  %2533 = vmatprep.subr.mxu1 %v11037_v52 }
 0x780   :  { %2534 = vmatpush1.msra.mxu1 %v11062_v0  ;;  %2469 = vmatpush1.msra.mxu0 %v11032_v20 }
 0x781   :  { %2535 = vmatprep.subr.mxu1 %v11076_v51  ;;  %2470 = vmatprep.subr.mxu0 %v11044_v3 }
 0x782   :  { %2536 = vmatpush1.msra.mxu1 %v11114_v23  ;;  %2471 = vmatpush1.msra.mxu0 %v11050_v61 }
 0x783   :  { %2537 = vmatprep.subr.mxu1 %v11140_v27  ;;  %2472 = vmatprep.subr.mxu0 %v11056_v38 }
 0x784   :  { %2538 = vmatpush1.msra.mxu1 %v11158_v33  ;;  %2473 = vmatpush1.msra.mxu0 %v11071_v56 }
 0x785   :  { %2539 = vmatprep.subr.mxu1 %v11170_v35  ;;  %2474 = vmatprep.subr.mxu0 %v11083_v29 }
 0x786   :  { %2540 = vmatpush1.msra.mxu1 %v11189_v39  ;;  %2475 = vmatpush1.msra.mxu0 %v11089_v1 }
 0x787   :  { %2541 = vmatprep.subr.mxu1 %v11201_v41  ;;  %2476 = vmatprep.subr.mxu0 %v11096_v62 }
 0x788   :  { %2542 = vmatpush1.msra.mxu1 %v11215_v43  ;;  %2477 = vmatpush1.msra.mxu0 %v11109_v22 }
 0x789   :  { %2543 = vmatprep.subr.mxu1 %v11226_v45  ;;  %2478 = vmatprep.subr.mxu0 %v11121_v24 }
 0x78a   :  { %2544 = vmatpush1.msra.mxu1 %v11242_v15  ;;  %2479 = vmatpush1.msra.mxu0 %v11128_v25 }
 0x78b   :  { %2545 = vmatprep.subr.mxu1 %v11254_v9  ;;  %2480 = vmatprep.subr.mxu0 %v11135_v47 }
 0x78c   :  { %2546 = vmatpush1.msra.mxu1 %v11268_v8  ;;  %2481 = vmatpush1.msra.mxu0 %v11152_v32 }
 0x78d   :  { %2547 = vmatprep.subr.mxu1 %v11280_v16  ;;  %2482 = vmatprep.subr.mxu0 %v11165_v34 }
 0x78e   :  { %2548 = vmatpush1.msra.mxu1 %v11296_v17  ;;  %2483 = vmatpush1.msra.mxu0 %v11177_v36 }
 0x78f   :  { %2549 = vmatprep.subr.mxu1 %v11308_v28  ;;  %2484 = vmatprep.subr.mxu0 %v11194_v40 }
 0x790   :  { %2550 = vmatpush1.msra.mxu1 %v11322_v2  ;;  %2485 = vmatpush1.msra.mxu0 %v11208_v42 }
 0x791   :  { %2551 = vmatprep.subr.mxu1 %v11329_v57  ;;  %2486 = vmatprep.subr.mxu0 %v11221_v44 }
 0x792   :  { %2552 = vmatpush1.msra.mxu1 %v11336_v60  ;;  %2487 = vmatpush1.msra.mxu0 %v11233_v46 }
 0x793   :  { %2553 = vmatprep.subr.mxu1 %v11343_v59  ;;  %2488 = vmatprep.subr.mxu0 %v11247_v50 }
 0x794   :  { %2554 = vmatpush1.msra.mxu1 %v11350_v21  ;;  %2489 = vmatpush1.msra.mxu0 %v11261_v30 }
 0x795   :  { %2555 = vmatprep.subr.mxu1 %v11356_v31  ;;  %2490 = vmatprep.subr.mxu0 %v11275_v6 }
 0x796   :  { %2556 = vmatpush1.msra.mxu1 %v11364_v14  ;;  %2491 = vmatpush1.msra.mxu0 %v11287_v10  ;;  %v17015_v10 = vld [vmem:[#allocation57_spill] sm:$0xff] }
 0x797   :  { %2557 = vmatprep.subr.mxu1 %v11371_v63  ;;  %2492 = vmatprep.subr.mxu0 %v11301_v26  ;;  %v17014_v26 = vld [vmem:[#allocation58_spill] sm:$0xff] }
 0x798   :  { %2558 = vmatpush1.msra.mxu1 %v11377_v37  ;;  %2493 = vmatpush1.msra.mxu0 %v11315_v12  ;;  %v264_v6 = vadd.f32 %v17015_v10, %v17014_v26  ;;  %v17018_v37 = vld [vmem:[#allocation61_spill] sm:$0xff] }
 0x799   :  { %2559 = vmatprep.subr.mxu1 %v11384_v18  ;;  %2526 = vmatprep.mubr.f32.mxu0 %v16982_v19 }
 0x79a   :  { %2560 = vmatpush1.msra.mxu1 %v11391_v53  ;;  %2597 = vmatprep.mubr.f32.mxu1 %v16982_v19  ;;  %v17016_v53 = vld [vmem:[#allocation55_spill] sm:$0xff]  ;;  %v17017_v19 = vld [vmem:[#allocation56_spill] sm:$0xff] }
 0x79b   :  { %2561 = vmatprep.subr.mxu1 %v11398_v49  ;;  %2637 = vmatprep.subr.mxu0 %v10981_v7 }
 0x79c   :  { %2562 = vmatpush1.msra.mxu1 %v11404_v5 }
 0x79d   :  { %2563 = vmatprep.subr.mxu1 %v11411_v48 }
 0x79e   :  { %2564 = vmatpush1.msra.mxu1 %v11418_v4  ;;  %v17019_v4 = vld [vmem:[#allocation59_spill] sm:$0xff] }
 0x79f   :  { %2708 = vmatprep.subr.mxu1 %v11037_v52  ;;  %v377_v46 = vadd.f32 %v17019_v4, %v17018_v37 }
 0x7ea   :  { %v1770_v13 = vpop.f32.mrf.mxu0  ;;  %v1841_v12 = vpop.f32.mrf.mxu1 }
 0x7eb   :  { %v1846_v30 = vadd.f32 %v1770_v13, %v17016_v53  ;;  %v1848_v18 = vadd.f32 %v1841_v12, %v17017_v19  ;;  %v11497_v19 = vld [vmem:[%s16227_s6] sm:$0xf] }
 0x7ec   :  { %v1772_v49 = vpop.f32.mrf.mxu0  ;;  %v1843_v48 = vpop.f32.mrf.mxu1  ;;  %v17024_v12 = vld [vmem:[#allocation37_spill] sm:$0xff] }
 0x7ed   :  { %v8155_v50 = vmul.f32 -1.442695, %v1846_v30  ;;  %v1847_v7 = vadd.f32 %v1772_v49, %v264_v6  ;;  %v1849_v52 = vadd.f32 %v1843_v48, %v377_v46 }
 0x7ef   :  { %8450 = vpow2.f32 %v8155_v50  ;;  %v8156_v5 = vmul.f32 -1.442695, %v1847_v7  ;;  %v8157_v63 = vmul.f32 -1.442695, %v1849_v52  ;;  %v17020_v7 = vld [vmem:[#allocation28_spill] sm:$0xff] }
 0x7f0   :  { %v1944_v49 = vrot.slane %v11497_v19, %v17020_v7 }
 0x7f1   :  { %8452 = vpow2.f32 %v8156_v5 }
 0x7f2   :  { %8454 = vtanh.f32 %v1848_v18 }
 0x7f3   :  { %8456 = vpow2.f32 %v8157_v63 }
 0x7fc   :  { %v8451_v44 = vpop.eup %8450 }
 0x7fd   :  { %v1853_v14 = vadd.f32 1.0, %v8451_v44 }
 0x7fe   :  { %v8453_v10 = vpop.eup %8452 }
 0x7ff   :  { %8458 = vrcp.f32 %v1853_v14  ;;  %v1859_v53 = vadd.f32 1.0, %v8453_v10  ;;  %v8455_v50 = vpop.eup %8454  ;;  %v17023_v14 = vld [vmem:[#allocation29_spill] sm:$0xff] }
 0x800   :  { %v8457_v48 = vpop.eup %8456  ;;  %v11507_v46 = vrot.slane %v11497_v19, %v17023_v14 }
 0x801   :  { %8460 = vrcp.f32 %v1859_v53  ;;  %v1866_v6 = vadd.f32 1.0, %v8457_v48 }
 0x803   :  { %8462 = vrcp.f32 %v1866_v6 }
 0x80a   :  { %v2027_v4 = vpop.f32.mrf.mxu0 }
 0x80b   :  { %v11501_v52 = vadd.f32 %v2027_v4, %v1944_v49 }
 0x80c   :  { %v8459_v44 = vpop.eup %8458  ;;  %v11503_v18 = vpop.f32.mrf.mxu0 }
 0x80d   :  { %17021 = vst [vmem:[#allocation17_spill] sm:$0xff] %v11501_v52  ;;  %17022 = vst [vmem:[#allocation18_spill] sm:$0xff] %v11503_v18  ;;  %v1870_v63 = vmul.f32 %v8459_v44, %v8455_v50 }
 0x80e   :  { %v8461_v30 = vpop.eup %8460  ;;  %v2033_v26 = vpop.f32.mrf.mxu0 }
 0x80f   :  { %v1869_v37 = vmul.f32 %v8461_v30, %v17024_v12  ;;  %v11510_v5 = vadd.f32 %v2033_v26, %v1944_v49 }
 0x810   :  { %v11512_v13 = vpop.f32.mrf.mxu0  ;;  %v2140_v10 = vpop.f32.mrf.mxu1 }
 0x811   :  { %17025 = vst [vmem:[#allocation19_spill] sm:$0xff] %v11510_v5  ;;  %17026 = vst [vmem:[#allocation20_spill] sm:$0xff] %v11512_v13  ;;  %v11515_v53 = vadd.f32 %v2140_v10, %v11507_v46  ;;  %v1871_v4 = vadd.f32 %v1870_v63, %v1869_v37 }
 0x812   :  { %v2039_v50 = vpop.f32.mrf.mxu0  ;;  %v11523_v30 = vpop.f32.mrf.mxu1 }
 0x813   :  { %17027 = vst [vmem:[#allocation21_spill] sm:$0xff] %v11515_v53  ;;  %v11517_v44 = vadd.f32 %v2039_v50, %v1944_v49  ;;  %8464 = vtanh.f32 %v1871_v4  ;;  %17031 = vst [vmem:[#allocation25_spill] sm:$0xff] %v11523_v30  ;;  %v8463_v4 = vpop.eup %8462 }
 0x814   :  { %v11519_v14 = vpop.f32.mrf.mxu0 }
 0x815   :  { %17028 = vst [vmem:[#allocation22_spill] sm:$0xff] %v11517_v44  ;;  %17029 = vst [vmem:[#allocation23_spill] sm:$0xff] %v11519_v14 }
 0x816   :  { %v2045_v48 = vpop.f32.mrf.mxu0 }
 0x817   :  { %v11521_v7 = vadd.f32 %v2045_v48, %v1944_v49 }
 0x818   :  { %v11525_v26 = vpop.f32.mrf.mxu0 }
 0x819   :  { %17030 = vst [vmem:[#allocation24_spill] sm:$0xff] %v11521_v7  ;;  %17032 = vst [vmem:[#allocation26_spill] sm:$0xff] %v11525_v26 }
 0x81a   :  { %v2051_v12 = vpop.f32.mrf.mxu0 }
 0x81b   :  { %v11527_v52 = vadd.f32 %v2051_v12, %v1944_v49  ;;  %v2146_v10 = vpop.f32.mrf.mxu1 }
 0x81c   :  { %v11529_v53 = vpop.f32.mrf.mxu0  ;;  %v11532_v63 = vadd.f32 %v2146_v10, %v11507_v46 }
 0x81d   :  { %17033 = vst [vmem:[#allocation5_spill] sm:$0xff] %v11527_v52  ;;  %17034 = vst [vmem:[#allocation6_spill] sm:$0xff] %v11529_v53  ;;  %v11534_v37 = vpop.f32.mrf.mxu1 }
 0x81e   :  { %17035 = vst [vmem:[#allocation52_spill] sm:$0xff] %v11532_v63  ;;  %v2057_v6 = vpop.f32.mrf.mxu0  ;;  %17036 = vst [vmem:[#allocation50_spill] sm:$0xff] %v11534_v37 }
 0x81f   :  { %v11536_v50 = vadd.f32 %v2057_v6, %v1944_v49 }
 0x820   :  { %v8465_v48 = vpop.eup %8464  ;;  %v11538_v18 = vpop.f32.mrf.mxu0 }
 0x821   :  { %17037 = vst [vmem:[#allocation53_spill] sm:$0xff] %v11536_v50  ;;  %17038 = vst [vmem:[#allocation51_spill] sm:$0xff] %v11538_v18  ;;  %v11540_v30 = vmul.f32 %v8465_v48, %v8463_v4 }
 0x822   :  { %v2152_v5 = vpop.f32.mrf.mxu1 }
 0x823   :  { %17039 = vst [vmem:[#allocation58_spill] sm:$0xff] %v11540_v30  ;;  %v11543_v12 = vadd.f32 %v2152_v5, %v11507_v46  ;;  %v17045_v30 = vld [vmem:[#allocation54_spill] sm:$0xff] }
 0x824   :  { %v2063_v13 = vpop.f32.mrf.mxu0  ;;  %v11545_v44 = vpop.f32.mrf.mxu1  ;;  %v11558_v5 = vrot.slane %v11497_v19, %v17045_v30 }
 0x825   :  { %17040 = vst [vmem:[#allocation57_spill] sm:$0xff] %v11543_v12  ;;  %17041 = vst [vmem:[#allocation55_spill] sm:$0xff] %v11545_v44  ;;  %v11547_v10 = vadd.f32 %v2063_v13, %v1944_v49 }
 0x826   :  { %v11549_v63 = vpop.f32.mrf.mxu0 }
 0x827   :  { %17042 = vst [vmem:[#allocation56_spill] sm:$0xff] %v11547_v10 }
 0x828   :  { %v2158_v37 = vpop.f32.mrf.mxu1 }
 0x829   :  { %v11552_v6 = vadd.f32 %v2158_v37, %v11507_v46 }
 0x82a   :  { %v2069_v14 = vpop.f32.mrf.mxu0  ;;  %v11554_v7 = vpop.f32.mrf.mxu1 }
 0x82b   :  { %17043 = vst [vmem:[#allocation61_spill] sm:$0xff] %v11552_v6  ;;  %17044 = vst [vmem:[#allocation59_spill] sm:$0xff] %v11554_v7  ;;  %v2070_v12 = vadd.f32 %v2069_v14, %v1944_v49 }
 0x82c   :  { %v2071_v4 = vpop.f32.mrf.mxu0 }
 0x82d   :  { %v2072_v52 = vadd.f32 %v2071_v4, %v11558_v5 }
 0x82e   :  { %v2164_v48 = vpop.f32.mrf.mxu1 }
 0x82f   :  { %v11561_v44 = vadd.f32 %v2164_v48, %v11507_v46 }
 0x830   :  { %v11563_v13 = vpop.f32.mrf.mxu1  ;;  %v2353_v26 = vpop.f32.mrf.mxu0 }
 0x831   :  { %17046 = vst [vmem:[#allocation37_spill] sm:$0xff] %v11561_v44  ;;  %17047 = vst [vmem:[#allocation63_spill] sm:$0xff] %v11563_v13  ;;  %v2429_v37 = vadd.f32 %v2353_v26, %v2070_v12  ;;  %v17052_v26 = vld [vmem:[#allocation60_spill] sm:$0xff] }
 0x832   :  { %v2355_v6 = vpop.f32.mrf.mxu0  ;;  %v11578_v12 = vrot.slane %v11497_v19, %v17052_v26 }
 0x833   :  { %v8158_v53 = vmul.f32 -1.442695, %v2429_v37  ;;  %v2170_v50 = vpop.f32.mrf.mxu1  ;;  %v2430_v7 = vadd.f32 %v2355_v6, %v2072_v52 }
 0x834   :  { %v11567_v18 = vadd.f32 %v2170_v50, %v11507_v46  ;;  %17053 = vst [vmem:[#allocation68_spill] sm:$0xff] %v11578_v12 }
 0x835   :  { %8466 = vpow2.f32 %v8158_v53  ;;  %v8159_v30 = vmul.f32 -1.442695, %v2430_v7  ;;  %v11569_v10 = vpop.f32.mrf.mxu1 }
 0x836   :  { %17048 = vst [vmem:[#allocation64_spill] sm:$0xff] %v11567_v18  ;;  %17049 = vst [vmem:[#allocation65_spill] sm:$0xff] %v11569_v10 }
 0x837   :  { %8468 = vpow2.f32 %v8159_v30  ;;  %v2176_v49 = vpop.f32.mrf.mxu1 }
 0x838   :  { %v11572_v14 = vadd.f32 %v2176_v49, %v11507_v46 }
 0x839   :  { %v11574_v48 = vpop.f32.mrf.mxu1 }
 0x83a   :  { %17050 = vst [vmem:[#allocation66_spill] sm:$0xff] %v11572_v14  ;;  %17051 = vst [vmem:[#allocation67_spill] sm:$0xff] %v11574_v48 }
 0x83b   :  { %v2182_v4 = vpop.f32.mrf.mxu1 }
 0x83c   :  { %v2183_v52 = vadd.f32 %v2182_v4, %v11507_v46 }
 0x83d   :  { %v2184_v50 = vpop.f32.mrf.mxu1 }
 0x83e   :  { %v2185_v53 = vadd.f32 %v2184_v50, %v11578_v12 }
 0x83f   :  { %v2424_v7 = vpop.f32.mrf.mxu1 }
 0x840   :  { %v2431_v6 = vadd.f32 %v2424_v7, %v2183_v52 }
 0x841   :  { %v2426_v37 = vpop.f32.mrf.mxu1 }
 0x842   :  { %v8467_v30 = vpop.eup %8466  ;;  %v2432_v44 = vadd.f32 %v2426_v37, %v2185_v53  ;;  %8470 = vtanh.f32 %v2431_v6  ;;  %v17062_v6 = vld [vmem:[#allocation45_spill] sm:$0xff]  ;;  %v17063_v37 = vld [vmem:[#allocation11_spill] sm:$0xff] }
 0x843   :  { %v2436_v13 = vadd.f32 1.0, %v8467_v30  ;;  %v17064_v30 = vld [vmem:[#allocation43_spill] sm:$0xff] }
 0x844   :  { %v8469_v49 = vpop.eup %8468  ;;  %v8160_v18 = vmul.f32 -1.442695, %v2432_v44  ;;  %v17056_v44 = vld [vmem:[#allocation38_spill] sm:$0xff] }
 0x845   :  { %8472 = vrcp.f32 %v2436_v13  ;;  %v2442_v10 = vadd.f32 1.0, %v8469_v49  ;;  %v17058_v13 = vld [vmem:[#allocation44_spill] sm:$0xff] }
 0x846   :  { %8474 = vpow2.f32 %v8160_v18  ;;  %v17055_v18 = vld [vmem:[#allocation40_spill] sm:$0xff] }
 0x847   :  { %8476 = vrcp.f32 %v2442_v10  ;;  %v17057_v10 = vld [vmem:[#allocation47_spill] sm:$0xff]  ;;  %v17065_v49 = vld [vmem:[#allocation12_spill] sm:$0xff] }
 0x84f   :  { %v8471_v19 = vpop.eup %8470 }
 0x852   :  { %v8473_v26 = vpop.eup %8472 }
 0x853   :  { %v8475_v14 = vpop.eup %8474  ;;  %v2453_v50 = vmul.f32 %v8473_v26, %v8471_v19  ;;  %v17061_v26 = vld [vmem:[#allocation10_spill] sm:$0xff]  ;;  %v17066_v19 = vld [vmem:[#allocation33_spill] sm:$0xff] }
 0x854   :  { %v8477_v46 = vpop.eup %8476  ;;  %v2449_v4 = vadd.f32 1.0, %v8475_v14  ;;  %v17059_v14 = vld [vmem:[#allocation9_spill] sm:$0xff] }
 0x855   :  { %v2452_v48 = vmul.f32 0.0, %v8477_v46  ;;  %v17067_v46 = vld [vmem:[#allocation13_spill] sm:$0xff] }
 0x856   :  { %8478 = vrcp.f32 %v2449_v4  ;;  %v17068_v4 = vld [vmem:[#allocation31_spill] sm:$0xff] }
 0x857   :  { %v11582_v12 = vadd.f32 %v2453_v50, %v2452_v48  ;;  %v17060_v48 = vld [vmem:[#allocation42_spill] sm:$0xff] }
 0x858   :  { %v17069_v50 = vld [vmem:[#allocation14_spill] sm:$0xff] }
 0x859   :  { %8480 = vtanh.f32 %v11582_v12 }
 0x863   :  { %v8479_v52 = vpop.eup %8478 }
 0x866   :  { %v8481_v53 = vpop.eup %8480 }
 0x867   :  { %v11585_v7 = vmul.f32 %v8481_v53, %v8479_v52  ;;  %v17070_v52 = vld [vmem:[#allocation48_spill] sm:$0xff]  ;;  %v17071_v53 = vld [vmem:[#allocation15_spill] sm:$0xff] }
 0x869   :  { %17054 = vst [vmem:[#allocation69_spill] sm:$0xff] %v11585_v7  ;;  %2527 = vmatmul.mubr.f32.vlgmr.msra.gmra.mxu0 %v11585_v7  ;;  %2598 = vmatmul.mubr.f32.vlgmr.msra.gmra.mxu1 %v11585_v7  ;;  %v17072_v7 = vld [vmem:[#allocation46_spill] sm:$0xff] }
 0x86a   :  { %2638 = vmatpush1.msra.mxu0 %v17055_v18  ;;  %2709 = vmatpush1.msra.mxu1 %v11062_v0 }
 0x86b   :  { %2639 = vmatprep.subr.mxu0 %v17056_v44  ;;  %2710 = vmatprep.subr.mxu1 %v11076_v51 }
 0x86c   :  { %2640 = vmatpush1.msra.mxu0 %v11003_v54  ;;  %2711 = vmatpush1.msra.mxu1 %v11114_v23 }
 0x86d   :  { %2641 = vmatprep.subr.mxu0 %v11010_v55  ;;  %2712 = vmatprep.subr.mxu1 %v11140_v27 }
 0x86e   :  { %2642 = vmatpush1.msra.mxu0 %v11016_v58  ;;  %2713 = vmatpush1.msra.mxu1 %v11158_v33 }
 0x86f   :  { %2643 = vmatprep.subr.mxu0 %v11022_v11  ;;  %2714 = vmatprep.subr.mxu1 %v11170_v35 }
 0x870   :  { %2644 = vmatpush1.msra.mxu0 %v11032_v20  ;;  %2715 = vmatpush1.msra.mxu1 %v11189_v39 }
 0x871   :  { %2645 = vmatprep.subr.mxu0 %v11044_v3  ;;  %2716 = vmatprep.subr.mxu1 %v11201_v41 }
 0x872   :  { %2646 = vmatpush1.msra.mxu0 %v11050_v61  ;;  %2717 = vmatpush1.msra.mxu1 %v11215_v43 }
 0x873   :  { %2647 = vmatprep.subr.mxu0 %v11056_v38  ;;  %2718 = vmatprep.subr.mxu1 %v11226_v45 }
 0x874   :  { %2648 = vmatpush1.msra.mxu0 %v11071_v56  ;;  %2719 = vmatpush1.msra.mxu1 %v11242_v15 }
 0x875   :  { %2649 = vmatprep.subr.mxu0 %v11083_v29  ;;  %2720 = vmatprep.subr.mxu1 %v11254_v9 }
 0x876   :  { %2650 = vmatpush1.msra.mxu0 %v11089_v1  ;;  %2721 = vmatpush1.msra.mxu1 %v11268_v8 }
 0x877   :  { %2651 = vmatprep.subr.mxu0 %v11096_v62  ;;  %2722 = vmatprep.subr.mxu1 %v11280_v16 }
 0x878   :  { %2652 = vmatpush1.msra.mxu0 %v11109_v22  ;;  %2723 = vmatpush1.msra.mxu1 %v11296_v17 }
 0x879   :  { %2653 = vmatprep.subr.mxu0 %v11121_v24  ;;  %2724 = vmatprep.subr.mxu1 %v11308_v28 }
 0x87a   :  { %2654 = vmatpush1.msra.mxu0 %v11128_v25  ;;  %2725 = vmatpush1.msra.mxu1 %v11322_v2 }
 0x87b   :  { %2655 = vmatprep.subr.mxu0 %v11135_v47  ;;  %2726 = vmatprep.subr.mxu1 %v11329_v57 }
 0x87c   :  { %2656 = vmatpush1.msra.mxu0 %v11152_v32  ;;  %2727 = vmatpush1.msra.mxu1 %v11336_v60 }
 0x87d   :  { %2657 = vmatprep.subr.mxu0 %v11165_v34  ;;  %2728 = vmatprep.subr.mxu1 %v11343_v59 }
 0x87e   :  { %2658 = vmatpush1.msra.mxu0 %v11177_v36  ;;  %2729 = vmatpush1.msra.mxu1 %v11350_v21 }
 0x87f   :  { %2659 = vmatprep.subr.mxu0 %v11194_v40  ;;  %2730 = vmatprep.subr.mxu1 %v11356_v31 }
 0x880   :  { %2660 = vmatpush1.msra.mxu0 %v11208_v42  ;;  %2731 = vmatpush1.msra.mxu1 %v17057_v10  ;;  %v17080_v10 = vld [vmem:[#allocation66_spill] sm:$0xff] }
 0x881   :  { %2661 = vmatprep.subr.mxu0 %v17058_v13  ;;  %2732 = vmatprep.subr.mxu1 %v17059_v14  ;;  %v17078_v14 = vld [vmem:[#allocation68_spill] sm:$0xff] }
 0x882   :  { %2662 = vmatpush1.msra.mxu0 %v17060_v48  ;;  %2733 = vmatpush1.msra.mxu1 %v17061_v26 }
 0x883   :  { %2663 = vmatprep.subr.mxu0 %v17062_v6  ;;  %2734 = vmatprep.subr.mxu1 %v17063_v37  ;;  %v17073_v6 = vmov 0.0   ;;  %v17074_v37 = vld [vmem:[#allocation16_spill] sm:$0xff] }
 0x884   :  { %2664 = vmatpush1.msra.mxu0 %v17064_v30  ;;  %2735 = vmatpush1.msra.mxu1 %v17065_v49  ;;  %v17075_v49 = vld [vmem:[#allocation27_spill] sm:$0xff] }
 0x885   :  { %2665 = vmatprep.subr.mxu0 %v17066_v19  ;;  %2736 = vmatprep.subr.mxu1 %v17067_v46  ;;  %v17076_v19 = vld [vmem:[#allocation41_spill] sm:$0xff] }
 0x886   :  { %2666 = vmatpush1.msra.mxu0 %v17068_v4  ;;  %2737 = vmatpush1.msra.mxu1 %v17069_v50  ;;  %v2066_v50 = vadd.f32 %v11549_v63, %v11558_v5  ;;  %v17077_v4 = vld [vmem:[#allocation56_spill] sm:$0xff] }
 0x887   :  { %2667 = vmatprep.subr.mxu0 %v17070_v52  ;;  %2738 = vmatprep.subr.mxu1 %v17071_v53 }
 0x888   :  { %2668 = vmatpush1.msra.mxu0 %v17072_v7  ;;  %2701 = vmatprep.mubr.f32.mxu0 %v17073_v6 }
 0x889   :  { %2739 = vmatpush1.msra.mxu1 %v17074_v37  ;;  %2772 = vmatprep.mubr.f32.mxu1 %v17073_v6  ;;  %v17079_v6 = vld [vmem:[#allocation67_spill] sm:$0xff] }
 0x88a   :  { %2812 = vmatprep.subr.mxu0 %v17075_v49  ;;  %2883 = vmatprep.subr.mxu1 %v17076_v19  ;;  %v2179_v13 = vadd.f32 %v17079_v6, %v17078_v14 }
 0x929   :  { %v2528_v46 = vpop.f32.mrf.mxu0  ;;  %v2599_v7 = vpop.f32.mrf.mxu1 }
 0x92a   :  { %v2604_v52 = vadd.f32 %v2528_v46, %v17077_v4  ;;  %v2606_v19 = vadd.f32 %v2599_v7, %v17080_v10 }
 0x92b   :  { %v2530_v30 = vpop.f32.mrf.mxu0  ;;  %v2601_v37 = vpop.f32.mrf.mxu1 }
 0x92c   :  { %v8161_v53 = vmul.f32 -1.442695, %v2604_v52  ;;  %v2605_v26 = vadd.f32 %v2530_v30, %v2066_v50  ;;  %v2607_v49 = vadd.f32 %v2601_v37, %v2179_v13 }
 0x92e   :  { %8482 = vpow2.f32 %v8161_v53  ;;  %v8162_v48 = vmul.f32 -1.442695, %v2605_v26  ;;  %v8163_v42 = vmul.f32 -1.442695, %v2607_v49 }
 0x930   :  { %8484 = vpow2.f32 %v8162_v48 }
 0x931   :  { %8486 = vtanh.f32 %v2606_v19 }
 0x932   :  { %8488 = vpow2.f32 %v8163_v42  ;;  %v17106_v42 = vld [vmem:[#allocation53_spill] sm:$0xff] }
 0x93b   :  { %v8483_v31 = vpop.eup %8482 }
 0x93c   :  { %v2611_v40 = vadd.f32 1.0, %v8483_v31 }
 0x93d   :  { %v8485_v63 = vpop.eup %8484 }
 0x93e   :  { %8490 = vrcp.f32 %v2611_v40  ;;  %v2617_v46 = vadd.f32 1.0, %v8485_v63  ;;  %v8487_v30 = vpop.eup %8486  ;;  %v17107_v63 = vld [vmem:[#allocation65_spill] sm:$0xff] }
 0x93f   :  { %v8489_v4 = vpop.eup %8488 }
 0x940   :  { %8492 = vrcp.f32 %v2617_v46  ;;  %v2624_v52 = vadd.f32 1.0, %v8489_v4  ;;  %v2173_v46 = vadd.f32 %v17107_v63, %v17078_v14  ;;  %v17108_v4 = vld [vmem:[#allocation64_spill] sm:$0xff]  ;;  %v11829_v63 = vld [vmem:[%s16226_s5 + $0x180] sm:$0xff] }
 0x942   :  { %8494 = vrcp.f32 %v2624_v52 }
 0x94b   :  { %v8491_v26 = vpop.eup %8490 }
 0x94c   :  { %v2628_v48 = vmul.f32 %v8491_v26, %v8487_v30 }
 0x94d   :  { %v8493_v50 = vpop.eup %8492 }
 0x94e   :  { %v2627_v6 = vmul.f32 %v8493_v50, %v11582_v12 }
 0x94f   :  { %v8495_v31 = vpop.eup %8494 }
 0x950   :  { %v11662_v13 = vadd.f32 %v2628_v48, %v2627_v6 }
 0x952   :  { %8496 = vtanh.f32 %v11662_v13 }
 0x95f   :  { %v8497_v7 = vpop.eup %8496 }
 0x960   :  { %v11665_v10 = vmul.f32 %v8497_v7, %v8495_v31 }
 0x962   :  { %17081 = vst [vmem:[#allocation40_spill] sm:$0xff] %v11665_v10  ;;  %2702 = vmatmul.mubr.f32.vlgmr.msra.gmra.mxu0 %v11665_v10  ;;  %2773 = vmatmul.mubr.f32.vlgmr.msra.gmra.mxu1 %v11665_v10  ;;  %v12168_v10 = vld [vmem:[%s16226_s5 + $0x58] sm:$0xff] }
 0x963   :  { %2813 = vmatpush1.msra.mxu0 %v17055_v18  ;;  %2884 = vmatpush1.msra.mxu1 %v11062_v0  ;;  %v17090_v0 = vld [vmem:[#allocation45_spill] sm:$0xff] }
 0x964   :  { %2814 = vmatprep.subr.mxu0 %v17056_v44  ;;  %2885 = vmatprep.subr.mxu1 %v11076_v51  ;;  %v17092_v51 = vld [vmem:[#allocation43_spill] sm:$0xff] }
 0x965   :  { %2815 = vmatpush1.msra.mxu0 %v11003_v54  ;;  %2886 = vmatpush1.msra.mxu1 %v11114_v23  ;;  %v17082_v54 = vld [vmem:[#allocation39_spill] sm:$0xff]  ;;  %v17097_v23 = vld [vmem:[#allocation14_spill] sm:$0xff] }
 0x966   :  { %2816 = vmatprep.subr.mxu0 %v11010_v55  ;;  %2887 = vmatprep.subr.mxu1 %v11140_v27  ;;  %v17083_v55 = vld [vmem:[#allocation49_spill] sm:$0xff]  ;;  %v17101_v27 = vmov 0.0  }
 0x967   :  { %2817 = vmatpush1.msra.mxu0 %v11016_v58  ;;  %2888 = vmatpush1.msra.mxu1 %v11158_v33  ;;  %v17084_v58 = vld [vmem:[#allocation30_spill] sm:$0xff] }
 0x968   :  { %2818 = vmatprep.subr.mxu0 %v11022_v11  ;;  %2889 = vmatprep.subr.mxu1 %v11170_v35  ;;  %v17085_v11 = vld [vmem:[#allocation47_spill] sm:$0xff]  ;;  %v11736_v33 = vld [vmem:[%s16226_s5 + $0x1e8] sm:$0xff] }
 0x969   :  { %2819 = vmatpush1.msra.mxu0 %v11032_v20  ;;  %2890 = vmatpush1.msra.mxu1 %v11189_v39  ;;  %v17086_v20 = vld [vmem:[#allocation44_spill] sm:$0xff]  ;;  %17103 = vst [vmem:[#allocation38_spill] sm:$0xff] %v11736_v33 }
 0x96a   :  { %2820 = vmatprep.subr.mxu0 %v11044_v3  ;;  %2891 = vmatprep.subr.mxu1 %v11201_v41  ;;  %v17087_v3 = vld [vmem:[#allocation9_spill] sm:$0xff] }
 0x96b   :  { %2821 = vmatpush1.msra.mxu0 %v11050_v61  ;;  %2892 = vmatpush1.msra.mxu1 %v11215_v43  ;;  %v17088_v61 = vld [vmem:[#allocation42_spill] sm:$0xff] }
 0x96c   :  { %2822 = vmatprep.subr.mxu0 %v11056_v38  ;;  %2893 = vmatprep.subr.mxu1 %v11226_v45  ;;  %v17089_v38 = vld [vmem:[#allocation10_spill] sm:$0xff] }
 0x96d   :  { %2823 = vmatpush1.msra.mxu0 %v11071_v56  ;;  %2894 = vmatpush1.msra.mxu1 %v11242_v15  ;;  %v17091_v56 = vld [vmem:[#allocation11_spill] sm:$0xff] }
 0x96e   :  { %2824 = vmatprep.subr.mxu0 %v11083_v29  ;;  %2895 = vmatprep.subr.mxu1 %v11254_v9  ;;  %v17093_v29 = vld [vmem:[#allocation12_spill] sm:$0xff] }
 0x96f   :  { %2825 = vmatpush1.msra.mxu0 %v11089_v1  ;;  %2896 = vmatpush1.msra.mxu1 %v11268_v8  ;;  %v17094_v1 = vld [vmem:[#allocation33_spill] sm:$0xff]  ;;  %17129 = vst [vmem:[#allocation12_spill] sm:$0xff] %v12168_v10 }
 0x970   :  { %2826 = vmatprep.subr.mxu0 %v11096_v62  ;;  %2897 = vmatprep.subr.mxu1 %v11280_v16  ;;  %v17095_v62 = vld [vmem:[#allocation13_spill] sm:$0xff] }
 0x971   :  { %2827 = vmatpush1.msra.mxu0 %v11109_v22  ;;  %2898 = vmatpush1.msra.mxu1 %v11296_v17  ;;  %v17096_v22 = vld [vmem:[#allocation31_spill] sm:$0xff] }
 0x972   :  { %2828 = vmatprep.subr.mxu0 %v11121_v24  ;;  %2899 = vmatprep.subr.mxu1 %v11308_v28  ;;  %v17098_v24 = vld [vmem:[#allocation48_spill] sm:$0xff] }
 0x973   :  { %2829 = vmatpush1.msra.mxu0 %v11128_v25  ;;  %2900 = vmatpush1.msra.mxu1 %v11322_v2  ;;  %v17099_v25 = vld [vmem:[#allocation15_spill] sm:$0xff] }
 0x974   :  { %2830 = vmatprep.subr.mxu0 %v11135_v47  ;;  %2901 = vmatprep.subr.mxu1 %v11329_v57  ;;  %v17100_v47 = vld [vmem:[#allocation46_spill] sm:$0xff] }
 0x975   :  { %2831 = vmatpush1.msra.mxu0 %v11152_v32  ;;  %2902 = vmatpush1.msra.mxu1 %v11336_v60  ;;  %v17102_v32 = vld [vmem:[#allocation16_spill] sm:$0xff] }
 0x976   :  { %2832 = vmatprep.subr.mxu0 %v11165_v34  ;;  %2903 = vmatprep.subr.mxu1 %v11343_v59  ;;  %v17104_v34 = vld [vmem:[#allocation41_spill] sm:$0xff] }
 0x977   :  { %2833 = vmatpush1.msra.mxu0 %v11177_v36  ;;  %2904 = vmatpush1.msra.mxu1 %v11350_v21  ;;  %v17105_v36 = vld [vmem:[#allocation51_spill] sm:$0xff] }
 0x978   :  { %2834 = vmatprep.subr.mxu0 %v17082_v54  ;;  %2905 = vmatprep.subr.mxu1 %v17083_v55  ;;  %v2060_v40 = vadd.f32 %v17105_v36, %v11558_v5  ;;  %v11769_v36 = vld [vmem:[%s16226_s5 + $0x1c8] sm:$0xff] }
 0x979   :  { %2835 = vmatpush1.msra.mxu0 %v17084_v58  ;;  %2906 = vmatpush1.msra.mxu1 %v17085_v11 }
 0x97a   :  { %2836 = vmatprep.subr.mxu0 %v17086_v20  ;;  %2907 = vmatprep.subr.mxu1 %v17087_v3 }
 0x97b   :  { %2837 = vmatpush1.msra.mxu0 %v17088_v61  ;;  %2908 = vmatpush1.msra.mxu1 %v17089_v38 }
 0x97c   :  { %2838 = vmatprep.subr.mxu0 %v17090_v0  ;;  %2909 = vmatprep.subr.mxu1 %v17091_v56 }
 0x97d   :  { %2839 = vmatpush1.msra.mxu0 %v17092_v51  ;;  %2910 = vmatpush1.msra.mxu1 %v17093_v29 }
 0x97e   :  { %2840 = vmatprep.subr.mxu0 %v17094_v1  ;;  %2911 = vmatprep.subr.mxu1 %v17095_v62 }
 0x97f   :  { %2841 = vmatpush1.msra.mxu0 %v17096_v22  ;;  %2912 = vmatpush1.msra.mxu1 %v17097_v23 }
 0x980   :  { %2842 = vmatprep.subr.mxu0 %v17098_v24  ;;  %2913 = vmatprep.subr.mxu1 %v17099_v25 }
 0x981   :  { %2843 = vmatpush1.msra.mxu0 %v17100_v47  ;;  %2876 = vmatprep.mubr.f32.mxu0 %v17101_v27 }
 0x982   :  { %2914 = vmatpush1.msra.mxu1 %v17102_v32  ;;  %2947 = vmatprep.mubr.f32.mxu1 %v17101_v27 }
 0x983   :  { %2987 = vmatprep.subr.mxu0 %v11736_v33  ;;  %3058 = vmatprep.subr.mxu1 %v17104_v34 }
 0xa22   :  { %v2703_v35 = vpop.f32.mrf.mxu0  ;;  %v2774_v19 = vpop.f32.mrf.mxu1 }
 0xa23   :  { %v2779_v12 = vadd.f32 %v2703_v35, %v17106_v42  ;;  %v2781_v26 = vadd.f32 %v2774_v19, %v17108_v4  ;;  %v11757_v35 = vld [vmem:[%s16226_s5 + $0x1e0] sm:$0xff]  ;;  %v11811_v19 = vld [vmem:[%s16226_s5 + $0x1b0] sm:$0xff] }
 0xa24   :  { %v2705_v18 = vpop.f32.mrf.mxu0  ;;  %v2776_v49 = vpop.f32.mrf.mxu1  ;;  %v11781_v42 = vld [vmem:[%s16226_s5 + $0x1c0] sm:$0xff] }
 0xa25   :  { %v8164_v44 = vmul.f32 -1.442695, %v2779_v12  ;;  %v2780_v37 = vadd.f32 %v2705_v18, %v2060_v40  ;;  %v2782_v30 = vadd.f32 %v2776_v49, %v2173_v46  ;;  %v11775_v40 = vld [vmem:[%s16226_s5 + $0x1d8] sm:$0xff]  ;;  %v11787_v12 = vld [vmem:[%s16226_s5 + $0x1d0] sm:$0xff]  ;;  %v11793_v18 = vld [vmem:[%s16226_s5 + $0x1a8] sm:$0xff] }
 0xa26   :  { %v11823_v49 = vld [vmem:[%s16226_s5 + $0x198] sm:$0xff]  ;;  %v11836_v46 = vld [vmem:[%s16226_s5 + $0x168] sm:$0xff] }
 0xa27   :  { %8498 = vpow2.f32 %v8164_v44  ;;  %v8165_v53 = vmul.f32 -1.442695, %v2780_v37  ;;  %v8166_v48 = vmul.f32 -1.442695, %v2782_v30  ;;  %v11799_v44 = vld [vmem:[%s16226_s5 + $0x1b8] sm:$0xff]  ;;  %v11805_v37 = vld [vmem:[%s16226_s5 + $0x1a0] sm:$0xff] }
 0xa28   :  { %v11843_v30 = vld [vmem:[%s16226_s5 + $0x160] sm:$0xff] }
 0xa29   :  { %8500 = vpow2.f32 %v8165_v53  ;;  %v11817_v53 = vld [vmem:[%s16226_s5 + $0x188] sm:$0xff] }
 0xa2a   :  { %8502 = vtanh.f32 %v2781_v26 }
 0xa2b   :  { %8504 = vpow2.f32 %v8166_v48 }
 0xa34   :  { %v8499_v50 = vpop.eup %8498 }
 0xa35   :  { %v2786_v52 = vadd.f32 1.0, %v8499_v50 }
 0xa36   :  { %v8501_v6 = vpop.eup %8500 }
 0xa37   :  { %8506 = vrcp.f32 %v2786_v52  ;;  %v2792_v31 = vadd.f32 1.0, %v8501_v6  ;;  %v8503_v7 = vpop.eup %8502 }
 0xa38   :  { %v8505_v54 = vpop.eup %8504 }
 0xa39   :  { %8508 = vrcp.f32 %v2792_v31  ;;  %v2799_v0 = vadd.f32 1.0, %v8505_v54 }
 0xa3b   :  { %8510 = vrcp.f32 %v2799_v0 }
 0xa44   :  { %v8507_v58 = vpop.eup %8506 }
 0xa45   :  { %v2803_v20 = vmul.f32 %v8507_v58, %v8503_v7  ;;  %v17122_v7 = vld [vmem:[#allocation63_spill] sm:$0xff] }
 0xa46   :  { %v8509_v61 = vpop.eup %8508  ;;  %v2167_v54 = vadd.f32 %v17122_v7, %v17078_v14 }
 0xa47   :  { %v2802_v51 = vmul.f32 %v8509_v61, %v11662_v13  ;;  %v11763_v13 = vld [vmem:[%s16226_s5 + $0x1f0] sm:$0xff] }
 0xa48   :  { %v8511_v22 = vpop.eup %8510 }
 0xa49   :  { %v11747_v1 = vadd.f32 %v2803_v20, %v2802_v51  ;;  %v17123_v20 = vld [vmem:[#allocation37_spill] sm:$0xff] }
 0xa4b   :  { %8512 = vtanh.f32 %v11747_v1 }
 0xa58   :  { %v8513_v24 = vpop.eup %8512 }
 0xa59   :  { %v11750_v34 = vmul.f32 %v8513_v24, %v8511_v22 }
 0xa5b   :  { %17109 = vst [vmem:[#allocation27_spill] sm:$0xff] %v11750_v34  ;;  %2877 = vmatmul.mubr.f32.vlgmr.msra.gmra.mxu0 %v11750_v34  ;;  %2948 = vmatmul.mubr.f32.vlgmr.msra.gmra.mxu1 %v11750_v34  ;;  %v12175_v34 = vld [vmem:[%s16226_s5 + $0x50] sm:$0xff] }
 0xa5c   :  { %2988 = vmatpush1.msra.mxu0 %v11757_v35  ;;  %3059 = vmatpush1.msra.mxu1 %v11763_v13  ;;  %17130 = vst [vmem:[#allocation33_spill] sm:$0xff] %v12175_v34 }
 0xa5d   :  { %2989 = vmatprep.subr.mxu0 %v11769_v36  ;;  %3060 = vmatprep.subr.mxu1 %v11775_v40 }
 0xa5e   :  { %2990 = vmatpush1.msra.mxu0 %v11781_v42  ;;  %3061 = vmatpush1.msra.mxu1 %v11787_v12 }
 0xa5f   :  { %2991 = vmatprep.subr.mxu0 %v11793_v18  ;;  %3062 = vmatprep.subr.mxu1 %v11799_v44 }
 0xa60   :  { %2992 = vmatpush1.msra.mxu0 %v11805_v37  ;;  %3063 = vmatpush1.msra.mxu1 %v11811_v19 }
 0xa61   :  { %2993 = vmatprep.subr.mxu0 %v11817_v53  ;;  %3064 = vmatprep.subr.mxu1 %v11823_v49 }
 0xa62   :  { %2994 = vmatpush1.msra.mxu0 %v11829_v63  ;;  %3065 = vmatpush1.msra.mxu1 %v11189_v39  ;;  %v11850_v39 = vld [vmem:[%s16226_s5 + $0x148] sm:$0xff] }
 0xa63   :  { %2995 = vmatprep.subr.mxu0 %v11836_v46  ;;  %3066 = vmatprep.subr.mxu1 %v11201_v41  ;;  %v11857_v41 = vld [vmem:[%s16226_s5 + $0x140] sm:$0xff] }
 0xa64   :  { %2996 = vmatpush1.msra.mxu0 %v11843_v30  ;;  %3067 = vmatpush1.msra.mxu1 %v11215_v43  ;;  %v11864_v43 = vld [vmem:[%s16226_s5 + $0x128] sm:$0xff] }
 0xa65   :  { %2997 = vmatprep.subr.mxu0 %v11850_v39  ;;  %3068 = vmatprep.subr.mxu1 %v11226_v45  ;;  %v11871_v45 = vld [vmem:[%s16226_s5 + $0x120] sm:$0xff] }
 0xa66   :  { %2998 = vmatpush1.msra.mxu0 %v11857_v41  ;;  %3069 = vmatpush1.msra.mxu1 %v11242_v15  ;;  %v11878_v15 = vld [vmem:[%s16226_s5 + $0x108] sm:$0xff] }
 0xa67   :  { %2999 = vmatprep.subr.mxu0 %v11864_v43  ;;  %3070 = vmatprep.subr.mxu1 %v11254_v9  ;;  %v11885_v9 = vld [vmem:[%s16226_s5 + $0x100] sm:$0xff] }
 0xa68   :  { %3000 = vmatpush1.msra.mxu0 %v11871_v45  ;;  %3071 = vmatpush1.msra.mxu1 %v11268_v8  ;;  %v11892_v8 = vld [vmem:[%s16226_s5 + $0xe8] sm:$0xff] }
 0xa69   :  { %3001 = vmatprep.subr.mxu0 %v11878_v15  ;;  %3072 = vmatprep.subr.mxu1 %v11280_v16  ;;  %v11899_v16 = vld [vmem:[%s16226_s5 + $0xe0] sm:$0xff] }
 0xa6a   :  { %3002 = vmatpush1.msra.mxu0 %v11885_v9  ;;  %3073 = vmatpush1.msra.mxu1 %v11296_v17  ;;  %v11906_v17 = vld [vmem:[%s16226_s5 + $0xc8] sm:$0xff] }
 0xa6b   :  { %3003 = vmatprep.subr.mxu0 %v11892_v8  ;;  %3074 = vmatprep.subr.mxu1 %v11308_v28  ;;  %v11913_v28 = vld [vmem:[%s16226_s5 + $0xc0] sm:$0xff] }
 0xa6c   :  { %3004 = vmatpush1.msra.mxu0 %v11899_v16  ;;  %3075 = vmatpush1.msra.mxu1 %v11322_v2  ;;  %v11920_v2 = vld [vmem:[%s16226_s5 + $0xa8] sm:$0xff] }
 0xa6d   :  { %3005 = vmatprep.subr.mxu0 %v11906_v17  ;;  %3076 = vmatprep.subr.mxu1 %v11329_v57  ;;  %v11927_v57 = vld [vmem:[%s16226_s5 + $0xa0] sm:$0xff] }
 0xa6e   :  { %3006 = vmatpush1.msra.mxu0 %v11913_v28  ;;  %3077 = vmatpush1.msra.mxu1 %v11336_v60  ;;  %v11934_v60 = vld [vmem:[%s16226_s5 + $0x88] sm:$0xff] }
 0xa6f   :  { %3007 = vmatprep.subr.mxu0 %v11920_v2  ;;  %3078 = vmatprep.subr.mxu1 %v11343_v59  ;;  %17110 = vst [vmem:[#allocation56_spill] sm:$0xff] %v11934_v60  ;;  %v11941_v59 = vld [vmem:[%s16226_s5 + $0x80] sm:$0xff] }
 0xa70   :  { %3008 = vmatpush1.msra.mxu0 %v11927_v57  ;;  %3079 = vmatpush1.msra.mxu1 %v11350_v21  ;;  %17111 = vst [vmem:[#allocation68_spill] sm:$0xff] %v11941_v59  ;;  %v11948_v21 = vld [vmem:[%s16226_s5 + $0x68] sm:$0xff] }
 0xa71   :  { %3009 = vmatprep.subr.mxu0 %v11934_v60  ;;  %3080 = vmatprep.subr.mxu1 %v17083_v55  ;;  %17112 = vst [vmem:[#allocation67_spill] sm:$0xff] %v11948_v21  ;;  %v11955_v55 = vld [vmem:[%s16226_s5 + $0x60] sm:$0xff] }
 0xa72   :  { %3010 = vmatpush1.msra.mxu0 %v11941_v59  ;;  %3081 = vmatpush1.msra.mxu1 %v17085_v11  ;;  %17113 = vst [vmem:[#allocation66_spill] sm:$0xff] %v11955_v55  ;;  %v11962_v11 = vld [vmem:[%s16226_s5 + $0x48] sm:$0xff] }
 0xa73   :  { %3011 = vmatprep.subr.mxu0 %v11948_v21  ;;  %3082 = vmatprep.subr.mxu1 %v17087_v3  ;;  %17114 = vst [vmem:[#allocation39_spill] sm:$0xff] %v11962_v11  ;;  %v11969_v3 = vld [vmem:[%s16226_s5 + $0x40] sm:$0xff] }
 0xa74   :  { %3012 = vmatpush1.msra.mxu0 %v11955_v55  ;;  %3083 = vmatpush1.msra.mxu1 %v17089_v38  ;;  %17115 = vst [vmem:[#allocation49_spill] sm:$0xff] %v11969_v3  ;;  %v11976_v38 = vld [vmem:[%s16226_s5 + $0x28] sm:$0xff] }
 0xa75   :  { %3013 = vmatprep.subr.mxu0 %v11962_v11  ;;  %3084 = vmatprep.subr.mxu1 %v17091_v56  ;;  %17116 = vst [vmem:[#allocation30_spill] sm:$0xff] %v11976_v38  ;;  %v11983_v56 = vld [vmem:[%s16226_s5 + $0x20] sm:$0xff] }
 0xa76   :  { %3014 = vmatpush1.msra.mxu0 %v11969_v3  ;;  %3085 = vmatpush1.msra.mxu1 %v17093_v29  ;;  %17117 = vst [vmem:[#allocation47_spill] sm:$0xff] %v11983_v56  ;;  %v11990_v29 = vld [vmem:[%s16226_s5 + $0x8] sm:$0xff] }
 0xa77   :  { %3015 = vmatprep.subr.mxu0 %v11976_v38  ;;  %3086 = vmatprep.subr.mxu1 %v17095_v62  ;;  %17118 = vst [vmem:[#allocation44_spill] sm:$0xff] %v11990_v29  ;;  %v12002_v62 = vld [vmem:[%s16226_s5 + $0x1f8] sm:$0xff] }
 0xa78   :  { %3016 = vmatpush1.msra.mxu0 %v11983_v56  ;;  %3087 = vmatpush1.msra.mxu1 %v17097_v23  ;;  %17119 = vst [vmem:[#allocation9_spill] sm:$0xff] %v12002_v62 }
 0xa79   :  { %3017 = vmatprep.subr.mxu0 %v11990_v29  ;;  %3088 = vmatprep.subr.mxu1 %v17099_v25  ;;  %v17120_v25 = vld [vmem:[#allocation6_spill] sm:$0xff] }
 0xa7a   :  { %3018 = vmatpush1.msra.mxu0 %v17100_v47  ;;  %3051 = vmatprep.mubr.f32.mxu0 %v17101_v27  ;;  %v2054_v4 = vadd.f32 %v17120_v25, %v11558_v5  ;;  %v17121_v47 = vld [vmem:[#allocation5_spill] sm:$0xff] }
 0xa7b   :  { %3089 = vmatpush1.msra.mxu1 %v17102_v32  ;;  %3122 = vmatprep.mubr.f32.mxu1 %v17101_v27 }
 0xa7c   :  { %3162 = vmatprep.subr.mxu0 %v11736_v33  ;;  %3233 = vmatprep.subr.mxu1 %v12002_v62 }
 0xb1b   :  { %v2878_v23 = vpop.f32.mrf.mxu0  ;;  %v2949_v52 = vpop.f32.mrf.mxu1 }
 0xb1c   :  { %v2954_v26 = vadd.f32 %v2878_v23, %v17121_v47  ;;  %v2956_v61 = vadd.f32 %v2949_v52, %v17123_v20  ;;  %v12056_v20 = vld [vmem:[%s16226_s5 + $0x158] sm:$0xff] }
 0xb1d   :  { %v2880_v48 = vpop.f32.mrf.mxu0  ;;  %v2951_v31 = vpop.f32.mrf.mxu1 }
 0xb1e   :  { %v8167_v50 = vmul.f32 -1.442695, %v2954_v26  ;;  %v2955_v32 = vadd.f32 %v2880_v48, %v2054_v4  ;;  %v2957_v58 = vadd.f32 %v2951_v31, %v2167_v54  ;;  %v12042_v54 = vld [vmem:[%s16226_s5 + $0x178] sm:$0xff] }
 0xb20   :  { %8514 = vpow2.f32 %v8167_v50  ;;  %v8168_v6 = vmul.f32 -1.442695, %v2955_v32  ;;  %v8169_v0 = vmul.f32 -1.442695, %v2957_v58  ;;  %v12049_v58 = vld [vmem:[%s16226_s5 + $0x170] sm:$0xff] }
 0xb22   :  { %8516 = vpow2.f32 %v8168_v6 }
 0xb23   :  { %8518 = vtanh.f32 %v2956_v61  ;;  %v12063_v61 = vld [vmem:[%s16226_s5 + $0x150] sm:$0xff] }
 0xb24   :  { %8520 = vpow2.f32 %v8169_v0  ;;  %v12070_v0 = vld [vmem:[%s16226_s5 + $0x138] sm:$0xff] }
 0xb2d   :  { %v8515_v51 = vpop.eup %8514 }
 0xb2e   :  { %v2961_v22 = vadd.f32 1.0, %v8515_v51  ;;  %v12077_v51 = vld [vmem:[%s16226_s5 + $0x130] sm:$0xff] }
 0xb2f   :  { %v8517_v24 = vpop.eup %8516 }
 0xb30   :  { %8522 = vrcp.f32 %v2961_v22  ;;  %v2967_v23 = vadd.f32 1.0, %v8517_v24  ;;  %v8519_v25 = vpop.eup %8518  ;;  %v12084_v22 = vld [vmem:[%s16226_s5 + $0x118] sm:$0xff]  ;;  %v12091_v24 = vld [vmem:[%s16226_s5 + $0x110] sm:$0xff] }
 0xb31   :  { %v8521_v4 = vpop.eup %8520 }
 0xb32   :  { %8524 = vrcp.f32 %v2967_v23  ;;  %v2974_v50 = vadd.f32 1.0, %v8521_v4  ;;  %v12098_v23 = vld [vmem:[%s16226_s5 + $0xf8] sm:$0xff] }
 0xb33   :  { %v12112_v4 = vld [vmem:[%s16226_s5 + $0xd8] sm:$0xff] }
 0xb34   :  { %8526 = vrcp.f32 %v2974_v50  ;;  %v12140_v50 = vld [vmem:[%s16226_s5 + $0x98] sm:$0xff] }
 0xb35   :  { %17125 = vst [vmem:[#allocation10_spill] sm:$0xff] %v12140_v50 }
 0xb3d   :  { %v8523_v47 = vpop.eup %8522 }
 0xb3e   :  { %v2978_v26 = vmul.f32 %v8523_v47, %v8519_v25  ;;  %v12105_v25 = vld [vmem:[%s16226_s5 + $0xf0] sm:$0xff] }
 0xb3f   :  { %v8525_v48 = vpop.eup %8524  ;;  %v12119_v47 = vld [vmem:[%s16226_s5 + $0xd0] sm:$0xff] }
 0xb40   :  { %v2977_v32 = vmul.f32 %v8525_v48, %v11747_v1  ;;  %v12035_v1 = vld [vmem:[%s16226_s5 + $0x190] sm:$0xff] }
 0xb41   :  { %v8527_v52 = vpop.eup %8526  ;;  %v12133_v48 = vld [vmem:[%s16226_s5 + $0xb0] sm:$0xff] }
 0xb42   :  { %v12012_v6 = vadd.f32 %v2978_v26, %v2977_v32  ;;  %v12126_v26 = vld [vmem:[%s16226_s5 + $0xb8] sm:$0xff]  ;;  %v12147_v32 = vld [vmem:[%s16226_s5 + $0x90] sm:$0xff] }
 0xb43   :  { %17126 = vst [vmem:[#allocation45_spill] sm:$0xff] %v12147_v32 }
 0xb44   :  { %8528 = vtanh.f32 %v12012_v6 }
 0xb51   :  { %v8529_v31 = vpop.eup %8528 }
 0xb52   :  { %v12015_v7 = vmul.f32 %v8529_v31, %v8527_v52  ;;  %v12154_v52 = vld [vmem:[%s16226_s5 + $0x78] sm:$0xff]  ;;  %v12161_v31 = vld [vmem:[%s16226_s5 + $0x70] sm:$0xff] }
 0xb53   :  { %17127 = vst [vmem:[#allocation11_spill] sm:$0xff] %v12154_v52  ;;  %17128 = vst [vmem:[#allocation43_spill] sm:$0xff] %v12161_v31 }
 0xb54   :  { %17124 = vst [vmem:[#allocation42_spill] sm:$0xff] %v12015_v7  ;;  %3052 = vmatmul.mubr.f32.vlgmr.msra.gmra.mxu0 %v12015_v7  ;;  %3123 = vmatmul.mubr.f32.vlgmr.msra.gmra.mxu1 %v12015_v7  ;;  %v12182_v7 = vld [vmem:[%s16226_s5 + $0x38] sm:$0xff] }
 0xb55   :  { %3163 = vmatpush1.msra.mxu0 %v11757_v35  ;;  %3234 = vmatpush1.msra.mxu1 %v11763_v13  ;;  %17131 = vst [vmem:[#allocation13_spill] sm:$0xff] %v12182_v7 }
 0xb56   :  { %3164 = vmatprep.subr.mxu0 %v11769_v36  ;;  %3235 = vmatprep.subr.mxu1 %v11775_v40 }
 0xb57   :  { %3165 = vmatpush1.msra.mxu0 %v11781_v42  ;;  %3236 = vmatpush1.msra.mxu1 %v11787_v12 }
 0xb58   :  { %3166 = vmatprep.subr.mxu0 %v11793_v18  ;;  %3237 = vmatprep.subr.mxu1 %v11799_v44 }
 0xb59   :  { %3167 = vmatpush1.msra.mxu0 %v11805_v37  ;;  %3238 = vmatpush1.msra.mxu1 %v11811_v19 }
 0xb5a   :  { %3168 = vmatprep.subr.mxu0 %v11817_v53  ;;  %3239 = vmatprep.subr.mxu1 %v11823_v49 }
 0xb5b   :  { %3169 = vmatpush1.msra.mxu0 %v11829_v63  ;;  %3240 = vmatpush1.msra.mxu1 %v12035_v1 }
 0xb5c   :  { %3170 = vmatprep.subr.mxu0 %v11836_v46  ;;  %3241 = vmatprep.subr.mxu1 %v12042_v54 }
 0xb5d   :  { %3171 = vmatpush1.msra.mxu0 %v11843_v30  ;;  %3242 = vmatpush1.msra.mxu1 %v12049_v58 }
 0xb5e   :  { %3172 = vmatprep.subr.mxu0 %v11850_v39  ;;  %3243 = vmatprep.subr.mxu1 %v12056_v20 }
 0xb5f   :  { %3173 = vmatpush1.msra.mxu0 %v11857_v41  ;;  %3244 = vmatpush1.msra.mxu1 %v12063_v61 }
 0xb60   :  { %3174 = vmatprep.subr.mxu0 %v11864_v43  ;;  %3245 = vmatprep.subr.mxu1 %v12070_v0 }
 0xb61   :  { %3175 = vmatpush1.msra.mxu0 %v11871_v45  ;;  %3246 = vmatpush1.msra.mxu1 %v12077_v51 }
 0xb62   :  { %3176 = vmatprep.subr.mxu0 %v11878_v15  ;;  %3247 = vmatprep.subr.mxu1 %v12084_v22 }
 0xb63   :  { %3177 = vmatpush1.msra.mxu0 %v11885_v9  ;;  %3248 = vmatpush1.msra.mxu1 %v12091_v24 }
 0xb64   :  { %3178 = vmatprep.subr.mxu0 %v11892_v8  ;;  %3249 = vmatprep.subr.mxu1 %v12098_v23 }
 0xb65   :  { %3179 = vmatpush1.msra.mxu0 %v11899_v16  ;;  %3250 = vmatpush1.msra.mxu1 %v12105_v25 }
 0xb66   :  { %3180 = vmatprep.subr.mxu0 %v11906_v17  ;;  %3251 = vmatprep.subr.mxu1 %v12112_v4 }
 0xb67   :  { %3181 = vmatpush1.msra.mxu0 %v11913_v28  ;;  %3252 = vmatpush1.msra.mxu1 %v12119_v47 }
 0xb68   :  { %3182 = vmatprep.subr.mxu0 %v11920_v2  ;;  %3253 = vmatprep.subr.mxu1 %v12126_v26 }
 0xb69   :  { %3183 = vmatpush1.msra.mxu0 %v11927_v57  ;;  %3254 = vmatpush1.msra.mxu1 %v12133_v48 }
 0xb6a   :  { %3184 = vmatprep.subr.mxu0 %v11934_v60  ;;  %3255 = vmatprep.subr.mxu1 %v12140_v50 }
 0xb6b   :  { %3185 = vmatpush1.msra.mxu0 %v11941_v59  ;;  %3256 = vmatpush1.msra.mxu1 %v12147_v32  ;;  %v17139_v32 = vld [vmem:[#allocation61_spill] sm:$0xff] }
 0xb6c   :  { %3186 = vmatprep.subr.mxu0 %v11948_v21  ;;  %3257 = vmatprep.subr.mxu1 %v12154_v52 }
 0xb6d   :  { %3187 = vmatpush1.msra.mxu0 %v11955_v55  ;;  %3258 = vmatpush1.msra.mxu1 %v12161_v31 }
 0xb6e   :  { %3188 = vmatprep.subr.mxu0 %v11962_v11  ;;  %3259 = vmatprep.subr.mxu1 %v12168_v10 }
 0xb6f   :  { %3189 = vmatpush1.msra.mxu0 %v11969_v3  ;;  %3260 = vmatpush1.msra.mxu1 %v12175_v34  ;;  %v12189_v3 = vld [vmem:[%s16226_s5 + $0x30] sm:$0xff] }
 0xb70   :  { %3190 = vmatprep.subr.mxu0 %v11976_v38  ;;  %3261 = vmatprep.subr.mxu1 %v12182_v7  ;;  %17132 = vst [vmem:[#allocation31_spill] sm:$0xff] %v12189_v3  ;;  %v12196_v38 = vld [vmem:[%s16226_s5 + $0x18] sm:$0xff] }
 0xb71   :  { %3191 = vmatpush1.msra.mxu0 %v11983_v56  ;;  %3262 = vmatpush1.msra.mxu1 %v12189_v3  ;;  %17133 = vst [vmem:[#allocation14_spill] sm:$0xff] %v12196_v38  ;;  %v12202_v56 = vld [vmem:[%s16226_s5] sm:$0xff]  ;;  %v17136_v3 = vld [vmem:[#allocation26_spill] sm:$0xff] }
 0xb72   :  { %3192 = vmatprep.subr.mxu0 %v11990_v29  ;;  %3263 = vmatprep.subr.mxu1 %v12196_v38  ;;  %17134 = vst [vmem:[#allocation48_spill] sm:$0xff] %v12202_v56  ;;  %v12209_v29 = vld [vmem:[%s16226_s5 + $0x10] sm:$0xff]  ;;  %v2048_v7 = vadd.f32 %v17136_v3, %v11558_v5 }
 0xb73   :  { %3193 = vmatpush1.msra.mxu0 %v12202_v56  ;;  %3226 = vmatprep.mubr.f32.mxu0 %v17101_v27  ;;  %17135 = vst [vmem:[#allocation15_spill] sm:$0xff] %v12209_v29  ;;  %v17137_v56 = vld [vmem:[#allocation24_spill] sm:$0xff] }
 0xb74   :  { %3264 = vmatpush1.msra.mxu1 %v12209_v29  ;;  %3297 = vmatprep.mubr.f32.mxu1 %v17101_v27  ;;  %v17138_v27 = vld [vmem:[#allocation59_spill] sm:$0xff] }
 0xb75   :  { %3337 = vmatprep.subr.mxu0 %v11736_v33  ;;  %3408 = vmatprep.subr.mxu1 %v12002_v62  ;;  %v2161_v21 = vadd.f32 %v17138_v27, %v17078_v14 }
 0xc14   :  { %v3053_v38 = vpop.f32.mrf.mxu0  ;;  %v3124_v55 = vpop.f32.mrf.mxu1 }
 0xc15   :  { %v3129_v34 = vadd.f32 %v3053_v38, %v17137_v56  ;;  %v3131_v62 = vadd.f32 %v3124_v55, %v17139_v32  ;;  %v17146_v32 = vld [vmem:[#allocation11_spill] sm:$0xff] }
 0xc16   :  { %v3055_v10 = vpop.f32.mrf.mxu0  ;;  %v3126_v29 = vpop.f32.mrf.mxu1 }
 0xc17   :  { %v8170_v11 = vmul.f32 -1.442695, %v3129_v34  ;;  %v3130_v31 = vadd.f32 %v3055_v10, %v2048_v7  ;;  %v3132_v33 = vadd.f32 %v3126_v29, %v2161_v21 }
 0xc19   :  { %8530 = vpow2.f32 %v8170_v11  ;;  %v8171_v52 = vmul.f32 -1.442695, %v3130_v31  ;;  %v8172_v59 = vmul.f32 -1.442695, %v3132_v33  ;;  %v17147_v31 = vld [vmem:[#allocation66_spill] sm:$0xff] }
 0xc1b   :  { %8532 = vpow2.f32 %v8171_v52 }
 0xc1c   :  { %8534 = vtanh.f32 %v3131_v62  ;;  %v17143_v62 = vld [vmem:[#allocation68_spill] sm:$0xff] }
 0xc1d   :  { %8536 = vpow2.f32 %v8172_v59  ;;  %v17142_v59 = vld [vmem:[#allocation10_spill] sm:$0xff] }
 0xc26   :  { %v8531_v50 = vpop.eup %8530 }
 0xc27   :  { %v3136_v60 = vadd.f32 1.0, %v8531_v50  ;;  %v17145_v50 = vld [vmem:[#allocation67_spill] sm:$0xff] }
 0xc28   :  { %v8533_v3 = vpop.eup %8532 }
 0xc29   :  { %8538 = vrcp.f32 %v3136_v60  ;;  %v3142_v34 = vadd.f32 1.0, %v8533_v3  ;;  %v8535_v10 = vpop.eup %8534  ;;  %v17141_v60 = vld [vmem:[#allocation56_spill] sm:$0xff]  ;;  %v17148_v3 = vld [vmem:[#allocation43_spill] sm:$0xff] }
 0xc2a   :  { %v8537_v11 = vpop.eup %8536 }
 0xc2b   :  { %8540 = vrcp.f32 %v3142_v34  ;;  %v3149_v52 = vadd.f32 1.0, %v8537_v11  ;;  %v17149_v34 = vld [vmem:[#allocation39_spill] sm:$0xff]  ;;  %v17151_v11 = vld [vmem:[#allocation49_spill] sm:$0xff] }
 0xc2d   :  { %8542 = vrcp.f32 %v3149_v52  ;;  %v17155_v52 = vld [vmem:[#allocation47_spill] sm:$0xff] }
 0xc36   :  { %v8539_v38 = vpop.eup %8538 }
 0xc37   :  { %v3153_v56 = vmul.f32 %v8539_v38, %v8535_v10  ;;  %v17150_v10 = vld [vmem:[#allocation12_spill] sm:$0xff]  ;;  %v17152_v38 = vld [vmem:[#allocation33_spill] sm:$0xff] }
 0xc38   :  { %v8541_v7 = vpop.eup %8540 }
 0xc39   :  { %v3152_v27 = vmul.f32 %v8541_v7, %v12012_v6  ;;  %v17144_v6 = vld [vmem:[#allocation45_spill] sm:$0xff] }
 0xc3a   :  { %v8543_v33 = vpop.eup %8542  ;;  %v17154_v7 = vld [vmem:[#allocation13_spill] sm:$0xff] }
 0xc3b   :  { %v12222_v21 = vadd.f32 %v3153_v56, %v3152_v27  ;;  %v17153_v56 = vld [vmem:[#allocation30_spill] sm:$0xff]  ;;  %v17156_v27 = vld [vmem:[#allocation31_spill] sm:$0xff] }
 0xc3d   :  { %8544 = vtanh.f32 %v12222_v21 }
 0xc4a   :  { %v8545_v55 = vpop.eup %8544 }
 0xc4b   :  { %v12225_v29 = vmul.f32 %v8545_v55, %v8543_v33  ;;  %v17157_v33 = vld [vmem:[#allocation44_spill] sm:$0xff]  ;;  %v17158_v55 = vld [vmem:[#allocation14_spill] sm:$0xff] }
 0xc4d   :  { %17140 = vst [vmem:[#allocation46_spill] sm:$0xff] %v12225_v29  ;;  %3227 = vmatmul.mubr.f32.vlgmr.msra.gmra.mxu0 %v12225_v29  ;;  %3298 = vmatmul.mubr.f32.vlgmr.msra.gmra.mxu1 %v12225_v29  ;;  %v17159_v29 = vld [vmem:[#allocation48_spill] sm:$0xff] }
 0xc4e   :  { %3338 = vmatpush1.msra.mxu0 %v11757_v35  ;;  %3409 = vmatpush1.msra.mxu1 %v11763_v13 }
 0xc4f   :  { %3339 = vmatprep.subr.mxu0 %v11769_v36  ;;  %3410 = vmatprep.subr.mxu1 %v11775_v40 }
 0xc50   :  { %3340 = vmatpush1.msra.mxu0 %v11781_v42  ;;  %3411 = vmatpush1.msra.mxu1 %v11787_v12 }
 0xc51   :  { %3341 = vmatprep.subr.mxu0 %v11793_v18  ;;  %3412 = vmatprep.subr.mxu1 %v11799_v44 }
 0xc52   :  { %3342 = vmatpush1.msra.mxu0 %v11805_v37  ;;  %3413 = vmatpush1.msra.mxu1 %v11811_v19 }
 0xc53   :  { %3343 = vmatprep.subr.mxu0 %v11817_v53  ;;  %3414 = vmatprep.subr.mxu1 %v11823_v49 }
 0xc54   :  { %3344 = vmatpush1.msra.mxu0 %v11829_v63  ;;  %3415 = vmatpush1.msra.mxu1 %v12035_v1 }
 0xc55   :  { %3345 = vmatprep.subr.mxu0 %v11836_v46  ;;  %3416 = vmatprep.subr.mxu1 %v12042_v54 }
 0xc56   :  { %3346 = vmatpush1.msra.mxu0 %v11843_v30  ;;  %3417 = vmatpush1.msra.mxu1 %v12049_v58 }
 0xc57   :  { %3347 = vmatprep.subr.mxu0 %v11850_v39  ;;  %3418 = vmatprep.subr.mxu1 %v12056_v20 }
 0xc58   :  { %3348 = vmatpush1.msra.mxu0 %v11857_v41  ;;  %3419 = vmatpush1.msra.mxu1 %v12063_v61 }
 0xc59   :  { %3349 = vmatprep.subr.mxu0 %v11864_v43  ;;  %3420 = vmatprep.subr.mxu1 %v12070_v0 }
 0xc5a   :  { %3350 = vmatpush1.msra.mxu0 %v11871_v45  ;;  %3421 = vmatpush1.msra.mxu1 %v12077_v51 }
 0xc5b   :  { %3351 = vmatprep.subr.mxu0 %v11878_v15  ;;  %3422 = vmatprep.subr.mxu1 %v12084_v22 }
 0xc5c   :  { %3352 = vmatpush1.msra.mxu0 %v11885_v9  ;;  %3423 = vmatpush1.msra.mxu1 %v12091_v24 }
 0xc5d   :  { %3353 = vmatprep.subr.mxu0 %v11892_v8  ;;  %3424 = vmatprep.subr.mxu1 %v12098_v23 }
 0xc5e   :  { %3354 = vmatpush1.msra.mxu0 %v11899_v16  ;;  %3425 = vmatpush1.msra.mxu1 %v12105_v25 }
 0xc5f   :  { %3355 = vmatprep.subr.mxu0 %v11906_v17  ;;  %3426 = vmatprep.subr.mxu1 %v12112_v4 }
 0xc60   :  { %3356 = vmatpush1.msra.mxu0 %v11913_v28  ;;  %3427 = vmatpush1.msra.mxu1 %v12119_v47 }
 0xc61   :  { %3357 = vmatprep.subr.mxu0 %v11920_v2  ;;  %3428 = vmatprep.subr.mxu1 %v12126_v26 }
 0xc62   :  { %3358 = vmatpush1.msra.mxu0 %v11927_v57  ;;  %3429 = vmatpush1.msra.mxu1 %v12133_v48 }
 0xc63   :  { %3359 = vmatprep.subr.mxu0 %v17141_v60  ;;  %3430 = vmatprep.subr.mxu1 %v17142_v59 }
 0xc64   :  { %3360 = vmatpush1.msra.mxu0 %v17143_v62  ;;  %3431 = vmatpush1.msra.mxu1 %v17144_v6  ;;  %v17167_v6 = vld [vmem:[#allocation57_spill] sm:$0xff] }
 0xc65   :  { %3361 = vmatprep.subr.mxu0 %v17145_v50  ;;  %3432 = vmatprep.subr.mxu1 %v17146_v32 }
 0xc66   :  { %3362 = vmatpush1.msra.mxu0 %v17147_v31  ;;  %3433 = vmatpush1.msra.mxu1 %v17148_v3 }
 0xc67   :  { %3363 = vmatprep.subr.mxu0 %v17149_v34  ;;  %3434 = vmatprep.subr.mxu1 %v17150_v10  ;;  %v17160_v34 = vmov 0.0   ;;  %v17161_v10 = vld [vmem:[#allocation15_spill] sm:$0xff] }
 0xc68   :  { %3364 = vmatpush1.msra.mxu0 %v17151_v11  ;;  %3435 = vmatpush1.msra.mxu1 %v17152_v38  ;;  %v17162_v38 = vld [vmem:[#allocation38_spill] sm:$0xff] }
 0xc69   :  { %3365 = vmatprep.subr.mxu0 %v17153_v56  ;;  %3436 = vmatprep.subr.mxu1 %v17154_v7  ;;  %v17163_v56 = vld [vmem:[#allocation9_spill] sm:$0xff]  ;;  %v17165_v11 = vld [vmem:[#allocation22_spill] sm:$0xff] }
 0xc6a   :  { %3366 = vmatpush1.msra.mxu0 %v17155_v52  ;;  %3437 = vmatpush1.msra.mxu1 %v17156_v27  ;;  %v17164_v52 = vld [vmem:[#allocation23_spill] sm:$0xff] }
 0xc6b   :  { %3367 = vmatprep.subr.mxu0 %v17157_v33  ;;  %3438 = vmatprep.subr.mxu1 %v17158_v55  ;;  %v2042_v27 = vadd.f32 %v17164_v52, %v11558_v5 }
 0xc6c   :  { %3368 = vmatpush1.msra.mxu0 %v17159_v29  ;;  %3401 = vmatprep.mubr.f32.mxu0 %v17160_v34 }
 0xc6d   :  { %3439 = vmatpush1.msra.mxu1 %v17161_v10  ;;  %3472 = vmatprep.mubr.f32.mxu1 %v17160_v34  ;;  %v17166_v34 = vld [vmem:[#allocation55_spill] sm:$0xff] }
 0xc6e   :  { %3512 = vmatprep.subr.mxu0 %v17162_v38  ;;  %3583 = vmatprep.subr.mxu1 %v17163_v56  ;;  %v2155_v50 = vadd.f32 %v17166_v34, %v17078_v14 }
 0xd0d   :  { %v3228_v7 = vpop.f32.mrf.mxu0  ;;  %v3299_v29 = vpop.f32.mrf.mxu1 }
 0xd0e   :  { %v3304_v33 = vadd.f32 %v3228_v7, %v17165_v11  ;;  %v3306_v56 = vadd.f32 %v3299_v29, %v17167_v6 }
 0xd0f   :  { %v3230_v3 = vpop.f32.mrf.mxu0  ;;  %v3301_v10 = vpop.f32.mrf.mxu1 }
 0xd10   :  { %v8173_v55 = vmul.f32 -1.442695, %v3304_v33  ;;  %v3305_v31 = vadd.f32 %v3230_v3, %v2042_v27  ;;  %v3307_v38 = vadd.f32 %v3301_v10, %v2155_v50 }
 0xd12   :  { %8546 = vpow2.f32 %v8173_v55  ;;  %v8174_v32 = vmul.f32 -1.442695, %v3305_v31  ;;  %v8175_v62 = vmul.f32 -1.442695, %v3307_v38 }
 0xd14   :  { %8548 = vpow2.f32 %v8174_v32 }
 0xd15   :  { %8550 = vtanh.f32 %v3306_v56 }
 0xd16   :  { %8552 = vpow2.f32 %v8175_v62 }
 0xd1f   :  { %v8547_v59 = vpop.eup %8546 }
 0xd20   :  { %v3311_v60 = vadd.f32 1.0, %v8547_v59 }
 0xd21   :  { %v8549_v52 = vpop.eup %8548 }
 0xd22   :  { %8554 = vrcp.f32 %v3311_v60  ;;  %v3317_v11 = vadd.f32 1.0, %v8549_v52  ;;  %v8551_v3 = vpop.eup %8550 }
 0xd23   :  { %v8553_v7 = vpop.eup %8552 }
 0xd24   :  { %8556 = vrcp.f32 %v3317_v11  ;;  %v3324_v33 = vadd.f32 1.0, %v8553_v7 }
 0xd26   :  { %8558 = vrcp.f32 %v3324_v33  ;;  %v3825_v33 = vld [vmem:[%s16228_s8 + $0x1f0] sm:$0xff] }
 0xd2f   :  { %v8555_v31 = vpop.eup %8554 }
 0xd30   :  { %v3328_v32 = vmul.f32 %v8555_v31, %v8551_v3  ;;  %v3824_v31 = vld [vmem:[%s16228_s8 + $0x1e8] sm:$0xff] }
 0xd31   :  { %v8557_v27 = vpop.eup %8556 }
 0xd32   :  { %v3327_v34 = vmul.f32 %v8557_v27, %v12222_v21  ;;  %v3823_v27 = vld [vmem:[%s16228_s8 + $0x1e0] sm:$0xff] }
 0xd33   :  { %v8559_v29 = vpop.eup %8558 }
 0xd34   :  { %v12302_v50 = vadd.f32 %v3328_v32, %v3327_v34  ;;  %v3826_v32 = vld [vmem:[%s16228_s8 + $0x1f8] sm:$0xff]  ;;  %v3820_v34 = vld [vmem:[%s16228_s8 + $0x1c8] sm:$0xff] }
 0xd36   :  { %8560 = vtanh.f32 %v12302_v50 }
 0xd43   :  { %v8561_v59 = vpop.eup %8560 }
 0xd44   :  { %v12305_v6 = vmul.f32 %v8561_v59, %v8559_v29  ;;  %v3819_v29 = vld [vmem:[%s16228_s8 + $0x1c0] sm:$0xff]  ;;  %v3821_v59 = vld [vmem:[%s16228_s8 + $0x1d0] sm:$0xff] }
 0xd46   :  { %17168 = vst [vmem:[#allocation16_spill] sm:$0xff] %v12305_v6  ;;  %3402 = vmatmul.mubr.f32.vlgmr.msra.gmra.mxu0 %v12305_v6  ;;  %3473 = vmatmul.mubr.f32.vlgmr.msra.gmra.mxu1 %v12305_v6 }
 0xd47   :  { %3513 = vmatpush1.msra.mxu0 %v11757_v35  ;;  %3584 = vmatpush1.msra.mxu1 %v11763_v13  ;;  %v17169_v35 = vld [vmem:[#allocation56_spill] sm:$0xff]  ;;  %v17170_v13 = vld [vmem:[#allocation10_spill] sm:$0xff] }
 0xd48   :  { %3514 = vmatprep.subr.mxu0 %v11769_v36  ;;  %3585 = vmatprep.subr.mxu1 %v11775_v40  ;;  %v17171_v36 = vld [vmem:[#allocation68_spill] sm:$0xff]  ;;  %v17172_v40 = vld [vmem:[#allocation45_spill] sm:$0xff] }
 0xd49   :  { %3515 = vmatpush1.msra.mxu0 %v11781_v42  ;;  %3586 = vmatpush1.msra.mxu1 %v11787_v12  ;;  %v17173_v42 = vld [vmem:[#allocation67_spill] sm:$0xff] }
 0xd4a   :  { %3516 = vmatprep.subr.mxu0 %v11793_v18  ;;  %3587 = vmatprep.subr.mxu1 %v11799_v44  ;;  %v17174_v12 = vld [vmem:[#allocation11_spill] sm:$0xff]  ;;  %v17175_v18 = vld [vmem:[#allocation66_spill] sm:$0xff] }
 0xd4b   :  { %3517 = vmatpush1.msra.mxu0 %v11805_v37  ;;  %3588 = vmatpush1.msra.mxu1 %v11811_v19  ;;  %v17176_v44 = vld [vmem:[#allocation43_spill] sm:$0xff]  ;;  %v17178_v19 = vld [vmem:[#allocation12_spill] sm:$0xff] }
 0xd4c   :  { %3518 = vmatprep.subr.mxu0 %v11817_v53  ;;  %3589 = vmatprep.subr.mxu1 %v11823_v49  ;;  %v17177_v37 = vld [vmem:[#allocation39_spill] sm:$0xff]  ;;  %v17179_v53 = vld [vmem:[#allocation49_spill] sm:$0xff] }
 0xd4d   :  { %3519 = vmatpush1.msra.mxu0 %v11829_v63  ;;  %3590 = vmatpush1.msra.mxu1 %v12035_v1  ;;  %v17180_v49 = vld [vmem:[#allocation33_spill] sm:$0xff]  ;;  %v17181_v63 = vld [vmem:[#allocation30_spill] sm:$0xff] }
 0xd4e   :  { %3520 = vmatprep.subr.mxu0 %v11836_v46  ;;  %3591 = vmatprep.subr.mxu1 %v12042_v54  ;;  %v17182_v46 = vld [vmem:[#allocation13_spill] sm:$0xff] }
 0xd4f   :  { %3521 = vmatpush1.msra.mxu0 %v11843_v30  ;;  %3592 = vmatpush1.msra.mxu1 %v12049_v58  ;;  %v17183_v30 = vld [vmem:[#allocation47_spill] sm:$0xff] }
 0xd50   :  { %3522 = vmatprep.subr.mxu0 %v11850_v39  ;;  %3593 = vmatprep.subr.mxu1 %v12056_v20  ;;  %v17184_v39 = vld [vmem:[#allocation31_spill] sm:$0xff] }
 0xd51   :  { %3523 = vmatpush1.msra.mxu0 %v11857_v41  ;;  %3594 = vmatpush1.msra.mxu1 %v12063_v61  ;;  %v17185_v41 = vld [vmem:[#allocation44_spill] sm:$0xff] }
 0xd52   :  { %3524 = vmatprep.subr.mxu0 %v11864_v43  ;;  %3595 = vmatprep.subr.mxu1 %v12070_v0  ;;  %v17186_v43 = vld [vmem:[#allocation14_spill] sm:$0xff] }
 0xd53   :  { %3525 = vmatpush1.msra.mxu0 %v11871_v45  ;;  %3596 = vmatpush1.msra.mxu1 %v12077_v51  ;;  %v17187_v45 = vld [vmem:[#allocation48_spill] sm:$0xff]  ;;  %v17192_v0 = vld [vmem:[#allocation50_spill] sm:$0xff] }
 0xd54   :  { %3526 = vmatprep.subr.mxu0 %v11878_v15  ;;  %3597 = vmatprep.subr.mxu1 %v12084_v22  ;;  %v17188_v15 = vmov 0.0   ;;  %v2149_v51 = vadd.f32 %v17192_v0, %v17078_v14  ;;  %v3789_v0 = vld [vmem:[%s16228_s8 + $0xd0] sm:$0xff] }
 0xd55   :  { %3527 = vmatpush1.msra.mxu0 %v11885_v9  ;;  %3598 = vmatpush1.msra.mxu1 %v12091_v24  ;;  %v17189_v9 = vld [vmem:[#allocation15_spill] sm:$0xff]  ;;  %v17193_v24 = vld [vmem:[#allocation52_spill] sm:$0xff] }
 0xd56   :  { %3528 = vmatprep.subr.mxu0 %v11892_v8  ;;  %3599 = vmatprep.subr.mxu1 %v12098_v23 }
 0xd57   :  { %3529 = vmatpush1.msra.mxu0 %v11899_v16  ;;  %3600 = vmatpush1.msra.mxu1 %v12105_v25  ;;  %v17190_v16 = vld [vmem:[#allocation20_spill] sm:$0xff] }
 0xd58   :  { %3530 = vmatprep.subr.mxu0 %v11906_v17  ;;  %3601 = vmatprep.subr.mxu1 %v12112_v4  ;;  %v2036_v17 = vadd.f32 %v17190_v16, %v11558_v5  ;;  %v3798_v16 = vld [vmem:[%s16228_s8 + $0x118] sm:$0xff] }
 0xd59   :  { %3531 = vmatpush1.msra.mxu0 %v11913_v28  ;;  %3602 = vmatpush1.msra.mxu1 %v12119_v47  ;;  %v17191_v28 = vld [vmem:[#allocation19_spill] sm:$0xff] }
 0xd5a   :  { %3532 = vmatprep.subr.mxu0 %v11920_v2  ;;  %3603 = vmatprep.subr.mxu1 %v12126_v26 }
 0xd5b   :  { %3533 = vmatpush1.msra.mxu0 %v11927_v57  ;;  %3604 = vmatpush1.msra.mxu1 %v12133_v48 }
 0xd5c   :  { %3534 = vmatprep.subr.mxu0 %v17169_v35  ;;  %3605 = vmatprep.subr.mxu1 %v17170_v13  ;;  %v3816_v35 = vld [vmem:[%s16228_s8 + $0x1a8] sm:$0xff]  ;;  %v3818_v13 = vld [vmem:[%s16228_s8 + $0x1b8] sm:$0xff] }
 0xd5d   :  { %3535 = vmatpush1.msra.mxu0 %v17171_v36  ;;  %3606 = vmatpush1.msra.mxu1 %v17172_v40  ;;  %v3815_v36 = vld [vmem:[%s16228_s8 + $0x1a0] sm:$0xff]  ;;  %v3817_v40 = vld [vmem:[%s16228_s8 + $0x1b0] sm:$0xff] }
 0xd5e   :  { %3536 = vmatprep.subr.mxu0 %v17173_v42  ;;  %3607 = vmatprep.subr.mxu1 %v17174_v12  ;;  %v3812_v42 = vld [vmem:[%s16228_s8 + $0x188] sm:$0xff]  ;;  %v3814_v12 = vld [vmem:[%s16228_s8 + $0x198] sm:$0xff] }
 0xd5f   :  { %3537 = vmatpush1.msra.mxu0 %v17175_v18  ;;  %3608 = vmatpush1.msra.mxu1 %v17176_v44  ;;  %v3811_v18 = vld [vmem:[%s16228_s8 + $0x180] sm:$0xff]  ;;  %v3813_v44 = vld [vmem:[%s16228_s8 + $0x190] sm:$0xff] }
 0xd60   :  { %3538 = vmatprep.subr.mxu0 %v17177_v37  ;;  %3609 = vmatprep.subr.mxu1 %v17178_v19  ;;  %v3808_v37 = vld [vmem:[%s16228_s8 + $0x168] sm:$0xff]  ;;  %v3810_v19 = vld [vmem:[%s16228_s8 + $0x178] sm:$0xff] }
 0xd61   :  { %3539 = vmatpush1.msra.mxu0 %v17179_v53  ;;  %3610 = vmatpush1.msra.mxu1 %v17180_v49  ;;  %v3807_v53 = vld [vmem:[%s16228_s8 + $0x160] sm:$0xff]  ;;  %v3809_v49 = vld [vmem:[%s16228_s8 + $0x170] sm:$0xff] }
 0xd62   :  { %3540 = vmatprep.subr.mxu0 %v17181_v63  ;;  %3611 = vmatprep.subr.mxu1 %v17182_v46  ;;  %v3804_v63 = vld [vmem:[%s16228_s8 + $0x148] sm:$0xff]  ;;  %v3806_v46 = vld [vmem:[%s16228_s8 + $0x158] sm:$0xff] }
 0xd63   :  { %3541 = vmatpush1.msra.mxu0 %v17183_v30  ;;  %3612 = vmatpush1.msra.mxu1 %v17184_v39  ;;  %v3803_v30 = vld [vmem:[%s16228_s8 + $0x140] sm:$0xff]  ;;  %v3805_v39 = vld [vmem:[%s16228_s8 + $0x150] sm:$0xff] }
 0xd64   :  { %3542 = vmatprep.subr.mxu0 %v17185_v41  ;;  %3613 = vmatprep.subr.mxu1 %v17186_v43  ;;  %v3800_v41 = vld [vmem:[%s16228_s8 + $0x128] sm:$0xff]  ;;  %v3802_v43 = vld [vmem:[%s16228_s8 + $0x138] sm:$0xff] }
 0xd65   :  { %3543 = vmatpush1.msra.mxu0 %v17187_v45  ;;  %3576 = vmatprep.mubr.f32.mxu0 %v17188_v15  ;;  %v3799_v45 = vld [vmem:[%s16228_s8 + $0x120] sm:$0xff] }
 0xd66   :  { %3614 = vmatpush1.msra.mxu1 %v17189_v9  ;;  %3647 = vmatprep.mubr.f32.mxu1 %v17188_v15  ;;  %v3801_v9 = vld [vmem:[%s16228_s8 + $0x130] sm:$0xff] }
 0xd67   :  { %3827 = vmatprep.subr.mxu0 %v3824_v31  ;;  %3940 = vmatprep.subr.mxu1 %v3826_v32  ;;  %v3767_v31 = vld [vmem:[%s16228_s8 + $0x20] sm:$0xff]  ;;  %v3769_v32 = vld [vmem:[%s16228_s8 + $0x30] sm:$0xff] }
 0xe06   :  { %v3403_v8 = vpop.f32.mrf.mxu0  ;;  %v3474_v58 = vpop.f32.mrf.mxu1 }
 0xe07   :  { %v3479_v2 = vadd.f32 %v3403_v8, %v17191_v28  ;;  %v3481_v23 = vadd.f32 %v3474_v58, %v17193_v24  ;;  %v3796_v8 = vld [vmem:[%s16228_s8 + $0x108] sm:$0xff]  ;;  %v3797_v28 = vld [vmem:[%s16228_s8 + $0x110] sm:$0xff]  ;;  %v3783_v24 = vld [vmem:[%s16228_s8 + $0xa0] sm:$0xff] }
 0xe08   :  { %v3405_v57 = vpop.f32.mrf.mxu0  ;;  %v3476_v61 = vpop.f32.mrf.mxu1  ;;  %v3788_v58 = vld [vmem:[%s16228_s8 + $0xc8] sm:$0xff] }
 0xe09   :  { %v8176_v1 = vmul.f32 -1.442695, %v3479_v2  ;;  %v3480_v54 = vadd.f32 %v3405_v57, %v2036_v17  ;;  %v3482_v22 = vadd.f32 %v3476_v61, %v2149_v51  ;;  %v3795_v17 = vld [vmem:[%s16228_s8 + $0x100] sm:$0xff]  ;;  %v3792_v2 = vld [vmem:[%s16228_s8 + $0xe8] sm:$0xff]  ;;  %v3794_v57 = vld [vmem:[%s16228_s8 + $0xf8] sm:$0xff] }
 0xe0a   :  { %v3787_v61 = vld [vmem:[%s16228_s8 + $0xc0] sm:$0xff]  ;;  %v3784_v51 = vld [vmem:[%s16228_s8 + $0xa8] sm:$0xff] }
 0xe0b   :  { %8562 = vpow2.f32 %v8176_v1  ;;  %v8177_v20 = vmul.f32 -1.442695, %v3480_v54  ;;  %v8178_v25 = vmul.f32 -1.442695, %v3482_v22  ;;  %v3791_v1 = vld [vmem:[%s16228_s8 + $0xe0] sm:$0xff]  ;;  %v3793_v54 = vld [vmem:[%s16228_s8 + $0xf0] sm:$0xff] }
 0xe0c   :  { %v3786_v22 = vld [vmem:[%s16228_s8 + $0xb8] sm:$0xff] }
 0xe0d   :  { %8564 = vpow2.f32 %v8177_v20  ;;  %v3790_v20 = vld [vmem:[%s16228_s8 + $0xd8] sm:$0xff] }
 0xe0e   :  { %8566 = vtanh.f32 %v3481_v23  ;;  %v3785_v23 = vld [vmem:[%s16228_s8 + $0xb0] sm:$0xff] }
 0xe0f   :  { %8568 = vpow2.f32 %v8178_v25  ;;  %v3780_v25 = vld [vmem:[%s16228_s8 + $0x88] sm:$0xff] }
 0xe18   :  { %v8563_v4 = vpop.eup %8562 }
 0xe19   :  { %v3486_v47 = vadd.f32 1.0, %v8563_v4  ;;  %v3782_v4 = vld [vmem:[%s16228_s8 + $0x98] sm:$0xff] }
 0xe1a   :  { %v8565_v26 = vpop.eup %8564 }
 0xe1b   :  { %8570 = vrcp.f32 %v3486_v47  ;;  %v3492_v48 = vadd.f32 1.0, %v8565_v26  ;;  %v8567_v21 = vpop.eup %8566  ;;  %v3779_v47 = vld [vmem:[%s16228_s8 + $0x80] sm:$0xff]  ;;  %v3781_v26 = vld [vmem:[%s16228_s8 + $0x90] sm:$0xff] }
 0xe1c   :  { %v8569_v60 = vpop.eup %8568 }
 0xe1d   :  { %8572 = vrcp.f32 %v3492_v48  ;;  %v3499_v38 = vadd.f32 1.0, %v8569_v60  ;;  %v3776_v48 = vld [vmem:[%s16228_s8 + $0x68] sm:$0xff]  ;;  %v3775_v60 = vld [vmem:[%s16228_s8 + $0x60] sm:$0xff] }
 0xe1f   :  { %8574 = vrcp.f32 %v3499_v38  ;;  %v3771_v38 = vld [vmem:[%s16228_s8 + $0x40] sm:$0xff] }
 0xe28   :  { %v8571_v62 = vpop.eup %8570 }
 0xe29   :  { %v3503_v10 = vmul.f32 %v8571_v62, %v8567_v21  ;;  %v3778_v21 = vld [vmem:[%s16228_s8 + $0x78] sm:$0xff]  ;;  %v3777_v62 = vld [vmem:[%s16228_s8 + $0x70] sm:$0xff] }
 0xe2a   :  { %v8573_v55 = vpop.eup %8572 }
 0xe2b   :  { %v3502_v56 = vmul.f32 %v8573_v55, %v12302_v50  ;;  %v3822_v50 = vld [vmem:[%s16228_s8 + $0x1d8] sm:$0xff] }
 0xe2c   :  { %v8575_v11 = vpop.eup %8574  ;;  %v3774_v55 = vld [vmem:[%s16228_s8 + $0x58] sm:$0xff] }
 0xe2d   :  { %v12380_v52 = vadd.f32 %v3503_v10, %v3502_v56  ;;  %v3772_v10 = vld [vmem:[%s16228_s8 + $0x48] sm:$0xff]  ;;  %v3773_v56 = vld [vmem:[%s16228_s8 + $0x50] sm:$0xff] }
 0xe2f   :  { %8576 = vtanh.f32 %v12380_v52 }
 0xe3c   :  { %v8577_v3 = vpop.eup %8576 }
 0xe3d   :  { %v12383_v7 = vmul.f32 %v8577_v3, %v8575_v11  ;;  %v3768_v11 = vld [vmem:[%s16228_s8 + $0x28] sm:$0xff]  ;;  %v3770_v3 = vld [vmem:[%s16228_s8 + $0x38] sm:$0xff] }
 0xe3f   :  { %17194 = vst [vmem:[#allocation41_spill] sm:$0xff] %v12383_v7  ;;  %3577 = vmatmul.mubr.f32.vlgmr.msra.gmra.mxu0 %v12383_v7  ;;  %3648 = vmatmul.mubr.f32.vlgmr.msra.gmra.mxu1 %v12383_v7 }
 0xe40   :  { %3891 = vmatprep.mubr.f32.mxu0 %v17188_v15  ;;  %4004 = vmatprep.mubr.f32.mxu1 %v17188_v15 }
 0xe41   :  { %3828 = vmatpush1.msra.mxu0 %v3823_v27  ;;  %3941 = vmatpush1.msra.mxu1 %v3825_v33  ;;  %v3764_v27 = vld [vmem:[%s16228_s8 + $0x8] sm:$0xff]  ;;  %v3766_v33 = vld [vmem:[%s16228_s8 + $0x18] sm:$0xff] }
 0xe42   :  { %3829 = vmatprep.subr.mxu0 %v3820_v34  ;;  %3942 = vmatprep.subr.mxu1 %v3822_v50  ;;  %v3763_v34 = vld [vmem:[%s16228_s8] sm:$0xff]  ;;  %v3765_v50 = vld [vmem:[%s16228_s8 + $0x10] sm:$0xff] }
 0xe43   :  { %3830 = vmatpush1.msra.mxu0 %v3819_v29  ;;  %3943 = vmatpush1.msra.mxu1 %v3821_v59  ;;  %v3760_v29 = vld [vmem:[%s16229_s7 + $0x1e8] sm:$0xff]  ;;  %v3762_v59 = vld [vmem:[%s16229_s7 + $0x1f8] sm:$0xff] }
 0xe44   :  { %3831 = vmatprep.subr.mxu0 %v3816_v35  ;;  %3944 = vmatprep.subr.mxu1 %v3818_v13  ;;  %v17195_v13 = vld [vmem:[#allocation18_spill] sm:$0xff] }
 0xe45   :  { %3832 = vmatpush1.msra.mxu0 %v3815_v36  ;;  %3945 = vmatpush1.msra.mxu1 %v3817_v40  ;;  %v2030_v36 = vadd.f32 %v17195_v13, %v11558_v5  ;;  %v17196_v40 = vld [vmem:[#allocation17_spill] sm:$0xff]  ;;  %v3733_v13 = vld [vmem:[%s16229_s7 + $0x110] sm:$0xff] }
 0xe46   :  { %3833 = vmatprep.subr.mxu0 %v3812_v42  ;;  %3946 = vmatprep.subr.mxu1 %v3814_v12 }
 0xe47   :  { %3834 = vmatpush1.msra.mxu0 %v3811_v18  ;;  %3947 = vmatpush1.msra.mxu1 %v3813_v44 }
 0xe48   :  { %3835 = vmatprep.subr.mxu0 %v3808_v37  ;;  %3948 = vmatprep.subr.mxu1 %v3810_v19 }
 0xe49   :  { %3836 = vmatpush1.msra.mxu0 %v3807_v53  ;;  %3949 = vmatpush1.msra.mxu1 %v3809_v49  ;;  %v17197_v49 = vld [vmem:[#allocation25_spill] sm:$0xff] }
 0xe4a   :  { %3837 = vmatprep.subr.mxu0 %v3804_v63  ;;  %3950 = vmatprep.subr.mxu1 %v3806_v46  ;;  %v2143_v63 = vadd.f32 %v17197_v49, %v17078_v14  ;;  %v3720_v49 = vld [vmem:[%s16229_s7 + $0xa8] sm:$0xff] }
 0xe4b   :  { %3838 = vmatpush1.msra.mxu0 %v3803_v30  ;;  %3951 = vmatpush1.msra.mxu1 %v3805_v39  ;;  %v17198_v30 = vld [vmem:[#allocation21_spill] sm:$0xff] }
 0xe4c   :  { %3839 = vmatprep.subr.mxu0 %v3800_v41  ;;  %3952 = vmatprep.subr.mxu1 %v3802_v43 }
 0xe4d   :  { %3840 = vmatpush1.msra.mxu0 %v3799_v45  ;;  %3953 = vmatpush1.msra.mxu1 %v3801_v9 }
 0xe4e   :  { %3841 = vmatprep.subr.mxu0 %v3796_v8  ;;  %3954 = vmatprep.subr.mxu1 %v3798_v16 }
 0xe4f   :  { %3842 = vmatpush1.msra.mxu0 %v3795_v17  ;;  %3955 = vmatpush1.msra.mxu1 %v3797_v28 }
 0xe50   :  { %3843 = vmatprep.subr.mxu0 %v3792_v2  ;;  %3956 = vmatprep.subr.mxu1 %v3794_v57 }
 0xe51   :  { %3844 = vmatpush1.msra.mxu0 %v3791_v1  ;;  %3957 = vmatpush1.msra.mxu1 %v3793_v54 }
 0xe52   :  { %3845 = vmatprep.subr.mxu0 %v3788_v58  ;;  %3958 = vmatprep.subr.mxu1 %v3790_v20 }
 0xe53   :  { %3846 = vmatpush1.msra.mxu0 %v3787_v61  ;;  %3959 = vmatpush1.msra.mxu1 %v3789_v0  ;;  %v3759_v61 = vld [vmem:[%s16229_s7 + $0x1e0] sm:$0xff]  ;;  %v3761_v0 = vld [vmem:[%s16229_s7 + $0x1f0] sm:$0xff] }
 0xe54   :  { %3847 = vmatprep.subr.mxu0 %v3784_v51  ;;  %3960 = vmatprep.subr.mxu1 %v3786_v22  ;;  %v3756_v51 = vld [vmem:[%s16229_s7 + $0x1c8] sm:$0xff]  ;;  %v3755_v22 = vld [vmem:[%s16229_s7 + $0x1c0] sm:$0xff] }
 0xe55   :  { %3848 = vmatpush1.msra.mxu0 %v3783_v24  ;;  %3961 = vmatpush1.msra.mxu1 %v3785_v23  ;;  %v3757_v24 = vld [vmem:[%s16229_s7 + $0x1d0] sm:$0xff]  ;;  %v3752_v23 = vld [vmem:[%s16229_s7 + $0x1a8] sm:$0xff] }
 0xe56   :  { %3849 = vmatprep.subr.mxu0 %v3780_v25  ;;  %3962 = vmatprep.subr.mxu1 %v3782_v4  ;;  %v3754_v25 = vld [vmem:[%s16229_s7 + $0x1b8] sm:$0xff]  ;;  %v3751_v4 = vld [vmem:[%s16229_s7 + $0x1a0] sm:$0xff] }
 0xe57   :  { %3850 = vmatpush1.msra.mxu0 %v3779_v47  ;;  %3963 = vmatpush1.msra.mxu1 %v3781_v26  ;;  %v3753_v47 = vld [vmem:[%s16229_s7 + $0x1b0] sm:$0xff]  ;;  %v3748_v26 = vld [vmem:[%s16229_s7 + $0x188] sm:$0xff] }
 0xe58   :  { %3851 = vmatprep.subr.mxu0 %v3776_v48  ;;  %3964 = vmatprep.subr.mxu1 %v3778_v21  ;;  %v3750_v48 = vld [vmem:[%s16229_s7 + $0x198] sm:$0xff]  ;;  %v3747_v21 = vld [vmem:[%s16229_s7 + $0x180] sm:$0xff] }
 0xe59   :  { %3852 = vmatpush1.msra.mxu0 %v3775_v60  ;;  %3965 = vmatpush1.msra.mxu1 %v3777_v62  ;;  %v3749_v60 = vld [vmem:[%s16229_s7 + $0x190] sm:$0xff]  ;;  %v3744_v62 = vld [vmem:[%s16229_s7 + $0x168] sm:$0xff] }
 0xe5a   :  { %3853 = vmatprep.subr.mxu0 %v3772_v10  ;;  %3966 = vmatprep.subr.mxu1 %v3774_v55  ;;  %v3746_v10 = vld [vmem:[%s16229_s7 + $0x178] sm:$0xff]  ;;  %v3743_v55 = vld [vmem:[%s16229_s7 + $0x160] sm:$0xff] }
 0xe5b   :  { %3854 = vmatpush1.msra.mxu0 %v3771_v38  ;;  %3967 = vmatpush1.msra.mxu1 %v3773_v56  ;;  %v3745_v38 = vld [vmem:[%s16229_s7 + $0x170] sm:$0xff]  ;;  %v3740_v56 = vld [vmem:[%s16229_s7 + $0x148] sm:$0xff] }
 0xe5c   :  { %3855 = vmatprep.subr.mxu0 %v3768_v11  ;;  %3968 = vmatprep.subr.mxu1 %v3770_v3  ;;  %v3742_v11 = vld [vmem:[%s16229_s7 + $0x158] sm:$0xff]  ;;  %v3739_v3 = vld [vmem:[%s16229_s7 + $0x140] sm:$0xff] }
 0xe5d   :  { %3856 = vmatpush1.msra.mxu0 %v3767_v31  ;;  %3969 = vmatpush1.msra.mxu1 %v3769_v32  ;;  %v3741_v31 = vld [vmem:[%s16229_s7 + $0x150] sm:$0xff]  ;;  %v3736_v32 = vld [vmem:[%s16229_s7 + $0x128] sm:$0xff] }
 0xe5e   :  { %3857 = vmatprep.subr.mxu0 %v3764_v27  ;;  %3970 = vmatprep.subr.mxu1 %v3766_v33  ;;  %v3738_v27 = vld [vmem:[%s16229_s7 + $0x138] sm:$0xff]  ;;  %v3735_v33 = vld [vmem:[%s16229_s7 + $0x120] sm:$0xff] }
 0xe5f   :  { %3858 = vmatpush1.msra.mxu0 %v3763_v34  ;;  %3971 = vmatpush1.msra.mxu1 %v3765_v50  ;;  %v3737_v34 = vld [vmem:[%s16229_s7 + $0x130] sm:$0xff]  ;;  %v17200_v50 = vld [vmem:[#allocation46_spill] sm:$0xff] }
 0xe60   :  { %4053 = vmatprep.subr.mxu0 %v3760_v29  ;;  %4166 = vmatprep.subr.mxu1 %v3762_v59  ;;  %v3732_v29 = vld [vmem:[%s16229_s7 + $0x108] sm:$0xff]  ;;  %v3734_v59 = vld [vmem:[%s16229_s7 + $0x118] sm:$0xff] }
 0xeff   :  { %v3578_v35 = vpop.f32.mrf.mxu0  ;;  %v3649_v37 = vpop.f32.mrf.mxu1 }
 0xf00   :  { %v3654_v42 = vadd.f32 %v3578_v35, %v17196_v40  ;;  %v3656_v39 = vadd.f32 %v3649_v37, %v17198_v30  ;;  %v3731_v35 = vld [vmem:[%s16229_s7 + $0x100] sm:$0xff]  ;;  %v3730_v40 = vld [vmem:[%s16229_s7 + $0xf8] sm:$0xff]  ;;  %v3721_v30 = vld [vmem:[%s16229_s7 + $0xb0] sm:$0xff] }
 0xf01   :  { %v3580_v12 = vpop.f32.mrf.mxu0  ;;  %v3651_v53 = vpop.f32.mrf.mxu1  ;;  %v3726_v37 = vld [vmem:[%s16229_s7 + $0xd8] sm:$0xff] }
 0xf02   :  { %v8179_v18 = vmul.f32 -1.442695, %v3654_v42  ;;  %v3655_v44 = vadd.f32 %v3580_v12, %v2030_v36  ;;  %v3657_v46 = vadd.f32 %v3651_v53, %v2143_v63  ;;  %v3728_v36 = vld [vmem:[%s16229_s7 + $0xe8] sm:$0xff]  ;;  %v3727_v42 = vld [vmem:[%s16229_s7 + $0xe0] sm:$0xff]  ;;  %v3729_v12 = vld [vmem:[%s16229_s7 + $0xf0] sm:$0xff] }
 0xf03   :  { %v3725_v53 = vld [vmem:[%s16229_s7 + $0xd0] sm:$0xff]  ;;  %v3722_v63 = vld [vmem:[%s16229_s7 + $0xb8] sm:$0xff] }
 0xf04   :  { %8578 = vpow2.f32 %v8179_v18  ;;  %v8180_v19 = vmul.f32 -1.442695, %v3655_v44  ;;  %v8181_v41 = vmul.f32 -1.442695, %v3657_v46  ;;  %v17201_v18 = vld [vmem:[#allocation42_spill] sm:$0xff]  ;;  %v3719_v46 = vld [vmem:[%s16229_s7 + $0xa0] sm:$0xff] }
 0xf05   :  { %v3724_v44 = vld [vmem:[%s16229_s7 + $0xc8] sm:$0xff] }
 0xf06   :  { %8580 = vpow2.f32 %v8180_v19  ;;  %v3723_v19 = vld [vmem:[%s16229_s7 + $0xc0] sm:$0xff] }
 0xf07   :  { %8582 = vtanh.f32 %v3656_v39  ;;  %v17202_v39 = vld [vmem:[#allocation27_spill] sm:$0xff] }
 0xf08   :  { %8584 = vpow2.f32 %v8181_v41  ;;  %v3716_v41 = vld [vmem:[%s16229_s7 + $0x88] sm:$0xff] }
 0xf11   :  { %v8579_v43 = vpop.eup %8578 }
 0xf12   :  { %v3661_v45 = vadd.f32 1.0, %v8579_v43  ;;  %v3718_v43 = vld [vmem:[%s16229_s7 + $0x98] sm:$0xff] }
 0xf13   :  { %v8581_v5 = vpop.eup %8580 }
 0xf14   :  { %8586 = vrcp.f32 %v3661_v45  ;;  %v3667_v9 = vadd.f32 1.0, %v8581_v5  ;;  %v8583_v8 = vpop.eup %8582  ;;  %v3715_v45 = vld [vmem:[%s16229_s7 + $0x80] sm:$0xff]  ;;  %v3717_v5 = vld [vmem:[%s16229_s7 + $0x90] sm:$0xff] }
 0xf15   :  { %v8585_v16 = vpop.eup %8584 }
 0xf16   :  { %8588 = vrcp.f32 %v3667_v9  ;;  %v3674_v57 = vadd.f32 1.0, %v8585_v16  ;;  %v3712_v9 = vld [vmem:[%s16229_s7 + $0x68] sm:$0xff]  ;;  %v3711_v16 = vld [vmem:[%s16229_s7 + $0x60] sm:$0xff] }
 0xf18   :  { %8590 = vrcp.f32 %v3674_v57  ;;  %v3710_v57 = vld [vmem:[%s16229_s7 + $0x58] sm:$0xff] }
 0xf21   :  { %v8587_v17 = vpop.eup %8586 }
 0xf22   :  { %v3678_v28 = vmul.f32 %v8587_v17, %v8583_v8  ;;  %v3714_v8 = vld [vmem:[%s16229_s7 + $0x78] sm:$0xff]  ;;  %v3713_v17 = vld [vmem:[%s16229_s7 + $0x70] sm:$0xff] }
 0xf23   :  { %v8589_v2 = vpop.eup %8588 }
 0xf24   :  { %v3677_v14 = vmul.f32 %v8589_v2, %v12380_v52  ;;  %v3758_v52 = vld [vmem:[%s16229_s7 + $0x1d8] sm:$0xff]  ;;  %v3708_v2 = vld [vmem:[%s16229_s7 + $0x48] sm:$0xff] }
 0xf25   :  { %v8591_v54 = vpop.eup %8590 }
 0xf26   :  { %v3679_v1 = vadd.f32 %v3678_v28, %v3677_v14  ;;  %v17203_v28 = vld [vmem:[#allocation40_spill] sm:$0xff]  ;;  %v3707_v14 = vld [vmem:[%s16229_s7 + $0x40] sm:$0xff] }
 0xf28   :  { %8592 = vtanh.f32 %v3679_v1  ;;  %v3709_v1 = vld [vmem:[%s16229_s7 + $0x50] sm:$0xff] }
 0xf35   :  { %v8593_v58 = vpop.eup %8592 }
 0xf36   :  { %v12594_v20 = vmul.f32 %v8593_v58, %v8591_v54  ;;  %v3704_v54 = vld [vmem:[%s16229_s7 + $0x28] sm:$0xff]  ;;  %v3706_v58 = vld [vmem:[%s16229_s7 + $0x38] sm:$0xff] }
 0xf38   :  { %17199 = vst [vmem:[#allocation51_spill] sm:$0xff] %v12594_v20  ;;  %3892 = vmatmul.mubr.f32.vlgmr.msra.gmra.mxu0 %v12594_v20  ;;  %4005 = vmatmul.mubr.f32.vlgmr.msra.gmra.mxu1 %v12594_v20  ;;  %v13208_v20 = vld [vmem:[%s16230_s9 + $0x18] sm:$0xff] }
 0xf39   :  { %4054 = vmatpush1.msra.mxu0 %v3759_v61  ;;  %4167 = vmatpush1.msra.mxu1 %v3761_v0  ;;  %v3703_v61 = vld [vmem:[%s16229_s7 + $0x20] sm:$0xff]  ;;  %v3705_v0 = vld [vmem:[%s16229_s7 + $0x30] sm:$0xff]  ;;  %17264 = vst [vmem:[#allocation76_spill] sm:$0xff] %v13208_v20 }
 0xf3a   :  { %4055 = vmatprep.subr.mxu0 %v3756_v51  ;;  %4168 = vmatprep.subr.mxu1 %v3758_v52  ;;  %v17204_v51 = vld [vmem:[#allocation69_spill] sm:$0xff]  ;;  %v3700_v52 = vld [vmem:[%s16229_s7 + $0x8] sm:$0xff] }
 0xf3b   :  { %3897 = vmatprep.mubr.f32.mxu0 %v17188_v15  ;;  %4010 = vmatprep.mubr.f32.mxu1 %v17188_v15 }
 0xf3c   :  { %4056 = vmatpush1.msra.mxu0 %v3755_v22  ;;  %4169 = vmatpush1.msra.mxu1 %v3757_v24  ;;  %v3702_v22 = vld [vmem:[%s16229_s7 + $0x18] sm:$0xff]  ;;  %v3699_v24 = vld [vmem:[%s16229_s7] sm:$0xff] }
 0xf3d   :  { %3898 = vmatmul.mubr.f32.gmra.mxu0 %v12383_v7  ;;  %4011 = vmatmul.mubr.f32.gmra.mxu1 %v12383_v7  ;;  %v13203_v7 = vld [vmem:[%s16230_s9 + $0x8] sm:$0xff] }
 0xf3e   :  { %4057 = vmatprep.subr.mxu0 %v3752_v23  ;;  %4170 = vmatprep.subr.mxu1 %v3754_v25  ;;  %v3701_v23 = vld [vmem:[%s16229_s7 + $0x10] sm:$0xff]  ;;  %v12816_v25 = vld [vmem:[%s16230_s9 + $0x1e8] sm:$0xff]  ;;  %17263 = vst [vmem:[#allocation75_spill] sm:$0xff] %v13203_v7 }
 0xf3f   :  { %4058 = vmatpush1.msra.mxu0 %v3751_v4  ;;  %4171 = vmatpush1.msra.mxu1 %v3753_v47  ;;  %17205 = vst [vmem:[#allocation53_spill] sm:$0xff] %v12816_v25  ;;  %v12821_v4 = vld [vmem:[%s16230_s9 + $0x1f8] sm:$0xff]  ;;  %v12827_v47 = vld [vmem:[%s16230_s9 + $0x1e0] sm:$0xff] }
 0xf40   :  { %4059 = vmatprep.subr.mxu0 %v3748_v26  ;;  %4172 = vmatprep.subr.mxu1 %v3750_v48  ;;  %17206 = vst [vmem:[#allocation65_spill] sm:$0xff] %v12821_v4  ;;  %v12832_v26 = vld [vmem:[%s16230_s9 + $0x1f0] sm:$0xff]  ;;  %v17207_v48 = vld [vmem:[#allocation62_spill] sm:$0xff] }
 0xf41   :  { %3903 = vmatprep.mubr.f32.mxu0 %v17188_v15  ;;  %4016 = vmatprep.mubr.f32.mxu1 %v17188_v15 }
 0xf42   :  { %4060 = vmatpush1.msra.mxu0 %v3747_v21  ;;  %4173 = vmatpush1.msra.mxu1 %v3749_v60  ;;  %v12839_v21 = vld [vmem:[%s16230_s9 + $0x1c8] sm:$0xff]  ;;  %v12844_v60 = vld [vmem:[%s16230_s9 + $0x1d8] sm:$0xff] }
 0xf43   :  { %3904 = vmatmul.mubr.f32.gmra.mxu0 %v12305_v6  ;;  %4017 = vmatmul.mubr.f32.gmra.mxu1 %v12305_v6  ;;  %v17262_v6 = vld [vmem:[#allocation58_spill] sm:$0xff] }
 0xf44   :  { %4061 = vmatprep.subr.mxu0 %v3744_v62  ;;  %4174 = vmatprep.subr.mxu1 %v3746_v10  ;;  %v12853_v62 = vld [vmem:[%s16230_s9 + $0x1c0] sm:$0xff]  ;;  %v12858_v10 = vld [vmem:[%s16230_s9 + $0x1d0] sm:$0xff] }
 0xf45   :  { %4062 = vmatpush1.msra.mxu0 %v3743_v55  ;;  %4175 = vmatpush1.msra.mxu1 %v3745_v38  ;;  %v12867_v55 = vld [vmem:[%s16230_s9 + $0x1a8] sm:$0xff]  ;;  %v12872_v38 = vld [vmem:[%s16230_s9 + $0x1b8] sm:$0xff] }
 0xf46   :  { %4063 = vmatprep.subr.mxu0 %v3740_v56  ;;  %4176 = vmatprep.subr.mxu1 %v3742_v11  ;;  %v12879_v56 = vld [vmem:[%s16230_s9 + $0x1a0] sm:$0xff]  ;;  %v12884_v11 = vld [vmem:[%s16230_s9 + $0x1b0] sm:$0xff] }
 0xf47   :  { %3909 = vmatprep.mubr.f32.mxu0 %v17188_v15  ;;  %4022 = vmatprep.mubr.f32.mxu1 %v17188_v15 }
 0xf48   :  { %4064 = vmatpush1.msra.mxu0 %v3739_v3  ;;  %4177 = vmatpush1.msra.mxu1 %v3741_v31  ;;  %v17208_v3 = vld [vmem:[#allocation7_spill] sm:$0xff]  ;;  %v12891_v31 = vld [vmem:[%s16230_s9 + $0x188] sm:$0xff] }
 0xf49   :  { %3910 = vmatmul.mubr.f32.gmra.mxu0 %v17200_v50  ;;  %4023 = vmatmul.mubr.f32.gmra.mxu1 %v17200_v50  ;;  %17209 = vst [vmem:[#allocation64_spill] sm:$0xff] %v12891_v31  ;;  %v13196_v50 = vld [vmem:[%s16230_s9 + $0x30] sm:$0xff] }
 0xf4a   :  { %4065 = vmatprep.subr.mxu0 %v3736_v32  ;;  %4178 = vmatprep.subr.mxu1 %v3738_v27  ;;  %v12896_v32 = vld [vmem:[%s16230_s9 + $0x198] sm:$0xff]  ;;  %v12905_v27 = vld [vmem:[%s16230_s9 + $0x180] sm:$0xff]  ;;  %17261 = vst [vmem:[#allocation74_spill] sm:$0xff] %v13196_v50 }
 0xf4b   :  { %4066 = vmatpush1.msra.mxu0 %v3735_v33  ;;  %4179 = vmatpush1.msra.mxu1 %v3737_v34  ;;  %17210 = vst [vmem:[#allocation6_spill] sm:$0xff] %v12896_v32  ;;  %17211 = vst [vmem:[#allocation5_spill] sm:$0xff] %v12905_v27  ;;  %v12910_v33 = vld [vmem:[%s16230_s9 + $0x190] sm:$0xff]  ;;  %v12919_v34 = vld [vmem:[%s16230_s9 + $0x168] sm:$0xff] }
 0xf4c   :  { %4067 = vmatprep.subr.mxu0 %v3732_v29  ;;  %4180 = vmatprep.subr.mxu1 %v3734_v59  ;;  %17212 = vst [vmem:[#allocation63_spill] sm:$0xff] %v12910_v33  ;;  %17213 = vst [vmem:[#allocation37_spill] sm:$0xff] %v12919_v34  ;;  %v12924_v29 = vld [vmem:[%s16230_s9 + $0x178] sm:$0xff]  ;;  %v12931_v59 = vld [vmem:[%s16230_s9 + $0x160] sm:$0xff] }
 0xf4d   :  { %3915 = vmatprep.mubr.f32.mxu0 %v17188_v15  ;;  %4028 = vmatprep.mubr.f32.mxu1 %v17188_v15  ;;  %17214 = vst [vmem:[#allocation26_spill] sm:$0xff] %v12924_v29  ;;  %17215 = vst [vmem:[#allocation24_spill] sm:$0xff] %v12931_v59 }
 0xf4e   :  { %4068 = vmatpush1.msra.mxu0 %v3731_v35  ;;  %4181 = vmatpush1.msra.mxu1 %v3733_v13  ;;  %v12936_v35 = vld [vmem:[%s16230_s9 + $0x170] sm:$0xff]  ;;  %v17217_v13 = vld [vmem:[#allocation32_spill] sm:$0xff] }
 0xf4f   :  { %3916 = vmatmul.mubr.f32.gmra.mxu0 %v17201_v18  ;;  %4029 = vmatmul.mubr.f32.gmra.mxu1 %v17201_v18  ;;  %17216 = vst [vmem:[#allocation59_spill] sm:$0xff] %v12936_v35  ;;  %v13191_v18 = vld [vmem:[%s16230_s9 + $0x20] sm:$0xff] }
 0xf50   :  { %4069 = vmatprep.subr.mxu0 %v3728_v36  ;;  %4182 = vmatprep.subr.mxu1 %v3730_v40  ;;  %v12943_v36 = vld [vmem:[%s16230_s9 + $0x148] sm:$0xff]  ;;  %v12948_v40 = vld [vmem:[%s16230_s9 + $0x158] sm:$0xff]  ;;  %17260 = vst [vmem:[#allocation73_spill] sm:$0xff] %v13191_v18 }
 0xf51   :  { %4070 = vmatpush1.msra.mxu0 %v3727_v42  ;;  %4183 = vmatpush1.msra.mxu1 %v3729_v12  ;;  %17218 = vst [vmem:[#allocation61_spill] sm:$0xff] %v12943_v36  ;;  %17219 = vst [vmem:[#allocation38_spill] sm:$0xff] %v12948_v40  ;;  %v12957_v42 = vld [vmem:[%s16230_s9 + $0x140] sm:$0xff]  ;;  %v12962_v12 = vld [vmem:[%s16230_s9 + $0x150] sm:$0xff] }
 0xf52   :  { %4071 = vmatprep.subr.mxu0 %v3724_v44  ;;  %4184 = vmatprep.subr.mxu1 %v3726_v37  ;;  %17220 = vst [vmem:[#allocation9_spill] sm:$0xff] %v12957_v42  ;;  %17221 = vst [vmem:[#allocation23_spill] sm:$0xff] %v12962_v12  ;;  %v12971_v44 = vld [vmem:[%s16230_s9 + $0x128] sm:$0xff]  ;;  %v12976_v37 = vld [vmem:[%s16230_s9 + $0x138] sm:$0xff] }
 0xf53   :  { %3921 = vmatprep.mubr.f32.mxu0 %v17188_v15  ;;  %4034 = vmatprep.mubr.f32.mxu1 %v17188_v15  ;;  %17222 = vst [vmem:[#allocation22_spill] sm:$0xff] %v12971_v44  ;;  %17223 = vst [vmem:[#allocation55_spill] sm:$0xff] %v12976_v37 }
 0xf54   :  { %4072 = vmatpush1.msra.mxu0 %v3723_v19  ;;  %4185 = vmatpush1.msra.mxu1 %v3725_v53  ;;  %v12983_v19 = vld [vmem:[%s16230_s9 + $0x120] sm:$0xff]  ;;  %v12988_v53 = vld [vmem:[%s16230_s9 + $0x130] sm:$0xff] }
 0xf55   :  { %3922 = vmatmul.mubr.f32.gmra.mxu0 %v17202_v39  ;;  %4035 = vmatmul.mubr.f32.gmra.mxu1 %v17202_v39  ;;  %17224 = vst [vmem:[#allocation57_spill] sm:$0xff] %v12983_v19  ;;  %17225 = vst [vmem:[#allocation56_spill] sm:$0xff] %v12988_v53  ;;  %v13184_v39 = vld [vmem:[%s16230_s9 + $0x38] sm:$0xff] }
 0xf56   :  { %4073 = vmatprep.subr.mxu0 %v3720_v49  ;;  %4186 = vmatprep.subr.mxu1 %v3722_v63  ;;  %v17226_v49 = vld [vmem:[#allocation8_spill] sm:$0xff]  ;;  %v12995_v63 = vld [vmem:[%s16230_s9 + $0x108] sm:$0xff]  ;;  %17259 = vst [vmem:[#allocation72_spill] sm:$0xff] %v13184_v39 }
 0xf57   :  { %4074 = vmatpush1.msra.mxu0 %v3719_v46  ;;  %4187 = vmatpush1.msra.mxu1 %v3721_v30  ;;  %17227 = vst [vmem:[#allocation10_spill] sm:$0xff] %v12995_v63  ;;  %v13000_v46 = vld [vmem:[%s16230_s9 + $0x118] sm:$0xff]  ;;  %v13009_v30 = vld [vmem:[%s16230_s9 + $0x100] sm:$0xff] }
 0xf58   :  { %4075 = vmatprep.subr.mxu0 %v3716_v41  ;;  %4188 = vmatprep.subr.mxu1 %v3718_v43  ;;  %17228 = vst [vmem:[#allocation68_spill] sm:$0xff] %v13000_v46  ;;  %17229 = vst [vmem:[#allocation45_spill] sm:$0xff] %v13009_v30  ;;  %v13014_v41 = vld [vmem:[%s16230_s9 + $0x110] sm:$0xff]  ;;  %v13023_v43 = vld [vmem:[%s16230_s9 + $0xe8] sm:$0xff] }
 0xf59   :  { %3927 = vmatprep.mubr.f32.mxu0 %v17188_v15  ;;  %4040 = vmatprep.mubr.f32.mxu1 %v17188_v15  ;;  %17230 = vst [vmem:[#allocation67_spill] sm:$0xff] %v13014_v41  ;;  %17231 = vst [vmem:[#allocation11_spill] sm:$0xff] %v13023_v43 }
 0xf5a   :  { %4076 = vmatpush1.msra.mxu0 %v3715_v45  ;;  %4189 = vmatpush1.msra.mxu1 %v3717_v5  ;;  %v13028_v45 = vld [vmem:[%s16230_s9 + $0xf8] sm:$0xff]  ;;  %v13035_v5 = vld [vmem:[%s16230_s9 + $0xe0] sm:$0xff] }
 0xf5b   :  { %3928 = vmatmul.mubr.f32.gmra.mxu0 %v17203_v28  ;;  %4041 = vmatmul.mubr.f32.gmra.mxu1 %v17203_v28  ;;  %17232 = vst [vmem:[#allocation66_spill] sm:$0xff] %v13028_v45  ;;  %17233 = vst [vmem:[#allocation43_spill] sm:$0xff] %v13035_v5  ;;  %v13179_v28 = vld [vmem:[%s16230_s9 + $0x28] sm:$0xff] }
 0xf5c   :  { %4077 = vmatprep.subr.mxu0 %v3712_v9  ;;  %4190 = vmatprep.subr.mxu1 %v3714_v8  ;;  %v13040_v9 = vld [vmem:[%s16230_s9 + $0xf0] sm:$0xff]  ;;  %v17235_v8 = vld [vmem:[#allocation36_spill] sm:$0xff]  ;;  %17258 = vst [vmem:[#allocation71_spill] sm:$0xff] %v13179_v28 }
 0xf5d   :  { %4078 = vmatpush1.msra.mxu0 %v3711_v16  ;;  %4191 = vmatpush1.msra.mxu1 %v3713_v17  ;;  %17234 = vst [vmem:[#allocation39_spill] sm:$0xff] %v13040_v9  ;;  %v13047_v16 = vld [vmem:[%s16230_s9 + $0xc8] sm:$0xff]  ;;  %v13052_v17 = vld [vmem:[%s16230_s9 + $0xd8] sm:$0xff] }
 0xf5e   :  { %4079 = vmatprep.subr.mxu0 %v3708_v2  ;;  %4192 = vmatprep.subr.mxu1 %v3710_v57  ;;  %17236 = vst [vmem:[#allocation12_spill] sm:$0xff] %v13047_v16  ;;  %17237 = vst [vmem:[#allocation49_spill] sm:$0xff] %v13052_v17  ;;  %v13061_v2 = vld [vmem:[%s16230_s9 + $0xc0] sm:$0xff]  ;;  %v13066_v57 = vld [vmem:[%s16230_s9 + $0xd0] sm:$0xff] }
 0xf5f   :  { %3933 = vmatprep.mubr.f32.mxu0 %v17188_v15  ;;  %4046 = vmatprep.mubr.f32.mxu1 %v17188_v15  ;;  %17238 = vst [vmem:[#allocation33_spill] sm:$0xff] %v13061_v2  ;;  %17239 = vst [vmem:[#allocation30_spill] sm:$0xff] %v13066_v57 }
 0xf60   :  { %4080 = vmatpush1.msra.mxu0 %v3707_v14  ;;  %4193 = vmatpush1.msra.mxu1 %v3709_v1  ;;  %v13075_v14 = vld [vmem:[%s16230_s9 + $0xa8] sm:$0xff]  ;;  %v13080_v1 = vld [vmem:[%s16230_s9 + $0xb8] sm:$0xff] }
 0xf61   :  { %3934 = vmatmul.mubr.f32.gmra.mxu0 %v17204_v51  ;;  %4047 = vmatmul.mubr.f32.gmra.mxu1 %v17204_v51  ;;  %17240 = vst [vmem:[#allocation13_spill] sm:$0xff] %v13075_v14  ;;  %17241 = vst [vmem:[#allocation47_spill] sm:$0xff] %v13080_v1  ;;  %v13170_v51 = vld [vmem:[%s16230_s9 + $0x50] sm:$0xff] }
 0xf62   :  { %4081 = vmatprep.subr.mxu0 %v3704_v54  ;;  %4194 = vmatprep.subr.mxu1 %v3706_v58  ;;  %v13087_v54 = vld [vmem:[%s16230_s9 + $0xa0] sm:$0xff]  ;;  %v13092_v58 = vld [vmem:[%s16230_s9 + $0xb0] sm:$0xff]  ;;  %17257 = vst [vmem:[#allocation70_spill] sm:$0xff] %v13170_v51 }
 0xf63   :  { %4082 = vmatpush1.msra.mxu0 %v3703_v61  ;;  %4195 = vmatpush1.msra.mxu1 %v3705_v0  ;;  %17242 = vst [vmem:[#allocation31_spill] sm:$0xff] %v13087_v54  ;;  %17243 = vst [vmem:[#allocation44_spill] sm:$0xff] %v13092_v58  ;;  %v17244_v61 = vld [vmem:[#allocation34_spill] sm:$0xff] }
 0xf64   :  { %4083 = vmatprep.subr.mxu0 %v3700_v52  ;;  %4196 = vmatprep.subr.mxu1 %v3702_v22  ;;  %v13099_v0 = vld [vmem:[%s16230_s9 + $0x88] sm:$0xff]  ;;  %v13104_v52 = vld [vmem:[%s16230_s9 + $0x98] sm:$0xff]  ;;  %v13113_v22 = vld [vmem:[%s16230_s9 + $0x80] sm:$0xff] }
 0xf65   :  { %4084 = vmatpush1.msra.mxu0 %v3699_v24  ;;  %4117 = vmatprep.mubr.f32.mxu0 %v17188_v15  ;;  %17245 = vst [vmem:[#allocation14_spill] sm:$0xff] %v13099_v0  ;;  %17246 = vst [vmem:[#allocation48_spill] sm:$0xff] %v13104_v52  ;;  %v13118_v24 = vld [vmem:[%s16230_s9 + $0x90] sm:$0xff] }
 0xf66   :  { %4197 = vmatpush1.msra.mxu1 %v3701_v23  ;;  %4230 = vmatprep.mubr.f32.mxu1 %v17188_v15  ;;  %17247 = vst [vmem:[#allocation15_spill] sm:$0xff] %v13113_v22  ;;  %17248 = vst [vmem:[#allocation20_spill] sm:$0xff] %v13118_v24  ;;  %v13127_v23 = vld [vmem:[%s16230_s9 + $0x68] sm:$0xff] }
 0xf67   :  { %4118 = vmatmul.mubr.f32.vlgmr.msra.gmra.mxu0 %v17207_v48  ;;  %4231 = vmatmul.mubr.f32.vlgmr.msra.gmra.mxu1 %v17207_v48  ;;  %17249 = vst [vmem:[#allocation19_spill] sm:$0xff] %v13127_v23  ;;  %v13156_v48 = vld [vmem:[%s16230_s9 + $0x58] sm:$0xff] }
 0xf68   :  { %4433 = vmatprep.subr.mxu0 %v12816_v25  ;;  %4504 = vmatprep.subr.mxu1 %v12821_v4  ;;  %17255 = vst [vmem:[#allocation25_spill] sm:$0xff] %v13156_v48 }
 0xf69   :  { %4434 = vmatpush1.msra.mxu0 %v12827_v47  ;;  %4505 = vmatpush1.msra.mxu1 %v12832_v26 }
 0xf6a   :  { %4435 = vmatprep.subr.mxu0 %v12839_v21  ;;  %4506 = vmatprep.subr.mxu1 %v12844_v60 }
 0xf6b   :  { %4123 = vmatprep.mubr.f32.mxu0 %v17188_v15  ;;  %4236 = vmatprep.mubr.f32.mxu1 %v17188_v15 }
 0xf6c   :  { %4436 = vmatpush1.msra.mxu0 %v12853_v62  ;;  %4507 = vmatpush1.msra.mxu1 %v12858_v10 }
 0xf6d   :  { %4124 = vmatmul.mubr.f32.gmra.mxu0 %v17208_v3  ;;  %4237 = vmatmul.mubr.f32.gmra.mxu1 %v17208_v3  ;;  %v13151_v3 = vld [vmem:[%s16230_s9 + $0x48] sm:$0xff] }
 0xf6e   :  { %4437 = vmatprep.subr.mxu0 %v12867_v55  ;;  %4508 = vmatprep.subr.mxu1 %v12872_v38  ;;  %17254 = vst [vmem:[#allocation17_spill] sm:$0xff] %v13151_v3 }
 0xf6f   :  { %4438 = vmatpush1.msra.mxu0 %v12879_v56  ;;  %4509 = vmatpush1.msra.mxu1 %v12884_v11 }
 0xf70   :  { %4439 = vmatprep.subr.mxu0 %v12891_v31  ;;  %4510 = vmatprep.subr.mxu1 %v12896_v32 }
 0xf71   :  { %4129 = vmatprep.mubr.f32.mxu0 %v17188_v15  ;;  %4242 = vmatprep.mubr.f32.mxu1 %v17188_v15 }
 0xf72   :  { %4440 = vmatpush1.msra.mxu0 %v12905_v27  ;;  %4511 = vmatpush1.msra.mxu1 %v12910_v33 }
 0xf73   :  { %4130 = vmatmul.mubr.f32.gmra.mxu0 %v17217_v13  ;;  %4243 = vmatmul.mubr.f32.gmra.mxu1 %v17217_v13  ;;  %v17253_v13 = vld [vmem:[#allocation35_spill] sm:$0xff] }
 0xf74   :  { %4441 = vmatprep.subr.mxu0 %v12919_v34  ;;  %4512 = vmatprep.subr.mxu1 %v12924_v29 }
 0xf75   :  { %4442 = vmatpush1.msra.mxu0 %v12931_v59  ;;  %4513 = vmatpush1.msra.mxu1 %v12936_v35 }
 0xf76   :  { %4443 = vmatprep.subr.mxu0 %v12943_v36  ;;  %4514 = vmatprep.subr.mxu1 %v12948_v40 }
 0xf77   :  { %4135 = vmatprep.mubr.f32.mxu0 %v17188_v15  ;;  %4248 = vmatprep.mubr.f32.mxu1 %v17188_v15 }
 0xf78   :  { %4444 = vmatpush1.msra.mxu0 %v12957_v42  ;;  %4515 = vmatpush1.msra.mxu1 %v12962_v12 }
 0xf79   :  { %4136 = vmatmul.mubr.f32.gmra.mxu0 %v17226_v49  ;;  %4249 = vmatmul.mubr.f32.gmra.mxu1 %v17226_v49  ;;  %v13144_v49 = vld [vmem:[%s16230_s9 + $0x70] sm:$0xff] }
 0xf7a   :  { %4445 = vmatprep.subr.mxu0 %v12971_v44  ;;  %4516 = vmatprep.subr.mxu1 %v12976_v37  ;;  %17252 = vst [vmem:[#allocation18_spill] sm:$0xff] %v13144_v49 }
 0xf7b   :  { %4446 = vmatpush1.msra.mxu0 %v12983_v19  ;;  %4517 = vmatpush1.msra.mxu1 %v12988_v53 }
 0xf7c   :  { %4447 = vmatprep.subr.mxu0 %v12995_v63  ;;  %4518 = vmatprep.subr.mxu1 %v13000_v46 }
 0xf7d   :  { %4141 = vmatprep.mubr.f32.mxu0 %v17188_v15  ;;  %4254 = vmatprep.mubr.f32.mxu1 %v17188_v15 }
 0xf7e   :  { %4448 = vmatpush1.msra.mxu0 %v13009_v30  ;;  %4519 = vmatpush1.msra.mxu1 %v13014_v41 }
 0xf7f   :  { %4142 = vmatmul.mubr.f32.gmra.mxu0 %v17235_v8  ;;  %4255 = vmatmul.mubr.f32.gmra.mxu1 %v17235_v8  ;;  %v13139_v8 = vld [vmem:[%s16230_s9 + $0x60] sm:$0xff] }
 0xf80   :  { %4449 = vmatprep.subr.mxu0 %v13023_v43  ;;  %4520 = vmatprep.subr.mxu1 %v13028_v45  ;;  %17251 = vst [vmem:[#allocation52_spill] sm:$0xff] %v13139_v8 }
 0xf81   :  { %4450 = vmatpush1.msra.mxu0 %v13035_v5  ;;  %4521 = vmatpush1.msra.mxu1 %v13040_v9 }
 0xf82   :  { %4451 = vmatprep.subr.mxu0 %v13047_v16  ;;  %4522 = vmatprep.subr.mxu1 %v13052_v17 }
 0xf83   :  { %4147 = vmatprep.mubr.f32.mxu0 %v17188_v15  ;;  %4260 = vmatprep.mubr.f32.mxu1 %v17188_v15 }
 0xf84   :  { %4452 = vmatpush1.msra.mxu0 %v13061_v2  ;;  %4523 = vmatpush1.msra.mxu1 %v13066_v57 }
 0xf85   :  { %4148 = vmatmul.mubr.f32.gmra.mxu0 %v17244_v61  ;;  %4261 = vmatmul.mubr.f32.gmra.mxu1 %v17244_v61  ;;  %v13132_v61 = vld [vmem:[%s16230_s9 + $0x78] sm:$0xff] }
 0xf86   :  { %4453 = vmatprep.subr.mxu0 %v13075_v14  ;;  %4524 = vmatprep.subr.mxu1 %v13080_v1  ;;  %17250 = vst [vmem:[#allocation50_spill] sm:$0xff] %v13132_v61 }
 0xf87   :  { %4454 = vmatpush1.msra.mxu0 %v13087_v54  ;;  %4525 = vmatpush1.msra.mxu1 %v13092_v58 }
 0xf88   :  { %4455 = vmatprep.subr.mxu0 %v13099_v0  ;;  %4526 = vmatprep.subr.mxu1 %v13104_v52 }
 0xf89   :  { %4153 = vmatprep.mubr.f32.mxu0 %v17188_v15  ;;  %4266 = vmatprep.mubr.f32.mxu1 %v17188_v15 }
 0xf8a   :  { %4456 = vmatpush1.msra.mxu0 %v13113_v22  ;;  %4527 = vmatpush1.msra.mxu1 %v13118_v24 }
 0xf8b   :  { %4154 = vmatmul.mubr.f32.gmra.mxu0 %v17253_v13  ;;  %4267 = vmatmul.mubr.f32.gmra.mxu1 %v17253_v13  ;;  %v13165_v13 = vld [vmem:[%s16230_s9 + $0x40] sm:$0xff] }
 0xf8c   :  { %4457 = vmatprep.subr.mxu0 %v13127_v23  ;;  %4528 = vmatprep.subr.mxu1 %v13132_v61  ;;  %17256 = vst [vmem:[#allocation21_spill] sm:$0xff] %v13165_v13 }
 0xf8d   :  { %4458 = vmatpush1.msra.mxu0 %v13139_v8  ;;  %4529 = vmatpush1.msra.mxu1 %v13144_v49 }
 0xf8e   :  { %4459 = vmatprep.subr.mxu0 %v13151_v3  ;;  %4530 = vmatprep.subr.mxu1 %v13156_v48 }
 0xf8f   :  { %4159 = vmatprep.mubr.f32.mxu0 %v17188_v15  ;;  %4272 = vmatprep.mubr.f32.mxu1 %v17188_v15 }
 0xf90   :  { %4460 = vmatpush1.msra.mxu0 %v13165_v13  ;;  %4531 = vmatpush1.msra.mxu1 %v13170_v51  ;;  %v13215_v51 = vld [vmem:[%s16230_s9] sm:$0xff] }
 0xf91   :  { %4160 = vmatmul.mubr.f32.gmra.mxu0 %v17262_v6  ;;  %4273 = vmatmul.mubr.f32.gmra.mxu1 %v17262_v6  ;;  %17265 = vst [vmem:[#allocation77_spill] sm:$0xff] %v13215_v51  ;;  %v13222_v6 = vld [vmem:[%s16230_s9 + $0x10] sm:$0xff] }
 0xf92   :  { %4461 = vmatprep.subr.mxu0 %v13179_v28  ;;  %4532 = vmatprep.subr.mxu1 %v13184_v39  ;;  %17266 = vst [vmem:[#allocation78_spill] sm:$0xff] %v13222_v6 }
 0xf93   :  { %4462 = vmatpush1.msra.mxu0 %v13191_v18  ;;  %4533 = vmatpush1.msra.mxu1 %v13196_v50 }
 0xf94   :  { %4463 = vmatprep.subr.mxu0 %v13203_v7  ;;  %4534 = vmatprep.subr.mxu1 %v13208_v20 }
 0xf95   :  { %4464 = vmatpush1.msra.mxu0 %v13215_v51  ;;  %4497 = vmatprep.mubr.f32.mxu0 %v17188_v15 }
 0xf96   :  { %4535 = vmatpush1.msra.mxu1 %v13222_v6  ;;  %4568 = vmatprep.mubr.f32.mxu1 %v17188_v15 }
 0xf97   :  { %4498 = vmatmul.mubr.f32.vlgmr.msra.gmra.mxu0 %v17188_v15  ;;  %4569 = vmatmul.mubr.f32.vlgmr.msra.gmra.mxu1 %v17188_v15 }
 0xf98   :  { %4607 = vmatprep.subr.mxu0 %v12816_v25  ;;  %4678 = vmatprep.subr.mxu1 %v12821_v4 }
 0xf99   :  { %4608 = vmatpush1.msra.mxu0 %v12827_v47  ;;  %4679 = vmatpush1.msra.mxu1 %v12832_v26 }
 0xf9a   :  { %4609 = vmatprep.subr.mxu0 %v12839_v21  ;;  %4680 = vmatprep.subr.mxu1 %v12844_v60 }
 0xf9b   :  { %4610 = vmatpush1.msra.mxu0 %v12853_v62  ;;  %4681 = vmatpush1.msra.mxu1 %v12858_v10 }
 0xf9c   :  { %4611 = vmatprep.subr.mxu0 %v12867_v55  ;;  %4682 = vmatprep.subr.mxu1 %v12872_v38 }
 0xf9d   :  { %4612 = vmatpush1.msra.mxu0 %v12879_v56  ;;  %4683 = vmatpush1.msra.mxu1 %v12884_v11 }
 0xf9e   :  { %4613 = vmatprep.subr.mxu0 %v12891_v31  ;;  %4684 = vmatprep.subr.mxu1 %v12896_v32 }
 0xf9f   :  { %4614 = vmatpush1.msra.mxu0 %v12905_v27  ;;  %4685 = vmatpush1.msra.mxu1 %v12910_v33 }
 0xfa0   :  { %4615 = vmatprep.subr.mxu0 %v12919_v34  ;;  %4686 = vmatprep.subr.mxu1 %v12924_v29  ;;  %v17271_v34 = vld [vmem:[#allocation60_spill] sm:$0xff] }
 0xfa1   :  { %4616 = vmatpush1.msra.mxu0 %v12931_v59  ;;  %4687 = vmatpush1.msra.mxu1 %v12936_v35  ;;  %v17270_v59 = vld [vmem:[#allocation54_spill] sm:$0xff] }
 0xfa2   :  { %4617 = vmatprep.subr.mxu0 %v12943_v36  ;;  %4688 = vmatprep.subr.mxu1 %v12948_v40 }
 0xfa3   :  { %4618 = vmatpush1.msra.mxu0 %v12957_v42  ;;  %4689 = vmatpush1.msra.mxu1 %v12962_v12  ;;  %v17269_v42 = vld [vmem:[#allocation29_spill] sm:$0xff] }
 0xfa4   :  { %4619 = vmatprep.subr.mxu0 %v12971_v44  ;;  %4690 = vmatprep.subr.mxu1 %v12976_v37  ;;  %v17268_v44 = vld [vmem:[#allocation28_spill] sm:$0xff] }
 0xfa5   :  { %4620 = vmatpush1.msra.mxu0 %v12983_v19  ;;  %4691 = vmatpush1.msra.mxu1 %v12988_v53 }
 0xfa6   :  { %4621 = vmatprep.subr.mxu0 %v12995_v63  ;;  %4692 = vmatprep.subr.mxu1 %v13000_v46  ;;  %v4279_v46 = vld [vmem:[%s16231_s10] sm:$0xf] }
 0xfa7   :  { %4622 = vmatpush1.msra.mxu0 %v13009_v30  ;;  %4693 = vmatpush1.msra.mxu1 %v13014_v41  ;;  %v13352_v12 = vrot.slane %v4279_v46, %v17268_v44  ;;  %v13355_v40 = vrot.slane %v4279_v46, %v17269_v42  ;;  %v13358_v29 = vrot.slane %v4279_v46, %v17270_v59 }
 0xfa8   :  { %4623 = vmatprep.subr.mxu0 %v13023_v43  ;;  %4694 = vmatprep.subr.mxu1 %v13028_v45  ;;  %v13361_v33 = vrot.slane %v4279_v46, %v17271_v34 }
 0xfa9   :  { %4624 = vmatpush1.msra.mxu0 %v13035_v5  ;;  %4695 = vmatpush1.msra.mxu1 %v13040_v9 }
 0xfaa   :  { %4625 = vmatprep.subr.mxu0 %v13047_v16  ;;  %4696 = vmatprep.subr.mxu1 %v13052_v17 }
 0xfab   :  { %4626 = vmatpush1.msra.mxu0 %v13061_v2  ;;  %4697 = vmatpush1.msra.mxu1 %v13066_v57 }
 0xfac   :  { %4627 = vmatprep.subr.mxu0 %v13075_v14  ;;  %4698 = vmatprep.subr.mxu1 %v13080_v1 }
 0xfad   :  { %4628 = vmatpush1.msra.mxu0 %v13087_v54  ;;  %4699 = vmatpush1.msra.mxu1 %v13092_v58 }
 0xfae   :  { %4629 = vmatprep.subr.mxu0 %v13099_v0  ;;  %4700 = vmatprep.subr.mxu1 %v13104_v52  ;;  %v17267_v0 = vld [vmem:[#allocation70_spill] sm:$0xff] }
 0xfaf   :  { %4630 = vmatpush1.msra.mxu0 %v13113_v22  ;;  %4701 = vmatpush1.msra.mxu1 %v13118_v24 }
 0xfb0   :  { %4631 = vmatprep.subr.mxu0 %v13127_v23  ;;  %4702 = vmatprep.subr.mxu1 %v13132_v61 }
 0xfb1   :  { %4632 = vmatpush1.msra.mxu0 %v13139_v8  ;;  %4703 = vmatpush1.msra.mxu1 %v13144_v49 }
 0xfb2   :  { %4633 = vmatprep.subr.mxu0 %v13151_v3  ;;  %4704 = vmatprep.subr.mxu1 %v13156_v48 }
 0xfb3   :  { %4634 = vmatpush1.msra.mxu0 %v13165_v13  ;;  %4705 = vmatpush1.msra.mxu1 %v17267_v0 }
 0xfb4   :  { %4635 = vmatprep.subr.mxu0 %v13179_v28  ;;  %4706 = vmatprep.subr.mxu1 %v13184_v39 }
 0xfb5   :  { %4636 = vmatpush1.msra.mxu0 %v13191_v18  ;;  %4707 = vmatpush1.msra.mxu1 %v13196_v50 }
 0xfb6   :  { %4637 = vmatprep.subr.mxu0 %v13203_v7  ;;  %4708 = vmatprep.subr.mxu1 %v13208_v20 }
 0xfb7   :  { %4638 = vmatpush1.msra.mxu0 %v13215_v51  ;;  %4671 = vmatprep.mubr.f32.mxu0 %v17188_v15 }
 0xfb8   :  { %4709 = vmatpush1.msra.mxu1 %v13222_v6  ;;  %4742 = vmatprep.mubr.f32.mxu1 %v17188_v15 }
 0xfb9   :  { %4781 = vmatprep.subr.mxu0 %v12816_v25  ;;  %4852 = vmatprep.subr.mxu1 %v12821_v4 }
 0xff8   :  { %v13300_v39 = vpop.f32.mrf.mxu0  ;;  %v13302_v18 = vpop.f32.mrf.mxu1 }
 0xffa   :  { %v13304_v50 = vpop.f32.mrf.mxu0  ;;  %v13306_v7 = vpop.f32.mrf.mxu1 }
 0xffd   :  { %v3899_v20 = vpop.f32.mrf.mxu0  ;;  %v4012_v51 = vpop.f32.mrf.mxu1 }
 0xfff   :  { %v3901_v28 = vpop.f32.mrf.mxu0  ;;  %v4014_v0 = vpop.f32.mrf.mxu1 }
0x1003   :  { %v3905_v13 = vpop.f32.mrf.mxu0  ;;  %v4018_v6 = vpop.f32.mrf.mxu1 }
0x1005   :  { %v3907_v48 = vpop.f32.mrf.mxu0  ;;  %v4020_v15 = vpop.f32.mrf.mxu1 }
0x1009   :  { %v3911_v3 = vpop.f32.mrf.mxu0  ;;  %v4024_v25 = vpop.f32.mrf.mxu1 }
0x100b   :  { %v3913_v49 = vpop.f32.mrf.mxu0  ;;  %v4026_v4 = vpop.f32.mrf.mxu1 }
0x100f   :  { %v13308_v8 = vpop.f32.mrf.mxu0  ;;  %v13310_v61 = vpop.f32.mrf.mxu1 }
0x1011   :  { %v13312_v23 = vpop.f32.mrf.mxu0  ;;  %v13314_v24 = vpop.f32.mrf.mxu1 }
0x1015   :  { %v13316_v22 = vpop.f32.mrf.mxu0  ;;  %v13318_v52 = vpop.f32.mrf.mxu1 }
0x1017   :  { %v13320_v58 = vpop.f32.mrf.mxu0  ;;  %v13322_v54 = vpop.f32.mrf.mxu1 }
0x101b   :  { %v13324_v1 = vpop.f32.mrf.mxu0  ;;  %v13326_v14 = vpop.f32.mrf.mxu1 }
0x101d   :  { %v13328_v57 = vpop.f32.mrf.mxu0  ;;  %v13330_v2 = vpop.f32.mrf.mxu1 }
0x1021   :  { %v13332_v17 = vpop.f32.mrf.mxu0  ;;  %v13334_v16 = vpop.f32.mrf.mxu1 }
0x1023   :  { %v13336_v9 = vpop.f32.mrf.mxu0  ;;  %v13338_v5 = vpop.f32.mrf.mxu1 }
0x1027   :  { %v13340_v45 = vpop.f32.mrf.mxu0  ;;  %v13342_v43 = vpop.f32.mrf.mxu1 }
0x1029   :  { %v13344_v41 = vpop.f32.mrf.mxu0  ;;  %v13346_v30 = vpop.f32.mrf.mxu1 }
0x102d   :  { %v4125_v63 = vpop.f32.mrf.mxu0  ;;  %v4238_v53 = vpop.f32.mrf.mxu1 }
0x102e   :  { %v4126_v19 = vadd.f32 %v4125_v63, %v3899_v20  ;;  %v4239_v37 = vadd.f32 %v4238_v53, %v4012_v51 }
0x102f   :  { %v4127_v36 = vpop.f32.mrf.mxu0  ;;  %v4240_v35 = vpop.f32.mrf.mxu1 }
0x1030   :  { %v4128_v27 = vadd.f32 %v4127_v36, %v3901_v28  ;;  %v4241_v32 = vadd.f32 %v4240_v35, %v4014_v0  ;;  %v13364_v31 = vadd.f32 %v13352_v12, %v4126_v19  ;;  %v13367_v20 = vadd.f32 %v13355_v40, %v4239_v37 }
0x1032   :  { %v13370_v51 = vadd.f32 %v13358_v29, %v4128_v27  ;;  %v13373_v53 = vadd.f32 %v13361_v33, %v4241_v32 }
0x1033   :  { %v4131_v63 = vpop.f32.mrf.mxu0  ;;  %v4244_v59 = vpop.f32.mrf.mxu1 }
0x1034   :  { %v4132_v42 = vadd.f32 %v4131_v63, %v3905_v13  ;;  %v4245_v44 = vadd.f32 %v4244_v59, %v4018_v6 }
0x1035   :  { %v4133_v46 = vpop.f32.mrf.mxu0  ;;  %v4246_v34 = vpop.f32.mrf.mxu1 }
0x1036   :  { %v4134_v28 = vadd.f32 %v4133_v46, %v3907_v48  ;;  %v4247_v35 = vadd.f32 %v4246_v34, %v4020_v15  ;;  %v13376_v36 = vadd.f32 %v13352_v12, %v4132_v42  ;;  %v13379_v37 = vadd.f32 %v13355_v40, %v4245_v44 }
0x1038   :  { %17272 = vst [vmem:[#allocation79_spill] sm:$0xff] %v13376_v36  ;;  %17273 = vst [vmem:[#allocation80_spill] sm:$0xff] %v13379_v37  ;;  %v13382_v27 = vadd.f32 %v13358_v29, %v4134_v28  ;;  %v13385_v32 = vadd.f32 %v13361_v33, %v4247_v35  ;;  %v17341_v37 = vld [vmem:[#allocation72_spill] sm:$0xff]  ;;  %v17344_v36 = vld [vmem:[#allocation75_spill] sm:$0xff] }
0x1039   :  { %v4137_v19 = vpop.f32.mrf.mxu0  ;;  %v4250_v0 = vpop.f32.mrf.mxu1 }
0x103a   :  { %17274 = vst [vmem:[#allocation81_spill] sm:$0xff] %v13382_v27  ;;  %17275 = vst [vmem:[#allocation82_spill] sm:$0xff] %v13385_v32  ;;  %v4138_v13 = vadd.f32 %v4137_v19, %v3911_v3  ;;  %v4251_v6 = vadd.f32 %v4250_v0, %v4024_v25  ;;  %v17342_v32 = vld [vmem:[#allocation73_spill] sm:$0xff]  ;;  %v17343_v27 = vld [vmem:[#allocation74_spill] sm:$0xff] }
0x103b   :  { %v4139_v59 = vpop.f32.mrf.mxu0  ;;  %v4252_v63 = vpop.f32.mrf.mxu1 }
0x103c   :  { %v4140_v48 = vadd.f32 %v4139_v59, %v3913_v49  ;;  %v4253_v15 = vadd.f32 %v4252_v63, %v4026_v4  ;;  %v13388_v34 = vadd.f32 %v13352_v12, %v4138_v13  ;;  %v13391_v42 = vadd.f32 %v13355_v40, %v4251_v6 }
0x103e   :  { %17276 = vst [vmem:[#allocation83_spill] sm:$0xff] %v13388_v34  ;;  %17277 = vst [vmem:[#allocation84_spill] sm:$0xff] %v13391_v42  ;;  %v13394_v44 = vadd.f32 %v13358_v29, %v4140_v48  ;;  %v13397_v46 = vadd.f32 %v13361_v33, %v4253_v15  ;;  %v17337_v42 = vld [vmem:[#allocation25_spill] sm:$0xff]  ;;  %v17340_v34 = vld [vmem:[#allocation71_spill] sm:$0xff] }
0x103f   :  { %v4143_v28 = vpop.f32.mrf.mxu0  ;;  %v4256_v35 = vpop.f32.mrf.mxu1 }
0x1040   :  { %17278 = vst [vmem:[#allocation85_spill] sm:$0xff] %v13394_v44  ;;  %17279 = vst [vmem:[#allocation86_spill] sm:$0xff] %v13397_v46  ;;  %v4144_v25 = vadd.f32 %v4143_v28, %v13308_v8  ;;  %v4257_v3 = vadd.f32 %v4256_v35, %v13310_v61  ;;  %v17338_v46 = vld [vmem:[#allocation21_spill] sm:$0xff]  ;;  %v17339_v44 = vld [vmem:[#allocation70_spill] sm:$0xff] }
0x1041   :  { %v4145_v49 = vpop.f32.mrf.mxu0  ;;  %v4258_v4 = vpop.f32.mrf.mxu1 }
0x1042   :  { %v4146_v19 = vadd.f32 %v4145_v49, %v13312_v23  ;;  %v4259_v0 = vadd.f32 %v4258_v4, %v13314_v24  ;;  %v13404_v13 = vadd.f32 %v13352_v12, %v4144_v25  ;;  %v13407_v6 = vadd.f32 %v13355_v40, %v4257_v3 }
0x1044   :  { %17280 = vst [vmem:[#allocation87_spill] sm:$0xff] %v13404_v13  ;;  %17281 = vst [vmem:[#allocation88_spill] sm:$0xff] %v13407_v6  ;;  %v13410_v59 = vadd.f32 %v13358_v29, %v4146_v19  ;;  %v13413_v63 = vadd.f32 %v13361_v33, %v4259_v0  ;;  %v17333_v6 = vld [vmem:[#allocation50_spill] sm:$0xff]  ;;  %v17336_v13 = vld [vmem:[#allocation17_spill] sm:$0xff] }
0x1045   :  { %v4149_v8 = vpop.f32.mrf.mxu0  ;;  %v4262_v61 = vpop.f32.mrf.mxu1 }
0x1046   :  { %17282 = vst [vmem:[#allocation89_spill] sm:$0xff] %v13410_v59  ;;  %17283 = vst [vmem:[#allocation90_spill] sm:$0xff] %v13413_v63  ;;  %v4150_v48 = vadd.f32 %v4149_v8, %v13316_v22  ;;  %v4263_v23 = vadd.f32 %v4262_v61, %v13318_v52  ;;  %v17334_v63 = vld [vmem:[#allocation52_spill] sm:$0xff]  ;;  %v17335_v59 = vld [vmem:[#allocation18_spill] sm:$0xff] }
0x1047   :  { %v4151_v15 = vpop.f32.mrf.mxu0  ;;  %v4264_v24 = vpop.f32.mrf.mxu1 }
0x1048   :  { %v4152_v28 = vadd.f32 %v4151_v15, %v13320_v58  ;;  %v4265_v35 = vadd.f32 %v4264_v24, %v13322_v54  ;;  %v13420_v25 = vadd.f32 %v13352_v12, %v4150_v48  ;;  %v13423_v3 = vadd.f32 %v13355_v40, %v4263_v23 }
0x104a   :  { %17284 = vst [vmem:[#allocation91_spill] sm:$0xff] %v13420_v25  ;;  %17285 = vst [vmem:[#allocation92_spill] sm:$0xff] %v13423_v3  ;;  %v13426_v49 = vadd.f32 %v13358_v29, %v4152_v28  ;;  %v13429_v4 = vadd.f32 %v13361_v33, %v4265_v35  ;;  %v4120_v28 = vadd.f32 %v13340_v45, %v13300_v39  ;;  %v17329_v3 = vld [vmem:[#allocation48_spill] sm:$0xff]  ;;  %v17332_v25 = vld [vmem:[#allocation19_spill] sm:$0xff] }
0x104b   :  { %v4155_v22 = vpop.f32.mrf.mxu0  ;;  %v4268_v52 = vpop.f32.mrf.mxu1  ;;  %v4122_v35 = vadd.f32 %v13344_v41, %v13304_v50 }
0x104c   :  { %17286 = vst [vmem:[#allocation93_spill] sm:$0xff] %v13426_v49  ;;  %17287 = vst [vmem:[#allocation94_spill] sm:$0xff] %v13429_v4  ;;  %v4156_v19 = vadd.f32 %v4155_v22, %v13324_v1  ;;  %v4269_v58 = vadd.f32 %v4268_v52, %v13326_v14  ;;  %v4301_v39 = vadd.f32 %v13352_v12, %v4120_v28  ;;  %v17330_v4 = vld [vmem:[#allocation15_spill] sm:$0xff]  ;;  %v17331_v49 = vld [vmem:[#allocation20_spill] sm:$0xff] }
0x104d   :  { %v4157_v0 = vpop.f32.mrf.mxu0  ;;  %v4270_v54 = vpop.f32.mrf.mxu1 }
0x104e   :  { %v4158_v8 = vadd.f32 %v4157_v0, %v13328_v57  ;;  %v4271_v61 = vadd.f32 %v4270_v54, %v13330_v2  ;;  %v13436_v48 = vadd.f32 %v13352_v12, %v4156_v19  ;;  %v13439_v23 = vadd.f32 %v13355_v40, %v4269_v58 }
0x1050   :  { %17288 = vst [vmem:[#allocation95_spill] sm:$0xff] %v13436_v48  ;;  %17289 = vst [vmem:[#allocation96_spill] sm:$0xff] %v13439_v23  ;;  %v13442_v15 = vadd.f32 %v13358_v29, %v4158_v8  ;;  %v13445_v24 = vadd.f32 %v13361_v33, %v4271_v61  ;;  %v17325_v23 = vld [vmem:[#allocation47_spill] sm:$0xff]  ;;  %v17328_v48 = vld [vmem:[#allocation14_spill] sm:$0xff] }
0x1051   :  { %v4161_v1 = vpop.f32.mrf.mxu0  ;;  %v4274_v14 = vpop.f32.mrf.mxu1 }
0x1052   :  { %17290 = vst [vmem:[#allocation97_spill] sm:$0xff] %v13442_v15  ;;  %17291 = vst [vmem:[#allocation98_spill] sm:$0xff] %v13445_v24  ;;  %v4162_v57 = vadd.f32 %v4161_v1, %v13332_v17  ;;  %v4275_v2 = vadd.f32 %v4274_v14, %v13334_v16  ;;  %v4235_v14 = vadd.f32 %v13346_v30, %v13306_v7  ;;  %v17326_v24 = vld [vmem:[#allocation31_spill] sm:$0xff]  ;;  %v17327_v15 = vld [vmem:[#allocation44_spill] sm:$0xff] }
0x1053   :  { %v4163_v22 = vpop.f32.mrf.mxu0  ;;  %v4276_v52 = vpop.f32.mrf.mxu1 }
0x1054   :  { %v4164_v19 = vadd.f32 %v4163_v22, %v13336_v9  ;;  %v4277_v58 = vadd.f32 %v4276_v52, %v13338_v5  ;;  %v13456_v0 = vadd.f32 %v13352_v12, %v4162_v57  ;;  %v13459_v54 = vadd.f32 %v13355_v40, %v4275_v2 }
0x1055   :  { %v4302_v9 = vadd.f32 %v13358_v29, %v4122_v35  ;;  %v4304_v28 = vadd.f32 %v13361_v33, %v4235_v14  ;;  %v4233_v57 = vadd.f32 %v13342_v43, %v13302_v18  ;;  %v17299_v14 = vld [vmem:[#allocation63_spill] sm:$0xff] }
0x1056   :  { %17292 = vst [vmem:[#allocation99_spill] sm:$0xff] %v13456_v0  ;;  %17293 = vst [vmem:[#allocation100_spill] sm:$0xff] %v13459_v54  ;;  %v13463_v45 = vadd.f32 %v13358_v29, %v4164_v19  ;;  %v13466_v16 = vadd.f32 %v13361_v33, %v4277_v58  ;;  %v17323_v54 = vld [vmem:[#allocation30_spill] sm:$0xff]  ;;  %v17324_v0 = vld [vmem:[#allocation13_spill] sm:$0xff] }
0x1057   :  { %v4499_v50 = vpop.f32.mrf.mxu0  ;;  %v4570_v61 = vpop.f32.mrf.mxu1  ;;  %v4303_v22 = vadd.f32 %v13355_v40, %v4233_v57  ;;  %v17302_v57 = vld [vmem:[#allocation24_spill] sm:$0xff] }
0x1058   :  { %17294 = vst [vmem:[#allocation101_spill] sm:$0xff] %v13463_v45  ;;  %17295 = vst [vmem:[#allocation102_spill] sm:$0xff] %v13466_v16  ;;  %v4575_v41 = vadd.f32 %v4499_v50, %v4301_v39  ;;  %v17321_v16 = vld [vmem:[#allocation49_spill] sm:$0xff] }
0x1059   :  { %v4501_v17 = vpop.f32.mrf.mxu0  ;;  %v4572_v12 = vpop.f32.mrf.mxu1  ;;  %v4577_v52 = vadd.f32 %v4570_v61, %v4303_v22  ;;  %v17297_v61 = vld [vmem:[#allocation6_spill] sm:$0xff]  ;;  %v17304_v22 = vld [vmem:[#allocation61_spill] sm:$0xff] }
0x105a   :  { %v8182_v5 = vmul.f32 -1.442695, %v4575_v41  ;;  %v4576_v8 = vadd.f32 %v4501_v17, %v4302_v9  ;;  %v4578_v2 = vadd.f32 %v4572_v12, %v4304_v28  ;;  %v17300_v12 = vld [vmem:[#allocation37_spill] sm:$0xff]  ;;  %v17301_v28 = vld [vmem:[#allocation26_spill] sm:$0xff] }
0x105b   :  { %v17322_v45 = vld [vmem:[#allocation33_spill] sm:$0xff] }
0x105c   :  { %8594 = vpow2.f32 %v8182_v5  ;;  %v8183_v1 = vmul.f32 -1.442695, %v4576_v8  ;;  %v8184_v29 = vmul.f32 -1.442695, %v4578_v2  ;;  %v17296_v8 = vld [vmem:[#allocation64_spill] sm:$0xff]  ;;  %v17303_v2 = vld [vmem:[#allocation59_spill] sm:$0xff] }
0x105e   :  { %8596 = vpow2.f32 %v8183_v1  ;;  %v17298_v1 = vld [vmem:[#allocation5_spill] sm:$0xff] }
0x105f   :  { %8598 = vpow2.f32 %v8184_v29  ;;  %v17305_v29 = vld [vmem:[#allocation38_spill] sm:$0xff] }
0x1069   :  { %v8595_v35 = vpop.eup %8594 }
0x106a   :  { %v4582_v19 = vadd.f32 1.0, %v8595_v35  ;;  %v17306_v35 = vld [vmem:[#allocation9_spill] sm:$0xff] }
0x106b   :  { %v8597_v58 = vpop.eup %8596 }
0x106c   :  { %8600 = vrcp.f32 %v4582_v19  ;;  %v4588_v39 = vadd.f32 1.0, %v8597_v58  ;;  %v8599_v7 = vpop.eup %8598  ;;  %v17308_v19 = vld [vmem:[#allocation22_spill] sm:$0xff]  ;;  %v17309_v58 = vld [vmem:[#allocation55_spill] sm:$0xff] }
0x106d   :  { %8602 = vtanh.f32 %v4577_v52  ;;  %v4595_v41 = vadd.f32 1.0, %v8599_v7  ;;  %v17307_v52 = vld [vmem:[#allocation23_spill] sm:$0xff]  ;;  %v17311_v7 = vld [vmem:[#allocation56_spill] sm:$0xff] }
0x106e   :  { %8604 = vrcp.f32 %v4588_v39  ;;  %v17310_v39 = vld [vmem:[#allocation57_spill] sm:$0xff] }
0x106f   :  { %8606 = vrcp.f32 %v4595_v41  ;;  %v17315_v41 = vld [vmem:[#allocation67_spill] sm:$0xff] }
0x1079   :  { %v8601_v30 = vpop.eup %8600 }
0x107a   :  { %v8603_v50 = vpop.eup %8602 }
0x107b   :  { %v8605_v33 = vpop.eup %8604  ;;  %v4599_v18 = vmul.f32 %v8603_v50, %v8601_v30  ;;  %v17312_v30 = vld [vmem:[#allocation10_spill] sm:$0xff]  ;;  %v17313_v50 = vld [vmem:[#allocation68_spill] sm:$0xff] }
0x107c   :  { %v4598_v9 = vmul.f32 0.0, %v8605_v33  ;;  %v8607_v40 = vpop.eup %8606  ;;  %v17314_v33 = vld [vmem:[#allocation45_spill] sm:$0xff] }
0x107e   :  { %v13475_v43 = vadd.f32 %v4599_v18, %v4598_v9  ;;  %v17316_v9 = vld [vmem:[#allocation11_spill] sm:$0xff]  ;;  %v17317_v18 = vld [vmem:[#allocation66_spill] sm:$0xff] }
0x1080   :  { %8608 = vtanh.f32 %v13475_v43 }
0x108d   :  { %v8609_v17 = vpop.eup %8608 }
0x108e   :  { %v4602_v5 = vmul.f32 %v8609_v17, %v8607_v40  ;;  %v17318_v40 = vld [vmem:[#allocation43_spill] sm:$0xff] }
0x108f   :  { %v17319_v17 = vld [vmem:[#allocation39_spill] sm:$0xff] }
0x1090   :  { %4672 = vmatmul.mubr.f32.vlgmr.msra.gmra.mxu0 %v4602_v5  ;;  %4743 = vmatmul.mubr.f32.vlgmr.msra.gmra.mxu1 %v4602_v5  ;;  %v17320_v5 = vld [vmem:[#allocation12_spill] sm:$0xff] }
0x1091   :  { %4782 = vmatpush1.msra.mxu0 %v12827_v47  ;;  %4853 = vmatpush1.msra.mxu1 %v12832_v26 }
0x1092   :  { %4783 = vmatprep.subr.mxu0 %v12839_v21  ;;  %4854 = vmatprep.subr.mxu1 %v12844_v60 }
0x1093   :  { %4784 = vmatpush1.msra.mxu0 %v12853_v62  ;;  %4855 = vmatpush1.msra.mxu1 %v12858_v10 }
0x1094   :  { %4785 = vmatprep.subr.mxu0 %v12867_v55  ;;  %4856 = vmatprep.subr.mxu1 %v12872_v38 }
0x1095   :  { %4786 = vmatpush1.msra.mxu0 %v12879_v56  ;;  %4857 = vmatpush1.msra.mxu1 %v12884_v11 }
0x1096   :  { %4787 = vmatprep.subr.mxu0 %v17296_v8  ;;  %4858 = vmatprep.subr.mxu1 %v17297_v61 }
0x1097   :  { %4788 = vmatpush1.msra.mxu0 %v17298_v1  ;;  %4859 = vmatpush1.msra.mxu1 %v17299_v14 }
0x1098   :  { %4789 = vmatprep.subr.mxu0 %v17300_v12  ;;  %4860 = vmatprep.subr.mxu1 %v17301_v28 }
0x1099   :  { %4790 = vmatpush1.msra.mxu0 %v17302_v57  ;;  %4861 = vmatpush1.msra.mxu1 %v17303_v2 }
0x109a   :  { %4791 = vmatprep.subr.mxu0 %v17304_v22  ;;  %4862 = vmatprep.subr.mxu1 %v17305_v29 }
0x109b   :  { %4792 = vmatpush1.msra.mxu0 %v17306_v35  ;;  %4863 = vmatpush1.msra.mxu1 %v17307_v52 }
0x109c   :  { %4793 = vmatprep.subr.mxu0 %v17308_v19  ;;  %4864 = vmatprep.subr.mxu1 %v17309_v58 }
0x109d   :  { %4794 = vmatpush1.msra.mxu0 %v17310_v39  ;;  %4865 = vmatpush1.msra.mxu1 %v17311_v7 }
0x109e   :  { %4795 = vmatprep.subr.mxu0 %v17312_v30  ;;  %4866 = vmatprep.subr.mxu1 %v17313_v50 }
0x109f   :  { %4796 = vmatpush1.msra.mxu0 %v17314_v33  ;;  %4867 = vmatpush1.msra.mxu1 %v17315_v41 }
0x10a0   :  { %4797 = vmatprep.subr.mxu0 %v17316_v9  ;;  %4868 = vmatprep.subr.mxu1 %v17317_v18 }
0x10a1   :  { %4798 = vmatpush1.msra.mxu0 %v17318_v40  ;;  %4869 = vmatpush1.msra.mxu1 %v17319_v17 }
0x10a2   :  { %4799 = vmatprep.subr.mxu0 %v17320_v5  ;;  %4870 = vmatprep.subr.mxu1 %v17321_v16 }
0x10a3   :  { %4800 = vmatpush1.msra.mxu0 %v17322_v45  ;;  %4871 = vmatpush1.msra.mxu1 %v17323_v54 }
0x10a4   :  { %4801 = vmatprep.subr.mxu0 %v17324_v0  ;;  %4872 = vmatprep.subr.mxu1 %v17325_v23 }
0x10a5   :  { %4802 = vmatpush1.msra.mxu0 %v17326_v24  ;;  %4873 = vmatpush1.msra.mxu1 %v17327_v15 }
0x10a6   :  { %4803 = vmatprep.subr.mxu0 %v17328_v48  ;;  %4874 = vmatprep.subr.mxu1 %v17329_v3 }
0x10a7   :  { %4804 = vmatpush1.msra.mxu0 %v17330_v4  ;;  %4875 = vmatpush1.msra.mxu1 %v17331_v49 }
0x10a8   :  { %4805 = vmatprep.subr.mxu0 %v17332_v25  ;;  %4876 = vmatprep.subr.mxu1 %v17333_v6 }
0x10a9   :  { %4806 = vmatpush1.msra.mxu0 %v17334_v63  ;;  %4877 = vmatpush1.msra.mxu1 %v17335_v59  ;;  %v17345_v63 = vld [vmem:[#allocation76_spill] sm:$0xff]  ;;  %v17346_v59 = vld [vmem:[#allocation77_spill] sm:$0xff] }
0x10aa   :  { %4807 = vmatprep.subr.mxu0 %v17336_v13  ;;  %4878 = vmatprep.subr.mxu1 %v17337_v42  ;;  %v17347_v13 = vmov 0.0   ;;  %v17348_v42 = vld [vmem:[#allocation78_spill] sm:$0xff] }
0x10ab   :  { %4808 = vmatpush1.msra.mxu0 %v17338_v46  ;;  %4879 = vmatpush1.msra.mxu1 %v17339_v44  ;;  %v17349_v44 = vld [vmem:[#allocation53_spill] sm:$0xff] }
0x10ac   :  { %4809 = vmatprep.subr.mxu0 %v17340_v34  ;;  %4880 = vmatprep.subr.mxu1 %v17341_v37  ;;  %v17350_v34 = vld [vmem:[#allocation65_spill] sm:$0xff] }
0x10ad   :  { %4810 = vmatpush1.msra.mxu0 %v17342_v32  ;;  %4881 = vmatpush1.msra.mxu1 %v17343_v27 }
0x10ae   :  { %4811 = vmatprep.subr.mxu0 %v17344_v36  ;;  %4882 = vmatprep.subr.mxu1 %v17345_v63 }
0x10af   :  { %4812 = vmatpush1.msra.mxu0 %v17346_v59  ;;  %4845 = vmatprep.mubr.f32.mxu0 %v17347_v13 }
0x10b0   :  { %4883 = vmatpush1.msra.mxu1 %v17348_v42  ;;  %4916 = vmatprep.mubr.f32.mxu1 %v17347_v13 }
0x10b1   :  { %4955 = vmatprep.subr.mxu0 %v17349_v44  ;;  %5026 = vmatprep.subr.mxu1 %v17350_v34 }
0x1150   :  { %v4673_v37 = vpop.f32.mrf.mxu0  ;;  %v4744_v63 = vpop.f32.mrf.mxu1 }
0x1151   :  { %v4749_v32 = vadd.f32 %v4673_v37, %v13364_v31  ;;  %v4751_v13 = vadd.f32 %v4744_v63, %v13367_v20  ;;  %v17362_v63 = vld [vmem:[#allocation73_spill] sm:$0xff] }
0x1152   :  { %v4675_v27 = vpop.f32.mrf.mxu0  ;;  %v4746_v6 = vpop.f32.mrf.mxu1 }
0x1153   :  { %v8185_v46 = vmul.f32 -1.442695, %v4749_v32  ;;  %v4750_v36 = vadd.f32 %v4675_v27, %v13370_v51  ;;  %v4752_v42 = vadd.f32 %v4746_v6, %v13373_v53  ;;  %v17361_v6 = vld [vmem:[#allocation72_spill] sm:$0xff] }
0x1155   :  { %8610 = vpow2.f32 %v8185_v46  ;;  %v8186_v59 = vmul.f32 -1.442695, %v4750_v36  ;;  %v8187_v25 = vmul.f32 -1.442695, %v4752_v42 }
0x1157   :  { %8612 = vpow2.f32 %v8186_v59 }
0x1158   :  { %8614 = vtanh.f32 %v4751_v13 }
0x1159   :  { %8616 = vpow2.f32 %v8187_v25  ;;  %v17363_v25 = vld [vmem:[#allocation74_spill] sm:$0xff] }
0x1162   :  { %v8611_v44 = vpop.eup %8610 }
0x1163   :  { %v4756_v49 = vadd.f32 1.0, %v8611_v44  ;;  %v13639_v44 = vld [vmem:[%s16230_s9 + $0x1e0] sm:$0xff] }
0x1164   :  { %v8613_v34 = vpop.eup %8612 }
0x1165   :  { %8618 = vrcp.f32 %v4756_v49  ;;  %v4762_v31 = vadd.f32 1.0, %v8613_v34  ;;  %v8615_v37 = vpop.eup %8614  ;;  %v17365_v49 = vld [vmem:[#allocation76_spill] sm:$0xff]  ;;  %v13645_v34 = vld [vmem:[%s16230_s9 + $0x1f0] sm:$0xff] }
0x1166   :  { %v8617_v51 = vpop.eup %8616 }
0x1167   :  { %8620 = vrcp.f32 %v4762_v31  ;;  %v4769_v46 = vadd.f32 1.0, %v8617_v51  ;;  %v13651_v31 = vld [vmem:[%s16230_s9 + $0x1c8] sm:$0xff]  ;;  %v13663_v51 = vld [vmem:[%s16230_s9 + $0x1c0] sm:$0xff] }
0x1169   :  { %8622 = vrcp.f32 %v4769_v46  ;;  %v13687_v46 = vld [vmem:[%s16230_s9 + $0x1a0] sm:$0xff] }
0x1172   :  { %v8619_v27 = vpop.eup %8618 }
0x1173   :  { %v4773_v32 = vmul.f32 %v8619_v27, %v8615_v37  ;;  %v13657_v37 = vld [vmem:[%s16230_s9 + $0x1d8] sm:$0xff]  ;;  %v13669_v27 = vld [vmem:[%s16230_s9 + $0x1d0] sm:$0xff] }
0x1174   :  { %v8621_v36 = vpop.eup %8620 }
0x1175   :  { %v4772_v59 = vmul.f32 %v8621_v36, %v13475_v43  ;;  %v13681_v36 = vld [vmem:[%s16230_s9 + $0x1b8] sm:$0xff] }
0x1176   :  { %v8623_v20 = vpop.eup %8622 }
0x1177   :  { %v13549_v53 = vadd.f32 %v4773_v32, %v4772_v59  ;;  %v13675_v32 = vld [vmem:[%s16230_s9 + $0x1a8] sm:$0xff]  ;;  %v13693_v59 = vld [vmem:[%s16230_s9 + $0x1b0] sm:$0xff] }
0x1179   :  { %8624 = vtanh.f32 %v13549_v53 }
0x1186   :  { %v8625_v42 = vpop.eup %8624 }
0x1187   :  { %v4776_v13 = vmul.f32 %v8625_v42, %v8623_v20  ;;  %v13705_v20 = vld [vmem:[%s16230_s9 + $0x198] sm:$0xff]  ;;  %v13711_v42 = vld [vmem:[%s16230_s9 + $0x180] sm:$0xff] }
0x1189   :  { %4846 = vmatmul.mubr.f32.vlgmr.msra.gmra.mxu0 %v4776_v13  ;;  %4917 = vmatmul.mubr.f32.vlgmr.msra.gmra.mxu1 %v4776_v13  ;;  %v13717_v13 = vld [vmem:[%s16230_s9 + $0x190] sm:$0xff] }
0x118a   :  { %4956 = vmatpush1.msra.mxu0 %v12827_v47  ;;  %5027 = vmatpush1.msra.mxu1 %v12832_v26  ;;  %v17351_v47 = vld [vmem:[#allocation20_spill] sm:$0xff]  ;;  %v17352_v26 = vld [vmem:[#allocation19_spill] sm:$0xff] }
0x118b   :  { %4957 = vmatprep.subr.mxu0 %v12839_v21  ;;  %5028 = vmatprep.subr.mxu1 %v12844_v60  ;;  %v17353_v21 = vld [vmem:[#allocation50_spill] sm:$0xff]  ;;  %v17354_v60 = vld [vmem:[#allocation52_spill] sm:$0xff] }
0x118c   :  { %4958 = vmatpush1.msra.mxu0 %v12853_v62  ;;  %5029 = vmatpush1.msra.mxu1 %v12858_v10  ;;  %v17355_v62 = vld [vmem:[#allocation18_spill] sm:$0xff]  ;;  %v17356_v10 = vld [vmem:[#allocation17_spill] sm:$0xff] }
0x118d   :  { %4959 = vmatprep.subr.mxu0 %v12867_v55  ;;  %5030 = vmatprep.subr.mxu1 %v12872_v38  ;;  %v17357_v55 = vld [vmem:[#allocation25_spill] sm:$0xff] }
0x118e   :  { %4960 = vmatpush1.msra.mxu0 %v12879_v56  ;;  %5031 = vmatpush1.msra.mxu1 %v12884_v11  ;;  %v17358_v38 = vld [vmem:[#allocation21_spill] sm:$0xff]  ;;  %v17359_v56 = vld [vmem:[#allocation70_spill] sm:$0xff]  ;;  %v17360_v11 = vld [vmem:[#allocation71_spill] sm:$0xff] }
0x118f   :  { %4961 = vmatprep.subr.mxu0 %v17296_v8  ;;  %5032 = vmatprep.subr.mxu1 %v17297_v61  ;;  %v17372_v8 = vld [vmem:[#allocation81_spill] sm:$0xff] }
0x1190   :  { %4962 = vmatpush1.msra.mxu0 %v17298_v1  ;;  %5033 = vmatpush1.msra.mxu1 %v17299_v14 }
0x1191   :  { %4963 = vmatprep.subr.mxu0 %v17300_v12  ;;  %5034 = vmatprep.subr.mxu1 %v17301_v28  ;;  %v17373_v28 = vld [vmem:[#allocation82_spill] sm:$0xff] }
0x1192   :  { %4964 = vmatpush1.msra.mxu0 %v17302_v57  ;;  %5035 = vmatpush1.msra.mxu1 %v17303_v2  ;;  %v17374_v2 = vld [vmem:[#allocation80_spill] sm:$0xff] }
0x1193   :  { %4965 = vmatprep.subr.mxu0 %v17304_v22  ;;  %5036 = vmatprep.subr.mxu1 %v17305_v29 }
0x1194   :  { %4966 = vmatpush1.msra.mxu0 %v17306_v35  ;;  %5037 = vmatpush1.msra.mxu1 %v17307_v52 }
0x1195   :  { %4967 = vmatprep.subr.mxu0 %v17308_v19  ;;  %5038 = vmatprep.subr.mxu1 %v17309_v58 }
0x1196   :  { %4968 = vmatpush1.msra.mxu0 %v17310_v39  ;;  %5039 = vmatpush1.msra.mxu1 %v17311_v7 }
0x1197   :  { %4969 = vmatprep.subr.mxu0 %v17312_v30  ;;  %5040 = vmatprep.subr.mxu1 %v17313_v50 }
0x1198   :  { %4970 = vmatpush1.msra.mxu0 %v17314_v33  ;;  %5041 = vmatpush1.msra.mxu1 %v17315_v41 }
0x1199   :  { %4971 = vmatprep.subr.mxu0 %v17316_v9  ;;  %5042 = vmatprep.subr.mxu1 %v17317_v18 }
0x119a   :  { %4972 = vmatpush1.msra.mxu0 %v17318_v40  ;;  %5043 = vmatpush1.msra.mxu1 %v17319_v17 }
0x119b   :  { %4973 = vmatprep.subr.mxu0 %v17320_v5  ;;  %5044 = vmatprep.subr.mxu1 %v17321_v16 }
0x119c   :  { %4974 = vmatpush1.msra.mxu0 %v17322_v45  ;;  %5045 = vmatpush1.msra.mxu1 %v17323_v54  ;;  %v17371_v54 = vld [vmem:[#allocation79_spill] sm:$0xff] }
0x119d   :  { %4975 = vmatprep.subr.mxu0 %v17324_v0  ;;  %5046 = vmatprep.subr.mxu1 %v17325_v23  ;;  %v17368_v23 = vld [vmem:[#allocation78_spill] sm:$0xff] }
0x119e   :  { %4976 = vmatpush1.msra.mxu0 %v17326_v24  ;;  %5047 = vmatpush1.msra.mxu1 %v17327_v15  ;;  %v13619_v15 = vld [vmem:[%s16230_s9 + $0x1e8] sm:$0xff]  ;;  %v13625_v24 = vld [vmem:[%s16230_s9 + $0x1f8] sm:$0xff] }
0x119f   :  { %4977 = vmatprep.subr.mxu0 %v17328_v48  ;;  %5048 = vmatprep.subr.mxu1 %v17329_v3  ;;  %v17364_v3 = vld [vmem:[#allocation75_spill] sm:$0xff]  ;;  %v17367_v48 = vmov 0.0   ;;  %17369 = vst [vmem:[#allocation64_spill] sm:$0xff] %v13619_v15  ;;  %17370 = vst [vmem:[#allocation6_spill] sm:$0xff] %v13625_v24 }
0x11a0   :  { %4978 = vmatpush1.msra.mxu0 %v17330_v4  ;;  %5049 = vmatpush1.msra.mxu1 %v17351_v47  ;;  %v17366_v4 = vld [vmem:[#allocation77_spill] sm:$0xff]  ;;  %v13723_v47 = vld [vmem:[%s16230_s9 + $0x168] sm:$0xff] }
0x11a1   :  { %4979 = vmatprep.subr.mxu0 %v17352_v26  ;;  %5050 = vmatprep.subr.mxu1 %v17353_v21  ;;  %v13729_v26 = vld [vmem:[%s16230_s9 + $0x178] sm:$0xff]  ;;  %v13735_v21 = vld [vmem:[%s16230_s9 + $0x160] sm:$0xff] }
0x11a2   :  { %4980 = vmatpush1.msra.mxu0 %v17354_v60  ;;  %5051 = vmatpush1.msra.mxu1 %v17355_v62  ;;  %v13741_v60 = vld [vmem:[%s16230_s9 + $0x170] sm:$0xff]  ;;  %v13747_v62 = vld [vmem:[%s16230_s9 + $0x148] sm:$0xff] }
0x11a3   :  { %4981 = vmatprep.subr.mxu0 %v17356_v10  ;;  %5052 = vmatprep.subr.mxu1 %v17357_v55  ;;  %v13753_v10 = vld [vmem:[%s16230_s9 + $0x158] sm:$0xff]  ;;  %v13759_v55 = vld [vmem:[%s16230_s9 + $0x140] sm:$0xff] }
0x11a4   :  { %4982 = vmatpush1.msra.mxu0 %v17358_v38  ;;  %5053 = vmatpush1.msra.mxu1 %v17359_v56  ;;  %v13765_v38 = vld [vmem:[%s16230_s9 + $0x150] sm:$0xff]  ;;  %v13771_v56 = vld [vmem:[%s16230_s9 + $0x128] sm:$0xff] }
0x11a5   :  { %4983 = vmatprep.subr.mxu0 %v17360_v11  ;;  %5054 = vmatprep.subr.mxu1 %v17361_v6  ;;  %v13777_v11 = vld [vmem:[%s16230_s9 + $0x138] sm:$0xff]  ;;  %v13783_v6 = vld [vmem:[%s16230_s9 + $0x120] sm:$0xff] }
0x11a6   :  { %4984 = vmatpush1.msra.mxu0 %v17362_v63  ;;  %5055 = vmatpush1.msra.mxu1 %v17363_v25  ;;  %v13789_v63 = vld [vmem:[%s16230_s9 + $0x130] sm:$0xff]  ;;  %v13795_v25 = vld [vmem:[%s16230_s9 + $0x108] sm:$0xff] }
0x11a7   :  { %4985 = vmatprep.subr.mxu0 %v17364_v3  ;;  %5056 = vmatprep.subr.mxu1 %v17365_v49  ;;  %v13801_v3 = vld [vmem:[%s16230_s9 + $0x118] sm:$0xff]  ;;  %v13807_v49 = vld [vmem:[%s16230_s9 + $0x100] sm:$0xff] }
0x11a8   :  { %4986 = vmatpush1.msra.mxu0 %v17366_v4  ;;  %5019 = vmatprep.mubr.f32.mxu0 %v17367_v48  ;;  %v13813_v4 = vld [vmem:[%s16230_s9 + $0x110] sm:$0xff] }
0x11a9   :  { %5057 = vmatpush1.msra.mxu1 %v17368_v23  ;;  %5090 = vmatprep.mubr.f32.mxu1 %v17367_v48  ;;  %v13819_v23 = vld [vmem:[%s16230_s9 + $0xe8] sm:$0xff] }
0x11aa   :  { %5129 = vmatprep.subr.mxu0 %v13619_v15  ;;  %5200 = vmatprep.subr.mxu1 %v13625_v24 }
0x1249   :  { %v4847_v0 = vpop.f32.mrf.mxu0  ;;  %v4918_v1 = vpop.f32.mrf.mxu1 }
0x124a   :  { %v4923_v45 = vadd.f32 %v4847_v0, %v17371_v54  ;;  %v4925_v22 = vadd.f32 %v4918_v1, %v17374_v2  ;;  %v13825_v0 = vld [vmem:[%s16230_s9 + $0xf8] sm:$0xff]  ;;  %v13831_v54 = vld [vmem:[%s16230_s9 + $0xe0] sm:$0xff]  ;;  %v13867_v1 = vld [vmem:[%s16230_s9 + $0xa8] sm:$0xff] }
0x124b   :  { %v4849_v16 = vpop.f32.mrf.mxu0  ;;  %v4920_v12 = vpop.f32.mrf.mxu1  ;;  %v13897_v2 = vld [vmem:[%s16230_s9 + $0x98] sm:$0xff] }
0x124c   :  { %v8188_v43 = vmul.f32 -1.442695, %v4923_v45  ;;  %v4924_v61 = vadd.f32 %v4849_v16, %v17372_v8  ;;  %v4926_v57 = vadd.f32 %v4920_v12, %v17373_v28  ;;  %v13837_v45 = vld [vmem:[%s16230_s9 + $0xf0] sm:$0xff]  ;;  %v13843_v16 = vld [vmem:[%s16230_s9 + $0xc8] sm:$0xff]  ;;  %v13855_v8 = vld [vmem:[%s16230_s9 + $0xc0] sm:$0xff] }
0x124d   :  { %v13879_v12 = vld [vmem:[%s16230_s9 + $0xa0] sm:$0xff]  ;;  %v13885_v28 = vld [vmem:[%s16230_s9 + $0xb0] sm:$0xff] }
0x124e   :  { %8626 = vpow2.f32 %v8188_v43  ;;  %v8189_v14 = vmul.f32 -1.442695, %v4924_v61  ;;  %v8190_v29 = vmul.f32 -1.442695, %v4926_v57  ;;  %v13849_v43 = vld [vmem:[%s16230_s9 + $0xd8] sm:$0xff]  ;;  %v13861_v61 = vld [vmem:[%s16230_s9 + $0xd0] sm:$0xff] }
0x124f   :  { %v13891_v57 = vld [vmem:[%s16230_s9 + $0x88] sm:$0xff] }
0x1250   :  { %8628 = vpow2.f32 %v8189_v14  ;;  %v13873_v14 = vld [vmem:[%s16230_s9 + $0xb8] sm:$0xff] }
0x1251   :  { %8630 = vtanh.f32 %v4925_v22  ;;  %v13903_v22 = vld [vmem:[%s16230_s9 + $0x80] sm:$0xff] }
0x1252   :  { %8632 = vpow2.f32 %v8190_v29  ;;  %v13909_v29 = vld [vmem:[%s16230_s9 + $0x90] sm:$0xff] }
0x1253   :  { %17375 = vst [vmem:[#allocation5_spill] sm:$0xff] %v13909_v29 }
0x125b   :  { %v8627_v35 = vpop.eup %8626 }
0x125c   :  { %v4930_v52 = vadd.f32 1.0, %v8627_v35  ;;  %v13915_v35 = vld [vmem:[%s16230_s9 + $0x68] sm:$0xff] }
0x125d   :  { %v8629_v19 = vpop.eup %8628  ;;  %17376 = vst [vmem:[#allocation63_spill] sm:$0xff] %v13915_v35 }
0x125e   :  { %8634 = vrcp.f32 %v4930_v52  ;;  %v4936_v58 = vadd.f32 1.0, %v8629_v19  ;;  %v8631_v39 = vpop.eup %8630  ;;  %v13921_v52 = vld [vmem:[%s16230_s9 + $0x78] sm:$0xff]  ;;  %v13927_v19 = vld [vmem:[%s16230_s9 + $0x60] sm:$0xff] }
0x125f   :  { %v8633_v7 = vpop.eup %8632  ;;  %17377 = vst [vmem:[#allocation37_spill] sm:$0xff] %v13921_v52  ;;  %17378 = vst [vmem:[#allocation26_spill] sm:$0xff] %v13927_v19 }
0x1260   :  { %8636 = vrcp.f32 %v4936_v58  ;;  %v4943_v41 = vadd.f32 1.0, %v8633_v7  ;;  %v13933_v58 = vld [vmem:[%s16230_s9 + $0x70] sm:$0xff]  ;;  %v13945_v7 = vld [vmem:[%s16230_s9 + $0x58] sm:$0xff] }
0x1261   :  { %17379 = vst [vmem:[#allocation24_spill] sm:$0xff] %v13933_v58  ;;  %17381 = vst [vmem:[#allocation61_spill] sm:$0xff] %v13945_v7 }
0x1262   :  { %8638 = vrcp.f32 %v4943_v41  ;;  %v13969_v41 = vld [vmem:[%s16230_s9 + $0x38] sm:$0xff] }
0x1263   :  { %17385 = vst [vmem:[#allocation22_spill] sm:$0xff] %v13969_v41 }
0x126b   :  { %v8635_v30 = vpop.eup %8634 }
0x126c   :  { %v4947_v50 = vmul.f32 %v8635_v30, %v8631_v39  ;;  %v13939_v39 = vld [vmem:[%s16230_s9 + $0x48] sm:$0xff]  ;;  %v13951_v30 = vld [vmem:[%s16230_s9 + $0x40] sm:$0xff] }
0x126d   :  { %v8637_v33 = vpop.eup %8636  ;;  %17380 = vst [vmem:[#allocation59_spill] sm:$0xff] %v13939_v39  ;;  %17382 = vst [vmem:[#allocation38_spill] sm:$0xff] %v13951_v30 }
0x126e   :  { %v4946_v9 = vmul.f32 %v8637_v33, %v13549_v53  ;;  %v13699_v53 = vld [vmem:[%s16230_s9 + $0x188] sm:$0xff] }
0x126f   :  { %v8639_v40 = vpop.eup %8638  ;;  %v13963_v33 = vld [vmem:[%s16230_s9 + $0x28] sm:$0xff] }
0x1270   :  { %v13633_v18 = vadd.f32 %v4947_v50, %v4946_v9  ;;  %v13957_v50 = vld [vmem:[%s16230_s9 + $0x50] sm:$0xff]  ;;  %17384 = vst [vmem:[#allocation23_spill] sm:$0xff] %v13963_v33  ;;  %v13975_v9 = vld [vmem:[%s16230_s9 + $0x20] sm:$0xff] }
0x1271   :  { %17383 = vst [vmem:[#allocation9_spill] sm:$0xff] %v13957_v50  ;;  %17386 = vst [vmem:[#allocation55_spill] sm:$0xff] %v13975_v9 }
0x1272   :  { %8640 = vtanh.f32 %v13633_v18 }
0x127f   :  { %v8641_v17 = vpop.eup %8640 }
0x1280   :  { %v4950_v5 = vmul.f32 %v8641_v17, %v8639_v40  ;;  %v13981_v40 = vld [vmem:[%s16230_s9 + $0x30] sm:$0xff]  ;;  %v13987_v17 = vld [vmem:[%s16230_s9 + $0x8] sm:$0xff] }
0x1281   :  { %17387 = vst [vmem:[#allocation57_spill] sm:$0xff] %v13981_v40  ;;  %17388 = vst [vmem:[#allocation56_spill] sm:$0xff] %v13987_v17 }
0x1282   :  { %5020 = vmatmul.mubr.f32.vlgmr.msra.gmra.mxu0 %v4950_v5  ;;  %5091 = vmatmul.mubr.f32.vlgmr.msra.gmra.mxu1 %v4950_v5  ;;  %v13993_v5 = vld [vmem:[%s16230_s9 + $0x18] sm:$0xff] }
0x1283   :  { %5130 = vmatpush1.msra.mxu0 %v13639_v44  ;;  %5201 = vmatpush1.msra.mxu1 %v13645_v34  ;;  %17389 = vst [vmem:[#allocation10_spill] sm:$0xff] %v13993_v5 }
0x1284   :  { %5131 = vmatprep.subr.mxu0 %v13651_v31  ;;  %5202 = vmatprep.subr.mxu1 %v13657_v37 }
0x1285   :  { %5132 = vmatpush1.msra.mxu0 %v13663_v51  ;;  %5203 = vmatpush1.msra.mxu1 %v13669_v27 }
0x1286   :  { %5133 = vmatprep.subr.mxu0 %v13675_v32  ;;  %5204 = vmatprep.subr.mxu1 %v13681_v36 }
0x1287   :  { %5134 = vmatpush1.msra.mxu0 %v13687_v46  ;;  %5205 = vmatpush1.msra.mxu1 %v13693_v59 }
0x1288   :  { %5135 = vmatprep.subr.mxu0 %v13699_v53  ;;  %5206 = vmatprep.subr.mxu1 %v13705_v20 }
0x1289   :  { %5136 = vmatpush1.msra.mxu0 %v13711_v42  ;;  %5207 = vmatpush1.msra.mxu1 %v13717_v13 }
0x128a   :  { %5137 = vmatprep.subr.mxu0 %v13723_v47  ;;  %5208 = vmatprep.subr.mxu1 %v13729_v26 }
0x128b   :  { %5138 = vmatpush1.msra.mxu0 %v13735_v21  ;;  %5209 = vmatpush1.msra.mxu1 %v13741_v60 }
0x128c   :  { %5139 = vmatprep.subr.mxu0 %v13747_v62  ;;  %5210 = vmatprep.subr.mxu1 %v13753_v10 }
0x128d   :  { %5140 = vmatpush1.msra.mxu0 %v13759_v55  ;;  %5211 = vmatpush1.msra.mxu1 %v13765_v38 }
0x128e   :  { %5141 = vmatprep.subr.mxu0 %v13771_v56  ;;  %5212 = vmatprep.subr.mxu1 %v13777_v11 }
0x128f   :  { %5142 = vmatpush1.msra.mxu0 %v13783_v6  ;;  %5213 = vmatpush1.msra.mxu1 %v13789_v63 }
0x1290   :  { %5143 = vmatprep.subr.mxu0 %v13795_v25  ;;  %5214 = vmatprep.subr.mxu1 %v13801_v3 }
0x1291   :  { %5144 = vmatpush1.msra.mxu0 %v13807_v49  ;;  %5215 = vmatpush1.msra.mxu1 %v13813_v4 }
0x1292   :  { %5145 = vmatprep.subr.mxu0 %v13819_v23  ;;  %5216 = vmatprep.subr.mxu1 %v13825_v0 }
0x1293   :  { %5146 = vmatpush1.msra.mxu0 %v13831_v54  ;;  %5217 = vmatpush1.msra.mxu1 %v13837_v45 }
0x1294   :  { %5147 = vmatprep.subr.mxu0 %v13843_v16  ;;  %5218 = vmatprep.subr.mxu1 %v13849_v43 }
0x1295   :  { %5148 = vmatpush1.msra.mxu0 %v13855_v8  ;;  %5219 = vmatpush1.msra.mxu1 %v13861_v61 }
0x1296   :  { %5149 = vmatprep.subr.mxu0 %v13867_v1  ;;  %5220 = vmatprep.subr.mxu1 %v13873_v14 }
0x1297   :  { %5150 = vmatpush1.msra.mxu0 %v13879_v12  ;;  %5221 = vmatpush1.msra.mxu1 %v13885_v28 }
0x1298   :  { %5151 = vmatprep.subr.mxu0 %v13891_v57  ;;  %5222 = vmatprep.subr.mxu1 %v13897_v2 }
0x1299   :  { %5152 = vmatpush1.msra.mxu0 %v13903_v22  ;;  %5223 = vmatpush1.msra.mxu1 %v13909_v29 }
0x129a   :  { %5153 = vmatprep.subr.mxu0 %v13915_v35  ;;  %5224 = vmatprep.subr.mxu1 %v13921_v52  ;;  %v17395_v52 = vld [vmem:[#allocation84_spill] sm:$0xff] }
0x129b   :  { %5154 = vmatpush1.msra.mxu0 %v13927_v19  ;;  %5225 = vmatpush1.msra.mxu1 %v13933_v58  ;;  %v17394_v19 = vld [vmem:[#allocation86_spill] sm:$0xff] }
0x129c   :  { %5155 = vmatprep.subr.mxu0 %v13939_v39  ;;  %5226 = vmatprep.subr.mxu1 %v13945_v7 }
0x129d   :  { %5156 = vmatpush1.msra.mxu0 %v13951_v30  ;;  %5227 = vmatpush1.msra.mxu1 %v13957_v50  ;;  %v17393_v50 = vld [vmem:[#allocation85_spill] sm:$0xff] }
0x129e   :  { %5157 = vmatprep.subr.mxu0 %v13963_v33  ;;  %5228 = vmatprep.subr.mxu1 %v13969_v41 }
0x129f   :  { %5158 = vmatpush1.msra.mxu0 %v13975_v9  ;;  %5229 = vmatpush1.msra.mxu1 %v13981_v40  ;;  %v13999_v9 = vld [vmem:[%s16230_s9] sm:$0xff]  ;;  %v17392_v40 = vld [vmem:[#allocation83_spill] sm:$0xff] }
0x12a0   :  { %5159 = vmatprep.subr.mxu0 %v13987_v17  ;;  %5230 = vmatprep.subr.mxu1 %v13993_v5  ;;  %17390 = vst [vmem:[#allocation68_spill] sm:$0xff] %v13999_v9  ;;  %v14006_v17 = vld [vmem:[%s16230_s9 + $0x10] sm:$0xff] }
0x12a1   :  { %5160 = vmatpush1.msra.mxu0 %v13999_v9  ;;  %5193 = vmatprep.mubr.f32.mxu0 %v17367_v48  ;;  %17391 = vst [vmem:[#allocation45_spill] sm:$0xff] %v14006_v17 }
0x12a2   :  { %5231 = vmatpush1.msra.mxu1 %v14006_v17  ;;  %5264 = vmatprep.mubr.f32.mxu1 %v17367_v48 }
0x12a3   :  { %5303 = vmatprep.subr.mxu0 %v13619_v15  ;;  %5374 = vmatprep.subr.mxu1 %v13625_v24 }
0x1342   :  { %v5021_v5 = vpop.f32.mrf.mxu0  ;;  %v5092_v7 = vpop.f32.mrf.mxu1 }
0x1343   :  { %v5097_v41 = vadd.f32 %v5021_v5, %v17392_v40  ;;  %v5099_v48 = vadd.f32 %v5092_v7, %v17395_v52  ;;  %v17401_v7 = vld [vmem:[#allocation59_spill] sm:$0xff] }
0x1344   :  { %v5023_v33 = vpop.f32.mrf.mxu0  ;;  %v5094_v58 = vpop.f32.mrf.mxu1 }
0x1345   :  { %v8191_v9 = vmul.f32 -1.442695, %v5097_v41  ;;  %v5098_v30 = vadd.f32 %v5023_v33, %v17393_v50  ;;  %v5100_v17 = vadd.f32 %v5094_v58, %v17394_v19  ;;  %v17400_v58 = vld [vmem:[#allocation24_spill] sm:$0xff] }
0x1347   :  { %8642 = vpow2.f32 %v8191_v9  ;;  %v8192_v39 = vmul.f32 -1.442695, %v5098_v30  ;;  %v8193_v35 = vmul.f32 -1.442695, %v5100_v17  ;;  %v17402_v17 = vld [vmem:[#allocation61_spill] sm:$0xff] }
0x1349   :  { %8644 = vpow2.f32 %v8192_v39 }
0x134a   :  { %8646 = vtanh.f32 %v5099_v48 }
0x134b   :  { %8648 = vpow2.f32 %v8193_v35  ;;  %v17399_v35 = vld [vmem:[#allocation26_spill] sm:$0xff] }
0x1354   :  { %v8643_v15 = vpop.eup %8642 }
0x1355   :  { %v5104_v29 = vadd.f32 1.0, %v8643_v15 }
0x1356   :  { %v8645_v24 = vpop.eup %8644 }
0x1357   :  { %8650 = vrcp.f32 %v5104_v29  ;;  %v5110_v40 = vadd.f32 1.0, %v8645_v24  ;;  %v8647_v41 = vpop.eup %8646  ;;  %v17396_v24 = vld [vmem:[#allocation5_spill] sm:$0xff] }
0x1358   :  { %v8649_v50 = vpop.eup %8648  ;;  %v17398_v29 = vld [vmem:[#allocation37_spill] sm:$0xff] }
0x1359   :  { %8652 = vrcp.f32 %v5110_v40  ;;  %v5117_v39 = vadd.f32 1.0, %v8649_v50  ;;  %v17403_v40 = vld [vmem:[#allocation38_spill] sm:$0xff]  ;;  %v17405_v50 = vld [vmem:[#allocation23_spill] sm:$0xff] }
0x135b   :  { %8654 = vrcp.f32 %v5117_v39  ;;  %v17409_v39 = vld [vmem:[#allocation56_spill] sm:$0xff] }
0x1364   :  { %v8651_v33 = vpop.eup %8650 }
0x1365   :  { %v5121_v9 = vmul.f32 %v8651_v33, %v8647_v41  ;;  %v17404_v41 = vld [vmem:[#allocation9_spill] sm:$0xff]  ;;  %v17406_v33 = vld [vmem:[#allocation22_spill] sm:$0xff] }
0x1366   :  { %v8653_v30 = vpop.eup %8652 }
0x1367   :  { %v5120_v5 = vmul.f32 %v8653_v30, %v13633_v18  ;;  %v17397_v18 = vld [vmem:[#allocation63_spill] sm:$0xff]  ;;  %v17408_v30 = vld [vmem:[#allocation57_spill] sm:$0xff] }
0x1368   :  { %v8655_v15 = vpop.eup %8654 }
0x1369   :  { %v14017_v19 = vadd.f32 %v5121_v9, %v5120_v5  ;;  %v17407_v9 = vld [vmem:[#allocation55_spill] sm:$0xff]  ;;  %v17410_v5 = vld [vmem:[#allocation10_spill] sm:$0xff] }
0x136b   :  { %8656 = vtanh.f32 %v14017_v19 }
0x1378   :  { %v8657_v48 = vpop.eup %8656 }
0x1379   :  { %v5124_v52 = vmul.f32 %v8657_v48, %v8655_v15  ;;  %v17411_v15 = vld [vmem:[#allocation68_spill] sm:$0xff]  ;;  %v17412_v48 = vmov 0.0  }
0x137b   :  { %5194 = vmatmul.mubr.f32.vlgmr.msra.gmra.mxu0 %v5124_v52  ;;  %5265 = vmatmul.mubr.f32.vlgmr.msra.gmra.mxu1 %v5124_v52  ;;  %v17413_v52 = vld [vmem:[#allocation45_spill] sm:$0xff] }
0x137c   :  { %5304 = vmatpush1.msra.mxu0 %v13639_v44  ;;  %5375 = vmatpush1.msra.mxu1 %v13645_v34 }
0x137d   :  { %5305 = vmatprep.subr.mxu0 %v13651_v31  ;;  %5376 = vmatprep.subr.mxu1 %v13657_v37 }
0x137e   :  { %5306 = vmatpush1.msra.mxu0 %v13663_v51  ;;  %5377 = vmatpush1.msra.mxu1 %v13669_v27 }
0x137f   :  { %5307 = vmatprep.subr.mxu0 %v13675_v32  ;;  %5378 = vmatprep.subr.mxu1 %v13681_v36 }
0x1380   :  { %5308 = vmatpush1.msra.mxu0 %v13687_v46  ;;  %5379 = vmatpush1.msra.mxu1 %v13693_v59 }
0x1381   :  { %5309 = vmatprep.subr.mxu0 %v13699_v53  ;;  %5380 = vmatprep.subr.mxu1 %v13705_v20 }
0x1382   :  { %5310 = vmatpush1.msra.mxu0 %v13711_v42  ;;  %5381 = vmatpush1.msra.mxu1 %v13717_v13 }
0x1383   :  { %5311 = vmatprep.subr.mxu0 %v13723_v47  ;;  %5382 = vmatprep.subr.mxu1 %v13729_v26 }
0x1384   :  { %5312 = vmatpush1.msra.mxu0 %v13735_v21  ;;  %5383 = vmatpush1.msra.mxu1 %v13741_v60 }
0x1385   :  { %5313 = vmatprep.subr.mxu0 %v13747_v62  ;;  %5384 = vmatprep.subr.mxu1 %v13753_v10 }
0x1386   :  { %5314 = vmatpush1.msra.mxu0 %v13759_v55  ;;  %5385 = vmatpush1.msra.mxu1 %v13765_v38 }
0x1387   :  { %5315 = vmatprep.subr.mxu0 %v13771_v56  ;;  %5386 = vmatprep.subr.mxu1 %v13777_v11 }
0x1388   :  { %5316 = vmatpush1.msra.mxu0 %v13783_v6  ;;  %5387 = vmatpush1.msra.mxu1 %v13789_v63 }
0x1389   :  { %5317 = vmatprep.subr.mxu0 %v13795_v25  ;;  %5388 = vmatprep.subr.mxu1 %v13801_v3 }
0x138a   :  { %5318 = vmatpush1.msra.mxu0 %v13807_v49  ;;  %5389 = vmatpush1.msra.mxu1 %v13813_v4 }
0x138b   :  { %5319 = vmatprep.subr.mxu0 %v13819_v23  ;;  %5390 = vmatprep.subr.mxu1 %v13825_v0 }
0x138c   :  { %5320 = vmatpush1.msra.mxu0 %v13831_v54  ;;  %5391 = vmatpush1.msra.mxu1 %v13837_v45 }
0x138d   :  { %5321 = vmatprep.subr.mxu0 %v13843_v16  ;;  %5392 = vmatprep.subr.mxu1 %v13849_v43 }
0x138e   :  { %5322 = vmatpush1.msra.mxu0 %v13855_v8  ;;  %5393 = vmatpush1.msra.mxu1 %v13861_v61 }
0x138f   :  { %5323 = vmatprep.subr.mxu0 %v13867_v1  ;;  %5394 = vmatprep.subr.mxu1 %v13873_v14 }
0x1390   :  { %5324 = vmatpush1.msra.mxu0 %v13879_v12  ;;  %5395 = vmatpush1.msra.mxu1 %v13885_v28 }
0x1391   :  { %5325 = vmatprep.subr.mxu0 %v13891_v57  ;;  %5396 = vmatprep.subr.mxu1 %v13897_v2 }
0x1392   :  { %5326 = vmatpush1.msra.mxu0 %v13903_v22  ;;  %5397 = vmatpush1.msra.mxu1 %v17396_v24 }
0x1393   :  { %5327 = vmatprep.subr.mxu0 %v17397_v18  ;;  %5398 = vmatprep.subr.mxu1 %v17398_v29  ;;  %v17419_v29 = vld [vmem:[#allocation88_spill] sm:$0xff] }
0x1394   :  { %5328 = vmatpush1.msra.mxu0 %v17399_v35  ;;  %5399 = vmatpush1.msra.mxu1 %v17400_v58  ;;  %v17418_v35 = vld [vmem:[#allocation90_spill] sm:$0xff] }
0x1395   :  { %5329 = vmatprep.subr.mxu0 %v17401_v7  ;;  %5400 = vmatprep.subr.mxu1 %v17402_v17 }
0x1396   :  { %5330 = vmatpush1.msra.mxu0 %v17403_v40  ;;  %5401 = vmatpush1.msra.mxu1 %v17404_v41  ;;  %v17414_v41 = vld [vmem:[#allocation64_spill] sm:$0xff] }
0x1397   :  { %5331 = vmatprep.subr.mxu0 %v17405_v50  ;;  %5402 = vmatprep.subr.mxu1 %v17406_v33  ;;  %v17415_v50 = vld [vmem:[#allocation6_spill] sm:$0xff] }
0x1398   :  { %5332 = vmatpush1.msra.mxu0 %v17407_v9  ;;  %5403 = vmatpush1.msra.mxu1 %v17408_v30  ;;  %v17416_v9 = vld [vmem:[#allocation87_spill] sm:$0xff] }
0x1399   :  { %5333 = vmatprep.subr.mxu0 %v17409_v39  ;;  %5404 = vmatprep.subr.mxu1 %v17410_v5  ;;  %v17417_v39 = vld [vmem:[#allocation89_spill] sm:$0xff] }
0x139a   :  { %5334 = vmatpush1.msra.mxu0 %v17411_v15  ;;  %5367 = vmatprep.mubr.f32.mxu0 %v17412_v48 }
0x139b   :  { %5405 = vmatpush1.msra.mxu1 %v17413_v52  ;;  %5438 = vmatprep.mubr.f32.mxu1 %v17412_v48 }
0x139c   :  { %5477 = vmatprep.subr.mxu0 %v17414_v41  ;;  %5548 = vmatprep.subr.mxu1 %v17415_v50 }
0x143b   :  { %v5195_v33 = vpop.f32.mrf.mxu0  ;;  %v5266_v5 = vpop.f32.mrf.mxu1 }
0x143c   :  { %v5271_v40 = vadd.f32 %v5195_v33, %v17416_v9  ;;  %v5273_v48 = vadd.f32 %v5266_v5, %v17419_v29  ;;  %v17424_v5 = vld [vmem:[#allocation24_spill] sm:$0xff] }
0x143d   :  { %v5197_v30 = vpop.f32.mrf.mxu0  ;;  %v5268_v58 = vpop.f32.mrf.mxu1 }
0x143e   :  { %v8194_v17 = vmul.f32 -1.442695, %v5271_v40  ;;  %v5272_v7 = vadd.f32 %v5197_v30, %v17417_v39  ;;  %v5274_v52 = vadd.f32 %v5268_v58, %v17418_v35 }
0x1440   :  { %8658 = vpow2.f32 %v8194_v17  ;;  %v8195_v15 = vmul.f32 -1.442695, %v5272_v7  ;;  %v8196_v18 = vmul.f32 -1.442695, %v5274_v52  ;;  %v17426_v52 = vld [vmem:[#allocation61_spill] sm:$0xff] }
0x1442   :  { %8660 = vpow2.f32 %v8195_v15 }
0x1443   :  { %8662 = vtanh.f32 %v5273_v48  ;;  %v17425_v48 = vld [vmem:[#allocation59_spill] sm:$0xff] }
0x1444   :  { %8664 = vpow2.f32 %v8196_v18  ;;  %v17422_v18 = vld [vmem:[#allocation37_spill] sm:$0xff] }
0x144d   :  { %v8659_v41 = vpop.eup %8658 }
0x144e   :  { %v5278_v24 = vadd.f32 1.0, %v8659_v41 }
0x144f   :  { %v8661_v50 = vpop.eup %8660 }
0x1450   :  { %8666 = vrcp.f32 %v5278_v24  ;;  %v5284_v33 = vadd.f32 1.0, %v8661_v50  ;;  %v8663_v40 = vpop.eup %8662  ;;  %v17421_v24 = vld [vmem:[#allocation63_spill] sm:$0xff]  ;;  %v17423_v50 = vld [vmem:[#allocation26_spill] sm:$0xff] }
0x1451   :  { %v8665_v9 = vpop.eup %8664 }
0x1452   :  { %8668 = vrcp.f32 %v5284_v33  ;;  %v5291_v39 = vadd.f32 1.0, %v8665_v9  ;;  %v17427_v33 = vld [vmem:[#allocation38_spill] sm:$0xff]  ;;  %v17429_v9 = vld [vmem:[#allocation23_spill] sm:$0xff] }
0x1454   :  { %8670 = vrcp.f32 %v5291_v39  ;;  %v17433_v39 = vld [vmem:[#allocation56_spill] sm:$0xff] }
0x145d   :  { %v8667_v17 = vpop.eup %8666 }
0x145e   :  { %v5295_v30 = vmul.f32 %v8667_v17, %v8663_v40  ;;  %v17428_v40 = vld [vmem:[#allocation9_spill] sm:$0xff]  ;;  %v17430_v17 = vld [vmem:[#allocation22_spill] sm:$0xff] }
0x145f   :  { %v8669_v7 = vpop.eup %8668 }
0x1460   :  { %v5294_v15 = vmul.f32 %v8669_v7, %v14017_v19  ;;  %v17420_v19 = vld [vmem:[#allocation5_spill] sm:$0xff] }
0x1461   :  { %v8671_v29 = vpop.eup %8670  ;;  %v17432_v7 = vld [vmem:[#allocation57_spill] sm:$0xff] }
0x1462   :  { %v14091_v35 = vadd.f32 %v5295_v30, %v5294_v15  ;;  %v17431_v30 = vld [vmem:[#allocation55_spill] sm:$0xff]  ;;  %v17434_v15 = vld [vmem:[#allocation10_spill] sm:$0xff] }
0x1464   :  { %8672 = vtanh.f32 %v14091_v35 }
0x1471   :  { %v8673_v58 = vpop.eup %8672 }
0x1472   :  { %v5298_v41 = vmul.f32 %v8673_v58, %v8671_v29  ;;  %v17435_v29 = vld [vmem:[#allocation68_spill] sm:$0xff]  ;;  %v17436_v58 = vmov 0.0  }
0x1474   :  { %5368 = vmatmul.mubr.f32.vlgmr.msra.gmra.mxu0 %v5298_v41  ;;  %5439 = vmatmul.mubr.f32.vlgmr.msra.gmra.mxu1 %v5298_v41  ;;  %v17437_v41 = vld [vmem:[#allocation45_spill] sm:$0xff] }
0x1475   :  { %5478 = vmatpush1.msra.mxu0 %v13639_v44  ;;  %5549 = vmatpush1.msra.mxu1 %v13645_v34 }
0x1476   :  { %5479 = vmatprep.subr.mxu0 %v13651_v31  ;;  %5550 = vmatprep.subr.mxu1 %v13657_v37 }
0x1477   :  { %5480 = vmatpush1.msra.mxu0 %v13663_v51  ;;  %5551 = vmatpush1.msra.mxu1 %v13669_v27 }
0x1478   :  { %5481 = vmatprep.subr.mxu0 %v13675_v32  ;;  %5552 = vmatprep.subr.mxu1 %v13681_v36 }
0x1479   :  { %5482 = vmatpush1.msra.mxu0 %v13687_v46  ;;  %5553 = vmatpush1.msra.mxu1 %v13693_v59 }
0x147a   :  { %5483 = vmatprep.subr.mxu0 %v13699_v53  ;;  %5554 = vmatprep.subr.mxu1 %v13705_v20 }
0x147b   :  { %5484 = vmatpush1.msra.mxu0 %v13711_v42  ;;  %5555 = vmatpush1.msra.mxu1 %v13717_v13 }
0x147c   :  { %5485 = vmatprep.subr.mxu0 %v13723_v47  ;;  %5556 = vmatprep.subr.mxu1 %v13729_v26 }
0x147d   :  { %5486 = vmatpush1.msra.mxu0 %v13735_v21  ;;  %5557 = vmatpush1.msra.mxu1 %v13741_v60 }
0x147e   :  { %5487 = vmatprep.subr.mxu0 %v13747_v62  ;;  %5558 = vmatprep.subr.mxu1 %v13753_v10 }
0x147f   :  { %5488 = vmatpush1.msra.mxu0 %v13759_v55  ;;  %5559 = vmatpush1.msra.mxu1 %v13765_v38 }
0x1480   :  { %5489 = vmatprep.subr.mxu0 %v13771_v56  ;;  %5560 = vmatprep.subr.mxu1 %v13777_v11 }
0x1481   :  { %5490 = vmatpush1.msra.mxu0 %v13783_v6  ;;  %5561 = vmatpush1.msra.mxu1 %v13789_v63 }
0x1482   :  { %5491 = vmatprep.subr.mxu0 %v13795_v25  ;;  %5562 = vmatprep.subr.mxu1 %v13801_v3 }
0x1483   :  { %5492 = vmatpush1.msra.mxu0 %v13807_v49  ;;  %5563 = vmatpush1.msra.mxu1 %v13813_v4 }
0x1484   :  { %5493 = vmatprep.subr.mxu0 %v13819_v23  ;;  %5564 = vmatprep.subr.mxu1 %v13825_v0 }
0x1485   :  { %5494 = vmatpush1.msra.mxu0 %v13831_v54  ;;  %5565 = vmatpush1.msra.mxu1 %v13837_v45 }
0x1486   :  { %5495 = vmatprep.subr.mxu0 %v13843_v16  ;;  %5566 = vmatprep.subr.mxu1 %v13849_v43 }
0x1487   :  { %5496 = vmatpush1.msra.mxu0 %v13855_v8  ;;  %5567 = vmatpush1.msra.mxu1 %v13861_v61 }
0x1488   :  { %5497 = vmatprep.subr.mxu0 %v13867_v1  ;;  %5568 = vmatprep.subr.mxu1 %v13873_v14 }
0x1489   :  { %5498 = vmatpush1.msra.mxu0 %v13879_v12  ;;  %5569 = vmatpush1.msra.mxu1 %v13885_v28 }
0x148a   :  { %5499 = vmatprep.subr.mxu0 %v13891_v57  ;;  %5570 = vmatprep.subr.mxu1 %v13897_v2 }
0x148b   :  { %5500 = vmatpush1.msra.mxu0 %v13903_v22  ;;  %5571 = vmatpush1.msra.mxu1 %v17420_v19 }
0x148c   :  { %5501 = vmatprep.subr.mxu0 %v17421_v24  ;;  %5572 = vmatprep.subr.mxu1 %v17422_v18  ;;  %v17443_v18 = vld [vmem:[#allocation92_spill] sm:$0xff] }
0x148d   :  { %5502 = vmatpush1.msra.mxu0 %v17423_v50  ;;  %5573 = vmatpush1.msra.mxu1 %v17424_v5  ;;  %v17442_v50 = vld [vmem:[#allocation94_spill] sm:$0xff] }
0x148e   :  { %5503 = vmatprep.subr.mxu0 %v17425_v48  ;;  %5574 = vmatprep.subr.mxu1 %v17426_v52 }
0x148f   :  { %5504 = vmatpush1.msra.mxu0 %v17427_v33  ;;  %5575 = vmatpush1.msra.mxu1 %v17428_v40  ;;  %v17438_v40 = vld [vmem:[#allocation64_spill] sm:$0xff] }
0x1490   :  { %5505 = vmatprep.subr.mxu0 %v17429_v9  ;;  %5576 = vmatprep.subr.mxu1 %v17430_v17  ;;  %v17439_v9 = vld [vmem:[#allocation6_spill] sm:$0xff] }
0x1491   :  { %5506 = vmatpush1.msra.mxu0 %v17431_v30  ;;  %5577 = vmatpush1.msra.mxu1 %v17432_v7  ;;  %v17440_v30 = vld [vmem:[#allocation91_spill] sm:$0xff] }
0x1492   :  { %5507 = vmatprep.subr.mxu0 %v17433_v39  ;;  %5578 = vmatprep.subr.mxu1 %v17434_v15  ;;  %v17441_v39 = vld [vmem:[#allocation93_spill] sm:$0xff] }
0x1493   :  { %5508 = vmatpush1.msra.mxu0 %v17435_v29  ;;  %5541 = vmatprep.mubr.f32.mxu0 %v17436_v58 }
0x1494   :  { %5579 = vmatpush1.msra.mxu1 %v17437_v41  ;;  %5612 = vmatprep.mubr.f32.mxu1 %v17436_v58 }
0x1495   :  { %5651 = vmatprep.subr.mxu0 %v17438_v40  ;;  %5722 = vmatprep.subr.mxu1 %v17439_v9 }
0x1534   :  { %v5369_v17 = vpop.f32.mrf.mxu0  ;;  %v5440_v15 = vpop.f32.mrf.mxu1 }
0x1535   :  { %v5445_v33 = vadd.f32 %v5369_v17, %v17440_v30  ;;  %v5447_v58 = vadd.f32 %v5440_v15, %v17443_v18 }
0x1536   :  { %v5371_v7 = vpop.f32.mrf.mxu0  ;;  %v5442_v5 = vpop.f32.mrf.mxu1 }
0x1537   :  { %v8197_v52 = vmul.f32 -1.442695, %v5445_v33  ;;  %v5446_v48 = vadd.f32 %v5371_v7, %v17441_v39  ;;  %v5448_v41 = vadd.f32 %v5442_v5, %v17442_v50 }
0x1539   :  { %8674 = vpow2.f32 %v8197_v52  ;;  %v8198_v29 = vmul.f32 -1.442695, %v5446_v48  ;;  %v8199_v24 = vmul.f32 -1.442695, %v5448_v41 }
0x153b   :  { %8676 = vpow2.f32 %v8198_v29 }
0x153c   :  { %8678 = vtanh.f32 %v5447_v58 }
0x153d   :  { %8680 = vpow2.f32 %v8199_v24 }
0x1546   :  { %v8675_v40 = vpop.eup %8674 }
0x1547   :  { %v5452_v19 = vadd.f32 1.0, %v8675_v40  ;;  %v5945_v40 = vld [vmem:[%s16232_s12 + $0x1e0] sm:$0xff] }
0x1548   :  { %v8677_v9 = vpop.eup %8676 }
0x1549   :  { %8682 = vrcp.f32 %v5452_v19  ;;  %v5458_v17 = vadd.f32 1.0, %v8677_v9  ;;  %v8679_v33 = vpop.eup %8678  ;;  %v5947_v9 = vld [vmem:[%s16232_s12 + $0x1f0] sm:$0xff] }
0x154a   :  { %v8681_v30 = vpop.eup %8680 }
0x154b   :  { %8684 = vrcp.f32 %v5458_v17  ;;  %v5465_v39 = vadd.f32 1.0, %v8681_v30  ;;  %v5942_v17 = vld [vmem:[%s16232_s12 + $0x1c8] sm:$0xff]  ;;  %v5941_v30 = vld [vmem:[%s16232_s12 + $0x1c0] sm:$0xff] }
0x154d   :  { %8686 = vrcp.f32 %v5465_v39  ;;  %v5937_v39 = vld [vmem:[%s16232_s12 + $0x1a0] sm:$0xff] }
0x1556   :  { %v8683_v52 = vpop.eup %8682 }
0x1557   :  { %v5469_v7 = vmul.f32 %v8683_v52, %v8679_v33  ;;  %v5944_v33 = vld [vmem:[%s16232_s12 + $0x1d8] sm:$0xff]  ;;  %v5943_v52 = vld [vmem:[%s16232_s12 + $0x1d0] sm:$0xff] }
0x1558   :  { %v8685_v48 = vpop.eup %8684 }
0x1559   :  { %v5468_v29 = vmul.f32 %v8685_v48, %v14091_v35  ;;  %v5940_v48 = vld [vmem:[%s16232_s12 + $0x1b8] sm:$0xff] }
0x155a   :  { %v8687_v18 = vpop.eup %8686 }
0x155b   :  { %v14165_v50 = vadd.f32 %v5469_v7, %v5468_v29  ;;  %v5938_v7 = vld [vmem:[%s16232_s12 + $0x1a8] sm:$0xff]  ;;  %v5939_v29 = vld [vmem:[%s16232_s12 + $0x1b0] sm:$0xff] }
0x155d   :  { %8688 = vtanh.f32 %v14165_v50 }
0x156a   :  { %v8689_v5 = vpop.eup %8688 }
0x156b   :  { %v5472_v15 = vmul.f32 %v8689_v5, %v8687_v18  ;;  %v5936_v18 = vld [vmem:[%s16232_s12 + $0x198] sm:$0xff]  ;;  %v5933_v5 = vld [vmem:[%s16232_s12 + $0x180] sm:$0xff] }
0x156d   :  { %5542 = vmatmul.mubr.f32.vlgmr.msra.gmra.mxu0 %v5472_v15  ;;  %5613 = vmatmul.mubr.f32.vlgmr.msra.gmra.mxu1 %v5472_v15  ;;  %v5935_v15 = vld [vmem:[%s16232_s12 + $0x190] sm:$0xff] }
0x156e   :  { %5652 = vmatpush1.msra.mxu0 %v13639_v44  ;;  %5723 = vmatpush1.msra.mxu1 %v13645_v34  ;;  %v17444_v44 = vld [vmem:[#allocation5_spill] sm:$0xff]  ;;  %v17445_v34 = vld [vmem:[#allocation63_spill] sm:$0xff] }
0x156f   :  { %5653 = vmatprep.subr.mxu0 %v13651_v31  ;;  %5724 = vmatprep.subr.mxu1 %v13657_v37  ;;  %v17446_v31 = vld [vmem:[#allocation37_spill] sm:$0xff]  ;;  %v17447_v37 = vld [vmem:[#allocation26_spill] sm:$0xff] }
0x1570   :  { %5654 = vmatpush1.msra.mxu0 %v13663_v51  ;;  %5725 = vmatpush1.msra.mxu1 %v13669_v27  ;;  %v17448_v51 = vld [vmem:[#allocation24_spill] sm:$0xff]  ;;  %v17449_v27 = vld [vmem:[#allocation59_spill] sm:$0xff] }
0x1571   :  { %5655 = vmatprep.subr.mxu0 %v13675_v32  ;;  %5726 = vmatprep.subr.mxu1 %v13681_v36  ;;  %v17450_v32 = vld [vmem:[#allocation61_spill] sm:$0xff]  ;;  %v17451_v36 = vld [vmem:[#allocation38_spill] sm:$0xff] }
0x1572   :  { %5656 = vmatpush1.msra.mxu0 %v13687_v46  ;;  %5727 = vmatpush1.msra.mxu1 %v13693_v59  ;;  %v17452_v46 = vld [vmem:[#allocation9_spill] sm:$0xff]  ;;  %v17453_v59 = vld [vmem:[#allocation23_spill] sm:$0xff] }
0x1573   :  { %5657 = vmatprep.subr.mxu0 %v13699_v53  ;;  %5728 = vmatprep.subr.mxu1 %v13705_v20  ;;  %v17454_v53 = vld [vmem:[#allocation22_spill] sm:$0xff]  ;;  %v17455_v20 = vld [vmem:[#allocation55_spill] sm:$0xff] }
0x1574   :  { %5658 = vmatpush1.msra.mxu0 %v13711_v42  ;;  %5729 = vmatpush1.msra.mxu1 %v13717_v13  ;;  %v17456_v42 = vld [vmem:[#allocation57_spill] sm:$0xff]  ;;  %v17457_v13 = vld [vmem:[#allocation56_spill] sm:$0xff] }
0x1575   :  { %5659 = vmatprep.subr.mxu0 %v13723_v47  ;;  %5730 = vmatprep.subr.mxu1 %v13729_v26  ;;  %v17458_v47 = vld [vmem:[#allocation10_spill] sm:$0xff]  ;;  %v17459_v26 = vld [vmem:[#allocation68_spill] sm:$0xff] }
0x1576   :  { %5660 = vmatpush1.msra.mxu0 %v13735_v21  ;;  %5731 = vmatpush1.msra.mxu1 %v13741_v60  ;;  %v17460_v21 = vld [vmem:[#allocation45_spill] sm:$0xff]  ;;  %v17461_v60 = vmov 0.0  }
0x1577   :  { %5661 = vmatprep.subr.mxu0 %v13747_v62  ;;  %5732 = vmatprep.subr.mxu1 %v13753_v10  ;;  %v5946_v62 = vld [vmem:[%s16232_s12 + $0x1e8] sm:$0xff]  ;;  %v5948_v10 = vld [vmem:[%s16232_s12 + $0x1f8] sm:$0xff] }
0x1578   :  { %5662 = vmatpush1.msra.mxu0 %v13759_v55  ;;  %5733 = vmatpush1.msra.mxu1 %v13765_v38  ;;  %v17462_v38 = vld [vmem:[#allocation95_spill] sm:$0xff] }
0x1579   :  { %5663 = vmatprep.subr.mxu0 %v13771_v56  ;;  %5734 = vmatprep.subr.mxu1 %v13777_v11 }
0x157a   :  { %5664 = vmatpush1.msra.mxu0 %v13783_v6  ;;  %5735 = vmatpush1.msra.mxu1 %v13789_v63  ;;  %v17463_v63 = vld [vmem:[#allocation97_spill] sm:$0xff] }
0x157b   :  { %5665 = vmatprep.subr.mxu0 %v13795_v25  ;;  %5736 = vmatprep.subr.mxu1 %v13801_v3 }
0x157c   :  { %5666 = vmatpush1.msra.mxu0 %v13807_v49  ;;  %5737 = vmatpush1.msra.mxu1 %v13813_v4 }
0x157d   :  { %5667 = vmatprep.subr.mxu0 %v13819_v23  ;;  %5738 = vmatprep.subr.mxu1 %v13825_v0  ;;  %v17464_v23 = vld [vmem:[#allocation98_spill] sm:$0xff] }
0x157e   :  { %5668 = vmatpush1.msra.mxu0 %v13831_v54  ;;  %5739 = vmatpush1.msra.mxu1 %v13837_v45  ;;  %v17465_v54 = vld [vmem:[#allocation96_spill] sm:$0xff] }
0x157f   :  { %5669 = vmatprep.subr.mxu0 %v13843_v16  ;;  %5740 = vmatprep.subr.mxu1 %v13849_v43 }
0x1580   :  { %5670 = vmatpush1.msra.mxu0 %v13855_v8  ;;  %5741 = vmatpush1.msra.mxu1 %v13861_v61 }
0x1581   :  { %5671 = vmatprep.subr.mxu0 %v13867_v1  ;;  %5742 = vmatprep.subr.mxu1 %v13873_v14 }
0x1582   :  { %5672 = vmatpush1.msra.mxu0 %v13879_v12  ;;  %5743 = vmatpush1.msra.mxu1 %v13885_v28 }
0x1583   :  { %5673 = vmatprep.subr.mxu0 %v13891_v57  ;;  %5744 = vmatprep.subr.mxu1 %v13897_v2 }
0x1584   :  { %5674 = vmatpush1.msra.mxu0 %v13903_v22  ;;  %5745 = vmatpush1.msra.mxu1 %v17444_v44  ;;  %v5930_v44 = vld [vmem:[%s16232_s12 + $0x168] sm:$0xff] }
0x1585   :  { %5675 = vmatprep.subr.mxu0 %v17445_v34  ;;  %5746 = vmatprep.subr.mxu1 %v17446_v31  ;;  %v5932_v34 = vld [vmem:[%s16232_s12 + $0x178] sm:$0xff]  ;;  %v5929_v31 = vld [vmem:[%s16232_s12 + $0x160] sm:$0xff] }
0x1586   :  { %5676 = vmatpush1.msra.mxu0 %v17447_v37  ;;  %5747 = vmatpush1.msra.mxu1 %v17448_v51  ;;  %v5931_v37 = vld [vmem:[%s16232_s12 + $0x170] sm:$0xff]  ;;  %v5926_v51 = vld [vmem:[%s16232_s12 + $0x148] sm:$0xff] }
0x1587   :  { %5677 = vmatprep.subr.mxu0 %v17449_v27  ;;  %5748 = vmatprep.subr.mxu1 %v17450_v32  ;;  %v5928_v27 = vld [vmem:[%s16232_s12 + $0x158] sm:$0xff]  ;;  %v5925_v32 = vld [vmem:[%s16232_s12 + $0x140] sm:$0xff] }
0x1588   :  { %5678 = vmatpush1.msra.mxu0 %v17451_v36  ;;  %5749 = vmatpush1.msra.mxu1 %v17452_v46  ;;  %v5927_v36 = vld [vmem:[%s16232_s12 + $0x150] sm:$0xff]  ;;  %v5922_v46 = vld [vmem:[%s16232_s12 + $0x128] sm:$0xff] }
0x1589   :  { %5679 = vmatprep.subr.mxu0 %v17453_v59  ;;  %5750 = vmatprep.subr.mxu1 %v17454_v53  ;;  %v5924_v59 = vld [vmem:[%s16232_s12 + $0x138] sm:$0xff]  ;;  %v5921_v53 = vld [vmem:[%s16232_s12 + $0x120] sm:$0xff] }
0x158a   :  { %5680 = vmatpush1.msra.mxu0 %v17455_v20  ;;  %5751 = vmatpush1.msra.mxu1 %v17456_v42  ;;  %v5923_v20 = vld [vmem:[%s16232_s12 + $0x130] sm:$0xff]  ;;  %v5918_v42 = vld [vmem:[%s16232_s12 + $0x108] sm:$0xff] }
0x158b   :  { %5681 = vmatprep.subr.mxu0 %v17457_v13  ;;  %5752 = vmatprep.subr.mxu1 %v17458_v47  ;;  %v5920_v13 = vld [vmem:[%s16232_s12 + $0x118] sm:$0xff]  ;;  %v5917_v47 = vld [vmem:[%s16232_s12 + $0x100] sm:$0xff] }
0x158c   :  { %5682 = vmatpush1.msra.mxu0 %v17459_v26  ;;  %5753 = vmatpush1.msra.mxu1 %v17460_v21  ;;  %v5919_v26 = vld [vmem:[%s16232_s12 + $0x110] sm:$0xff]  ;;  %v5914_v21 = vld [vmem:[%s16232_s12 + $0xe8] sm:$0xff] }
0x158d   :  { %5715 = vmatprep.mubr.f32.mxu0 %v17461_v60  ;;  %5786 = vmatprep.mubr.f32.mxu1 %v17461_v60 }
0x158e   :  { %5949 = vmatprep.subr.mxu0 %v5946_v62  ;;  %6062 = vmatprep.subr.mxu1 %v5948_v10  ;;  %v5916_v62 = vld [vmem:[%s16232_s12 + $0xf8] sm:$0xff]  ;;  %v5913_v10 = vld [vmem:[%s16232_s12 + $0xe0] sm:$0xff] }
0x162d   :  { %v5543_v55 = vpop.f32.mrf.mxu0  ;;  %v5614_v3 = vpop.f32.mrf.mxu1 }
0x162e   :  { %v5619_v56 = vadd.f32 %v5543_v55, %v17462_v38  ;;  %v5621_v45 = vadd.f32 %v5614_v3, %v17465_v54  ;;  %v5915_v55 = vld [vmem:[%s16232_s12 + $0xf0] sm:$0xff]  ;;  %v5910_v38 = vld [vmem:[%s16232_s12 + $0xc8] sm:$0xff]  ;;  %v5905_v3 = vld [vmem:[%s16232_s12 + $0xa0] sm:$0xff] }
0x162f   :  { %v5545_v11 = vpop.f32.mrf.mxu0  ;;  %v5616_v4 = vpop.f32.mrf.mxu1  ;;  %v5903_v54 = vld [vmem:[%s16232_s12 + $0x90] sm:$0xff] }
0x1630   :  { %v8200_v6 = vmul.f32 -1.442695, %v5619_v56  ;;  %v5620_v25 = vadd.f32 %v5545_v11, %v17463_v63  ;;  %v5622_v0 = vadd.f32 %v5616_v4, %v17464_v23  ;;  %v5912_v56 = vld [vmem:[%s16232_s12 + $0xd8] sm:$0xff]  ;;  %v5909_v11 = vld [vmem:[%s16232_s12 + $0xc0] sm:$0xff]  ;;  %v5906_v63 = vld [vmem:[%s16232_s12 + $0xa8] sm:$0xff] }
0x1631   :  { %v5902_v4 = vld [vmem:[%s16232_s12 + $0x88] sm:$0xff]  ;;  %v5904_v23 = vld [vmem:[%s16232_s12 + $0x98] sm:$0xff] }
0x1632   :  { %8690 = vpow2.f32 %v8200_v6  ;;  %v8201_v49 = vmul.f32 -1.442695, %v5620_v25  ;;  %v8202_v16 = vmul.f32 -1.442695, %v5622_v0  ;;  %v5911_v6 = vld [vmem:[%s16232_s12 + $0xd0] sm:$0xff]  ;;  %v5908_v25 = vld [vmem:[%s16232_s12 + $0xb8] sm:$0xff] }
0x1633   :  { %v5901_v0 = vld [vmem:[%s16232_s12 + $0x80] sm:$0xff] }
0x1634   :  { %8692 = vpow2.f32 %v8201_v49  ;;  %v5907_v49 = vld [vmem:[%s16232_s12 + $0xb0] sm:$0xff] }
0x1635   :  { %8694 = vtanh.f32 %v5621_v45  ;;  %v5898_v45 = vld [vmem:[%s16232_s12 + $0x68] sm:$0xff] }
0x1636   :  { %8696 = vpow2.f32 %v8202_v16  ;;  %v5900_v16 = vld [vmem:[%s16232_s12 + $0x78] sm:$0xff] }
0x163f   :  { %v8691_v43 = vpop.eup %8690 }
0x1640   :  { %v5626_v8 = vadd.f32 1.0, %v8691_v43  ;;  %v5897_v43 = vld [vmem:[%s16232_s12 + $0x60] sm:$0xff] }
0x1641   :  { %v8693_v61 = vpop.eup %8692 }
0x1642   :  { %8698 = vrcp.f32 %v5626_v8  ;;  %v5632_v1 = vadd.f32 1.0, %v8693_v61  ;;  %v8695_v14 = vpop.eup %8694  ;;  %v5899_v8 = vld [vmem:[%s16232_s12 + $0x70] sm:$0xff]  ;;  %v5894_v61 = vld [vmem:[%s16232_s12 + $0x48] sm:$0xff] }
0x1643   :  { %v8697_v12 = vpop.eup %8696 }
0x1644   :  { %8700 = vrcp.f32 %v5632_v1  ;;  %v5639_v22 = vadd.f32 1.0, %v8697_v12  ;;  %v5896_v1 = vld [vmem:[%s16232_s12 + $0x58] sm:$0xff]  ;;  %v5895_v12 = vld [vmem:[%s16232_s12 + $0x50] sm:$0xff] }
0x1646   :  { %8702 = vrcp.f32 %v5639_v22  ;;  %v5891_v22 = vld [vmem:[%s16232_s12 + $0x30] sm:$0xff] }
0x164f   :  { %v8699_v28 = vpop.eup %8698 }
0x1650   :  { %v5643_v57 = vmul.f32 %v8699_v28, %v8695_v14  ;;  %v5893_v14 = vld [vmem:[%s16232_s12 + $0x40] sm:$0xff]  ;;  %v5890_v28 = vld [vmem:[%s16232_s12 + $0x28] sm:$0xff] }
0x1651   :  { %v8701_v2 = vpop.eup %8700 }
0x1652   :  { %v5642_v35 = vmul.f32 %v8701_v2, %v14165_v50  ;;  %v5934_v50 = vld [vmem:[%s16232_s12 + $0x188] sm:$0xff]  ;;  %v5889_v2 = vld [vmem:[%s16232_s12 + $0x20] sm:$0xff] }
0x1653   :  { %v8703_v24 = vpop.eup %8702 }
0x1654   :  { %v14243_v19 = vadd.f32 %v5643_v57, %v5642_v35  ;;  %v5892_v57 = vld [vmem:[%s16232_s12 + $0x38] sm:$0xff]  ;;  %v5886_v35 = vld [vmem:[%s16232_s12 + $0x8] sm:$0xff] }
0x1656   :  { %17466 = vst [vmem:[#allocation67_spill] sm:$0xff] %v14243_v19  ;;  %8704 = vtanh.f32 %v14243_v19  ;;  %v15052_v19 = vld [vmem:[%s16234_s13 + $0x18] sm:$0xff] }
0x1657   :  { %17530 = vst [vmem:[#allocation6_spill] sm:$0xff] %v15052_v19 }
0x1663   :  { %v8705_v58 = vpop.eup %8704 }
0x1664   :  { %v5646_v41 = vmul.f32 %v8705_v58, %v8703_v24  ;;  %v5888_v24 = vld [vmem:[%s16232_s12 + $0x18] sm:$0xff]  ;;  %v5885_v58 = vld [vmem:[%s16232_s12] sm:$0xff] }
0x1666   :  { %5716 = vmatmul.mubr.f32.vlgmr.msra.gmra.mxu0 %v5646_v41  ;;  %5787 = vmatmul.mubr.f32.vlgmr.msra.gmra.mxu1 %v5646_v41  ;;  %v5887_v41 = vld [vmem:[%s16232_s12 + $0x10] sm:$0xff] }
0x1667   :  { %5950 = vmatpush1.msra.mxu0 %v5945_v40  ;;  %6063 = vmatpush1.msra.mxu1 %v5947_v9  ;;  %v5882_v40 = vld [vmem:[%s16233_s11 + $0x1e8] sm:$0xff]  ;;  %v5884_v9 = vld [vmem:[%s16233_s11 + $0x1f8] sm:$0xff] }
0x1668   :  { %5951 = vmatprep.subr.mxu0 %v5942_v17  ;;  %6064 = vmatprep.subr.mxu1 %v5944_v33  ;;  %v5881_v17 = vld [vmem:[%s16233_s11 + $0x1e0] sm:$0xff]  ;;  %v5883_v33 = vld [vmem:[%s16233_s11 + $0x1f0] sm:$0xff] }
0x1669   :  { %5952 = vmatpush1.msra.mxu0 %v5941_v30  ;;  %6065 = vmatpush1.msra.mxu1 %v5943_v52  ;;  %v17467_v30 = vld [vmem:[#allocation51_spill] sm:$0xff]  ;;  %v5878_v52 = vld [vmem:[%s16233_s11 + $0x1c8] sm:$0xff] }
0x166a   :  { %5953 = vmatprep.subr.mxu0 %v5938_v7  ;;  %6066 = vmatprep.subr.mxu1 %v5940_v48  ;;  %v5880_v7 = vld [vmem:[%s16233_s11 + $0x1d8] sm:$0xff]  ;;  %v5877_v48 = vld [vmem:[%s16233_s11 + $0x1c0] sm:$0xff] }
0x166b   :  { %5954 = vmatpush1.msra.mxu0 %v5937_v39  ;;  %6067 = vmatpush1.msra.mxu1 %v5939_v29  ;;  %v5879_v39 = vld [vmem:[%s16233_s11 + $0x1d0] sm:$0xff]  ;;  %v5874_v29 = vld [vmem:[%s16233_s11 + $0x1a8] sm:$0xff] }
0x166c   :  { %5955 = vmatprep.subr.mxu0 %v5934_v50  ;;  %6068 = vmatprep.subr.mxu1 %v5936_v18  ;;  %v5876_v50 = vld [vmem:[%s16233_s11 + $0x1b8] sm:$0xff]  ;;  %v5873_v18 = vld [vmem:[%s16233_s11 + $0x1a0] sm:$0xff] }
0x166d   :  { %5956 = vmatpush1.msra.mxu0 %v5933_v5  ;;  %6069 = vmatpush1.msra.mxu1 %v5935_v15  ;;  %v5875_v5 = vld [vmem:[%s16233_s11 + $0x1b0] sm:$0xff]  ;;  %v17468_v15 = vld [vmem:[#allocation41_spill] sm:$0xff] }
0x166e   :  { %5957 = vmatprep.subr.mxu0 %v5930_v44  ;;  %6070 = vmatprep.subr.mxu1 %v5932_v34  ;;  %v5870_v44 = vld [vmem:[%s16233_s11 + $0x188] sm:$0xff]  ;;  %v5872_v34 = vld [vmem:[%s16233_s11 + $0x198] sm:$0xff] }
0x166f   :  { %5958 = vmatpush1.msra.mxu0 %v5929_v31  ;;  %6071 = vmatpush1.msra.mxu1 %v5931_v37  ;;  %v5869_v31 = vld [vmem:[%s16233_s11 + $0x180] sm:$0xff]  ;;  %v5871_v37 = vld [vmem:[%s16233_s11 + $0x190] sm:$0xff] }
0x1670   :  { %5959 = vmatprep.subr.mxu0 %v5926_v51  ;;  %6072 = vmatprep.subr.mxu1 %v5928_v27  ;;  %v5866_v51 = vld [vmem:[%s16233_s11 + $0x168] sm:$0xff]  ;;  %v5868_v27 = vld [vmem:[%s16233_s11 + $0x178] sm:$0xff] }
0x1671   :  { %5960 = vmatpush1.msra.mxu0 %v5925_v32  ;;  %6073 = vmatpush1.msra.mxu1 %v5927_v36  ;;  %v5865_v32 = vld [vmem:[%s16233_s11 + $0x160] sm:$0xff]  ;;  %v5867_v36 = vld [vmem:[%s16233_s11 + $0x170] sm:$0xff] }
0x1672   :  { %5961 = vmatprep.subr.mxu0 %v5922_v46  ;;  %6074 = vmatprep.subr.mxu1 %v5924_v59  ;;  %v17469_v46 = vld [vmem:[#allocation16_spill] sm:$0xff]  ;;  %v5862_v59 = vld [vmem:[%s16233_s11 + $0x148] sm:$0xff] }
0x1673   :  { %5962 = vmatpush1.msra.mxu0 %v5921_v53  ;;  %6075 = vmatpush1.msra.mxu1 %v5923_v20  ;;  %v5864_v53 = vld [vmem:[%s16233_s11 + $0x158] sm:$0xff]  ;;  %v5861_v20 = vld [vmem:[%s16233_s11 + $0x140] sm:$0xff] }
0x1674   :  { %5963 = vmatprep.subr.mxu0 %v5918_v42  ;;  %6076 = vmatprep.subr.mxu1 %v5920_v13  ;;  %v5863_v42 = vld [vmem:[%s16233_s11 + $0x150] sm:$0xff]  ;;  %v5858_v13 = vld [vmem:[%s16233_s11 + $0x128] sm:$0xff] }
0x1675   :  { %5964 = vmatpush1.msra.mxu0 %v5917_v47  ;;  %6077 = vmatpush1.msra.mxu1 %v5919_v26  ;;  %v5860_v47 = vld [vmem:[%s16233_s11 + $0x138] sm:$0xff]  ;;  %v5857_v26 = vld [vmem:[%s16233_s11 + $0x120] sm:$0xff] }
0x1676   :  { %5965 = vmatprep.subr.mxu0 %v5914_v21  ;;  %6078 = vmatprep.subr.mxu1 %v5916_v62  ;;  %v5859_v21 = vld [vmem:[%s16233_s11 + $0x130] sm:$0xff]  ;;  %v17470_v62 = vld [vmem:[#allocation46_spill] sm:$0xff] }
0x1677   :  { %5966 = vmatpush1.msra.mxu0 %v5913_v10  ;;  %6079 = vmatpush1.msra.mxu1 %v5915_v55  ;;  %v5854_v10 = vld [vmem:[%s16233_s11 + $0x108] sm:$0xff]  ;;  %v5856_v55 = vld [vmem:[%s16233_s11 + $0x118] sm:$0xff] }
0x1678   :  { %5967 = vmatprep.subr.mxu0 %v5910_v38  ;;  %6080 = vmatprep.subr.mxu1 %v5912_v56  ;;  %v5853_v38 = vld [vmem:[%s16233_s11 + $0x100] sm:$0xff]  ;;  %v5855_v56 = vld [vmem:[%s16233_s11 + $0x110] sm:$0xff] }
0x1679   :  { %5968 = vmatpush1.msra.mxu0 %v5909_v11  ;;  %6081 = vmatpush1.msra.mxu1 %v5911_v6  ;;  %v5850_v11 = vld [vmem:[%s16233_s11 + $0xe8] sm:$0xff]  ;;  %v5852_v6 = vld [vmem:[%s16233_s11 + $0xf8] sm:$0xff] }
0x167a   :  { %5969 = vmatprep.subr.mxu0 %v5906_v63  ;;  %6082 = vmatprep.subr.mxu1 %v5908_v25  ;;  %v5849_v63 = vld [vmem:[%s16233_s11 + $0xe0] sm:$0xff]  ;;  %v5851_v25 = vld [vmem:[%s16233_s11 + $0xf0] sm:$0xff] }
0x167b   :  { %5970 = vmatpush1.msra.mxu0 %v5905_v3  ;;  %6083 = vmatpush1.msra.mxu1 %v5907_v49  ;;  %v17471_v3 = vld [vmem:[#allocation42_spill] sm:$0xff] }
0x167c   :  { %5971 = vmatprep.subr.mxu0 %v5902_v4  ;;  %6084 = vmatprep.subr.mxu1 %v5904_v23  ;;  %v5846_v49 = vld [vmem:[%s16233_s11 + $0xc8] sm:$0xff]  ;;  %v5848_v4 = vld [vmem:[%s16233_s11 + $0xd8] sm:$0xff]  ;;  %v5845_v23 = vld [vmem:[%s16233_s11 + $0xc0] sm:$0xff] }
0x167d   :  { %5972 = vmatpush1.msra.mxu0 %v5901_v0  ;;  %6085 = vmatpush1.msra.mxu1 %v5903_v54  ;;  %v5847_v0 = vld [vmem:[%s16233_s11 + $0xd0] sm:$0xff]  ;;  %v5842_v54 = vld [vmem:[%s16233_s11 + $0xa8] sm:$0xff] }
0x167e   :  { %5973 = vmatprep.subr.mxu0 %v5898_v45  ;;  %6086 = vmatprep.subr.mxu1 %v5900_v16  ;;  %v5844_v45 = vld [vmem:[%s16233_s11 + $0xb8] sm:$0xff]  ;;  %v5841_v16 = vld [vmem:[%s16233_s11 + $0xa0] sm:$0xff] }
0x167f   :  { %5974 = vmatpush1.msra.mxu0 %v5897_v43  ;;  %6087 = vmatpush1.msra.mxu1 %v5899_v8  ;;  %v5843_v43 = vld [vmem:[%s16233_s11 + $0xb0] sm:$0xff] }
0x1680   :  { %5975 = vmatprep.subr.mxu0 %v5894_v61  ;;  %6088 = vmatprep.subr.mxu1 %v5896_v1  ;;  %v17472_v8 = vld [vmem:[#allocation27_spill] sm:$0xff]  ;;  %v5838_v61 = vld [vmem:[%s16233_s11 + $0x88] sm:$0xff]  ;;  %v5840_v1 = vld [vmem:[%s16233_s11 + $0x98] sm:$0xff] }
0x1681   :  { %5976 = vmatpush1.msra.mxu0 %v5893_v14  ;;  %6089 = vmatpush1.msra.mxu1 %v5895_v12  ;;  %v5837_v14 = vld [vmem:[%s16233_s11 + $0x80] sm:$0xff]  ;;  %v5839_v12 = vld [vmem:[%s16233_s11 + $0x90] sm:$0xff] }
0x1682   :  { %5977 = vmatprep.subr.mxu0 %v5890_v28  ;;  %6090 = vmatprep.subr.mxu1 %v5892_v57  ;;  %v5834_v28 = vld [vmem:[%s16233_s11 + $0x68] sm:$0xff]  ;;  %v5836_v57 = vld [vmem:[%s16233_s11 + $0x78] sm:$0xff] }
0x1683   :  { %5978 = vmatpush1.msra.mxu0 %v5889_v2  ;;  %6091 = vmatpush1.msra.mxu1 %v5891_v22  ;;  %v5833_v2 = vld [vmem:[%s16233_s11 + $0x60] sm:$0xff]  ;;  %v5835_v22 = vld [vmem:[%s16233_s11 + $0x70] sm:$0xff] }
0x1684   :  { %5979 = vmatprep.subr.mxu0 %v5886_v35  ;;  %6092 = vmatprep.subr.mxu1 %v5888_v24  ;;  %v17473_v35 = vld [vmem:[#allocation40_spill] sm:$0xff]  ;;  %v5830_v24 = vld [vmem:[%s16233_s11 + $0x48] sm:$0xff] }
0x1685   :  { %5980 = vmatpush1.msra.mxu0 %v5885_v58  ;;  %6013 = vmatprep.mubr.f32.mxu0 %v17461_v60  ;;  %v5832_v58 = vld [vmem:[%s16233_s11 + $0x58] sm:$0xff] }
0x1686   :  { %6093 = vmatpush1.msra.mxu1 %v5887_v41  ;;  %6126 = vmatprep.mubr.f32.mxu1 %v17461_v60  ;;  %v5829_v41 = vld [vmem:[%s16233_s11 + $0x40] sm:$0xff] }
0x1687   :  { %6014 = vmatmul.mubr.f32.vlgmr.msra.gmra.mxu0 %v17467_v30  ;;  %6127 = vmatmul.mubr.f32.vlgmr.msra.gmra.mxu1 %v17467_v30  ;;  %v5827_v30 = vld [vmem:[%s16233_s11 + $0x30] sm:$0xff] }
0x1688   :  { %6175 = vmatprep.subr.mxu0 %v5882_v40  ;;  %6288 = vmatprep.subr.mxu1 %v5884_v9  ;;  %v5831_v40 = vld [vmem:[%s16233_s11 + $0x50] sm:$0xff]  ;;  %v5826_v9 = vld [vmem:[%s16233_s11 + $0x28] sm:$0xff] }
0x1689   :  { %6176 = vmatpush1.msra.mxu0 %v5881_v17  ;;  %6289 = vmatpush1.msra.mxu1 %v5883_v33  ;;  %v5828_v17 = vld [vmem:[%s16233_s11 + $0x38] sm:$0xff]  ;;  %v5825_v33 = vld [vmem:[%s16233_s11 + $0x20] sm:$0xff] }
0x168a   :  { %6177 = vmatprep.subr.mxu0 %v5878_v52  ;;  %6290 = vmatprep.subr.mxu1 %v5880_v7  ;;  %v17474_v52 = vld [vmem:[#allocation69_spill] sm:$0xff]  ;;  %v5822_v7 = vld [vmem:[%s16233_s11 + $0x8] sm:$0xff] }
0x168b   :  { %6019 = vmatprep.mubr.f32.mxu0 %v17461_v60  ;;  %6132 = vmatprep.mubr.f32.mxu1 %v17461_v60 }
0x168c   :  { %6178 = vmatpush1.msra.mxu0 %v5877_v48  ;;  %6291 = vmatpush1.msra.mxu1 %v5879_v39  ;;  %v5824_v48 = vld [vmem:[%s16233_s11 + $0x18] sm:$0xff]  ;;  %v5821_v39 = vld [vmem:[%s16233_s11] sm:$0xff] }
0x168d   :  { %6020 = vmatmul.mubr.f32.gmra.mxu0 %v17468_v15  ;;  %6133 = vmatmul.mubr.f32.gmra.mxu1 %v17468_v15  ;;  %v14676_v15 = vld [vmem:[%s16234_s13 + $0x1f0] sm:$0xff] }
0x168e   :  { %6179 = vmatprep.subr.mxu0 %v5874_v29  ;;  %6292 = vmatprep.subr.mxu1 %v5876_v50  ;;  %v5823_v29 = vld [vmem:[%s16233_s11 + $0x10] sm:$0xff]  ;;  %v14660_v50 = vld [vmem:[%s16234_s13 + $0x1e8] sm:$0xff] }
0x168f   :  { %6180 = vmatpush1.msra.mxu0 %v5873_v18  ;;  %6293 = vmatpush1.msra.mxu1 %v5875_v5  ;;  %17475 = vst [vmem:[#allocation11_spill] sm:$0xff] %v14660_v50  ;;  %v14665_v18 = vld [vmem:[%s16234_s13 + $0x1f8] sm:$0xff]  ;;  %v14671_v5 = vld [vmem:[%s16234_s13 + $0x1e0] sm:$0xff] }
0x1690   :  { %6181 = vmatprep.subr.mxu0 %v5870_v44  ;;  %6294 = vmatprep.subr.mxu1 %v5872_v34  ;;  %17476 = vst [vmem:[#allocation66_spill] sm:$0xff] %v14665_v18  ;;  %v17477_v44 = vld [vmem:[#allocation62_spill] sm:$0xff] }
0x1691   :  { %6025 = vmatprep.mubr.f32.mxu0 %v17461_v60  ;;  %6138 = vmatprep.mubr.f32.mxu1 %v17461_v60  ;;  %v14683_v34 = vld [vmem:[%s16234_s13 + $0x1c8] sm:$0xff] }
0x1692   :  { %6182 = vmatpush1.msra.mxu0 %v5869_v31  ;;  %6295 = vmatpush1.msra.mxu1 %v5871_v37  ;;  %v14688_v31 = vld [vmem:[%s16234_s13 + $0x1d8] sm:$0xff]  ;;  %v14697_v37 = vld [vmem:[%s16234_s13 + $0x1c0] sm:$0xff] }
0x1693   :  { %6026 = vmatmul.mubr.f32.gmra.mxu0 %v17469_v46  ;;  %6139 = vmatmul.mubr.f32.gmra.mxu1 %v17469_v46  ;;  %v14728_v46 = vld [vmem:[%s16234_s13 + $0x1b0] sm:$0xff] }
0x1694   :  { %6183 = vmatprep.subr.mxu0 %v5866_v51  ;;  %6296 = vmatprep.subr.mxu1 %v5868_v27  ;;  %v14702_v51 = vld [vmem:[%s16234_s13 + $0x1d0] sm:$0xff]  ;;  %v14711_v27 = vld [vmem:[%s16234_s13 + $0x1a8] sm:$0xff] }
0x1695   :  { %6184 = vmatpush1.msra.mxu0 %v5865_v32  ;;  %6297 = vmatpush1.msra.mxu1 %v5867_v36  ;;  %v14716_v32 = vld [vmem:[%s16234_s13 + $0x1b8] sm:$0xff]  ;;  %v14723_v36 = vld [vmem:[%s16234_s13 + $0x1a0] sm:$0xff] }
0x1696   :  { %6185 = vmatprep.subr.mxu0 %v5862_v59  ;;  %6298 = vmatprep.subr.mxu1 %v5864_v53  ;;  %v17478_v59 = vld [vmem:[#allocation7_spill] sm:$0xff]  ;;  %v14735_v53 = vld [vmem:[%s16234_s13 + $0x188] sm:$0xff] }
0x1697   :  { %6031 = vmatprep.mubr.f32.mxu0 %v17461_v60  ;;  %6144 = vmatprep.mubr.f32.mxu1 %v17461_v60 }
0x1698   :  { %6186 = vmatpush1.msra.mxu0 %v5861_v20  ;;  %6299 = vmatpush1.msra.mxu1 %v5863_v42  ;;  %v14740_v20 = vld [vmem:[%s16234_s13 + $0x198] sm:$0xff]  ;;  %v14749_v42 = vld [vmem:[%s16234_s13 + $0x180] sm:$0xff] }
0x1699   :  { %6032 = vmatmul.mubr.f32.gmra.mxu0 %v17470_v62  ;;  %6145 = vmatmul.mubr.f32.gmra.mxu1 %v17470_v62  ;;  %v14780_v62 = vld [vmem:[%s16234_s13 + $0x170] sm:$0xff] }
0x169a   :  { %6187 = vmatprep.subr.mxu0 %v5858_v13  ;;  %6300 = vmatprep.subr.mxu1 %v5860_v47  ;;  %v14754_v13 = vld [vmem:[%s16234_s13 + $0x190] sm:$0xff]  ;;  %v14763_v47 = vld [vmem:[%s16234_s13 + $0x168] sm:$0xff]  ;;  %17482 = vst [vmem:[#allocation49_spill] sm:$0xff] %v14780_v62 }
0x169b   :  { %6188 = vmatpush1.msra.mxu0 %v5857_v26  ;;  %6301 = vmatpush1.msra.mxu1 %v5859_v21  ;;  %17479 = vst [vmem:[#allocation43_spill] sm:$0xff] %v14763_v47  ;;  %v14768_v26 = vld [vmem:[%s16234_s13 + $0x178] sm:$0xff]  ;;  %v14775_v21 = vld [vmem:[%s16234_s13 + $0x160] sm:$0xff] }
0x169c   :  { %6189 = vmatprep.subr.mxu0 %v5854_v10  ;;  %6302 = vmatprep.subr.mxu1 %v5856_v55  ;;  %17480 = vst [vmem:[#allocation39_spill] sm:$0xff] %v14768_v26  ;;  %17481 = vst [vmem:[#allocation12_spill] sm:$0xff] %v14775_v21  ;;  %v17483_v10 = vld [vmem:[#allocation32_spill] sm:$0xff]  ;;  %v14787_v55 = vld [vmem:[%s16234_s13 + $0x148] sm:$0xff] }
0x169d   :  { %6037 = vmatprep.mubr.f32.mxu0 %v17461_v60  ;;  %6150 = vmatprep.mubr.f32.mxu1 %v17461_v60  ;;  %17484 = vst [vmem:[#allocation33_spill] sm:$0xff] %v14787_v55 }
0x169e   :  { %6190 = vmatpush1.msra.mxu0 %v5853_v38  ;;  %6303 = vmatpush1.msra.mxu1 %v5855_v56  ;;  %v14792_v38 = vld [vmem:[%s16234_s13 + $0x158] sm:$0xff]  ;;  %v14801_v56 = vld [vmem:[%s16234_s13 + $0x140] sm:$0xff] }
0x169f   :  { %6038 = vmatmul.mubr.f32.gmra.mxu0 %v17471_v3  ;;  %6151 = vmatmul.mubr.f32.gmra.mxu1 %v17471_v3  ;;  %17485 = vst [vmem:[#allocation30_spill] sm:$0xff] %v14792_v38  ;;  %17486 = vst [vmem:[#allocation13_spill] sm:$0xff] %v14801_v56  ;;  %v14832_v3 = vld [vmem:[%s16234_s13 + $0x130] sm:$0xff] }
0x16a0   :  { %6191 = vmatprep.subr.mxu0 %v5850_v11  ;;  %6304 = vmatprep.subr.mxu1 %v5852_v6  ;;  %v14806_v11 = vld [vmem:[%s16234_s13 + $0x150] sm:$0xff]  ;;  %v14815_v6 = vld [vmem:[%s16234_s13 + $0x128] sm:$0xff]  ;;  %17491 = vst [vmem:[#allocation48_spill] sm:$0xff] %v14832_v3 }
0x16a1   :  { %6192 = vmatpush1.msra.mxu0 %v5849_v63  ;;  %6305 = vmatpush1.msra.mxu1 %v5851_v25  ;;  %17487 = vst [vmem:[#allocation47_spill] sm:$0xff] %v14806_v11  ;;  %17488 = vst [vmem:[#allocation31_spill] sm:$0xff] %v14815_v6  ;;  %v14820_v63 = vld [vmem:[%s16234_s13 + $0x138] sm:$0xff]  ;;  %v14827_v25 = vld [vmem:[%s16234_s13 + $0x120] sm:$0xff] }
0x16a2   :  { %6193 = vmatprep.subr.mxu0 %v5846_v49  ;;  %6306 = vmatprep.subr.mxu1 %v5848_v4  ;;  %17489 = vst [vmem:[#allocation44_spill] sm:$0xff] %v14820_v63  ;;  %17490 = vst [vmem:[#allocation14_spill] sm:$0xff] %v14827_v25  ;;  %v17492_v49 = vld [vmem:[#allocation8_spill] sm:$0xff]  ;;  %v14839_v4 = vld [vmem:[%s16234_s13 + $0x108] sm:$0xff] }
0x16a3   :  { %6043 = vmatprep.mubr.f32.mxu0 %v17461_v60  ;;  %6156 = vmatprep.mubr.f32.mxu1 %v17461_v60  ;;  %17493 = vst [vmem:[#allocation15_spill] sm:$0xff] %v14839_v4 }
0x16a4   :  { %6194 = vmatpush1.msra.mxu0 %v5845_v23  ;;  %6307 = vmatpush1.msra.mxu1 %v5847_v0  ;;  %v14844_v23 = vld [vmem:[%s16234_s13 + $0x118] sm:$0xff]  ;;  %v14853_v0 = vld [vmem:[%s16234_s13 + $0x100] sm:$0xff] }
0x16a5   :  { %6044 = vmatmul.mubr.f32.gmra.mxu0 %v17472_v8  ;;  %6157 = vmatmul.mubr.f32.gmra.mxu1 %v17472_v8  ;;  %17494 = vst [vmem:[#allocation53_spill] sm:$0xff] %v14844_v23  ;;  %17495 = vst [vmem:[#allocation65_spill] sm:$0xff] %v14853_v0  ;;  %v14884_v8 = vld [vmem:[%s16234_s13 + $0xf0] sm:$0xff] }
0x16a6   :  { %6195 = vmatprep.subr.mxu0 %v5842_v54  ;;  %6308 = vmatprep.subr.mxu1 %v5844_v45  ;;  %v14858_v54 = vld [vmem:[%s16234_s13 + $0x110] sm:$0xff]  ;;  %v14867_v45 = vld [vmem:[%s16234_s13 + $0xe8] sm:$0xff]  ;;  %17500 = vst [vmem:[#allocation18_spill] sm:$0xff] %v14884_v8 }
0x16a7   :  { %6196 = vmatpush1.msra.mxu0 %v5841_v16  ;;  %6309 = vmatpush1.msra.mxu1 %v5843_v43  ;;  %17496 = vst [vmem:[#allocation20_spill] sm:$0xff] %v14858_v54  ;;  %17497 = vst [vmem:[#allocation19_spill] sm:$0xff] %v14867_v45  ;;  %v14872_v16 = vld [vmem:[%s16234_s13 + $0xf8] sm:$0xff]  ;;  %v14879_v43 = vld [vmem:[%s16234_s13 + $0xe0] sm:$0xff] }
0x16a8   :  { %6197 = vmatprep.subr.mxu0 %v5838_v61  ;;  %6310 = vmatprep.subr.mxu1 %v5840_v1  ;;  %17498 = vst [vmem:[#allocation50_spill] sm:$0xff] %v14872_v16  ;;  %17499 = vst [vmem:[#allocation52_spill] sm:$0xff] %v14879_v43  ;;  %v17501_v61 = vld [vmem:[#allocation36_spill] sm:$0xff]  ;;  %v14891_v1 = vld [vmem:[%s16234_s13 + $0xc8] sm:$0xff] }
0x16a9   :  { %6049 = vmatprep.mubr.f32.mxu0 %v17461_v60  ;;  %6162 = vmatprep.mubr.f32.mxu1 %v17461_v60  ;;  %17502 = vst [vmem:[#allocation17_spill] sm:$0xff] %v14891_v1 }
0x16aa   :  { %6198 = vmatpush1.msra.mxu0 %v5837_v14  ;;  %6311 = vmatpush1.msra.mxu1 %v5839_v12  ;;  %v14896_v14 = vld [vmem:[%s16234_s13 + $0xd8] sm:$0xff]  ;;  %v14905_v12 = vld [vmem:[%s16234_s13 + $0xc0] sm:$0xff] }
0x16ab   :  { %6050 = vmatmul.mubr.f32.gmra.mxu0 %v17473_v35  ;;  %6163 = vmatmul.mubr.f32.gmra.mxu1 %v17473_v35  ;;  %17503 = vst [vmem:[#allocation25_spill] sm:$0xff] %v14896_v14  ;;  %17504 = vst [vmem:[#allocation21_spill] sm:$0xff] %v14905_v12  ;;  %v14936_v35 = vld [vmem:[%s16234_s13 + $0xb0] sm:$0xff] }
0x16ac   :  { %6199 = vmatprep.subr.mxu0 %v5834_v28  ;;  %6312 = vmatprep.subr.mxu1 %v5836_v57  ;;  %v14910_v28 = vld [vmem:[%s16234_s13 + $0xd0] sm:$0xff]  ;;  %v14919_v57 = vld [vmem:[%s16234_s13 + $0xa8] sm:$0xff]  ;;  %17509 = vst [vmem:[#allocation74_spill] sm:$0xff] %v14936_v35 }
0x16ad   :  { %6200 = vmatpush1.msra.mxu0 %v5833_v2  ;;  %6313 = vmatpush1.msra.mxu1 %v5835_v22  ;;  %17505 = vst [vmem:[#allocation70_spill] sm:$0xff] %v14910_v28  ;;  %17506 = vst [vmem:[#allocation71_spill] sm:$0xff] %v14919_v57  ;;  %v14924_v2 = vld [vmem:[%s16234_s13 + $0xb8] sm:$0xff]  ;;  %v14931_v22 = vld [vmem:[%s16234_s13 + $0xa0] sm:$0xff] }
0x16ae   :  { %6201 = vmatprep.subr.mxu0 %v5830_v24  ;;  %6314 = vmatprep.subr.mxu1 %v5832_v58  ;;  %17507 = vst [vmem:[#allocation72_spill] sm:$0xff] %v14924_v2  ;;  %17508 = vst [vmem:[#allocation73_spill] sm:$0xff] %v14931_v22  ;;  %v17510_v24 = vld [vmem:[#allocation34_spill] sm:$0xff] }
0x16af   :  { %6055 = vmatprep.mubr.f32.mxu0 %v17461_v60  ;;  %6168 = vmatprep.mubr.f32.mxu1 %v17461_v60  ;;  %v14943_v58 = vld [vmem:[%s16234_s13 + $0x88] sm:$0xff] }
0x16b0   :  { %6202 = vmatpush1.msra.mxu0 %v5829_v41  ;;  %6315 = vmatpush1.msra.mxu1 %v5831_v40  ;;  %17511 = vst [vmem:[#allocation75_spill] sm:$0xff] %v14943_v58  ;;  %v14948_v41 = vld [vmem:[%s16234_s13 + $0x98] sm:$0xff]  ;;  %v14957_v40 = vld [vmem:[%s16234_s13 + $0x80] sm:$0xff] }
0x16b1   :  { %6056 = vmatmul.mubr.f32.gmra.mxu0 %v17474_v52  ;;  %6169 = vmatmul.mubr.f32.gmra.mxu1 %v17474_v52  ;;  %17512 = vst [vmem:[#allocation76_spill] sm:$0xff] %v14948_v41  ;;  %17513 = vst [vmem:[#allocation77_spill] sm:$0xff] %v14957_v40  ;;  %v14988_v52 = vld [vmem:[%s16234_s13 + $0x70] sm:$0xff] }
0x16b2   :  { %6203 = vmatprep.subr.mxu0 %v5826_v9  ;;  %6316 = vmatprep.subr.mxu1 %v5828_v17  ;;  %v14962_v9 = vld [vmem:[%s16234_s13 + $0x90] sm:$0xff]  ;;  %v14971_v17 = vld [vmem:[%s16234_s13 + $0x68] sm:$0xff]  ;;  %17518 = vst [vmem:[#allocation80_spill] sm:$0xff] %v14988_v52 }
0x16b3   :  { %6204 = vmatpush1.msra.mxu0 %v5825_v33  ;;  %6317 = vmatpush1.msra.mxu1 %v5827_v30  ;;  %17514 = vst [vmem:[#allocation78_spill] sm:$0xff] %v14962_v9  ;;  %17515 = vst [vmem:[#allocation79_spill] sm:$0xff] %v14971_v17  ;;  %v14976_v33 = vld [vmem:[%s16234_s13 + $0x78] sm:$0xff]  ;;  %v14983_v30 = vld [vmem:[%s16234_s13 + $0x60] sm:$0xff] }
0x16b4   :  { %6205 = vmatprep.subr.mxu0 %v5822_v7  ;;  %6318 = vmatprep.subr.mxu1 %v5824_v48  ;;  %17516 = vst [vmem:[#allocation81_spill] sm:$0xff] %v14976_v33  ;;  %17517 = vst [vmem:[#allocation82_spill] sm:$0xff] %v14983_v30  ;;  %v17519_v7 = vld [vmem:[#allocation35_spill] sm:$0xff]  ;;  %v14995_v48 = vld [vmem:[%s16234_s13 + $0x48] sm:$0xff] }
0x16b5   :  { %6206 = vmatpush1.msra.mxu0 %v5821_v39  ;;  %6239 = vmatprep.mubr.f32.mxu0 %v17461_v60  ;;  %17520 = vst [vmem:[#allocation83_spill] sm:$0xff] %v14995_v48  ;;  %v15000_v39 = vld [vmem:[%s16234_s13 + $0x58] sm:$0xff] }
0x16b6   :  { %6319 = vmatpush1.msra.mxu1 %v5823_v29  ;;  %6352 = vmatprep.mubr.f32.mxu1 %v17461_v60  ;;  %17521 = vst [vmem:[#allocation85_spill] sm:$0xff] %v15000_v39  ;;  %v15009_v29 = vld [vmem:[%s16234_s13 + $0x40] sm:$0xff] }
0x16b7   :  { %6240 = vmatmul.mubr.f32.vlgmr.msra.gmra.mxu0 %v17477_v44  ;;  %6353 = vmatmul.mubr.f32.vlgmr.msra.gmra.mxu1 %v17477_v44  ;;  %17522 = vst [vmem:[#allocation86_spill] sm:$0xff] %v15009_v29  ;;  %v15014_v44 = vld [vmem:[%s16234_s13 + $0x50] sm:$0xff] }
0x16b8   :  { %6555 = vmatprep.subr.mxu0 %v14660_v50  ;;  %6626 = vmatprep.subr.mxu1 %v14665_v18  ;;  %17523 = vst [vmem:[#allocation84_spill] sm:$0xff] %v15014_v44 }
0x16b9   :  { %6556 = vmatpush1.msra.mxu0 %v14671_v5  ;;  %6627 = vmatpush1.msra.mxu1 %v14676_v15 }
0x16ba   :  { %6557 = vmatprep.subr.mxu0 %v14683_v34  ;;  %6628 = vmatprep.subr.mxu1 %v14688_v31 }
0x16bb   :  { %6245 = vmatprep.mubr.f32.mxu0 %v17461_v60  ;;  %6358 = vmatprep.mubr.f32.mxu1 %v17461_v60 }
0x16bc   :  { %6558 = vmatpush1.msra.mxu0 %v14697_v37  ;;  %6629 = vmatpush1.msra.mxu1 %v14702_v51 }
0x16bd   :  { %6246 = vmatmul.mubr.f32.gmra.mxu0 %v17478_v59  ;;  %6359 = vmatmul.mubr.f32.gmra.mxu1 %v17478_v59  ;;  %v15023_v59 = vld [vmem:[%s16234_s13 + $0x28] sm:$0xff] }
0x16be   :  { %6559 = vmatprep.subr.mxu0 %v14711_v27  ;;  %6630 = vmatprep.subr.mxu1 %v14716_v32  ;;  %17524 = vst [vmem:[#allocation87_spill] sm:$0xff] %v15023_v59 }
0x16bf   :  { %6560 = vmatpush1.msra.mxu0 %v14723_v36  ;;  %6631 = vmatpush1.msra.mxu1 %v14728_v46 }
0x16c0   :  { %6561 = vmatprep.subr.mxu0 %v14735_v53  ;;  %6632 = vmatprep.subr.mxu1 %v14740_v20 }
0x16c1   :  { %6251 = vmatprep.mubr.f32.mxu0 %v17461_v60  ;;  %6364 = vmatprep.mubr.f32.mxu1 %v17461_v60 }
0x16c2   :  { %6562 = vmatpush1.msra.mxu0 %v14749_v42  ;;  %6633 = vmatpush1.msra.mxu1 %v14754_v13 }
0x16c3   :  { %6252 = vmatmul.mubr.f32.gmra.mxu0 %v17483_v10  ;;  %6365 = vmatmul.mubr.f32.gmra.mxu1 %v17483_v10  ;;  %v15028_v10 = vld [vmem:[%s16234_s13 + $0x38] sm:$0xff] }
0x16c4   :  { %6563 = vmatprep.subr.mxu0 %v14763_v47  ;;  %6634 = vmatprep.subr.mxu1 %v14768_v26  ;;  %17525 = vst [vmem:[#allocation89_spill] sm:$0xff] %v15028_v10 }
0x16c5   :  { %6564 = vmatpush1.msra.mxu0 %v14775_v21  ;;  %6635 = vmatpush1.msra.mxu1 %v14780_v62 }
0x16c6   :  { %6565 = vmatprep.subr.mxu0 %v14787_v55  ;;  %6636 = vmatprep.subr.mxu1 %v14792_v38 }
0x16c7   :  { %6257 = vmatprep.mubr.f32.mxu0 %v17461_v60  ;;  %6370 = vmatprep.mubr.f32.mxu1 %v17461_v60 }
0x16c8   :  { %6566 = vmatpush1.msra.mxu0 %v14801_v56  ;;  %6637 = vmatpush1.msra.mxu1 %v14806_v11 }
0x16c9   :  { %6258 = vmatmul.mubr.f32.gmra.mxu0 %v17492_v49  ;;  %6371 = vmatmul.mubr.f32.gmra.mxu1 %v17492_v49  ;;  %v15035_v49 = vld [vmem:[%s16234_s13 + $0x20] sm:$0xff] }
0x16ca   :  { %6567 = vmatprep.subr.mxu0 %v14815_v6  ;;  %6638 = vmatprep.subr.mxu1 %v14820_v63  ;;  %17526 = vst [vmem:[#allocation90_spill] sm:$0xff] %v15035_v49 }
0x16cb   :  { %6568 = vmatpush1.msra.mxu0 %v14827_v25  ;;  %6639 = vmatpush1.msra.mxu1 %v14832_v3 }
0x16cc   :  { %6569 = vmatprep.subr.mxu0 %v14839_v4  ;;  %6640 = vmatprep.subr.mxu1 %v14844_v23 }
0x16cd   :  { %6263 = vmatprep.mubr.f32.mxu0 %v17461_v60  ;;  %6376 = vmatprep.mubr.f32.mxu1 %v17461_v60 }
0x16ce   :  { %6570 = vmatpush1.msra.mxu0 %v14853_v0  ;;  %6641 = vmatpush1.msra.mxu1 %v14858_v54 }
0x16cf   :  { %6264 = vmatmul.mubr.f32.gmra.mxu0 %v17501_v61  ;;  %6377 = vmatmul.mubr.f32.gmra.mxu1 %v17501_v61  ;;  %v15040_v61 = vld [vmem:[%s16234_s13 + $0x30] sm:$0xff] }
0x16d0   :  { %6571 = vmatprep.subr.mxu0 %v14867_v45  ;;  %6642 = vmatprep.subr.mxu1 %v14872_v16  ;;  %17527 = vst [vmem:[#allocation88_spill] sm:$0xff] %v15040_v61 }
0x16d1   :  { %6572 = vmatpush1.msra.mxu0 %v14879_v43  ;;  %6643 = vmatpush1.msra.mxu1 %v14884_v8 }
0x16d2   :  { %6573 = vmatprep.subr.mxu0 %v14891_v1  ;;  %6644 = vmatprep.subr.mxu1 %v14896_v14 }
0x16d3   :  { %6269 = vmatprep.mubr.f32.mxu0 %v17461_v60  ;;  %6382 = vmatprep.mubr.f32.mxu1 %v17461_v60 }
0x16d4   :  { %6574 = vmatpush1.msra.mxu0 %v14905_v12  ;;  %6645 = vmatpush1.msra.mxu1 %v14910_v28 }
0x16d5   :  { %6270 = vmatmul.mubr.f32.gmra.mxu0 %v17510_v24  ;;  %6383 = vmatmul.mubr.f32.gmra.mxu1 %v17510_v24  ;;  %v17528_v24 = vld [vmem:[#allocation58_spill] sm:$0xff] }
0x16d6   :  { %6575 = vmatprep.subr.mxu0 %v14919_v57  ;;  %6646 = vmatprep.subr.mxu1 %v14924_v2 }
0x16d7   :  { %6576 = vmatpush1.msra.mxu0 %v14931_v22  ;;  %6647 = vmatpush1.msra.mxu1 %v14936_v35 }
0x16d8   :  { %6577 = vmatprep.subr.mxu0 %v14943_v58  ;;  %6648 = vmatprep.subr.mxu1 %v14948_v41 }
0x16d9   :  { %6275 = vmatprep.mubr.f32.mxu0 %v17461_v60  ;;  %6388 = vmatprep.mubr.f32.mxu1 %v17461_v60 }
0x16da   :  { %6578 = vmatpush1.msra.mxu0 %v14957_v40  ;;  %6649 = vmatpush1.msra.mxu1 %v14962_v9 }
0x16db   :  { %6276 = vmatmul.mubr.f32.gmra.mxu0 %v17519_v7  ;;  %6389 = vmatmul.mubr.f32.gmra.mxu1 %v17519_v7  ;;  %v15047_v7 = vld [vmem:[%s16234_s13 + $0x8] sm:$0xff] }
0x16dc   :  { %6579 = vmatprep.subr.mxu0 %v14971_v17  ;;  %6650 = vmatprep.subr.mxu1 %v14976_v33  ;;  %17529 = vst [vmem:[#allocation64_spill] sm:$0xff] %v15047_v7 }
0x16dd   :  { %6580 = vmatpush1.msra.mxu0 %v14983_v30  ;;  %6651 = vmatpush1.msra.mxu1 %v14988_v52 }
0x16de   :  { %6581 = vmatprep.subr.mxu0 %v14995_v48  ;;  %6652 = vmatprep.subr.mxu1 %v15000_v39 }
0x16df   :  { %6281 = vmatprep.mubr.f32.mxu0 %v17461_v60  ;;  %6394 = vmatprep.mubr.f32.mxu1 %v17461_v60 }
0x16e0   :  { %6582 = vmatpush1.msra.mxu0 %v15009_v29  ;;  %6653 = vmatpush1.msra.mxu1 %v15014_v44  ;;  %v15059_v44 = vld [vmem:[%s16234_s13] sm:$0xff] }
0x16e1   :  { %6282 = vmatmul.mubr.f32.gmra.mxu0 %v17528_v24  ;;  %6395 = vmatmul.mubr.f32.gmra.mxu1 %v17528_v24  ;;  %17531 = vst [vmem:[#allocation91_spill] sm:$0xff] %v15059_v44  ;;  %v15066_v24 = vld [vmem:[%s16234_s13 + $0x10] sm:$0xff] }
0x16e2   :  { %6583 = vmatprep.subr.mxu0 %v15023_v59  ;;  %6654 = vmatprep.subr.mxu1 %v15028_v10  ;;  %17532 = vst [vmem:[#allocation93_spill] sm:$0xff] %v15066_v24 }
0x16e3   :  { %6584 = vmatpush1.msra.mxu0 %v15035_v49  ;;  %6655 = vmatpush1.msra.mxu1 %v15040_v61 }
0x16e4   :  { %6585 = vmatprep.subr.mxu0 %v15047_v7  ;;  %6656 = vmatprep.subr.mxu1 %v15052_v19 }
0x16e5   :  { %6586 = vmatpush1.msra.mxu0 %v15059_v44  ;;  %6619 = vmatprep.mubr.f32.mxu0 %v17461_v60 }
0x16e6   :  { %6657 = vmatpush1.msra.mxu1 %v15066_v24  ;;  %6690 = vmatprep.mubr.f32.mxu1 %v17461_v60 }
0x16e7   :  { %6620 = vmatmul.mubr.f32.vlgmr.msra.gmra.mxu0 %v17461_v60  ;;  %6691 = vmatmul.mubr.f32.vlgmr.msra.gmra.mxu1 %v17461_v60 }
0x16e8   :  { %6729 = vmatprep.subr.mxu0 %v14660_v50  ;;  %6800 = vmatprep.subr.mxu1 %v14665_v18 }
0x16e9   :  { %6730 = vmatpush1.msra.mxu0 %v14671_v5  ;;  %6801 = vmatpush1.msra.mxu1 %v14676_v15 }
0x16ea   :  { %6731 = vmatprep.subr.mxu0 %v14683_v34  ;;  %6802 = vmatprep.subr.mxu1 %v14688_v31 }
0x16eb   :  { %6732 = vmatpush1.msra.mxu0 %v14697_v37  ;;  %6803 = vmatpush1.msra.mxu1 %v14702_v51 }
0x16ec   :  { %6733 = vmatprep.subr.mxu0 %v14711_v27  ;;  %6804 = vmatprep.subr.mxu1 %v14716_v32 }
0x16ed   :  { %6734 = vmatpush1.msra.mxu0 %v14723_v36  ;;  %6805 = vmatpush1.msra.mxu1 %v14728_v46 }
0x16ee   :  { %6735 = vmatprep.subr.mxu0 %v14735_v53  ;;  %6806 = vmatprep.subr.mxu1 %v14740_v20 }
0x16ef   :  { %6736 = vmatpush1.msra.mxu0 %v14749_v42  ;;  %6807 = vmatpush1.msra.mxu1 %v14754_v13 }
0x16f0   :  { %6737 = vmatprep.subr.mxu0 %v14763_v47  ;;  %6808 = vmatprep.subr.mxu1 %v14768_v26 }
0x16f1   :  { %6738 = vmatpush1.msra.mxu0 %v14775_v21  ;;  %6809 = vmatpush1.msra.mxu1 %v14780_v62 }
0x16f2   :  { %6739 = vmatprep.subr.mxu0 %v14787_v55  ;;  %6810 = vmatprep.subr.mxu1 %v14792_v38 }
0x16f3   :  { %6740 = vmatpush1.msra.mxu0 %v14801_v56  ;;  %6811 = vmatpush1.msra.mxu1 %v14806_v11  ;;  %v17543_v56 = vld [vmem:[#allocation60_spill] sm:$0xff] }
0x16f4   :  { %6741 = vmatprep.subr.mxu0 %v14815_v6  ;;  %6812 = vmatprep.subr.mxu1 %v14820_v63  ;;  %v17542_v6 = vld [vmem:[#allocation54_spill] sm:$0xff] }
0x16f5   :  { %6742 = vmatpush1.msra.mxu0 %v14827_v25  ;;  %6813 = vmatpush1.msra.mxu1 %v14832_v3 }
0x16f6   :  { %6743 = vmatprep.subr.mxu0 %v14839_v4  ;;  %6814 = vmatprep.subr.mxu1 %v14844_v23 }
0x16f7   :  { %6744 = vmatpush1.msra.mxu0 %v14853_v0  ;;  %6815 = vmatpush1.msra.mxu1 %v14858_v54  ;;  %v17541_v0 = vld [vmem:[#allocation29_spill] sm:$0xff] }
0x16f8   :  { %6745 = vmatprep.subr.mxu0 %v14867_v45  ;;  %6816 = vmatprep.subr.mxu1 %v14872_v16  ;;  %v6401_v16 = vld [vmem:[%s16235_s14] sm:$0xf]  ;;  %v17540_v45 = vld [vmem:[#allocation28_spill] sm:$0xff] }
0x16f9   :  { %6746 = vmatpush1.msra.mxu0 %v14879_v43  ;;  %6817 = vmatpush1.msra.mxu1 %v14884_v8  ;;  %v15195_v54 = vrot.slane %v6401_v16, %v17540_v45  ;;  %v15198_v23 = vrot.slane %v6401_v16, %v17541_v0  ;;  %v15201_v11 = vrot.slane %v6401_v16, %v17542_v6 }
0x16fa   :  { %6747 = vmatprep.subr.mxu0 %v14891_v1  ;;  %6818 = vmatprep.subr.mxu1 %v14896_v14  ;;  %v15204_v38 = vrot.slane %v6401_v16, %v17543_v56 }
0x16fb   :  { %6748 = vmatpush1.msra.mxu0 %v14905_v12  ;;  %6819 = vmatpush1.msra.mxu1 %v14910_v28 }
0x16fc   :  { %6749 = vmatprep.subr.mxu0 %v14919_v57  ;;  %6820 = vmatprep.subr.mxu1 %v14924_v2 }
0x16fd   :  { %6750 = vmatpush1.msra.mxu0 %v14931_v22  ;;  %6821 = vmatpush1.msra.mxu1 %v14936_v35 }
0x16fe   :  { %6751 = vmatprep.subr.mxu0 %v14943_v58  ;;  %6822 = vmatprep.subr.mxu1 %v14948_v41  ;;  %v17533_v58 = vld [vmem:[#allocation84_spill] sm:$0xff] }
0x16ff   :  { %6752 = vmatpush1.msra.mxu0 %v14957_v40  ;;  %6823 = vmatpush1.msra.mxu1 %v14962_v9 }
0x1700   :  { %6753 = vmatprep.subr.mxu0 %v14971_v17  ;;  %6824 = vmatprep.subr.mxu1 %v14976_v33 }
0x1701   :  { %6754 = vmatpush1.msra.mxu0 %v14983_v30  ;;  %6825 = vmatpush1.msra.mxu1 %v14988_v52  ;;  %v17537_v52 = vld [vmem:[#allocation102_spill] sm:$0xff] }
0x1702   :  { %6755 = vmatprep.subr.mxu0 %v14995_v48  ;;  %6826 = vmatprep.subr.mxu1 %v15000_v39 }
0x1703   :  { %6756 = vmatpush1.msra.mxu0 %v15009_v29  ;;  %6827 = vmatpush1.msra.mxu1 %v17533_v58  ;;  %v17535_v58 = vld [vmem:[#allocation100_spill] sm:$0xff] }
0x1704   :  { %6757 = vmatprep.subr.mxu0 %v15023_v59  ;;  %6828 = vmatprep.subr.mxu1 %v15028_v10  ;;  %v17534_v59 = vld [vmem:[#allocation99_spill] sm:$0xff] }
0x1705   :  { %6758 = vmatpush1.msra.mxu0 %v15035_v49  ;;  %6829 = vmatpush1.msra.mxu1 %v15040_v61 }
0x1706   :  { %6759 = vmatprep.subr.mxu0 %v15047_v7  ;;  %6830 = vmatprep.subr.mxu1 %v15052_v19 }
0x1707   :  { %6760 = vmatpush1.msra.mxu0 %v15059_v44  ;;  %6793 = vmatprep.mubr.f32.mxu0 %v17461_v60  ;;  %v17536_v44 = vld [vmem:[#allocation101_spill] sm:$0xff] }
0x1708   :  { %6831 = vmatpush1.msra.mxu1 %v15066_v24  ;;  %6864 = vmatprep.mubr.f32.mxu1 %v17461_v60 }
0x1709   :  { %6903 = vmatprep.subr.mxu0 %v14660_v50  ;;  %6974 = vmatprep.subr.mxu1 %v14665_v18 }
0x1726   :  { %v5717_v10 = vpop.f32.mrf.mxu0  ;;  %v5788_v49 = vpop.f32.mrf.mxu1 }
0x1727   :  { %v5793_v61 = vadd.f32 %v5717_v10, %v17534_v59  ;;  %v5795_v7 = vadd.f32 %v5788_v49, %v17535_v58 }
0x1728   :  { %v5719_v29 = vpop.f32.mrf.mxu0  ;;  %v5790_v19 = vpop.f32.mrf.mxu1 }
0x1729   :  { %v8203_v39 = vmul.f32 -1.442695, %v5793_v61  ;;  %v5794_v48 = vadd.f32 %v5719_v29, %v17536_v44  ;;  %v5796_v30 = vadd.f32 %v5790_v19, %v17537_v52 }
0x172b   :  { %8706 = vpow2.f32 %v8203_v39  ;;  %v8204_v24 = vmul.f32 -1.442695, %v5794_v48  ;;  %v8205_v60 = vmul.f32 -1.442695, %v5796_v30  ;;  %v17538_v39 = vld [vmem:[#allocation67_spill] sm:$0xff] }
0x172d   :  { %8708 = vpow2.f32 %v8204_v24 }
0x172e   :  { %8710 = vtanh.f32 %v5795_v7 }
0x172f   :  { %8712 = vpow2.f32 %v8205_v60 }
0x1738   :  { %v8707_v50 = vpop.eup %8706 }
0x1739   :  { %v5800_v33 = vadd.f32 1.0, %v8707_v50 }
0x173a   :  { %v8709_v18 = vpop.eup %8708 }
0x173b   :  { %8714 = vrcp.f32 %v5800_v33  ;;  %v5806_v59 = vadd.f32 1.0, %v8709_v18  ;;  %v8711_v58 = vpop.eup %8710 }
0x173c   :  { %v8713_v10 = vpop.eup %8712 }
0x173d   :  { %8716 = vrcp.f32 %v5806_v59  ;;  %v5813_v48 = vadd.f32 1.0, %v8713_v10 }
0x173f   :  { %8718 = vrcp.f32 %v5813_v48 }
0x1747   :  { %v6015_v49 = vpop.f32.mrf.mxu0  ;;  %v6128_v61 = vpop.f32.mrf.mxu1 }
0x1748   :  { %v8715_v17 = vpop.eup %8714 }
0x1749   :  { %v5817_v29 = vmul.f32 %v8715_v17, %v8711_v58  ;;  %v6017_v44 = vpop.f32.mrf.mxu0  ;;  %v6130_v19 = vpop.f32.mrf.mxu1 }
0x174a   :  { %v8717_v52 = vpop.eup %8716 }
0x174b   :  { %v5816_v30 = vmul.f32 %v8717_v52, %v17538_v39 }
0x174c   :  { %v8719_v58 = vpop.eup %8718 }
0x174d   :  { %v5818_v24 = vadd.f32 %v5817_v29, %v5816_v30  ;;  %v6021_v50 = vpop.f32.mrf.mxu0  ;;  %v6134_v7 = vpop.f32.mrf.mxu1 }
0x174f   :  { %8720 = vtanh.f32 %v5818_v24  ;;  %v6023_v60 = vpop.f32.mrf.mxu0  ;;  %v6136_v18 = vpop.f32.mrf.mxu1 }
0x1753   :  { %v6027_v33 = vpop.f32.mrf.mxu0  ;;  %v6140_v59 = vpop.f32.mrf.mxu1 }
0x1755   :  { %v6029_v9 = vpop.f32.mrf.mxu0  ;;  %v6142_v40 = vpop.f32.mrf.mxu1 }
0x1759   :  { %v15149_v41 = vpop.f32.mrf.mxu0  ;;  %v15151_v17 = vpop.f32.mrf.mxu1 }
0x175b   :  { %v15153_v35 = vpop.f32.mrf.mxu0  ;;  %v15155_v10 = vpop.f32.mrf.mxu1 }
0x175c   :  { %v8721_v29 = vpop.eup %8720 }
0x175d   :  { %v15157_v52 = vmul.f32 %v8721_v29, %v8719_v58 }
0x175f   :  { %17539 = vst [vmem:[#allocation94_spill] sm:$0xff] %v15157_v52  ;;  %v15159_v48 = vpop.f32.mrf.mxu0  ;;  %v15161_v39 = vpop.f32.mrf.mxu1 }
0x1761   :  { %v15163_v30 = vpop.f32.mrf.mxu0  ;;  %v15165_v24 = vpop.f32.mrf.mxu1 }
0x1765   :  { %v15167_v22 = vpop.f32.mrf.mxu0  ;;  %v15169_v2 = vpop.f32.mrf.mxu1 }
0x1767   :  { %v15171_v57 = vpop.f32.mrf.mxu0  ;;  %v15173_v28 = vpop.f32.mrf.mxu1 }
0x176b   :  { %v15175_v12 = vpop.f32.mrf.mxu0  ;;  %v15177_v58 = vpop.f32.mrf.mxu1 }
0x176d   :  { %v15179_v29 = vpop.f32.mrf.mxu0  ;;  %v15181_v52 = vpop.f32.mrf.mxu1 }
0x1771   :  { %v15183_v14 = vpop.f32.mrf.mxu0  ;;  %v15185_v1 = vpop.f32.mrf.mxu1 }
0x1773   :  { %v15187_v8 = vpop.f32.mrf.mxu0  ;;  %v15189_v43 = vpop.f32.mrf.mxu1 }
0x1777   :  { %v6241_v4 = vpop.f32.mrf.mxu0  ;;  %v6354_v3 = vpop.f32.mrf.mxu1 }
0x1778   :  { %v6242_v25 = vadd.f32 %v6241_v4, %v6015_v49  ;;  %v6355_v63 = vadd.f32 %v6354_v3, %v6128_v61 }
0x1779   :  { %v6243_v55 = vpop.f32.mrf.mxu0  ;;  %v6356_v62 = vpop.f32.mrf.mxu1 }
0x177a   :  { %v6244_v21 = vadd.f32 %v6243_v55, %v6017_v44  ;;  %v6357_v26 = vadd.f32 %v6356_v62, %v6130_v19  ;;  %v15207_v45 = vadd.f32 %v15195_v54, %v6242_v25  ;;  %v15210_v0 = vadd.f32 %v15198_v23, %v6355_v63 }
0x177c   :  { %17544 = vst [vmem:[#allocation92_spill] sm:$0xff] %v15207_v45  ;;  %17545 = vst [vmem:[#allocation5_spill] sm:$0xff] %v15210_v0  ;;  %v15213_v47 = vadd.f32 %v15201_v11, %v6244_v21  ;;  %v15216_v3 = vadd.f32 %v15204_v38, %v6357_v26  ;;  %v17608_v45 = vld [vmem:[#allocation87_spill] sm:$0xff] }
0x177d   :  { %v6247_v6 = vpop.f32.mrf.mxu0  ;;  %v6360_v4 = vpop.f32.mrf.mxu1 }
0x177e   :  { %17546 = vst [vmem:[#allocation63_spill] sm:$0xff] %v15213_v47  ;;  %17547 = vst [vmem:[#allocation37_spill] sm:$0xff] %v15216_v3  ;;  %v6248_v56 = vadd.f32 %v6247_v6, %v6021_v50  ;;  %v6361_v16 = vadd.f32 %v6360_v4, %v6134_v7  ;;  %v17607_v47 = vld [vmem:[#allocation84_spill] sm:$0xff] }
0x177f   :  { %v6249_v49 = vpop.f32.mrf.mxu0  ;;  %v6362_v61 = vpop.f32.mrf.mxu1 }
0x1780   :  { %v6250_v55 = vadd.f32 %v6249_v49, %v6023_v60  ;;  %v6363_v62 = vadd.f32 %v6362_v61, %v6136_v18  ;;  %v15219_v25 = vadd.f32 %v15195_v54, %v6248_v56  ;;  %v15222_v63 = vadd.f32 %v15198_v23, %v6361_v16 }
0x1782   :  { %17548 = vst [vmem:[#allocation26_spill] sm:$0xff] %v15219_v25  ;;  %17549 = vst [vmem:[#allocation24_spill] sm:$0xff] %v15222_v63  ;;  %v15225_v21 = vadd.f32 %v15201_v11, %v6250_v55  ;;  %v15228_v26 = vadd.f32 %v15204_v38, %v6363_v62  ;;  %v17609_v63 = vld [vmem:[#allocation89_spill] sm:$0xff]  ;;  %v17612_v25 = vld [vmem:[#allocation64_spill] sm:$0xff] }
0x1783   :  { %v6253_v44 = vpop.f32.mrf.mxu0  ;;  %v6366_v19 = vpop.f32.mrf.mxu1 }
0x1784   :  { %17550 = vst [vmem:[#allocation59_spill] sm:$0xff] %v15225_v21  ;;  %17551 = vst [vmem:[#allocation61_spill] sm:$0xff] %v15228_v26  ;;  %v6254_v50 = vadd.f32 %v6253_v44, %v6027_v33  ;;  %v6367_v7 = vadd.f32 %v6366_v19, %v6140_v59  ;;  %v17610_v26 = vld [vmem:[#allocation90_spill] sm:$0xff]  ;;  %v17611_v21 = vld [vmem:[#allocation88_spill] sm:$0xff] }
0x1785   :  { %v6255_v6 = vpop.f32.mrf.mxu0  ;;  %v6368_v4 = vpop.f32.mrf.mxu1 }
0x1786   :  { %v6256_v60 = vadd.f32 %v6255_v6, %v6029_v9  ;;  %v6369_v18 = vadd.f32 %v6368_v4, %v6142_v40  ;;  %v15231_v56 = vadd.f32 %v15195_v54, %v6254_v50  ;;  %v15234_v16 = vadd.f32 %v15198_v23, %v6367_v7 }
0x1788   :  { %17552 = vst [vmem:[#allocation38_spill] sm:$0xff] %v15231_v56  ;;  %17553 = vst [vmem:[#allocation9_spill] sm:$0xff] %v15234_v16  ;;  %v15237_v49 = vadd.f32 %v15201_v11, %v6256_v60  ;;  %v15240_v61 = vadd.f32 %v15204_v38, %v6369_v18  ;;  %v17613_v16 = vld [vmem:[#allocation6_spill] sm:$0xff]  ;;  %v17616_v56 = vld [vmem:[#allocation93_spill] sm:$0xff] }
0x1789   :  { %v6259_v55 = vpop.f32.mrf.mxu0  ;;  %v6372_v62 = vpop.f32.mrf.mxu1 }
0x178a   :  { %17554 = vst [vmem:[#allocation23_spill] sm:$0xff] %v15237_v49  ;;  %17555 = vst [vmem:[#allocation22_spill] sm:$0xff] %v15240_v61  ;;  %v6260_v33 = vadd.f32 %v6259_v55, %v15149_v41  ;;  %v6373_v59 = vadd.f32 %v6372_v62, %v15151_v17  ;;  %v17614_v61 = vld [vmem:[#allocation91_spill] sm:$0xff]  ;;  %v17615_v49 = vmov 0.0  }
0x178b   :  { %v6261_v9 = vpop.f32.mrf.mxu0  ;;  %v6374_v40 = vpop.f32.mrf.mxu1 }
0x178c   :  { %v6262_v44 = vadd.f32 %v6261_v9, %v15153_v35  ;;  %v6375_v19 = vadd.f32 %v6374_v40, %v15155_v10  ;;  %v15247_v50 = vadd.f32 %v15195_v54, %v6260_v33  ;;  %v15250_v7 = vadd.f32 %v15198_v23, %v6373_v59 }
0x178e   :  { %17556 = vst [vmem:[#allocation55_spill] sm:$0xff] %v15247_v50  ;;  %17557 = vst [vmem:[#allocation57_spill] sm:$0xff] %v15250_v7  ;;  %v15253_v6 = vadd.f32 %v15201_v11, %v6262_v44  ;;  %v15256_v4 = vadd.f32 %v15204_v38, %v6375_v19  ;;  %v17617_v7 = vld [vmem:[#allocation11_spill] sm:$0xff] }
0x178f   :  { %v6265_v41 = vpop.f32.mrf.mxu0  ;;  %v6378_v17 = vpop.f32.mrf.mxu1 }
0x1790   :  { %17558 = vst [vmem:[#allocation56_spill] sm:$0xff] %v15253_v6  ;;  %17559 = vst [vmem:[#allocation10_spill] sm:$0xff] %v15256_v4  ;;  %v6266_v60 = vadd.f32 %v6265_v41, %v15159_v48  ;;  %v6379_v35 = vadd.f32 %v6378_v17, %v15161_v39  ;;  %v17618_v4 = vld [vmem:[#allocation66_spill] sm:$0xff] }
0x1791   :  { %v6267_v18 = vpop.f32.mrf.mxu0  ;;  %v6380_v10 = vpop.f32.mrf.mxu1 }
0x1792   :  { %v6268_v55 = vadd.f32 %v6267_v18, %v15163_v30  ;;  %v6381_v62 = vadd.f32 %v6380_v10, %v15165_v24  ;;  %v15263_v33 = vadd.f32 %v15195_v54, %v6266_v60  ;;  %v15266_v59 = vadd.f32 %v15198_v23, %v6379_v35 }
0x1794   :  { %17560 = vst [vmem:[#allocation68_spill] sm:$0xff] %v15263_v33  ;;  %17561 = vst [vmem:[#allocation45_spill] sm:$0xff] %v15266_v59  ;;  %v15269_v9 = vadd.f32 %v15201_v11, %v6268_v55  ;;  %v15272_v40 = vadd.f32 %v15204_v38, %v6381_v62 }
0x1795   :  { %v6271_v48 = vpop.f32.mrf.mxu0  ;;  %v6384_v39 = vpop.f32.mrf.mxu1 }
0x1796   :  { %17562 = vst [vmem:[#allocation95_spill] sm:$0xff] %v15269_v9  ;;  %17563 = vst [vmem:[#allocation97_spill] sm:$0xff] %v15272_v40  ;;  %v6272_v44 = vadd.f32 %v6271_v48, %v15167_v22  ;;  %v6385_v30 = vadd.f32 %v6384_v39, %v15169_v2 }
0x1797   :  { %v6273_v19 = vpop.f32.mrf.mxu0  ;;  %v6386_v24 = vpop.f32.mrf.mxu1 }
0x1798   :  { %v6274_v41 = vadd.f32 %v6273_v19, %v15171_v57  ;;  %v6387_v17 = vadd.f32 %v6386_v24, %v15173_v28  ;;  %v15279_v60 = vadd.f32 %v15195_v54, %v6272_v44  ;;  %v15282_v35 = vadd.f32 %v15198_v23, %v6385_v30 }
0x179a   :  { %17564 = vst [vmem:[#allocation98_spill] sm:$0xff] %v15279_v60  ;;  %17565 = vst [vmem:[#allocation96_spill] sm:$0xff] %v15282_v35  ;;  %v15285_v18 = vadd.f32 %v15201_v11, %v6274_v41  ;;  %v15288_v10 = vadd.f32 %v15204_v38, %v6387_v17 }
0x179b   :  { %v6277_v22 = vpop.f32.mrf.mxu0  ;;  %v6390_v2 = vpop.f32.mrf.mxu1 }
0x179c   :  { %17566 = vst [vmem:[#allocation51_spill] sm:$0xff] %v15285_v18  ;;  %17567 = vst [vmem:[#allocation41_spill] sm:$0xff] %v15288_v10  ;;  %v6278_v55 = vadd.f32 %v6277_v22, %v15175_v12  ;;  %v6391_v57 = vadd.f32 %v6390_v2, %v15177_v58 }
0x179d   :  { %v6279_v62 = vpop.f32.mrf.mxu0  ;;  %v6392_v28 = vpop.f32.mrf.mxu1 }
0x179e   :  { %v6280_v48 = vadd.f32 %v6279_v62, %v15179_v29  ;;  %v6393_v39 = vadd.f32 %v6392_v28, %v15181_v52  ;;  %v15295_v44 = vadd.f32 %v15195_v54, %v6278_v55  ;;  %v15298_v30 = vadd.f32 %v15198_v23, %v6391_v57 }
0x17a0   :  { %v15301_v19 = vadd.f32 %v15201_v11, %v6280_v48  ;;  %v15304_v24 = vadd.f32 %v15204_v38, %v6393_v39 }
0x17a1   :  { %v6283_v12 = vpop.f32.mrf.mxu0  ;;  %v6396_v17 = vpop.f32.mrf.mxu1 }
0x17a2   :  { %v6284_v58 = vadd.f32 %v6283_v12, %v15183_v14 }
0x17a3   :  { %v6285_v41 = vpop.f32.mrf.mxu0  ;;  %v6398_v55 = vpop.f32.mrf.mxu1 }
0x17a4   :  { %v6286_v29 = vadd.f32 %v6285_v41, %v15187_v8  ;;  %v6451_v52 = vadd.f32 %v15195_v54, %v6284_v58  ;;  %v6399_v39 = vadd.f32 %v6398_v55, %v15189_v43  ;;  %v6397_v8 = vadd.f32 %v6396_v17, %v15185_v1 }
0x17a6   :  { %v6452_v22 = vadd.f32 %v15201_v11, %v6286_v29  ;;  %v6454_v14 = vadd.f32 %v15204_v38, %v6399_v39  ;;  %v6453_v11 = vadd.f32 %v15198_v23, %v6397_v8  ;;  %v17583_v39 = vld [vmem:[#allocation20_spill] sm:$0xff] }
0x17a7   :  { %v6621_v2 = vpop.f32.mrf.mxu0  ;;  %v6692_v0 = vpop.f32.mrf.mxu1  ;;  %v17586_v8 = vld [vmem:[#allocation52_spill] sm:$0xff] }
0x17a8   :  { %v6697_v57 = vadd.f32 %v6621_v2, %v6451_v52  ;;  %v6699_v29 = vadd.f32 %v6692_v0, %v6453_v11  ;;  %v17588_v11 = vld [vmem:[#allocation17_spill] sm:$0xff] }
0x17a9   :  { %v6623_v62 = vpop.f32.mrf.mxu0  ;;  %v6694_v12 = vpop.f32.mrf.mxu1 }
0x17aa   :  { %v8206_v28 = vmul.f32 -1.442695, %v6697_v57  ;;  %v6698_v48 = vadd.f32 %v6623_v62, %v6452_v22  ;;  %v6700_v54 = vadd.f32 %v6694_v12, %v6454_v14  ;;  %v17584_v14 = vld [vmem:[#allocation19_spill] sm:$0xff]  ;;  %v17585_v12 = vld [vmem:[#allocation50_spill] sm:$0xff] }
0x17ac   :  { %8722 = vpow2.f32 %v8206_v28  ;;  %v8207_v3 = vmul.f32 -1.442695, %v6698_v48  ;;  %v8208_v58 = vmul.f32 -1.442695, %v6700_v54  ;;  %v17582_v48 = vld [vmem:[#allocation65_spill] sm:$0xff]  ;;  %v17587_v54 = vld [vmem:[#allocation18_spill] sm:$0xff] }
0x17ae   :  { %8724 = vpow2.f32 %v8207_v3 }
0x17af   :  { %8726 = vpow2.f32 %v8208_v58  ;;  %v17589_v58 = vld [vmem:[#allocation25_spill] sm:$0xff] }
0x17b9   :  { %v8723_v41 = vpop.eup %8722 }
0x17ba   :  { %v6704_v52 = vadd.f32 1.0, %v8723_v41  ;;  %v17590_v41 = vld [vmem:[#allocation21_spill] sm:$0xff] }
0x17bb   :  { %v8725_v2 = vpop.eup %8724 }
0x17bc   :  { %8728 = vrcp.f32 %v6704_v52  ;;  %v6710_v43 = vadd.f32 1.0, %v8725_v2  ;;  %v8727_v22 = vpop.eup %8726  ;;  %v17592_v52 = vld [vmem:[#allocation71_spill] sm:$0xff]  ;;  %v17593_v2 = vld [vmem:[#allocation72_spill] sm:$0xff] }
0x17bd   :  { %8730 = vtanh.f32 %v6699_v29  ;;  %v6717_v57 = vadd.f32 1.0, %v8727_v22  ;;  %v17591_v29 = vld [vmem:[#allocation70_spill] sm:$0xff] }
0x17be   :  { %8732 = vrcp.f32 %v6710_v43  ;;  %v17594_v43 = vld [vmem:[#allocation73_spill] sm:$0xff]  ;;  %v17595_v22 = vld [vmem:[#allocation74_spill] sm:$0xff] }
0x17bf   :  { %8734 = vrcp.f32 %v6717_v57  ;;  %v17599_v57 = vld [vmem:[#allocation78_spill] sm:$0xff] }
0x17c9   :  { %v8729_v3 = vpop.eup %8728 }
0x17ca   :  { %v8731_v55 = vpop.eup %8730 }
0x17cb   :  { %v8733_v38 = vpop.eup %8732  ;;  %v6721_v1 = vmul.f32 %v8731_v55, %v8729_v3  ;;  %v17596_v3 = vld [vmem:[#allocation75_spill] sm:$0xff]  ;;  %v17597_v55 = vld [vmem:[#allocation76_spill] sm:$0xff] }
0x17cc   :  { %v6720_v62 = vmul.f32 0.0, %v8733_v38  ;;  %v8735_v23 = vpop.eup %8734  ;;  %v17598_v38 = vld [vmem:[#allocation77_spill] sm:$0xff] }
0x17ce   :  { %v15314_v17 = vadd.f32 %v6721_v1, %v6720_v62  ;;  %v17600_v62 = vld [vmem:[#allocation79_spill] sm:$0xff]  ;;  %v17601_v1 = vld [vmem:[#allocation81_spill] sm:$0xff] }
0x17d0   :  { %8736 = vtanh.f32 %v15314_v17 }
0x17dd   :  { %v8737_v0 = vpop.eup %8736 }
0x17de   :  { %v6724_v28 = vmul.f32 %v8737_v0, %v8735_v23  ;;  %v17602_v23 = vld [vmem:[#allocation82_spill] sm:$0xff]  ;;  %v17603_v0 = vld [vmem:[#allocation80_spill] sm:$0xff] }
0x17e0   :  { %6794 = vmatmul.mubr.f32.vlgmr.msra.gmra.mxu0 %v6724_v28  ;;  %6865 = vmatmul.mubr.f32.vlgmr.msra.gmra.mxu1 %v6724_v28  ;;  %v17604_v28 = vld [vmem:[#allocation83_spill] sm:$0xff] }
0x17e1   :  { %6904 = vmatpush1.msra.mxu0 %v14671_v5  ;;  %6975 = vmatpush1.msra.mxu1 %v14676_v15  ;;  %v17568_v5 = vld [vmem:[#allocation43_spill] sm:$0xff] }
0x17e2   :  { %6905 = vmatprep.subr.mxu0 %v14683_v34  ;;  %6976 = vmatprep.subr.mxu1 %v14688_v31  ;;  %v17569_v15 = vld [vmem:[#allocation39_spill] sm:$0xff]  ;;  %v17570_v34 = vld [vmem:[#allocation12_spill] sm:$0xff]  ;;  %v17571_v31 = vld [vmem:[#allocation49_spill] sm:$0xff] }
0x17e3   :  { %6906 = vmatpush1.msra.mxu0 %v14697_v37  ;;  %6977 = vmatpush1.msra.mxu1 %v14702_v51  ;;  %v17572_v37 = vld [vmem:[#allocation33_spill] sm:$0xff]  ;;  %v17573_v51 = vld [vmem:[#allocation30_spill] sm:$0xff] }
0x17e4   :  { %6907 = vmatprep.subr.mxu0 %v14711_v27  ;;  %6978 = vmatprep.subr.mxu1 %v14716_v32  ;;  %v17574_v27 = vld [vmem:[#allocation13_spill] sm:$0xff]  ;;  %v17575_v32 = vld [vmem:[#allocation47_spill] sm:$0xff] }
0x17e5   :  { %6908 = vmatpush1.msra.mxu0 %v14723_v36  ;;  %6979 = vmatpush1.msra.mxu1 %v14728_v46  ;;  %v17576_v36 = vld [vmem:[#allocation31_spill] sm:$0xff]  ;;  %v17577_v46 = vld [vmem:[#allocation44_spill] sm:$0xff] }
0x17e6   :  { %6909 = vmatprep.subr.mxu0 %v14735_v53  ;;  %6980 = vmatprep.subr.mxu1 %v14740_v20  ;;  %v17578_v53 = vld [vmem:[#allocation14_spill] sm:$0xff]  ;;  %v17579_v20 = vld [vmem:[#allocation48_spill] sm:$0xff] }
0x17e7   :  { %6910 = vmatpush1.msra.mxu0 %v14749_v42  ;;  %6981 = vmatpush1.msra.mxu1 %v14754_v13  ;;  %v17580_v42 = vld [vmem:[#allocation15_spill] sm:$0xff]  ;;  %v17581_v13 = vld [vmem:[#allocation53_spill] sm:$0xff] }
0x17e8   :  { %6911 = vmatprep.subr.mxu0 %v17568_v5  ;;  %6982 = vmatprep.subr.mxu1 %v17569_v15  ;;  %v17605_v5 = vld [vmem:[#allocation85_spill] sm:$0xff]  ;;  %v17606_v15 = vld [vmem:[#allocation86_spill] sm:$0xff] }
0x17e9   :  { %6912 = vmatpush1.msra.mxu0 %v17570_v34  ;;  %6983 = vmatpush1.msra.mxu1 %v17571_v31 }
0x17ea   :  { %6913 = vmatprep.subr.mxu0 %v17572_v37  ;;  %6984 = vmatprep.subr.mxu1 %v17573_v51 }
0x17eb   :  { %6914 = vmatpush1.msra.mxu0 %v17574_v27  ;;  %6985 = vmatpush1.msra.mxu1 %v17575_v32 }
0x17ec   :  { %6915 = vmatprep.subr.mxu0 %v17576_v36  ;;  %6986 = vmatprep.subr.mxu1 %v17577_v46 }
0x17ed   :  { %6916 = vmatpush1.msra.mxu0 %v17578_v53  ;;  %6987 = vmatpush1.msra.mxu1 %v17579_v20 }
0x17ee   :  { %6917 = vmatprep.subr.mxu0 %v17580_v42  ;;  %6988 = vmatprep.subr.mxu1 %v17581_v13 }
0x17ef   :  { %6918 = vmatpush1.msra.mxu0 %v17582_v48  ;;  %6989 = vmatpush1.msra.mxu1 %v17583_v39 }
0x17f0   :  { %6919 = vmatprep.subr.mxu0 %v17584_v14  ;;  %6990 = vmatprep.subr.mxu1 %v17585_v12 }
0x17f1   :  { %6920 = vmatpush1.msra.mxu0 %v17586_v8  ;;  %6991 = vmatpush1.msra.mxu1 %v17587_v54 }
0x17f2   :  { %6921 = vmatprep.subr.mxu0 %v17588_v11  ;;  %6992 = vmatprep.subr.mxu1 %v17589_v58 }
0x17f3   :  { %6922 = vmatpush1.msra.mxu0 %v17590_v41  ;;  %6993 = vmatpush1.msra.mxu1 %v17591_v29 }
0x17f4   :  { %6923 = vmatprep.subr.mxu0 %v17592_v52  ;;  %6994 = vmatprep.subr.mxu1 %v17593_v2 }
0x17f5   :  { %6924 = vmatpush1.msra.mxu0 %v17594_v43  ;;  %6995 = vmatpush1.msra.mxu1 %v17595_v22 }
0x17f6   :  { %6925 = vmatprep.subr.mxu0 %v17596_v3  ;;  %6996 = vmatprep.subr.mxu1 %v17597_v55 }
0x17f7   :  { %6926 = vmatpush1.msra.mxu0 %v17598_v38  ;;  %6997 = vmatpush1.msra.mxu1 %v17599_v57 }
0x17f8   :  { %6927 = vmatprep.subr.mxu0 %v17600_v62  ;;  %6998 = vmatprep.subr.mxu1 %v17601_v1 }
0x17f9   :  { %6928 = vmatpush1.msra.mxu0 %v17602_v23  ;;  %6999 = vmatpush1.msra.mxu1 %v17603_v0 }
0x17fa   :  { %6929 = vmatprep.subr.mxu0 %v17604_v28  ;;  %7000 = vmatprep.subr.mxu1 %v17605_v5 }
0x17fb   :  { %6930 = vmatpush1.msra.mxu0 %v17606_v15  ;;  %7001 = vmatpush1.msra.mxu1 %v17607_v47 }
0x17fc   :  { %6931 = vmatprep.subr.mxu0 %v17608_v45  ;;  %7002 = vmatprep.subr.mxu1 %v17609_v63 }
0x17fd   :  { %6932 = vmatpush1.msra.mxu0 %v17610_v26  ;;  %7003 = vmatpush1.msra.mxu1 %v17611_v21 }
0x17fe   :  { %6933 = vmatprep.subr.mxu0 %v17612_v25  ;;  %7004 = vmatprep.subr.mxu1 %v17613_v16 }
0x17ff   :  { %6934 = vmatpush1.msra.mxu0 %v17614_v61  ;;  %6967 = vmatprep.mubr.f32.mxu0 %v17615_v49 }
0x1800   :  { %7005 = vmatpush1.msra.mxu1 %v17616_v56  ;;  %7038 = vmatprep.mubr.f32.mxu1 %v17615_v49 }
0x1801   :  { %7077 = vmatprep.subr.mxu0 %v17617_v7  ;;  %7148 = vmatprep.subr.mxu1 %v17618_v4 }
0x18a0   :  { %v6795_v6 = vpop.f32.mrf.mxu0  ;;  %v6866_v33 = vpop.f32.mrf.mxu1 }
0x18a1   :  { %v6871_v50 = vadd.f32 %v6795_v6, %v15295_v44  ;;  %v6873_v60 = vadd.f32 %v6866_v33, %v15298_v30  ;;  %v15406_v30 = vld [vmem:[%s16234_s13 + $0x1c8] sm:$0xff] }
0x18a2   :  { %v6797_v59 = vpop.f32.mrf.mxu0  ;;  %v6868_v10 = vpop.f32.mrf.mxu1 }
0x18a3   :  { %v8209_v40 = vmul.f32 -1.442695, %v6871_v50  ;;  %v6872_v9 = vadd.f32 %v6797_v59, %v15301_v19  ;;  %v6874_v18 = vadd.f32 %v6868_v10, %v15304_v24  ;;  %v15412_v24 = vld [vmem:[%s16234_s13 + $0x1d8] sm:$0xff] }
0x18a5   :  { %8738 = vpow2.f32 %v8209_v40  ;;  %v8210_v35 = vmul.f32 -1.442695, %v6872_v9  ;;  %v8211_v56 = vmul.f32 -1.442695, %v6874_v18 }
0x18a7   :  { %8740 = vpow2.f32 %v8210_v35 }
0x18a8   :  { %8742 = vtanh.f32 %v6873_v60 }
0x18a9   :  { %8744 = vpow2.f32 %v8211_v56  ;;  %v15394_v56 = vld [vmem:[%s16234_s13 + $0x1e0] sm:$0xff] }
0x18b2   :  { %v8739_v7 = vpop.eup %8738 }
0x18b3   :  { %v6878_v49 = vadd.f32 1.0, %v8739_v7  ;;  %v15424_v7 = vld [vmem:[%s16234_s13 + $0x1d0] sm:$0xff] }
0x18b4   :  { %v8741_v4 = vpop.eup %8740 }
0x18b5   :  { %8746 = vrcp.f32 %v6878_v49  ;;  %v6884_v6 = vadd.f32 1.0, %v8741_v4  ;;  %v8743_v50 = vpop.eup %8742  ;;  %v15400_v49 = vld [vmem:[%s16234_s13 + $0x1f0] sm:$0xff]  ;;  %v15430_v4 = vld [vmem:[%s16234_s13 + $0x1a8] sm:$0xff] }
0x18b6   :  { %v8745_v59 = vpop.eup %8744 }
0x18b7   :  { %8748 = vrcp.f32 %v6884_v6  ;;  %v6891_v35 = vadd.f32 1.0, %v8745_v59  ;;  %v15436_v6 = vld [vmem:[%s16234_s13 + $0x1b8] sm:$0xff]  ;;  %v15448_v59 = vld [vmem:[%s16234_s13 + $0x1b0] sm:$0xff] }
0x18b9   :  { %8750 = vrcp.f32 %v6891_v35  ;;  %v15472_v35 = vld [vmem:[%s16234_s13 + $0x190] sm:$0xff] }
0x18c2   :  { %v8747_v40 = vpop.eup %8746 }
0x18c3   :  { %v6895_v44 = vmul.f32 %v8747_v40, %v8743_v50  ;;  %v15442_v50 = vld [vmem:[%s16234_s13 + $0x1a0] sm:$0xff]  ;;  %v15454_v40 = vld [vmem:[%s16234_s13 + $0x188] sm:$0xff] }
0x18c4   :  { %v8749_v9 = vpop.eup %8748 }
0x18c5   :  { %v6894_v19 = vmul.f32 %v8749_v9, %v15314_v17  ;;  %v15418_v17 = vld [vmem:[%s16234_s13 + $0x1c0] sm:$0xff] }
0x18c6   :  { %v8751_v33 = vpop.eup %8750  ;;  %v15466_v9 = vld [vmem:[%s16234_s13 + $0x180] sm:$0xff] }
0x18c7   :  { %v15388_v10 = vadd.f32 %v6895_v44, %v6894_v19  ;;  %v15460_v44 = vld [vmem:[%s16234_s13 + $0x198] sm:$0xff]  ;;  %v15478_v19 = vld [vmem:[%s16234_s13 + $0x168] sm:$0xff] }
0x18c9   :  { %8752 = vtanh.f32 %v15388_v10 }
0x18d6   :  { %v8753_v60 = vpop.eup %8752 }
0x18d7   :  { %v6898_v18 = vmul.f32 %v8753_v60, %v8751_v33  ;;  %v15484_v33 = vld [vmem:[%s16234_s13 + $0x178] sm:$0xff]  ;;  %v15646_v60 = vld [vmem:[%s16234_s13 + $0x100] sm:$0xff] }
0x18d9   :  { %6968 = vmatmul.mubr.f32.vlgmr.msra.gmra.mxu0 %v6898_v18  ;;  %7039 = vmatmul.mubr.f32.vlgmr.msra.gmra.mxu1 %v6898_v18  ;;  %v15652_v18 = vld [vmem:[%s16234_s13 + $0x110] sm:$0xff] }
0x18da   :  { %7078 = vmatpush1.msra.mxu0 %v15394_v56  ;;  %7149 = vmatpush1.msra.mxu1 %v15400_v49 }
0x18db   :  { %7079 = vmatprep.subr.mxu0 %v15406_v30  ;;  %7150 = vmatprep.subr.mxu1 %v15412_v24 }
0x18dc   :  { %7080 = vmatpush1.msra.mxu0 %v15418_v17  ;;  %7151 = vmatpush1.msra.mxu1 %v15424_v7 }
0x18dd   :  { %7081 = vmatprep.subr.mxu0 %v15430_v4  ;;  %7152 = vmatprep.subr.mxu1 %v15436_v6 }
0x18de   :  { %7082 = vmatpush1.msra.mxu0 %v15442_v50  ;;  %7153 = vmatpush1.msra.mxu1 %v15448_v59 }
0x18df   :  { %7083 = vmatprep.subr.mxu0 %v15454_v40  ;;  %7154 = vmatprep.subr.mxu1 %v15460_v44 }
0x18e0   :  { %7084 = vmatpush1.msra.mxu0 %v15466_v9  ;;  %7155 = vmatpush1.msra.mxu1 %v15472_v35 }
0x18e1   :  { %7085 = vmatprep.subr.mxu0 %v15478_v19  ;;  %7156 = vmatprep.subr.mxu1 %v15484_v33 }
0x18e2   :  { %7086 = vmatpush1.msra.mxu0 %v17570_v34  ;;  %7157 = vmatpush1.msra.mxu1 %v17571_v31  ;;  %v17619_v34 = vmov 0.0   ;;  %v17620_v31 = vld [vmem:[#allocation93_spill] sm:$0xff] }
0x18e3   :  { %7087 = vmatprep.subr.mxu0 %v17572_v37  ;;  %7158 = vmatprep.subr.mxu1 %v17573_v51 }
0x18e4   :  { %7088 = vmatpush1.msra.mxu0 %v17574_v27  ;;  %7159 = vmatpush1.msra.mxu1 %v17575_v32 }
0x18e5   :  { %7089 = vmatprep.subr.mxu0 %v17576_v36  ;;  %7160 = vmatprep.subr.mxu1 %v17577_v46  ;;  %v17625_v36 = vld [vmem:[#allocation41_spill] sm:$0xff] }
0x18e6   :  { %7090 = vmatpush1.msra.mxu0 %v17578_v53  ;;  %7161 = vmatpush1.msra.mxu1 %v17579_v20  ;;  %v17626_v53 = vld [vmem:[#allocation96_spill] sm:$0xff] }
0x18e7   :  { %7091 = vmatprep.subr.mxu0 %v17580_v42  ;;  %7162 = vmatprep.subr.mxu1 %v17581_v13 }
0x18e8   :  { %7092 = vmatpush1.msra.mxu0 %v17582_v48  ;;  %7163 = vmatpush1.msra.mxu1 %v17583_v39 }
0x18e9   :  { %7093 = vmatprep.subr.mxu0 %v17584_v14  ;;  %7164 = vmatprep.subr.mxu1 %v17585_v12 }
0x18ea   :  { %7094 = vmatpush1.msra.mxu0 %v17586_v8  ;;  %7165 = vmatpush1.msra.mxu1 %v17587_v54 }
0x18eb   :  { %7095 = vmatprep.subr.mxu0 %v17588_v11  ;;  %7166 = vmatprep.subr.mxu1 %v17589_v58 }
0x18ec   :  { %7096 = vmatpush1.msra.mxu0 %v17590_v41  ;;  %7167 = vmatpush1.msra.mxu1 %v17591_v29 }
0x18ed   :  { %7097 = vmatprep.subr.mxu0 %v17592_v52  ;;  %7168 = vmatprep.subr.mxu1 %v17593_v2 }
0x18ee   :  { %7098 = vmatpush1.msra.mxu0 %v17594_v43  ;;  %7169 = vmatpush1.msra.mxu1 %v17595_v22 }
0x18ef   :  { %7099 = vmatprep.subr.mxu0 %v17596_v3  ;;  %7170 = vmatprep.subr.mxu1 %v17597_v55  ;;  %v15574_v3 = vld [vmem:[%s16234_s13 + $0x160] sm:$0xff]  ;;  %v15580_v55 = vld [vmem:[%s16234_s13 + $0x170] sm:$0xff] }
0x18f0   :  { %7100 = vmatpush1.msra.mxu0 %v17598_v38  ;;  %7171 = vmatpush1.msra.mxu1 %v17599_v57  ;;  %v15586_v38 = vld [vmem:[%s16234_s13 + $0x148] sm:$0xff]  ;;  %v15592_v57 = vld [vmem:[%s16234_s13 + $0x158] sm:$0xff] }
0x18f1   :  { %7101 = vmatprep.subr.mxu0 %v17600_v62  ;;  %7172 = vmatprep.subr.mxu1 %v17601_v1  ;;  %v15598_v62 = vld [vmem:[%s16234_s13 + $0x140] sm:$0xff]  ;;  %v15604_v1 = vld [vmem:[%s16234_s13 + $0x150] sm:$0xff] }
0x18f2   :  { %7102 = vmatpush1.msra.mxu0 %v17602_v23  ;;  %7173 = vmatpush1.msra.mxu1 %v17603_v0  ;;  %v15610_v23 = vld [vmem:[%s16234_s13 + $0x128] sm:$0xff]  ;;  %v15616_v0 = vld [vmem:[%s16234_s13 + $0x138] sm:$0xff] }
0x18f3   :  { %7103 = vmatprep.subr.mxu0 %v17604_v28  ;;  %7174 = vmatprep.subr.mxu1 %v17605_v5  ;;  %v15622_v28 = vld [vmem:[%s16234_s13 + $0x120] sm:$0xff]  ;;  %v15628_v5 = vld [vmem:[%s16234_s13 + $0x130] sm:$0xff] }
0x18f4   :  { %7104 = vmatpush1.msra.mxu0 %v17606_v15  ;;  %7175 = vmatpush1.msra.mxu1 %v17607_v47  ;;  %v15538_v47 = vld [vmem:[%s16234_s13 + $0x1e8] sm:$0xff] }
0x18f5   :  { %7105 = vmatprep.subr.mxu0 %v17608_v45  ;;  %7176 = vmatprep.subr.mxu1 %v17609_v63  ;;  %17621 = vst [vmem:[#allocation16_spill] sm:$0xff] %v15538_v47  ;;  %v15544_v45 = vld [vmem:[%s16234_s13 + $0x1f8] sm:$0xff]  ;;  %v17623_v63 = vld [vmem:[#allocation98_spill] sm:$0xff] }
0x18f6   :  { %7106 = vmatpush1.msra.mxu0 %v17610_v26  ;;  %7177 = vmatpush1.msra.mxu1 %v17611_v21  ;;  %17622 = vst [vmem:[#allocation46_spill] sm:$0xff] %v15544_v45  ;;  %v15634_v15 = vld [vmem:[%s16234_s13 + $0x108] sm:$0xff] }
0x18f7   :  { %7107 = vmatprep.subr.mxu0 %v17612_v25  ;;  %7178 = vmatprep.subr.mxu1 %v17613_v16 }
0x18f8   :  { %7108 = vmatpush1.msra.mxu0 %v17614_v61  ;;  %7141 = vmatprep.mubr.f32.mxu0 %v17619_v34  ;;  %v17624_v61 = vld [vmem:[#allocation51_spill] sm:$0xff] }
0x18f9   :  { %7179 = vmatpush1.msra.mxu1 %v17620_v31  ;;  %7212 = vmatprep.mubr.f32.mxu1 %v17619_v34  ;;  %v15658_v31 = vld [vmem:[%s16234_s13 + $0xe8] sm:$0xff] }
0x18fa   :  { %7251 = vmatprep.subr.mxu0 %v15538_v47  ;;  %7322 = vmatprep.subr.mxu1 %v15544_v45 }
0x1999   :  { %v6969_v25 = vpop.f32.mrf.mxu0  ;;  %v7040_v51 = vpop.f32.mrf.mxu1 }
0x199a   :  { %v7045_v21 = vadd.f32 %v6969_v25, %v17623_v63  ;;  %v7047_v20 = vadd.f32 %v7040_v51, %v17626_v53  ;;  %v15664_v25 = vld [vmem:[%s16234_s13 + $0xf8] sm:$0xff]  ;;  %v15670_v63 = vld [vmem:[%s16234_s13 + $0xe0] sm:$0xff]  ;;  %v15706_v51 = vld [vmem:[%s16234_s13 + $0xa8] sm:$0xff] }
0x199b   :  { %v6971_v26 = vpop.f32.mrf.mxu0  ;;  %v7042_v32 = vpop.f32.mrf.mxu1  ;;  %v15736_v53 = vld [vmem:[%s16234_s13 + $0x98] sm:$0xff] }
0x199c   :  { %v8212_v16 = vmul.f32 -1.442695, %v7045_v21  ;;  %v7046_v37 = vadd.f32 %v6971_v26, %v17624_v61  ;;  %v7048_v46 = vadd.f32 %v7042_v32, %v17625_v36  ;;  %v15676_v21 = vld [vmem:[%s16234_s13 + $0xf0] sm:$0xff]  ;;  %v15682_v26 = vld [vmem:[%s16234_s13 + $0xc8] sm:$0xff]  ;;  %v15694_v61 = vld [vmem:[%s16234_s13 + $0xc0] sm:$0xff] }
0x199d   :  { %v15718_v32 = vld [vmem:[%s16234_s13 + $0xa0] sm:$0xff]  ;;  %v15724_v36 = vld [vmem:[%s16234_s13 + $0xb0] sm:$0xff] }
0x199e   :  { %8754 = vpow2.f32 %v8212_v16  ;;  %v8213_v27 = vmul.f32 -1.442695, %v7046_v37  ;;  %v8214_v42 = vmul.f32 -1.442695, %v7048_v46  ;;  %v15688_v16 = vld [vmem:[%s16234_s13 + $0xd8] sm:$0xff]  ;;  %v15700_v37 = vld [vmem:[%s16234_s13 + $0xd0] sm:$0xff] }
0x199f   :  { %v15730_v46 = vld [vmem:[%s16234_s13 + $0x88] sm:$0xff] }
0x19a0   :  { %8756 = vpow2.f32 %v8213_v27  ;;  %v15712_v27 = vld [vmem:[%s16234_s13 + $0xb8] sm:$0xff] }
0x19a1   :  { %8758 = vtanh.f32 %v7047_v20  ;;  %v15742_v20 = vld [vmem:[%s16234_s13 + $0x80] sm:$0xff] }
0x19a2   :  { %8760 = vpow2.f32 %v8214_v42  ;;  %17627 = vst [vmem:[#allocation42_spill] sm:$0xff] %v15742_v20  ;;  %v15748_v42 = vld [vmem:[%s16234_s13 + $0x90] sm:$0xff] }
0x19a3   :  { %17628 = vst [vmem:[#allocation27_spill] sm:$0xff] %v15748_v42 }
0x19ab   :  { %v8755_v13 = vpop.eup %8754 }
0x19ac   :  { %v7052_v48 = vadd.f32 1.0, %v8755_v13  ;;  %v15754_v13 = vld [vmem:[%s16234_s13 + $0x68] sm:$0xff] }
0x19ad   :  { %v8757_v39 = vpop.eup %8756  ;;  %17629 = vst [vmem:[#allocation40_spill] sm:$0xff] %v15754_v13 }
0x19ae   :  { %8762 = vrcp.f32 %v7052_v48  ;;  %v7058_v14 = vadd.f32 1.0, %v8757_v39  ;;  %v8759_v12 = vpop.eup %8758  ;;  %v15760_v48 = vld [vmem:[%s16234_s13 + $0x78] sm:$0xff]  ;;  %v15766_v39 = vld [vmem:[%s16234_s13 + $0x60] sm:$0xff] }
0x19af   :  { %v8761_v8 = vpop.eup %8760  ;;  %17630 = vst [vmem:[#allocation69_spill] sm:$0xff] %v15760_v48  ;;  %17631 = vst [vmem:[#allocation62_spill] sm:$0xff] %v15766_v39 }
0x19b0   :  { %8764 = vrcp.f32 %v7058_v14  ;;  %v7065_v41 = vadd.f32 1.0, %v8761_v8  ;;  %v15772_v14 = vld [vmem:[%s16234_s13 + $0x70] sm:$0xff]  ;;  %v15784_v8 = vld [vmem:[%s16234_s13 + $0x58] sm:$0xff] }
0x19b1   :  { %17632 = vst [vmem:[#allocation7_spill] sm:$0xff] %v15772_v14  ;;  %17634 = vst [vmem:[#allocation8_spill] sm:$0xff] %v15784_v8 }
0x19b2   :  { %8766 = vrcp.f32 %v7065_v41  ;;  %v15808_v41 = vld [vmem:[%s16234_s13 + $0x38] sm:$0xff] }
0x19b3   :  { %17638 = vst [vmem:[#allocation58_spill] sm:$0xff] %v15808_v41 }
0x19bb   :  { %v8763_v54 = vpop.eup %8762 }
0x19bc   :  { %v7069_v11 = vmul.f32 %v8763_v54, %v8759_v12  ;;  %v15778_v12 = vld [vmem:[%s16234_s13 + $0x48] sm:$0xff]  ;;  %v15790_v54 = vld [vmem:[%s16234_s13 + $0x40] sm:$0xff] }
0x19bd   :  { %v8765_v58 = vpop.eup %8764  ;;  %17633 = vst [vmem:[#allocation32_spill] sm:$0xff] %v15778_v12  ;;  %17635 = vst [vmem:[#allocation36_spill] sm:$0xff] %v15790_v54 }
0x19be   :  { %v7068_v29 = vmul.f32 %v8765_v58, %v15388_v10  ;;  %v15640_v10 = vld [vmem:[%s16234_s13 + $0x118] sm:$0xff]  ;;  %v15802_v58 = vld [vmem:[%s16234_s13 + $0x28] sm:$0xff] }
0x19bf   :  { %v8767_v2 = vpop.eup %8766  ;;  %17637 = vst [vmem:[#allocation35_spill] sm:$0xff] %v15802_v58 }
0x19c0   :  { %v15552_v52 = vadd.f32 %v7069_v11, %v7068_v29  ;;  %v15796_v11 = vld [vmem:[%s16234_s13 + $0x50] sm:$0xff]  ;;  %v15814_v29 = vld [vmem:[%s16234_s13 + $0x20] sm:$0xff] }
0x19c1   :  { %17636 = vst [vmem:[#allocation34_spill] sm:$0xff] %v15796_v11  ;;  %17639 = vst [vmem:[#allocation99_spill] sm:$0xff] %v15814_v29 }
0x19c2   :  { %8768 = vtanh.f32 %v15552_v52 }
0x19cf   :  { %v8769_v43 = vpop.eup %8768 }
0x19d0   :  { %v7072_v22 = vmul.f32 %v8769_v43, %v8767_v2  ;;  %v15820_v2 = vld [vmem:[%s16234_s13 + $0x30] sm:$0xff]  ;;  %v15826_v43 = vld [vmem:[%s16234_s13 + $0x8] sm:$0xff] }
0x19d1   :  { %17640 = vst [vmem:[#allocation100_spill] sm:$0xff] %v15820_v2  ;;  %17641 = vst [vmem:[#allocation101_spill] sm:$0xff] %v15826_v43 }
0x19d2   :  { %7142 = vmatmul.mubr.f32.vlgmr.msra.gmra.mxu0 %v7072_v22  ;;  %7213 = vmatmul.mubr.f32.vlgmr.msra.gmra.mxu1 %v7072_v22  ;;  %v15832_v22 = vld [vmem:[%s16234_s13 + $0x18] sm:$0xff] }
0x19d3   :  { %7252 = vmatpush1.msra.mxu0 %v15394_v56  ;;  %7323 = vmatpush1.msra.mxu1 %v15400_v49  ;;  %17642 = vst [vmem:[#allocation102_spill] sm:$0xff] %v15832_v22 }
0x19d4   :  { %7253 = vmatprep.subr.mxu0 %v15406_v30  ;;  %7324 = vmatprep.subr.mxu1 %v15412_v24 }
0x19d5   :  { %7254 = vmatpush1.msra.mxu0 %v15418_v17  ;;  %7325 = vmatpush1.msra.mxu1 %v15424_v7 }
0x19d6   :  { %7255 = vmatprep.subr.mxu0 %v15430_v4  ;;  %7326 = vmatprep.subr.mxu1 %v15436_v6 }
0x19d7   :  { %7256 = vmatpush1.msra.mxu0 %v15442_v50  ;;  %7327 = vmatpush1.msra.mxu1 %v15448_v59 }
0x19d8   :  { %7257 = vmatprep.subr.mxu0 %v15454_v40  ;;  %7328 = vmatprep.subr.mxu1 %v15460_v44 }
0x19d9   :  { %7258 = vmatpush1.msra.mxu0 %v15466_v9  ;;  %7329 = vmatpush1.msra.mxu1 %v15472_v35 }
0x19da   :  { %7259 = vmatprep.subr.mxu0 %v15478_v19  ;;  %7330 = vmatprep.subr.mxu1 %v15484_v33 }
0x19db   :  { %7260 = vmatpush1.msra.mxu0 %v15574_v3  ;;  %7331 = vmatpush1.msra.mxu1 %v15580_v55 }
0x19dc   :  { %7261 = vmatprep.subr.mxu0 %v15586_v38  ;;  %7332 = vmatprep.subr.mxu1 %v15592_v57 }
0x19dd   :  { %7262 = vmatpush1.msra.mxu0 %v15598_v62  ;;  %7333 = vmatpush1.msra.mxu1 %v15604_v1 }
0x19de   :  { %7263 = vmatprep.subr.mxu0 %v15610_v23  ;;  %7334 = vmatprep.subr.mxu1 %v15616_v0 }
0x19df   :  { %7264 = vmatpush1.msra.mxu0 %v15622_v28  ;;  %7335 = vmatpush1.msra.mxu1 %v15628_v5 }
0x19e0   :  { %7265 = vmatprep.subr.mxu0 %v15634_v15  ;;  %7336 = vmatprep.subr.mxu1 %v15640_v10 }
0x19e1   :  { %7266 = vmatpush1.msra.mxu0 %v15646_v60  ;;  %7337 = vmatpush1.msra.mxu1 %v15652_v18 }
0x19e2   :  { %7267 = vmatprep.subr.mxu0 %v15658_v31  ;;  %7338 = vmatprep.subr.mxu1 %v15664_v25 }
0x19e3   :  { %7268 = vmatpush1.msra.mxu0 %v15670_v63  ;;  %7339 = vmatpush1.msra.mxu1 %v15676_v21 }
0x19e4   :  { %7269 = vmatprep.subr.mxu0 %v15682_v26  ;;  %7340 = vmatprep.subr.mxu1 %v15688_v16 }
0x19e5   :  { %7270 = vmatpush1.msra.mxu0 %v15694_v61  ;;  %7341 = vmatpush1.msra.mxu1 %v15700_v37 }
0x19e6   :  { %7271 = vmatprep.subr.mxu0 %v15706_v51  ;;  %7342 = vmatprep.subr.mxu1 %v15712_v27 }
0x19e7   :  { %7272 = vmatpush1.msra.mxu0 %v15718_v32  ;;  %7343 = vmatpush1.msra.mxu1 %v15724_v36 }
0x19e8   :  { %7273 = vmatprep.subr.mxu0 %v15730_v46  ;;  %7344 = vmatprep.subr.mxu1 %v15736_v53 }
0x19e9   :  { %7274 = vmatpush1.msra.mxu0 %v15742_v20  ;;  %7345 = vmatpush1.msra.mxu1 %v15748_v42 }
0x19ea   :  { %7275 = vmatprep.subr.mxu0 %v15754_v13  ;;  %7346 = vmatprep.subr.mxu1 %v15760_v48  ;;  %v17648_v48 = vld [vmem:[#allocation45_spill] sm:$0xff] }
0x19eb   :  { %7276 = vmatpush1.msra.mxu0 %v15766_v39  ;;  %7347 = vmatpush1.msra.mxu1 %v15772_v14  ;;  %v17647_v39 = vld [vmem:[#allocation97_spill] sm:$0xff] }
0x19ec   :  { %7277 = vmatprep.subr.mxu0 %v15778_v12  ;;  %7348 = vmatprep.subr.mxu1 %v15784_v8 }
0x19ed   :  { %7278 = vmatpush1.msra.mxu0 %v15790_v54  ;;  %7349 = vmatpush1.msra.mxu1 %v15796_v11  ;;  %v17646_v11 = vld [vmem:[#allocation95_spill] sm:$0xff] }
0x19ee   :  { %7279 = vmatprep.subr.mxu0 %v15802_v58  ;;  %7350 = vmatprep.subr.mxu1 %v15808_v41 }
0x19ef   :  { %7280 = vmatpush1.msra.mxu0 %v15814_v29  ;;  %7351 = vmatpush1.msra.mxu1 %v15820_v2  ;;  %v15838_v29 = vld [vmem:[%s16234_s13] sm:$0xff]  ;;  %v17645_v2 = vld [vmem:[#allocation68_spill] sm:$0xff] }
0x19f0   :  { %7281 = vmatprep.subr.mxu0 %v15826_v43  ;;  %7352 = vmatprep.subr.mxu1 %v15832_v22  ;;  %17643 = vst [vmem:[#allocation67_spill] sm:$0xff] %v15838_v29  ;;  %v15845_v43 = vld [vmem:[%s16234_s13 + $0x10] sm:$0xff] }
0x19f1   :  { %7282 = vmatpush1.msra.mxu0 %v15838_v29  ;;  %7315 = vmatprep.mubr.f32.mxu0 %v17619_v34  ;;  %17644 = vst [vmem:[#allocation28_spill] sm:$0xff] %v15845_v43 }
0x19f2   :  { %7353 = vmatpush1.msra.mxu1 %v15845_v43  ;;  %7386 = vmatprep.mubr.f32.mxu1 %v17619_v34 }
0x19f3   :  { %7425 = vmatprep.subr.mxu0 %v15538_v47  ;;  %7496 = vmatprep.subr.mxu1 %v15544_v45 }
0x1a92   :  { %v7143_v22 = vpop.f32.mrf.mxu0  ;;  %v7214_v8 = vpop.f32.mrf.mxu1 }
0x1a93   :  { %v7219_v41 = vadd.f32 %v7143_v22, %v17645_v2  ;;  %v7221_v34 = vadd.f32 %v7214_v8, %v17648_v48  ;;  %v17654_v8 = vld [vmem:[#allocation32_spill] sm:$0xff] }
0x1a94   :  { %v7145_v58 = vpop.f32.mrf.mxu0  ;;  %v7216_v14 = vpop.f32.mrf.mxu1 }
0x1a95   :  { %v8215_v29 = vmul.f32 -1.442695, %v7219_v41  ;;  %v7220_v54 = vadd.f32 %v7145_v58, %v17646_v11  ;;  %v7222_v43 = vadd.f32 %v7216_v14, %v17647_v39  ;;  %v17653_v14 = vld [vmem:[#allocation7_spill] sm:$0xff] }
0x1a97   :  { %8770 = vpow2.f32 %v8215_v29  ;;  %v8216_v12 = vmul.f32 -1.442695, %v7220_v54  ;;  %v8217_v13 = vmul.f32 -1.442695, %v7222_v43  ;;  %v17655_v43 = vld [vmem:[#allocation8_spill] sm:$0xff] }
0x1a99   :  { %8772 = vpow2.f32 %v8216_v12 }
0x1a9a   :  { %8774 = vtanh.f32 %v7221_v34 }
0x1a9b   :  { %8776 = vpow2.f32 %v8217_v13  ;;  %v17652_v13 = vld [vmem:[#allocation62_spill] sm:$0xff] }
0x1aa4   :  { %v8771_v47 = vpop.eup %8770 }
0x1aa5   :  { %v7226_v42 = vadd.f32 1.0, %v8771_v47 }
0x1aa6   :  { %v8773_v45 = vpop.eup %8772 }
0x1aa7   :  { %8778 = vrcp.f32 %v7226_v42  ;;  %v7232_v2 = vadd.f32 1.0, %v8773_v45  ;;  %v8775_v41 = vpop.eup %8774  ;;  %v17649_v45 = vld [vmem:[#allocation27_spill] sm:$0xff]  ;;  %v17651_v42 = vld [vmem:[#allocation69_spill] sm:$0xff] }
0x1aa8   :  { %v8777_v11 = vpop.eup %8776 }
0x1aa9   :  { %8780 = vrcp.f32 %v7232_v2  ;;  %v7239_v12 = vadd.f32 1.0, %v8777_v11  ;;  %v17656_v2 = vld [vmem:[#allocation36_spill] sm:$0xff]  ;;  %v17658_v11 = vld [vmem:[#allocation35_spill] sm:$0xff] }
0x1aab   :  { %8782 = vrcp.f32 %v7239_v12  ;;  %v17662_v12 = vld [vmem:[#allocation101_spill] sm:$0xff] }
0x1ab4   :  { %v8779_v58 = vpop.eup %8778 }
0x1ab5   :  { %v7243_v29 = vmul.f32 %v8779_v58, %v8775_v41  ;;  %v17657_v41 = vld [vmem:[#allocation34_spill] sm:$0xff] }
0x1ab6   :  { %v8781_v54 = vpop.eup %8780  ;;  %v17659_v58 = vld [vmem:[#allocation58_spill] sm:$0xff] }
0x1ab7   :  { %v7242_v22 = vmul.f32 %v8781_v54, %v15552_v52  ;;  %v17650_v52 = vld [vmem:[#allocation40_spill] sm:$0xff] }
0x1ab8   :  { %v8783_v47 = vpop.eup %8782  ;;  %v17661_v54 = vld [vmem:[#allocation100_spill] sm:$0xff] }
0x1ab9   :  { %v15856_v39 = vadd.f32 %v7243_v29, %v7242_v22  ;;  %v17660_v29 = vld [vmem:[#allocation99_spill] sm:$0xff]  ;;  %v17663_v22 = vld [vmem:[#allocation102_spill] sm:$0xff] }
0x1abb   :  { %8784 = vtanh.f32 %v15856_v39 }
0x1ac8   :  { %v8785_v34 = vpop.eup %8784 }
0x1ac9   :  { %v7246_v48 = vmul.f32 %v8785_v34, %v8783_v47  ;;  %v17664_v47 = vld [vmem:[#allocation67_spill] sm:$0xff]  ;;  %v17665_v34 = vmov 0.0  }
0x1acb   :  { %7316 = vmatmul.mubr.f32.vlgmr.msra.gmra.mxu0 %v7246_v48  ;;  %7387 = vmatmul.mubr.f32.vlgmr.msra.gmra.mxu1 %v7246_v48  ;;  %v17666_v48 = vld [vmem:[#allocation28_spill] sm:$0xff] }
0x1acc   :  { %7426 = vmatpush1.msra.mxu0 %v15394_v56  ;;  %7497 = vmatpush1.msra.mxu1 %v15400_v49 }
0x1acd   :  { %7427 = vmatprep.subr.mxu0 %v15406_v30  ;;  %7498 = vmatprep.subr.mxu1 %v15412_v24 }
0x1ace   :  { %7428 = vmatpush1.msra.mxu0 %v15418_v17  ;;  %7499 = vmatpush1.msra.mxu1 %v15424_v7 }
0x1acf   :  { %7429 = vmatprep.subr.mxu0 %v15430_v4  ;;  %7500 = vmatprep.subr.mxu1 %v15436_v6 }
0x1ad0   :  { %7430 = vmatpush1.msra.mxu0 %v15442_v50  ;;  %7501 = vmatpush1.msra.mxu1 %v15448_v59 }
0x1ad1   :  { %7431 = vmatprep.subr.mxu0 %v15454_v40  ;;  %7502 = vmatprep.subr.mxu1 %v15460_v44 }
0x1ad2   :  { %7432 = vmatpush1.msra.mxu0 %v15466_v9  ;;  %7503 = vmatpush1.msra.mxu1 %v15472_v35 }
0x1ad3   :  { %7433 = vmatprep.subr.mxu0 %v15478_v19  ;;  %7504 = vmatprep.subr.mxu1 %v15484_v33 }
0x1ad4   :  { %7434 = vmatpush1.msra.mxu0 %v15574_v3  ;;  %7505 = vmatpush1.msra.mxu1 %v15580_v55 }
0x1ad5   :  { %7435 = vmatprep.subr.mxu0 %v15586_v38  ;;  %7506 = vmatprep.subr.mxu1 %v15592_v57 }
0x1ad6   :  { %7436 = vmatpush1.msra.mxu0 %v15598_v62  ;;  %7507 = vmatpush1.msra.mxu1 %v15604_v1 }
0x1ad7   :  { %7437 = vmatprep.subr.mxu0 %v15610_v23  ;;  %7508 = vmatprep.subr.mxu1 %v15616_v0 }
0x1ad8   :  { %7438 = vmatpush1.msra.mxu0 %v15622_v28  ;;  %7509 = vmatpush1.msra.mxu1 %v15628_v5 }
0x1ad9   :  { %7439 = vmatprep.subr.mxu0 %v15634_v15  ;;  %7510 = vmatprep.subr.mxu1 %v15640_v10 }
0x1ada   :  { %7440 = vmatpush1.msra.mxu0 %v15646_v60  ;;  %7511 = vmatpush1.msra.mxu1 %v15652_v18 }
0x1adb   :  { %7441 = vmatprep.subr.mxu0 %v15658_v31  ;;  %7512 = vmatprep.subr.mxu1 %v15664_v25 }
0x1adc   :  { %7442 = vmatpush1.msra.mxu0 %v15670_v63  ;;  %7513 = vmatpush1.msra.mxu1 %v15676_v21 }
0x1add   :  { %7443 = vmatprep.subr.mxu0 %v15682_v26  ;;  %7514 = vmatprep.subr.mxu1 %v15688_v16 }
0x1ade   :  { %7444 = vmatpush1.msra.mxu0 %v15694_v61  ;;  %7515 = vmatpush1.msra.mxu1 %v15700_v37 }
0x1adf   :  { %7445 = vmatprep.subr.mxu0 %v15706_v51  ;;  %7516 = vmatprep.subr.mxu1 %v15712_v27 }
0x1ae0   :  { %7446 = vmatpush1.msra.mxu0 %v15718_v32  ;;  %7517 = vmatpush1.msra.mxu1 %v15724_v36 }
0x1ae1   :  { %7447 = vmatprep.subr.mxu0 %v15730_v46  ;;  %7518 = vmatprep.subr.mxu1 %v15736_v53 }
0x1ae2   :  { %7448 = vmatpush1.msra.mxu0 %v15742_v20  ;;  %7519 = vmatpush1.msra.mxu1 %v17649_v45 }
0x1ae3   :  { %7449 = vmatprep.subr.mxu0 %v17650_v52  ;;  %7520 = vmatprep.subr.mxu1 %v17651_v42  ;;  %v17672_v42 = vld [vmem:[#allocation57_spill] sm:$0xff] }
0x1ae4   :  { %7450 = vmatpush1.msra.mxu0 %v17652_v13  ;;  %7521 = vmatpush1.msra.mxu1 %v17653_v14  ;;  %v17671_v13 = vld [vmem:[#allocation10_spill] sm:$0xff] }
0x1ae5   :  { %7451 = vmatprep.subr.mxu0 %v17654_v8  ;;  %7522 = vmatprep.subr.mxu1 %v17655_v43 }
0x1ae6   :  { %7452 = vmatpush1.msra.mxu0 %v17656_v2  ;;  %7523 = vmatpush1.msra.mxu1 %v17657_v41  ;;  %v17667_v41 = vld [vmem:[#allocation16_spill] sm:$0xff] }
0x1ae7   :  { %7453 = vmatprep.subr.mxu0 %v17658_v11  ;;  %7524 = vmatprep.subr.mxu1 %v17659_v58  ;;  %v17668_v11 = vld [vmem:[#allocation46_spill] sm:$0xff] }
0x1ae8   :  { %7454 = vmatpush1.msra.mxu0 %v17660_v29  ;;  %7525 = vmatpush1.msra.mxu1 %v17661_v54  ;;  %v17669_v29 = vld [vmem:[#allocation55_spill] sm:$0xff] }
0x1ae9   :  { %7455 = vmatprep.subr.mxu0 %v17662_v12  ;;  %7526 = vmatprep.subr.mxu1 %v17663_v22  ;;  %v17670_v12 = vld [vmem:[#allocation56_spill] sm:$0xff] }
0x1aea   :  { %7456 = vmatpush1.msra.mxu0 %v17664_v47  ;;  %7489 = vmatprep.mubr.f32.mxu0 %v17665_v34 }
0x1aeb   :  { %7527 = vmatpush1.msra.mxu1 %v17666_v48  ;;  %7560 = vmatprep.mubr.f32.mxu1 %v17665_v34 }
0x1aec   :  { %7599 = vmatprep.subr.mxu0 %v17667_v41  ;;  %7670 = vmatprep.subr.mxu1 %v17668_v11 }
0x1b8b   :  { %v7317_v58 = vpop.f32.mrf.mxu0  ;;  %v7388_v22 = vpop.f32.mrf.mxu1 }
0x1b8c   :  { %v7393_v2 = vadd.f32 %v7317_v58, %v17669_v29  ;;  %v7395_v34 = vadd.f32 %v7388_v22, %v17672_v42  ;;  %v17677_v22 = vld [vmem:[#allocation7_spill] sm:$0xff] }
0x1b8d   :  { %v7319_v54 = vpop.f32.mrf.mxu0  ;;  %v7390_v14 = vpop.f32.mrf.mxu1 }
0x1b8e   :  { %v8218_v43 = vmul.f32 -1.442695, %v7393_v2  ;;  %v7394_v8 = vadd.f32 %v7319_v54, %v17670_v12  ;;  %v7396_v48 = vadd.f32 %v7390_v14, %v17671_v13 }
0x1b90   :  { %8786 = vpow2.f32 %v8218_v43  ;;  %v8219_v47 = vmul.f32 -1.442695, %v7394_v8  ;;  %v8220_v52 = vmul.f32 -1.442695, %v7396_v48  ;;  %v17679_v48 = vld [vmem:[#allocation8_spill] sm:$0xff] }
0x1b92   :  { %8788 = vpow2.f32 %v8219_v47 }
0x1b93   :  { %8790 = vtanh.f32 %v7395_v34  ;;  %v17678_v34 = vld [vmem:[#allocation32_spill] sm:$0xff] }
0x1b94   :  { %8792 = vpow2.f32 %v8220_v52  ;;  %v17675_v52 = vld [vmem:[#allocation69_spill] sm:$0xff] }
0x1b9d   :  { %v8787_v41 = vpop.eup %8786 }
0x1b9e   :  { %v7400_v45 = vadd.f32 1.0, %v8787_v41 }
0x1b9f   :  { %v8789_v11 = vpop.eup %8788 }
0x1ba0   :  { %8794 = vrcp.f32 %v7400_v45  ;;  %v7406_v58 = vadd.f32 1.0, %v8789_v11  ;;  %v8791_v2 = vpop.eup %8790  ;;  %v17674_v45 = vld [vmem:[#allocation40_spill] sm:$0xff]  ;;  %v17676_v11 = vld [vmem:[#allocation62_spill] sm:$0xff] }
0x1ba1   :  { %v8793_v29 = vpop.eup %8792 }
0x1ba2   :  { %8796 = vrcp.f32 %v7406_v58  ;;  %v7413_v12 = vadd.f32 1.0, %v8793_v29  ;;  %v17680_v58 = vld [vmem:[#allocation36_spill] sm:$0xff]  ;;  %v17682_v29 = vld [vmem:[#allocation35_spill] sm:$0xff] }
0x1ba4   :  { %8798 = vrcp.f32 %v7413_v12  ;;  %v17686_v12 = vld [vmem:[#allocation101_spill] sm:$0xff] }
0x1bad   :  { %v8795_v43 = vpop.eup %8794 }
0x1bae   :  { %v7417_v54 = vmul.f32 %v8795_v43, %v8791_v2  ;;  %v17681_v2 = vld [vmem:[#allocation34_spill] sm:$0xff] }
0x1baf   :  { %v8797_v8 = vpop.eup %8796  ;;  %v17683_v43 = vld [vmem:[#allocation58_spill] sm:$0xff] }
0x1bb0   :  { %v7416_v47 = vmul.f32 %v8797_v8, %v15856_v39  ;;  %v17673_v39 = vld [vmem:[#allocation27_spill] sm:$0xff]  ;;  %v17685_v8 = vld [vmem:[#allocation100_spill] sm:$0xff] }
0x1bb1   :  { %v8799_v42 = vpop.eup %8798 }
0x1bb2   :  { %v15930_v13 = vadd.f32 %v7417_v54, %v7416_v47  ;;  %v17684_v54 = vld [vmem:[#allocation99_spill] sm:$0xff]  ;;  %v17687_v47 = vld [vmem:[#allocation102_spill] sm:$0xff] }
0x1bb4   :  { %8800 = vtanh.f32 %v15930_v13 }
0x1bc1   :  { %v8801_v14 = vpop.eup %8800 }
0x1bc2   :  { %v7420_v41 = vmul.f32 %v8801_v14, %v8799_v42  ;;  %v17688_v42 = vld [vmem:[#allocation67_spill] sm:$0xff]  ;;  %v17689_v14 = vmov 0.0  }
0x1bc4   :  { %7490 = vmatmul.mubr.f32.vlgmr.msra.gmra.mxu0 %v7420_v41  ;;  %7561 = vmatmul.mubr.f32.vlgmr.msra.gmra.mxu1 %v7420_v41  ;;  %v17690_v41 = vld [vmem:[#allocation28_spill] sm:$0xff] }
0x1bc5   :  { %7600 = vmatpush1.msra.mxu0 %v15394_v56  ;;  %7671 = vmatpush1.msra.mxu1 %v15400_v49 }
0x1bc6   :  { %7601 = vmatprep.subr.mxu0 %v15406_v30  ;;  %7672 = vmatprep.subr.mxu1 %v15412_v24 }
0x1bc7   :  { %7602 = vmatpush1.msra.mxu0 %v15418_v17  ;;  %7673 = vmatpush1.msra.mxu1 %v15424_v7 }
0x1bc8   :  { %7603 = vmatprep.subr.mxu0 %v15430_v4  ;;  %7674 = vmatprep.subr.mxu1 %v15436_v6 }
0x1bc9   :  { %7604 = vmatpush1.msra.mxu0 %v15442_v50  ;;  %7675 = vmatpush1.msra.mxu1 %v15448_v59 }
0x1bca   :  { %7605 = vmatprep.subr.mxu0 %v15454_v40  ;;  %7676 = vmatprep.subr.mxu1 %v15460_v44 }
0x1bcb   :  { %7606 = vmatpush1.msra.mxu0 %v15466_v9  ;;  %7677 = vmatpush1.msra.mxu1 %v15472_v35 }
0x1bcc   :  { %7607 = vmatprep.subr.mxu0 %v15478_v19  ;;  %7678 = vmatprep.subr.mxu1 %v15484_v33 }
0x1bcd   :  { %7608 = vmatpush1.msra.mxu0 %v15574_v3  ;;  %7679 = vmatpush1.msra.mxu1 %v15580_v55 }
0x1bce   :  { %7609 = vmatprep.subr.mxu0 %v15586_v38  ;;  %7680 = vmatprep.subr.mxu1 %v15592_v57 }
0x1bcf   :  { %7610 = vmatpush1.msra.mxu0 %v15598_v62  ;;  %7681 = vmatpush1.msra.mxu1 %v15604_v1 }
0x1bd0   :  { %7611 = vmatprep.subr.mxu0 %v15610_v23  ;;  %7682 = vmatprep.subr.mxu1 %v15616_v0 }
0x1bd1   :  { %7612 = vmatpush1.msra.mxu0 %v15622_v28  ;;  %7683 = vmatpush1.msra.mxu1 %v15628_v5 }
0x1bd2   :  { %7613 = vmatprep.subr.mxu0 %v15634_v15  ;;  %7684 = vmatprep.subr.mxu1 %v15640_v10 }
0x1bd3   :  { %7614 = vmatpush1.msra.mxu0 %v15646_v60  ;;  %7685 = vmatpush1.msra.mxu1 %v15652_v18 }
0x1bd4   :  { %7615 = vmatprep.subr.mxu0 %v15658_v31  ;;  %7686 = vmatprep.subr.mxu1 %v15664_v25 }
0x1bd5   :  { %7616 = vmatpush1.msra.mxu0 %v15670_v63  ;;  %7687 = vmatpush1.msra.mxu1 %v15676_v21 }
0x1bd6   :  { %7617 = vmatprep.subr.mxu0 %v15682_v26  ;;  %7688 = vmatprep.subr.mxu1 %v15688_v16 }
0x1bd7   :  { %7618 = vmatpush1.msra.mxu0 %v15694_v61  ;;  %7689 = vmatpush1.msra.mxu1 %v15700_v37 }
0x1bd8   :  { %7619 = vmatprep.subr.mxu0 %v15706_v51  ;;  %7690 = vmatprep.subr.mxu1 %v15712_v27 }
0x1bd9   :  { %7620 = vmatpush1.msra.mxu0 %v15718_v32  ;;  %7691 = vmatpush1.msra.mxu1 %v15724_v36 }
0x1bda   :  { %7621 = vmatprep.subr.mxu0 %v15730_v46  ;;  %7692 = vmatprep.subr.mxu1 %v15736_v53 }
0x1bdb   :  { %7622 = vmatpush1.msra.mxu0 %v15742_v20  ;;  %7693 = vmatpush1.msra.mxu1 %v17673_v39 }
0x1bdc   :  { %7623 = vmatprep.subr.mxu0 %v17674_v45  ;;  %7694 = vmatprep.subr.mxu1 %v17675_v52  ;;  %v17696_v45 = vld [vmem:[#allocation9_spill] sm:$0xff] }
0x1bdd   :  { %7624 = vmatpush1.msra.mxu0 %v17676_v11  ;;  %7695 = vmatpush1.msra.mxu1 %v17677_v22  ;;  %v17695_v22 = vld [vmem:[#allocation22_spill] sm:$0xff] }
0x1bde   :  { %7625 = vmatprep.subr.mxu0 %v17678_v34  ;;  %7696 = vmatprep.subr.mxu1 %v17679_v48 }
0x1bdf   :  { %7626 = vmatpush1.msra.mxu0 %v17680_v58  ;;  %7697 = vmatpush1.msra.mxu1 %v17681_v2  ;;  %v17691_v58 = vld [vmem:[#allocation46_spill] sm:$0xff] }
0x1be0   :  { %7627 = vmatprep.subr.mxu0 %v17682_v29  ;;  %7698 = vmatprep.subr.mxu1 %v17683_v43  ;;  %v17692_v29 = vld [vmem:[#allocation16_spill] sm:$0xff] }
0x1be1   :  { %7628 = vmatpush1.msra.mxu0 %v17684_v54  ;;  %7699 = vmatpush1.msra.mxu1 %v17685_v8  ;;  %v17693_v54 = vld [vmem:[#allocation38_spill] sm:$0xff] }
0x1be2   :  { %7629 = vmatprep.subr.mxu0 %v17686_v12  ;;  %7700 = vmatprep.subr.mxu1 %v17687_v47  ;;  %v17694_v12 = vld [vmem:[#allocation23_spill] sm:$0xff] }
0x1be3   :  { %7630 = vmatpush1.msra.mxu0 %v17688_v42  ;;  %7663 = vmatprep.mubr.f32.mxu0 %v17689_v14 }
0x1be4   :  { %7701 = vmatpush1.msra.mxu1 %v17690_v41  ;;  %7734 = vmatprep.mubr.f32.mxu1 %v17689_v14 }
0x1be5   :  { %7844 = vmatprep.subr.mxu1 %v17691_v58  ;;  %7773 = vmatprep.subr.mxu0 %v17692_v29 }
0x1c84   :  { %v7491_v43 = vpop.f32.mrf.mxu0  ;;  %v7562_v47 = vpop.f32.mrf.mxu1 }
0x1c85   :  { %v7567_v2 = vadd.f32 %v7491_v43, %v17693_v54  ;;  %v7569_v14 = vadd.f32 %v7562_v47, %v17696_v45 }
0x1c86   :  { %v7493_v8 = vpop.f32.mrf.mxu0  ;;  %v7564_v11 = vpop.f32.mrf.mxu1 }
0x1c87   :  { %v8221_v34 = vmul.f32 -1.442695, %v7567_v2  ;;  %v7568_v48 = vadd.f32 %v7493_v8, %v17694_v12  ;;  %v7570_v41 = vadd.f32 %v7564_v11, %v17695_v22 }
0x1c89   :  { %8802 = vpow2.f32 %v8221_v34  ;;  %v8222_v42 = vmul.f32 -1.442695, %v7568_v48  ;;  %v8223_v52 = vmul.f32 -1.442695, %v7570_v41  ;;  %v7957_v41 = vld [vmem:[%s16236_s15 + $0x70] sm:$0xff] }
0x1c8b   :  { %8804 = vpow2.f32 %v8222_v42 }
0x1c8c   :  { %8806 = vtanh.f32 %v7569_v14  ;;  %v7958_v14 = vld [vmem:[%s16236_s15 + $0x78] sm:$0xff] }
0x1c8d   :  { %8808 = vpow2.f32 %v8223_v52 }
0x1c96   :  { %v8803_v58 = vpop.eup %8802 }
0x1c97   :  { %v7574_v20 = vadd.f32 1.0, %v8803_v58  ;;  %v7956_v58 = vld [vmem:[%s16236_s15 + $0x68] sm:$0xff] }
0x1c98   :  { %v8805_v29 = vpop.eup %8804 }
0x1c99   :  { %8810 = vrcp.f32 %v7574_v20  ;;  %v7580_v43 = vadd.f32 1.0, %v8805_v29  ;;  %v8807_v2 = vpop.eup %8806  ;;  %v7955_v29 = vld [vmem:[%s16236_s15 + $0x60] sm:$0xff] }
0x1c9a   :  { %v8809_v54 = vpop.eup %8808 }
0x1c9b   :  { %8812 = vrcp.f32 %v7580_v43  ;;  %v7587_v12 = vadd.f32 1.0, %v8809_v54  ;;  %v7954_v43 = vld [vmem:[%s16236_s15 + $0x58] sm:$0xff]  ;;  %v7952_v54 = vld [vmem:[%s16236_s15 + $0x48] sm:$0xff] }
0x1c9d   :  { %8814 = vrcp.f32 %v7587_v12  ;;  %v7948_v12 = vld [vmem:[%s16236_s15 + $0x28] sm:$0xff] }
0x1ca6   :  { %v8811_v34 = vpop.eup %8810 }
0x1ca7   :  { %v7591_v8 = vmul.f32 %v8811_v34, %v8807_v2  ;;  %v7953_v2 = vld [vmem:[%s16236_s15 + $0x50] sm:$0xff]  ;;  %v7951_v34 = vld [vmem:[%s16236_s15 + $0x40] sm:$0xff] }
0x1ca8   :  { %v8813_v48 = vpop.eup %8812 }
0x1ca9   :  { %v7590_v42 = vmul.f32 %v8813_v48, %v15930_v13  ;;  %v7949_v48 = vld [vmem:[%s16236_s15 + $0x30] sm:$0xff] }
0x1caa   :  { %v8815_v45 = vpop.eup %8814 }
0x1cab   :  { %v16004_v11 = vadd.f32 %v7591_v8, %v7590_v42  ;;  %v7950_v8 = vld [vmem:[%s16236_s15 + $0x38] sm:$0xff]  ;;  %v7947_v42 = vld [vmem:[%s16236_s15 + $0x20] sm:$0xff] }
0x1cad   :  { %8816 = vtanh.f32 %v16004_v11 }
0x1cba   :  { %v8817_v22 = vpop.eup %8816 }
0x1cbb   :  { %v7594_v47 = vmul.f32 %v8817_v22, %v8815_v45  ;;  %v7945_v45 = vld [vmem:[%s16236_s15 + $0x10] sm:$0xff]  ;;  %v7944_v22 = vld [vmem:[%s16236_s15 + $0x8] sm:$0xff] }
0x1cbd   :  { %7664 = vmatmul.mubr.f32.vlgmr.msra.gmra.mxu0 %v7594_v47  ;;  %7735 = vmatmul.mubr.f32.vlgmr.msra.gmra.mxu1 %v7594_v47  ;;  %v7943_v47 = vld [vmem:[%s16236_s15] sm:$0xff] }
0x1cbe   :  { %7845 = vmatpush1.msra.mxu1 %v15400_v49  ;;  %7774 = vmatpush1.msra.mxu0 %v15394_v56  ;;  %v17697_v56 = vld [vmem:[#allocation42_spill] sm:$0xff]  ;;  %v17698_v49 = vld [vmem:[#allocation69_spill] sm:$0xff] }
0x1cbf   :  { %7846 = vmatprep.subr.mxu1 %v15412_v24  ;;  %7775 = vmatprep.subr.mxu0 %v15406_v30  ;;  %v17699_v30 = vld [vmem:[#allocation40_spill] sm:$0xff]  ;;  %v17700_v24 = vld [vmem:[#allocation7_spill] sm:$0xff] }
0x1cc0   :  { %7847 = vmatpush1.msra.mxu1 %v15424_v7  ;;  %7776 = vmatpush1.msra.mxu0 %v15418_v17  ;;  %v17701_v17 = vld [vmem:[#allocation62_spill] sm:$0xff]  ;;  %v17702_v7 = vld [vmem:[#allocation8_spill] sm:$0xff] }
0x1cc1   :  { %7848 = vmatprep.subr.mxu1 %v15436_v6  ;;  %7777 = vmatprep.subr.mxu0 %v15430_v4  ;;  %v17703_v4 = vld [vmem:[#allocation32_spill] sm:$0xff]  ;;  %v17704_v6 = vld [vmem:[#allocation34_spill] sm:$0xff] }
0x1cc2   :  { %7849 = vmatpush1.msra.mxu1 %v15448_v59  ;;  %7778 = vmatpush1.msra.mxu0 %v15442_v50  ;;  %v17705_v50 = vld [vmem:[#allocation36_spill] sm:$0xff]  ;;  %v17706_v59 = vld [vmem:[#allocation58_spill] sm:$0xff] }
0x1cc3   :  { %7850 = vmatprep.subr.mxu1 %v15460_v44  ;;  %7779 = vmatprep.subr.mxu0 %v15454_v40  ;;  %v17707_v40 = vld [vmem:[#allocation35_spill] sm:$0xff]  ;;  %v17708_v44 = vld [vmem:[#allocation100_spill] sm:$0xff] }
0x1cc4   :  { %7851 = vmatpush1.msra.mxu1 %v15472_v35  ;;  %7780 = vmatpush1.msra.mxu0 %v15466_v9  ;;  %v17709_v9 = vld [vmem:[#allocation99_spill] sm:$0xff]  ;;  %v17710_v35 = vld [vmem:[#allocation102_spill] sm:$0xff] }
0x1cc5   :  { %7852 = vmatprep.subr.mxu1 %v15484_v33  ;;  %7781 = vmatprep.subr.mxu0 %v15478_v19  ;;  %v17711_v19 = vld [vmem:[#allocation101_spill] sm:$0xff]  ;;  %v17712_v33 = vld [vmem:[#allocation28_spill] sm:$0xff] }
0x1cc6   :  { %7853 = vmatpush1.msra.mxu1 %v15580_v55  ;;  %7782 = vmatpush1.msra.mxu0 %v15574_v3  ;;  %v17713_v3 = vld [vmem:[#allocation67_spill] sm:$0xff]  ;;  %v17714_v55 = vmov 0.0  }
0x1cc7   :  { %7854 = vmatprep.subr.mxu1 %v15592_v57  ;;  %7783 = vmatprep.subr.mxu0 %v15586_v38  ;;  %v17715_v57 = vld [vmem:[#allocation26_spill] sm:$0xff] }
0x1cc8   :  { %7855 = vmatpush1.msra.mxu1 %v15604_v1  ;;  %7784 = vmatpush1.msra.mxu0 %v15598_v62 }
0x1cc9   :  { %7856 = vmatprep.subr.mxu1 %v15616_v0  ;;  %7785 = vmatprep.subr.mxu0 %v15610_v23  ;;  %v17716_v0 = vld [vmem:[#allocation59_spill] sm:$0xff] }
0x1cca   :  { %7857 = vmatpush1.msra.mxu1 %v15628_v5  ;;  %7786 = vmatpush1.msra.mxu0 %v15622_v28 }
0x1ccb   :  { %7858 = vmatprep.subr.mxu1 %v15640_v10  ;;  %7787 = vmatprep.subr.mxu0 %v15634_v15 }
0x1ccc   :  { %7859 = vmatpush1.msra.mxu1 %v15652_v18  ;;  %7788 = vmatpush1.msra.mxu0 %v15646_v60  ;;  %v17717_v60 = vld [vmem:[#allocation61_spill] sm:$0xff] }
0x1ccd   :  { %7860 = vmatprep.subr.mxu1 %v15664_v25  ;;  %7789 = vmatprep.subr.mxu0 %v15658_v31  ;;  %v17718_v31 = vld [vmem:[#allocation24_spill] sm:$0xff] }
0x1cce   :  { %7861 = vmatpush1.msra.mxu1 %v15676_v21  ;;  %7790 = vmatpush1.msra.mxu0 %v15670_v63 }
0x1ccf   :  { %7862 = vmatprep.subr.mxu1 %v15688_v16  ;;  %7791 = vmatprep.subr.mxu0 %v15682_v26 }
0x1cd0   :  { %7863 = vmatpush1.msra.mxu1 %v15700_v37  ;;  %7792 = vmatpush1.msra.mxu0 %v15694_v61 }
0x1cd1   :  { %7864 = vmatprep.subr.mxu1 %v15712_v27  ;;  %7793 = vmatprep.subr.mxu0 %v15706_v51 }
0x1cd2   :  { %7865 = vmatpush1.msra.mxu1 %v15724_v36  ;;  %7794 = vmatpush1.msra.mxu0 %v15718_v32 }
0x1cd3   :  { %7866 = vmatprep.subr.mxu1 %v15736_v53  ;;  %7795 = vmatprep.subr.mxu0 %v15730_v46 }
0x1cd4   :  { %7867 = vmatpush1.msra.mxu1 %v17673_v39  ;;  %7796 = vmatpush1.msra.mxu0 %v17697_v56  ;;  %v17719_v56 = vld [vmem:[#allocation94_spill] sm:$0xff] }
0x1cd5   :  { %7868 = vmatprep.subr.mxu1 %v17698_v49  ;;  %7797 = vmatprep.subr.mxu0 %v17699_v30  ;;  %v7974_v49 = vld [vmem:[%s16237_s16 + $0x78] sm:$0xff]  ;;  %v7973_v30 = vld [vmem:[%s16237_s16 + $0x70] sm:$0xff] }
0x1cd6   :  { %7869 = vmatpush1.msra.mxu1 %v17700_v24  ;;  %7798 = vmatpush1.msra.mxu0 %v17701_v17  ;;  %v7972_v24 = vld [vmem:[%s16237_s16 + $0x68] sm:$0xff]  ;;  %v7971_v17 = vld [vmem:[%s16237_s16 + $0x60] sm:$0xff] }
0x1cd7   :  { %7870 = vmatprep.subr.mxu1 %v17702_v7  ;;  %7799 = vmatprep.subr.mxu0 %v17703_v4  ;;  %v7970_v7 = vld [vmem:[%s16237_s16 + $0x58] sm:$0xff]  ;;  %v7969_v4 = vld [vmem:[%s16237_s16 + $0x50] sm:$0xff] }
0x1cd8   :  { %7871 = vmatpush1.msra.mxu1 %v17704_v6  ;;  %7800 = vmatpush1.msra.mxu0 %v17705_v50  ;;  %v7968_v6 = vld [vmem:[%s16237_s16 + $0x48] sm:$0xff]  ;;  %v7967_v50 = vld [vmem:[%s16237_s16 + $0x40] sm:$0xff] }
0x1cd9   :  { %7872 = vmatprep.subr.mxu1 %v17706_v59  ;;  %7801 = vmatprep.subr.mxu0 %v17707_v40  ;;  %v7966_v59 = vld [vmem:[%s16237_s16 + $0x38] sm:$0xff]  ;;  %v7965_v40 = vld [vmem:[%s16237_s16 + $0x30] sm:$0xff] }
0x1cda   :  { %7873 = vmatpush1.msra.mxu1 %v17708_v44  ;;  %7802 = vmatpush1.msra.mxu0 %v17709_v9  ;;  %v7964_v44 = vld [vmem:[%s16237_s16 + $0x28] sm:$0xff]  ;;  %v7963_v9 = vld [vmem:[%s16237_s16 + $0x20] sm:$0xff] }
0x1cdb   :  { %7874 = vmatprep.subr.mxu1 %v17710_v35  ;;  %7803 = vmatprep.subr.mxu0 %v17711_v19  ;;  %v7962_v35 = vld [vmem:[%s16237_s16 + $0x18] sm:$0xff]  ;;  %v7961_v19 = vld [vmem:[%s16237_s16 + $0x10] sm:$0xff] }
0x1cdc   :  { %7875 = vmatpush1.msra.mxu1 %v17712_v33  ;;  %7804 = vmatpush1.msra.mxu0 %v17713_v3  ;;  %v7960_v33 = vld [vmem:[%s16237_s16 + $0x8] sm:$0xff]  ;;  %v7959_v3 = vld [vmem:[%s16237_s16] sm:$0xff] }
0x1cdd   :  { %7837 = vmatprep.mubr.f32.mxu0 %v17714_v55  ;;  %7908 = vmatprep.mubr.f32.mxu1 %v17714_v55 }
0x1cde   :  { %8301 = vmatprep.subr.mxu1 %v17714_v55  ;;  %8266 = vmatprep.subr.mxu0 %v17714_v55 }
0x1d7d   :  { %v7665_v38 = vpop.f32.mrf.mxu0  ;;  %v7736_v5 = vpop.f32.mrf.mxu1 }
0x1d7e   :  { %v7741_v62 = vadd.f32 %v7665_v38, %v17715_v57  ;;  %v7743_v25 = vadd.f32 %v7736_v5, %v17718_v31  ;;  %v17720_v57 = vld [vmem:[#allocation92_spill] sm:$0xff]  ;;  %v17723_v31 = vld [vmem:[#allocation5_spill] sm:$0xff] }
0x1d7f   :  { %v7667_v1 = vpop.f32.mrf.mxu0  ;;  %v7738_v10 = vpop.f32.mrf.mxu1 }
0x1d80   :  { %v8224_v23 = vmul.f32 -1.442695, %v7741_v62  ;;  %v7742_v28 = vadd.f32 %v7667_v1, %v17716_v0  ;;  %v7744_v18 = vadd.f32 %v7738_v10, %v17717_v60  ;;  %v17721_v0 = vld [vmem:[#allocation63_spill] sm:$0xff]  ;;  %v17722_v60 = vld [vmem:[#allocation37_spill] sm:$0xff] }
0x1d82   :  { %8818 = vpow2.f32 %v8224_v23  ;;  %v8225_v15 = vmul.f32 -1.442695, %v7742_v28  ;;  %v8226_v63 = vmul.f32 -1.442695, %v7744_v18 }
0x1d84   :  { %8820 = vpow2.f32 %v8225_v15 }
0x1d85   :  { %8822 = vtanh.f32 %v7743_v25 }
0x1d86   :  { %8824 = vpow2.f32 %v8226_v63 }
0x1d8f   :  { %v8819_v21 = vpop.eup %8818 }
0x1d90   :  { %v7748_v26 = vadd.f32 1.0, %v8819_v21 }
0x1d91   :  { %v8821_v16 = vpop.eup %8820 }
0x1d92   :  { %8826 = vrcp.f32 %v7748_v26  ;;  %v7754_v61 = vadd.f32 1.0, %v8821_v16  ;;  %v8823_v37 = vpop.eup %8822 }
0x1d93   :  { %v8825_v51 = vpop.eup %8824 }
0x1d94   :  { %8828 = vrcp.f32 %v7754_v61  ;;  %v7761_v46 = vadd.f32 1.0, %v8825_v51 }
0x1d96   :  { %8830 = vrcp.f32 %v7761_v46 }
0x1d9f   :  { %v8827_v27 = vpop.eup %8826 }
0x1da0   :  { %v7765_v32 = vmul.f32 %v8827_v27, %v8823_v37 }
0x1da1   :  { %v8829_v36 = vpop.eup %8828 }
0x1da2   :  { %v7764_v53 = vmul.f32 %v8829_v36, %v16004_v11  ;;  %v7946_v11 = vld [vmem:[%s16236_s15 + $0x18] sm:$0xff] }
0x1da3   :  { %v8831_v13 = vpop.eup %8830 }
0x1da4   :  { %v16078_v20 = vadd.f32 %v7765_v32, %v7764_v53 }
0x1da6   :  { %8832 = vtanh.f32 %v16078_v20 }
0x1db3   :  { %v8833_v39 = vpop.eup %8832 }
0x1db4   :  { %v7768_v52 = vmul.f32 %v8833_v39, %v8831_v13 }
0x1db6   :  { %7838 = vmatmul.mubr.f32.vlgmr.msra.gmra.mxu0 %v7768_v52  ;;  %7909 = vmatmul.mubr.f32.vlgmr.msra.gmra.mxu1 %v7768_v52 }
0x1db7   :  { %8302 = vmatpush3.msra.mxu1 %v7958_v14  ;;  %8333 = vmatprep.mubr.msk.f32.mxu1 %vm9119_vm0, %v17714_v55 }
0x1db8   :  { %8303 = vmatprep.subr.mxu1 %v17714_v55  ;;  %8298 = vmatprep.mubr.msk.f32.mxu0 %vm9119_vm0, %v17714_v55 }
0x1db9   :  { %8304 = vmatpush3.msra.mxu1 %v7957_v41  ;;  %8267 = vmatpush3.msra.mxu0 %v7974_v49 }
0x1dba   :  { %8305 = vmatprep.subr.mxu1 %v17714_v55  ;;  %8268 = vmatprep.subr.mxu0 %v17714_v55 }
0x1dbb   :  { %8306 = vmatpush3.msra.mxu1 %v7956_v58  ;;  %8269 = vmatpush3.msra.mxu0 %v7973_v30 }
0x1dbc   :  { %8307 = vmatprep.subr.mxu1 %v17714_v55  ;;  %8270 = vmatprep.subr.mxu0 %v17714_v55 }
0x1dbd   :  { %8308 = vmatpush3.msra.mxu1 %v7955_v29  ;;  %8271 = vmatpush3.msra.mxu0 %v7972_v24  ;;  %v8230_v29 = vld [vmem:[%s16238_s17] ss:$0 sm:$0xff] }
0x1dbe   :  { %8309 = vmatprep.subr.mxu1 %v17714_v55  ;;  %8272 = vmatprep.subr.mxu0 %v17714_v55 }
0x1dbf   :  { %8310 = vmatpush3.msra.mxu1 %v7954_v43  ;;  %8273 = vmatpush3.msra.mxu0 %v7971_v17 }
0x1dc0   :  { %8311 = vmatprep.subr.mxu1 %v17714_v55  ;;  %8274 = vmatprep.subr.mxu0 %v17714_v55 }
0x1dc1   :  { %8312 = vmatpush3.msra.mxu1 %v7953_v2  ;;  %8275 = vmatpush3.msra.mxu0 %v7970_v7 }
0x1dc2   :  { %8313 = vmatprep.subr.mxu1 %v17714_v55  ;;  %8276 = vmatprep.subr.mxu0 %v17714_v55 }
0x1dc3   :  { %8314 = vmatpush3.msra.mxu1 %v7952_v54  ;;  %8277 = vmatpush3.msra.mxu0 %v7969_v4 }
0x1dc4   :  { %8315 = vmatprep.subr.mxu1 %v17714_v55  ;;  %8278 = vmatprep.subr.mxu0 %v17714_v55 }
0x1dc5   :  { %8316 = vmatpush3.msra.mxu1 %v7951_v34  ;;  %8279 = vmatpush3.msra.mxu0 %v7968_v6 }
0x1dc6   :  { %8317 = vmatprep.subr.mxu1 %v17714_v55  ;;  %8280 = vmatprep.subr.mxu0 %v17714_v55 }
0x1dc7   :  { %8318 = vmatpush3.msra.mxu1 %v7950_v8  ;;  %8281 = vmatpush3.msra.mxu0 %v7967_v50 }
0x1dc8   :  { %8319 = vmatprep.subr.mxu1 %v17714_v55  ;;  %8282 = vmatprep.subr.mxu0 %v17714_v55 }
0x1dc9   :  { %8320 = vmatpush3.msra.mxu1 %v7949_v48  ;;  %8283 = vmatpush3.msra.mxu0 %v7966_v59 }
0x1dca   :  { %8321 = vmatprep.subr.mxu1 %v17714_v55  ;;  %8284 = vmatprep.subr.mxu0 %v17714_v55 }
0x1dcb   :  { %8322 = vmatpush3.msra.mxu1 %v7948_v12  ;;  %8285 = vmatpush3.msra.mxu0 %v7965_v40 }
0x1dcc   :  { %8323 = vmatprep.subr.mxu1 %v17714_v55  ;;  %8286 = vmatprep.subr.mxu0 %v17714_v55 }
0x1dcd   :  { %8324 = vmatpush3.msra.mxu1 %v7947_v42  ;;  %8287 = vmatpush3.msra.mxu0 %v7964_v44 }
0x1dce   :  { %8325 = vmatprep.subr.mxu1 %v17714_v55  ;;  %8288 = vmatprep.subr.mxu0 %v17714_v55 }
0x1dcf   :  { %8326 = vmatpush3.msra.mxu1 %v7946_v11  ;;  %8289 = vmatpush3.msra.mxu0 %v7963_v9 }
0x1dd0   :  { %8327 = vmatprep.subr.mxu1 %v17714_v55  ;;  %8290 = vmatprep.subr.mxu0 %v17714_v55 }
0x1dd1   :  { %8328 = vmatpush3.msra.mxu1 %v7945_v45  ;;  %8291 = vmatpush3.msra.mxu0 %v7962_v35 }
0x1dd2   :  { %8329 = vmatprep.subr.mxu1 %v17714_v55  ;;  %8292 = vmatprep.subr.mxu0 %v17714_v55 }
0x1dd3   :  { %8330 = vmatpush3.msra.mxu1 %v7944_v22  ;;  %8293 = vmatpush3.msra.mxu0 %v7961_v19 }
0x1dd4   :  { %8331 = vmatprep.subr.mxu1 %v17714_v55  ;;  %8294 = vmatprep.subr.mxu0 %v17714_v55 }
0x1dd5   :  { %8332 = vmatpush3.msra.mxu1 %v7943_v47  ;;  %8295 = vmatpush3.msra.mxu0 %v7960_v33 }
0x1dd6   :  { %8334 = vmatmul.mubr.f32.vlgmr.msra.gmra.mxu1 %v17719_v56  ;;  %8296 = vmatprep.subr.mxu0 %v17714_v55 }
0x1dd7   :  { %8297 = vmatpush3.msra.mxu0 %v7959_v3 }
0x1e76   :  { %v7839_v38 = vpop.f32.mrf.mxu0  ;;  %v7910_v5 = vpop.f32.mrf.mxu1 }
0x1e77   :  { %v7915_v62 = vadd.f32 %v7839_v38, %v17720_v57  ;;  %v7917_v25 = vadd.f32 %v7910_v5, %v17723_v31 }
0x1e78   :  { %v7841_v1 = vpop.f32.mrf.mxu0  ;;  %v7912_v10 = vpop.f32.mrf.mxu1 }
0x1e79   :  { %v8227_v23 = vmul.f32 -1.442695, %v7915_v62  ;;  %v7916_v28 = vadd.f32 %v7841_v1, %v17721_v0  ;;  %v7918_v18 = vadd.f32 %v7912_v10, %v17722_v60 }
0x1e7b   :  { %8834 = vpow2.f32 %v8227_v23  ;;  %v8228_v15 = vmul.f32 -1.442695, %v7916_v28  ;;  %v8229_v63 = vmul.f32 -1.442695, %v7918_v18 }
0x1e7d   :  { %8836 = vpow2.f32 %v8228_v15 }
0x1e7e   :  { %8838 = vtanh.f32 %v7917_v25 }
0x1e7f   :  { %8840 = vpow2.f32 %v8229_v63 }
0x1e88   :  { %v8835_v21 = vpop.eup %8834 }
0x1e89   :  { %v7922_v55 = vadd.f32 1.0, %v8835_v21 }
0x1e8a   :  { %v8837_v26 = vpop.eup %8836 }
0x1e8b   :  { %8842 = vrcp.f32 %v7922_v55  ;;  %v7928_v16 = vadd.f32 1.0, %v8837_v26  ;;  %v8839_v61 = vpop.eup %8838 }
0x1e8c   :  { %v8841_v51 = vpop.eup %8840 }
0x1e8d   :  { %8844 = vrcp.f32 %v7928_v16  ;;  %v7935_v53 = vadd.f32 1.0, %v8841_v51 }
0x1e8f   :  { %8846 = vrcp.f32 %v7935_v53 }
0x1e96   :  { %v8111_v37 = vpop.f32.mrf.mxu1 }
0x1e98   :  { %v8843_v27 = vpop.eup %8842  ;;  %v8335_v32 = vpop.f32.mrf.mxu1 }
0x1e99   :  { %v7939_v36 = vmul.f32 %v8843_v27, %v8839_v61 }
0x1e9a   :  { %v8845_v46 = vpop.eup %8844 }
0x1e9b   :  { %v7938_v13 = vmul.f32 %v8845_v46, %v16078_v20 }
0x1e9c   :  { %v8847_v52 = vpop.eup %8846 }
0x1e9d   :  { %v7940_v39 = vadd.f32 %v7939_v36, %v7938_v13 }
0x1e9f   :  { %8848 = vtanh.f32 %v7940_v39 }
0x1eac   :  { %v8849_v14 = vpop.eup %8848 }
0x1ead   :  { %v7942_v41 = vmul.f32 %v8849_v14, %v8847_v52 }
0x1eaf   :  { %8299 = vmatmul.mubr.f32.vlgmr.msra.gmra.mxu0 %v7942_v41 }
0x1f6f   :  { %v8041_v58 = vpop.f32.mrf.mxu0 }
0x1f70   :  { %v8112_v43 = vadd.f32 %v8111_v37, %v8041_v58 }
0x1f71   :  { %v8300_v2 = vpop.f32.mrf.mxu0 }
0x1f72   :  { %v8122_v54 = vadd.f32 %v8230_v29, %v8112_v43 }
0x1f74   :  { %v8231_v34 = vmul.f32 -1.442695, %v8122_v54 }
0x1f76   :  { %8850 = vpow2.f32 %v8231_v34 }
0x1f83   :  { %v8851_v8 = vpop.eup %8850 }
0x1f84   :  { %v8126_v48 = vadd.f32 1.0, %v8851_v8 }
0x1f86   :  { %8852 = vrcp.f32 %v8126_v48 }
0x1f93   :  { %v8853_v20 = vpop.eup %8852 }
0x1f94   :  { %8129 = vst [vmem:[%s16239_s18] sm:$0xff] %v8853_v20 }

</bundles_post_ra>
